<compile_context>
chip_gen: v6e
topology: v6e:2x2x1
jax: 0.10.0
libtpu: 0.0.40
codegen_flags: <defaults>
</compile_context>

<pallas_src>
import functools
import math
import numpy as np
import jax
import jax.numpy as jnp
from jax.experimental import pallas as pl
from jax.experimental.pallas import tpu as pltpu

GRID_SIZE = 5
SPLINE_ORDER = 3
K_COEF = GRID_SIZE + SPLINE_ORDER          # 8 spline coefficients per (in, out) edge
G_PTS = GRID_SIZE + 2 * SPLINE_ORDER + 1   # 12 grid knots per input feature
N_PAIRS = sum(G_PTS - k - 1 for k in range(1, SPLINE_ORDER + 1))  # 27 recursion pairs


def _round_up(n, m):
    return ((n + m - 1) // m) * m


def _kan_kernel(x_ref, grid_ref, inv1_ref, inv2_ref, w_ref, o_ref, feats_ref, *, in_pad):
    """x_ref:     (TB, IN_pad)            input rows (lane-padded)
       grid_ref:  (G_PTS, IN_pad)         knot positions per input feature
       inv1_ref:  (N_PAIRS, IN_pad)       1 / (g[j+k]   - g[j])   flattened over (k, j)
       inv2_ref:  (N_PAIRS, IN_pad)       1 / (g[j+k+1] - g[j+1]) flattened over (k, j)
       w_ref:     ((K+1)*IN_pad, OUT_T)   fused [base ; spline_0 ; ... ; spline_7] weights
       o_ref:     (TB, OUT_T)
       feats_ref: (TB, (K+1)*IN_pad)      VMEM scratch, persists across out-tiles"""

    # Recompute the spline feature block only for the first out-feature tile of each
    # row tile; the out axis (program_id(1)) is the innermost, "arbitrary" grid axis.
    @pl.when(pl.program_id(1) == 0)
    def _compute_feats():
        x = x_ref[...].astype(jnp.float32)        # (TB, IN_pad)
        g = grid_ref[...]                         # (G_PTS, IN_pad) f32
        inv1 = inv1_ref[...]                      # (N_PAIRS, IN_pad) f32
        inv2 = inv2_ref[...]                      # (N_PAIRS, IN_pad) f32

        gk = [g[j:j + 1, :] for j in range(G_PTS)]   # (1, IN_pad) knot rows

        # Base path: SiLU(x), written straight into slab 0 of the scratch.
        feats_ref[:, 0:in_pad] = (x * jax.nn.sigmoid(x)).astype(feats_ref.dtype)

        # Degree-0 bases from 12 hoisted comparisons: (x>=g_j) & (x<g_{j+1}) == ge_j - ge_{j+1}
        # (knots strictly increasing, incl. the dummy padded lanes).
        ge = [(x >= gk[j]).astype(jnp.float32) for j in range(G_PTS)]
        bases = [ge[j] - ge[j + 1] for j in range(G_PTS - 1)]

        # Hoisted differences (broadcasts emitted once, reused across recursion levels).
        xm = [x - gk[j] for j in range(G_PTS)]       # (x - g_j)
        gmx = [gk[j] - x for j in range(G_PTS)]      # (g_j - x)

        # Cox-de Boor recursion, statically unrolled, divide-free.
        idx = 0
        for k in range(1, SPLINE_ORDER + 1):
            new_bases = []
            for j in range(G_PTS - k - 1):
                t1 = xm[j] * inv1[idx:idx + 1, :] * bases[j]
                t2 = gmx[j + k + 1] * inv2[idx:idx + 1, :] * bases[j + 1]
                new_bases.append(t1 + t2)
                idx += 1
            bases = new_bases
        # len(bases) == K_COEF; write each slab lane-aligned into the scratch.
        for m, b in enumerate(bases):
            feats_ref[:, (m + 1) * in_pad:(m + 2) * in_pad] = b.astype(feats_ref.dtype)

    # Single wide-contraction MXU matmul per (row tile, out tile).
    acc = jnp.dot(feats_ref[...], w_ref[...], preferred_element_type=jnp.float32)

    # TODO(synk): self.important_score (mean |y| over batch / input_range) is a module
    # attribute side effect of forward(), not part of the returned tensor; skipped.
    o_ref[...] = acc.astype(o_ref.dtype)


def prepare_kan_params(grid, base_weight, spline_weight, spline_scaler, mask,
                       *, mxu_dtype=None, block_out=None):
    """One-time (per parameter set) fusion / padding / reciprocal precompute.
    Returns a dict of device arrays + static tiling metadata for kan_linear_apply."""
    in_features = base_weight.shape[1]
    out_features = base_weight.shape[0]
    in_pad = _round_up(in_features, 128)

    w_dtype = jnp.float32 if mxu_dtype is None else mxu_dtype
    itemsize = 2 if w_dtype == jnp.bfloat16 else 4

    # Heuristic: keep the fused weight fully resident (single DMA) when it is small
    # enough that its double buffer stays well under the VMEM limit on all chips.
    if block_out is None:
        out_pad128 = _round_up(out_features, 128)
        w_bytes = (K_COEF + 1) * in_pad * out_pad128 * itemsize
        block_out = out_pad128 if w_bytes <= 12 * 1024 * 1024 else 128
    out_pad = _round_up(out_features, block_out)

    # Fold mask (ones by default) and standalone spline scaler into the weights, then
    # fuse base + K spline planes into one ((K+1)*IN_pad, OUT_pad) matrix whose row
    # order matches feats = [silu(x), B_0(x), ..., B_{K-1}(x)].
    bw_t = (base_weight * mask.T).T                                        # (IN, OUT)
    ssw = spline_weight * spline_scaler[:, :, None] * mask.T[:, :, None]   # (OUT, IN, K)
    sw_kio = jnp.transpose(ssw, (2, 1, 0))                                 # (K, IN, OUT)
    w_planes = jnp.concatenate([bw_t[None], sw_kio], axis=0)               # (K+1, IN, OUT)
    w_planes = jnp.pad(
        w_planes.astype(jnp.float32),
        ((0, 0), (0, in_pad - in_features), (0, out_pad - out_features)))
    w_fused = w_planes.reshape((K_COEF + 1) * in_pad, out_pad).astype(w_dtype)

    # Grid: pad the input-feature axis with strictly increasing dummy knots so the
    # precomputed knot-span reciprocals stay finite (padded weights are zero anyway).
    grid_f = grid.astype(jnp.float32)                                      # (IN, G_PTS)
    if in_pad != in_features:
        dummy = jnp.broadcast_to(jnp.arange(G_PTS, dtype=jnp.float32),
                                 (in_pad - in_features, G_PTS))
        grid_f = jnp.concatenate([grid_f, dummy], axis=0)
    grid_t = grid_f.T                                                      # (G_PTS, IN_pad)

    # Cox-de Boor knot-span reciprocals (batch-invariant).  NOTE: assumes no repeated
    # knots (uniform grid from the module init); a degenerate span gives inf here just
    # as the reference's divide-by-zero does.
    inv1_rows, inv2_rows = [], []
    for k in range(1, SPLINE_ORDER + 1):
        for j in range(G_PTS - k - 1):
            inv1_rows.append(1.0 / (grid_t[j + k] - grid_t[j]))
            inv2_rows.append(1.0 / (grid_t[j + k + 1] - grid_t[j + 1]))
    inv1 = jnp.stack(inv1_rows)                                            # (N_PAIRS, IN_pad)
    inv2 = jnp.stack(inv2_rows)                                            # (N_PAIRS, IN_pad)

    return dict(grid_t=grid_t, inv1=inv1, inv2=inv2, w_fused=w_fused,
                in_features=in_features, in_pad=in_pad,
                out_features=out_features, out_pad=out_pad,
                block_out=block_out, feat_dtype=w_dtype)


def kan_linear_apply(x, params, *, block_rows=128,
                     vmem_limit_bytes=48 * 1024 * 1024):
    """Apply the Pallas KANLinear forward with pre-fused parameters.
    block_rows can be raised to 256 on v6e (128 MiB VMEM); keep 128 on v7x."""
    in_features = params["in_features"]
    in_pad = params["in_pad"]
    out_features = params["out_features"]
    out_pad = params["out_pad"]
    block_out = params["block_out"]

    orig_shape = x.shape
    x2 = x.reshape(-1, in_features)
    n_rows = x2.shape[0]

    n_rows_pad = _round_up(n_rows, block_rows)
    pad_rows = n_rows_pad - n_rows
    pad_in = in_pad - in_features
    if pad_rows or pad_in:
        x2 = jnp.pad(x2, ((0, pad_rows), (0, pad_in)))

    grid_rows = n_rows_pad // block_rows
    grid_cols = out_pad // block_out

    kernel = functools.partial(_kan_kernel, in_pad=in_pad)

    out = pl.pallas_call(
        kernel,
        out_shape=jax.ShapeDtypeStruct((n_rows_pad, out_pad), x.dtype),
        grid_spec=pltpu.PrefetchScalarGridSpec(
            num_scalar_prefetch=0,
            grid=(grid_rows, grid_cols),
            in_specs=[
                pl.BlockSpec((block_rows, in_pad), lambda i, j: (i, 0)),
                pl.BlockSpec((G_PTS, in_pad), lambda i, j: (0, 0)),
                pl.BlockSpec((N_PAIRS, in_pad), lambda i, j: (0, 0)),
                pl.BlockSpec((N_PAIRS, in_pad), lambda i, j: (0, 0)),
                pl.BlockSpec(((K_COEF + 1) * in_pad, block_out),
                             lambda i, j: (0, j)),
            ],
            out_specs=pl.BlockSpec((block_rows, block_out), lambda i, j: (i, j)),
            scratch_shapes=[
                pltpu.VMEM((block_rows, (K_COEF + 1) * in_pad), params["feat_dtype"]),
            ]),
        compiler_params=pltpu.CompilerParams(
            dimension_semantics=("parallel", "arbitrary"),
            vmem_limit_bytes=vmem_limit_bytes),
    )(x2, params["grid_t"], params["inv1"], params["inv2"], params["w_fused"])

    out = out[:n_rows, :out_features]
    return out.reshape(*orig_shape[:-1], out_features)


def kan_linear_forward(x, grid, base_weight, spline_weight, spline_scaler, mask,
                       *, block_rows=128, block_out=None, mxu_dtype=None,
                       vmem_limit_bytes=48 * 1024 * 1024):
    """Convenience wrapper: prepare (fuse/pad) parameters, then run the kernel.
    For inference with static weights, call prepare_kan_params once and reuse."""
    params = prepare_kan_params(grid, base_weight, spline_weight, spline_scaler, mask,
                                mxu_dtype=mxu_dtype, block_out=block_out)
    return kan_linear_apply(x, params, block_rows=block_rows,
                            vmem_limit_bytes=vmem_limit_bytes)


# ----------------------- pure-JAX reference (mirrors the torch code) -----------------
def _b_splines_ref(x, grid):
    xg = x[:, :, None]
    bases = ((xg >= grid[None, :, :-1]) & (xg < grid[None, :, 1:])).astype(x.dtype)
    for k in range(1, SPLINE_ORDER + 1):
        bases = ((xg - grid[None, :, :-(k + 1)])
                 / (grid[None, :, k:-1] - grid[None, :, :-(k + 1)]) * bases[:, :, :-1]
                 + (grid[None, :, k + 1:] - xg)
                 / (grid[None, :, k + 1:] - grid[None, :, 1:-k]) * bases[:, :, 1:])
    return bases


def kan_linear_ref(x, grid, base_weight, spline_weight, spline_scaler, mask):
    in_features = base_weight.shape[1]
    out_features = base_weight.shape[0]
    orig_shape = x.shape
    x2 = x.reshape(-1, in_features)
    b = x2.shape[0]
    base = jax.nn.silu(x2)[:, :, None] * base_weight.T[None]
    ssw = spline_weight * spline_scaler[:, :, None]
    bs = _b_splines_ref(x2, grid)
    spline = (bs.reshape(b, in_features * K_COEF)[:, :, None]
              * ssw.reshape(out_features, -1).T[None])
    spline_summed = spline.reshape(b, in_features, K_COEF, out_features).sum(axis=2)
    y = (base + spline_summed) * mask[None]
    out = y.sum(axis=1)
    return out.reshape(*orig_shape[:-1], out_features)


if __name__ == "__main__":
    in_features, out_features = 32, 16
    key = jax.random.PRNGKey(0)
    k1, k2, k3, k4 = jax.random.split(key, 4)

    # Deterministic synthetic parameters (shapes from KANLinear.__init__).
    h = (1.0 - (-1.0)) / GRID_SIZE
    grid_row = jnp.arange(-SPLINE_ORDER, GRID_SIZE + SPLINE_ORDER + 1,
                          dtype=jnp.float32) * h + (-1.0)
    grid = jnp.broadcast_to(grid_row, (in_features, G_PTS))          # (IN, 12)
    bound = 1.0 / math.sqrt(in_features)
    base_weight = jax.random.uniform(k1, (out_features, in_features),
                                     minval=-bound, maxval=bound, dtype=jnp.float32)
    spline_weight = jax.random.uniform(k2, (out_features, in_features, K_COEF),
                                       minval=-0.1, maxval=0.1, dtype=jnp.float32)
    spline_scaler = jax.random.uniform(k3, (out_features, in_features),
                                       minval=-bound, maxval=bound, dtype=jnp.float32)
    mask = jnp.ones((in_features, out_features), dtype=jnp.float32)

    # Small input: x has shape (..., in_features) -> (2, 8, 32) == 16 flattened rows.
    x = jax.random.uniform(k4, (2, 8, in_features),
                           minval=-1.0, maxval=1.0, dtype=jnp.float32)

    # Parameters fused/padded once; reuse the prepared dict across calls.
    params = prepare_kan_params(grid, base_weight, spline_weight, spline_scaler, mask)
    out = kan_linear_apply(x, params)
    out = jax.block_until_ready(out)

    ref = kan_linear_ref(x, grid, base_weight, spline_weight, spline_scaler, mask)
    np.testing.assert_allclose(np.asarray(out), np.asarray(ref), rtol=1e-5, atol=1e-5)

    print("KERNEL_OK")
</pallas_src>

<mosaic_0001>
module attributes {stable_mosaic.version = 11 : i64} {
  func.func @_kan_kernel(%arg0: i32, %arg1: i32, %arg2: memref<128x128xf32, #tpu.memory_space<vmem>>, %arg3: memref<12x128xf32, #tpu.memory_space<vmem>>, %arg4: memref<27x128xf32, #tpu.memory_space<vmem>>, %arg5: memref<27x128xf32, #tpu.memory_space<vmem>>, %arg6: memref<1152x128xf32, #tpu.memory_space<vmem>>, %arg7: memref<128x128xf32, #tpu.memory_space<vmem>>, %arg8: memref<128x1152xf32, #tpu.memory_space<vmem>>) attributes {dimension_semantics = [#tpu.dimension_semantics<parallel>, #tpu.dimension_semantics<arbitrary>], iteration_bounds = array<i64: 1, 1>, scalar_prefetch = 0 : i64, scratch_operands = 1 : i64, tpu.core_type = #tpu.core_type<tc>, window_params = [{transform_indices = @transform_0, window_bounds = array<i64: 128, 128>}, {pipeline_mode = #tpu.pipeline_mode<synchronous>, transform_indices = @transform_1, window_bounds = array<i64: 12, 128>}, {pipeline_mode = #tpu.pipeline_mode<synchronous>, transform_indices = @transform_2, window_bounds = array<i64: 27, 128>}, {pipeline_mode = #tpu.pipeline_mode<synchronous>, transform_indices = @transform_3, window_bounds = array<i64: 27, 128>}, {transform_indices = @transform_4, window_bounds = array<i64: 1152, 128>}, {transform_indices = @transform_5, window_bounds = array<i64: 128, 128>}]} {
    %c0_i32 = arith.constant 0 : i32
    %0 = arith.cmpi eq, %arg1, %c0_i32 : i32
    %1 = arith.extui %0 : i1 to i32
    %c0_i32_0 = arith.constant 0 : i32
    %2 = arith.cmpi ne, %1, %c0_i32_0 : i32
    scf.if %2 {
      %c0_6 = arith.constant 0 : index
      %c0_7 = arith.constant 0 : index
      %7 = vector.load %arg2[%c0_6, %c0_7] : memref<128x128xf32, #tpu.memory_space<vmem>>, vector<128x128xf32>
      %c0_8 = arith.constant 0 : index
      %c0_9 = arith.constant 0 : index
      %8 = vector.load %arg3[%c0_8, %c0_9] : memref<12x128xf32, #tpu.memory_space<vmem>>, vector<12x128xf32>
      %c0_10 = arith.constant 0 : index
      %c0_11 = arith.constant 0 : index
      %9 = vector.load %arg4[%c0_10, %c0_11] : memref<27x128xf32, #tpu.memory_space<vmem>>, vector<27x128xf32>
      %c0_12 = arith.constant 0 : index
      %c0_13 = arith.constant 0 : index
      %10 = vector.load %arg5[%c0_12, %c0_13] : memref<27x128xf32, #tpu.memory_space<vmem>>, vector<27x128xf32>
      %11 = vector.extract_strided_slice %8 {offsets = [0, 0], sizes = [1, 128], strides = [1, 1]} : vector<12x128xf32> to vector<1x128xf32>
      %12 = vector.extract_strided_slice %8 {offsets = [1, 0], sizes = [1, 128], strides = [1, 1]} : vector<12x128xf32> to vector<1x128xf32>
      %13 = vector.extract_strided_slice %8 {offsets = [2, 0], sizes = [1, 128], strides = [1, 1]} : vector<12x128xf32> to vector<1x128xf32>
      %14 = vector.extract_strided_slice %8 {offsets = [3, 0], sizes = [1, 128], strides = [1, 1]} : vector<12x128xf32> to vector<1x128xf32>
      %15 = vector.extract_strided_slice %8 {offsets = [4, 0], sizes = [1, 128], strides = [1, 1]} : vector<12x128xf32> to vector<1x128xf32>
      %16 = vector.extract_strided_slice %8 {offsets = [5, 0], sizes = [1, 128], strides = [1, 1]} : vector<12x128xf32> to vector<1x128xf32>
      %17 = vector.extract_strided_slice %8 {offsets = [6, 0], sizes = [1, 128], strides = [1, 1]} : vector<12x128xf32> to vector<1x128xf32>
      %18 = vector.extract_strided_slice %8 {offsets = [7, 0], sizes = [1, 128], strides = [1, 1]} : vector<12x128xf32> to vector<1x128xf32>
      %19 = vector.extract_strided_slice %8 {offsets = [8, 0], sizes = [1, 128], strides = [1, 1]} : vector<12x128xf32> to vector<1x128xf32>
      %20 = vector.extract_strided_slice %8 {offsets = [9, 0], sizes = [1, 128], strides = [1, 1]} : vector<12x128xf32> to vector<1x128xf32>
      %21 = vector.extract_strided_slice %8 {offsets = [10, 0], sizes = [1, 128], strides = [1, 1]} : vector<12x128xf32> to vector<1x128xf32>
      %22 = vector.extract_strided_slice %8 {offsets = [11, 0], sizes = [1, 128], strides = [1, 1]} : vector<12x128xf32> to vector<1x128xf32>
      %23 = arith.negf %7 : vector<128x128xf32>
      %24 = math.exp %23 : vector<128x128xf32>
      %cst_14 = arith.constant 1.000000e+00 : f32
      %25 = vector.broadcast %cst_14 : f32 to vector<128x128xf32>
      %26 = arith.addf %25, %24 : vector<128x128xf32>
      %27 = arith.divf %25, %26 : vector<128x128xf32>
      %28 = arith.mulf %7, %27 : vector<128x128xf32>
      %c0_15 = arith.constant 0 : index
      %c0_16 = arith.constant 0 : index
      %29 = vector.load %arg8[%c0_15, %c0_16] : memref<128x1152xf32, #tpu.memory_space<vmem>>, vector<128x128xf32>
      tpu.vector_store %arg8[%c0_15, %c0_16], %28 {strides = array<i32>} : memref<128x1152xf32, #tpu.memory_space<vmem>>, vector<128x128xf32>,
      %30 = vector.broadcast %11 : vector<1x128xf32> to vector<128x128xf32>
      %31 = arith.cmpf oge, %7, %30 : vector<128x128xf32>
      %32 = arith.extui %31 : vector<128x128xi1> to vector<128x128xi32>
      %33 = arith.sitofp %32 : vector<128x128xi32> to vector<128x128xf32>
      %34 = vector.broadcast %12 : vector<1x128xf32> to vector<128x128xf32>
      %35 = arith.cmpf oge, %7, %34 : vector<128x128xf32>
      %36 = arith.extui %35 : vector<128x128xi1> to vector<128x128xi32>
      %37 = arith.sitofp %36 : vector<128x128xi32> to vector<128x128xf32>
      %38 = vector.broadcast %13 : vector<1x128xf32> to vector<128x128xf32>
      %39 = arith.cmpf oge, %7, %38 : vector<128x128xf32>
      %40 = arith.extui %39 : vector<128x128xi1> to vector<128x128xi32>
      %41 = arith.sitofp %40 : vector<128x128xi32> to vector<128x128xf32>
      %42 = vector.broadcast %14 : vector<1x128xf32> to vector<128x128xf32>
      %43 = arith.cmpf oge, %7, %42 : vector<128x128xf32>
      %44 = arith.extui %43 : vector<128x128xi1> to vector<128x128xi32>
      %45 = arith.sitofp %44 : vector<128x128xi32> to vector<128x128xf32>
      %46 = vector.broadcast %15 : vector<1x128xf32> to vector<128x128xf32>
      %47 = arith.cmpf oge, %7, %46 : vector<128x128xf32>
      %48 = arith.extui %47 : vector<128x128xi1> to vector<128x128xi32>
      %49 = arith.sitofp %48 : vector<128x128xi32> to vector<128x128xf32>
      %50 = vector.broadcast %16 : vector<1x128xf32> to vector<128x128xf32>
      %51 = arith.cmpf oge, %7, %50 : vector<128x128xf32>
      %52 = arith.extui %51 : vector<128x128xi1> to vector<128x128xi32>
      %53 = arith.sitofp %52 : vector<128x128xi32> to vector<128x128xf32>
      %54 = vector.broadcast %17 : vector<1x128xf32> to vector<128x128xf32>
      %55 = arith.cmpf oge, %7, %54 : vector<128x128xf32>
      %56 = arith.extui %55 : vector<128x128xi1> to vector<128x128xi32>
      %57 = arith.sitofp %56 : vector<128x128xi32> to vector<128x128xf32>
      %58 = vector.broadcast %18 : vector<1x128xf32> to vector<128x128xf32>
      %59 = arith.cmpf oge, %7, %58 : vector<128x128xf32>
      %60 = arith.extui %59 : vector<128x128xi1> to vector<128x128xi32>
      %61 = arith.sitofp %60 : vector<128x128xi32> to vector<128x128xf32>
      %62 = vector.broadcast %19 : vector<1x128xf32> to vector<128x128xf32>
      %63 = arith.cmpf oge, %7, %62 : vector<128x128xf32>
      %64 = arith.extui %63 : vector<128x128xi1> to vector<128x128xi32>
      %65 = arith.sitofp %64 : vector<128x128xi32> to vector<128x128xf32>
      %66 = vector.broadcast %20 : vector<1x128xf32> to vector<128x128xf32>
      %67 = arith.cmpf oge, %7, %66 : vector<128x128xf32>
      %68 = arith.extui %67 : vector<128x128xi1> to vector<128x128xi32>
      %69 = arith.sitofp %68 : vector<128x128xi32> to vector<128x128xf32>
      %70 = vector.broadcast %21 : vector<1x128xf32> to vector<128x128xf32>
      %71 = arith.cmpf oge, %7, %70 : vector<128x128xf32>
      %72 = arith.extui %71 : vector<128x128xi1> to vector<128x128xi32>
      %73 = arith.sitofp %72 : vector<128x128xi32> to vector<128x128xf32>
      %74 = vector.broadcast %22 : vector<1x128xf32> to vector<128x128xf32>
      %75 = arith.cmpf oge, %7, %74 : vector<128x128xf32>
      %76 = arith.extui %75 : vector<128x128xi1> to vector<128x128xi32>
      %77 = arith.sitofp %76 : vector<128x128xi32> to vector<128x128xf32>
      %78 = arith.subf %33, %37 : vector<128x128xf32>
      %79 = arith.subf %37, %41 : vector<128x128xf32>
      %80 = arith.subf %41, %45 : vector<128x128xf32>
      %81 = arith.subf %45, %49 : vector<128x128xf32>
      %82 = arith.subf %49, %53 : vector<128x128xf32>
      %83 = arith.subf %53, %57 : vector<128x128xf32>
      %84 = arith.subf %57, %61 : vector<128x128xf32>
      %85 = arith.subf %61, %65 : vector<128x128xf32>
      %86 = arith.subf %65, %69 : vector<128x128xf32>
      %87 = arith.subf %69, %73 : vector<128x128xf32>
      %88 = arith.subf %73, %77 : vector<128x128xf32>
      %89 = vector.broadcast %11 : vector<1x128xf32> to vector<128x128xf32>
      %90 = arith.subf %7, %89 : vector<128x128xf32>
      %91 = vector.broadcast %12 : vector<1x128xf32> to vector<128x128xf32>
      %92 = arith.subf %7, %91 : vector<128x128xf32>
      %93 = vector.broadcast %13 : vector<1x128xf32> to vector<128x128xf32>
      %94 = arith.subf %7, %93 : vector<128x128xf32>
      %95 = vector.broadcast %14 : vector<1x128xf32> to vector<128x128xf32>
      %96 = arith.subf %7, %95 : vector<128x128xf32>
      %97 = vector.broadcast %15 : vector<1x128xf32> to vector<128x128xf32>
      %98 = arith.subf %7, %97 : vector<128x128xf32>
      %99 = vector.broadcast %16 : vector<1x128xf32> to vector<128x128xf32>
      %100 = arith.subf %7, %99 : vector<128x128xf32>
      %101 = vector.broadcast %17 : vector<1x128xf32> to vector<128x128xf32>
      %102 = arith.subf %7, %101 : vector<128x128xf32>
      %103 = vector.broadcast %18 : vector<1x128xf32> to vector<128x128xf32>
      %104 = arith.subf %7, %103 : vector<128x128xf32>
      %105 = vector.broadcast %19 : vector<1x128xf32> to vector<128x128xf32>
      %106 = arith.subf %7, %105 : vector<128x128xf32>
      %107 = vector.broadcast %20 : vector<1x128xf32> to vector<128x128xf32>
      %108 = arith.subf %7, %107 : vector<128x128xf32>
      %109 = vector.broadcast %13 : vector<1x128xf32> to vector<128x128xf32>
      %110 = arith.subf %109, %7 : vector<128x128xf32>
      %111 = vector.broadcast %14 : vector<1x128xf32> to vector<128x128xf32>
      %112 = arith.subf %111, %7 : vector<128x128xf32>
      %113 = vector.broadcast %15 : vector<1x128xf32> to vector<128x128xf32>
      %114 = arith.subf %113, %7 : vector<128x128xf32>
      %115 = vector.broadcast %16 : vector<1x128xf32> to vector<128x128xf32>
      %116 = arith.subf %115, %7 : vector<128x128xf32>
      %117 = vector.broadcast %17 : vector<1x128xf32> to vector<128x128xf32>
      %118 = arith.subf %117, %7 : vector<128x128xf32>
      %119 = vector.broadcast %18 : vector<1x128xf32> to vector<128x128xf32>
      %120 = arith.subf %119, %7 : vector<128x128xf32>
      %121 = vector.broadcast %19 : vector<1x128xf32> to vector<128x128xf32>
      %122 = arith.subf %121, %7 : vector<128x128xf32>
      %123 = vector.broadcast %20 : vector<1x128xf32> to vector<128x128xf32>
      %124 = arith.subf %123, %7 : vector<128x128xf32>
      %125 = vector.broadcast %21 : vector<1x128xf32> to vector<128x128xf32>
      %126 = arith.subf %125, %7 : vector<128x128xf32>
      %127 = vector.broadcast %22 : vector<1x128xf32> to vector<128x128xf32>
      %128 = arith.subf %127, %7 : vector<128x128xf32>
      %129 = vector.extract_strided_slice %9 {offsets = [0, 0], sizes = [1, 128], strides = [1, 1]} : vector<27x128xf32> to vector<1x128xf32>
      %130 = vector.broadcast %129 : vector<1x128xf32> to vector<128x128xf32>
      %131 = arith.mulf %90, %130 : vector<128x128xf32>
      %132 = arith.mulf %131, %78 : vector<128x128xf32>
      %133 = vector.extract_strided_slice %10 {offsets = [0, 0], sizes = [1, 128], strides = [1, 1]} : vector<27x128xf32> to vector<1x128xf32>
      %134 = vector.broadcast %133 : vector<1x128xf32> to vector<128x128xf32>
      %135 = arith.mulf %110, %134 : vector<128x128xf32>
      %136 = arith.mulf %135, %79 : vector<128x128xf32>
      %137 = arith.addf %132, %136 : vector<128x128xf32>
      %138 = vector.extract_strided_slice %9 {offsets = [1, 0], sizes = [1, 128], strides = [1, 1]} : vector<27x128xf32> to vector<1x128xf32>
      %139 = vector.broadcast %138 : vector<1x128xf32> to vector<128x128xf32>
      %140 = arith.mulf %92, %139 : vector<128x128xf32>
      %141 = arith.mulf %140, %79 : vector<128x128xf32>
      %142 = vector.extract_strided_slice %10 {offsets = [1, 0], sizes = [1, 128], strides = [1, 1]} : vector<27x128xf32> to vector<1x128xf32>
      %143 = vector.broadcast %142 : vector<1x128xf32> to vector<128x128xf32>
      %144 = arith.mulf %112, %143 : vector<128x128xf32>
      %145 = arith.mulf %144, %80 : vector<128x128xf32>
      %146 = arith.addf %141, %145 : vector<128x128xf32>
      %147 = vector.extract_strided_slice %9 {offsets = [2, 0], sizes = [1, 128], strides = [1, 1]} : vector<27x128xf32> to vector<1x128xf32>
      %148 = vector.broadcast %147 : vector<1x128xf32> to vector<128x128xf32>
      %149 = arith.mulf %94, %148 : vector<128x128xf32>
      %150 = arith.mulf %149, %80 : vector<128x128xf32>
      %151 = vector.extract_strided_slice %10 {offsets = [2, 0], sizes = [1, 128], strides = [1, 1]} : vector<27x128xf32> to vector<1x128xf32>
      %152 = vector.broadcast %151 : vector<1x128xf32> to vector<128x128xf32>
      %153 = arith.mulf %114, %152 : vector<128x128xf32>
      %154 = arith.mulf %153, %81 : vector<128x128xf32>
      %155 = arith.addf %150, %154 : vector<128x128xf32>
      %156 = vector.extract_strided_slice %9 {offsets = [3, 0], sizes = [1, 128], strides = [1, 1]} : vector<27x128xf32> to vector<1x128xf32>
      %157 = vector.broadcast %156 : vector<1x128xf32> to vector<128x128xf32>
      %158 = arith.mulf %96, %157 : vector<128x128xf32>
      %159 = arith.mulf %158, %81 : vector<128x128xf32>
      %160 = vector.extract_strided_slice %10 {offsets = [3, 0], sizes = [1, 128], strides = [1, 1]} : vector<27x128xf32> to vector<1x128xf32>
      %161 = vector.broadcast %160 : vector<1x128xf32> to vector<128x128xf32>
      %162 = arith.mulf %116, %161 : vector<128x128xf32>
      %163 = arith.mulf %162, %82 : vector<128x128xf32>
      %164 = arith.addf %159, %163 : vector<128x128xf32>
      %165 = vector.extract_strided_slice %9 {offsets = [4, 0], sizes = [1, 128], strides = [1, 1]} : vector<27x128xf32> to vector<1x128xf32>
      %166 = vector.broadcast %165 : vector<1x128xf32> to vector<128x128xf32>
      %167 = arith.mulf %98, %166 : vector<128x128xf32>
      %168 = arith.mulf %167, %82 : vector<128x128xf32>
      %169 = vector.extract_strided_slice %10 {offsets = [4, 0], sizes = [1, 128], strides = [1, 1]} : vector<27x128xf32> to vector<1x128xf32>
      %170 = vector.broadcast %169 : vector<1x128xf32> to vector<128x128xf32>
      %171 = arith.mulf %118, %170 : vector<128x128xf32>
      %172 = arith.mulf %171, %83 : vector<128x128xf32>
      %173 = arith.addf %168, %172 : vector<128x128xf32>
      %174 = vector.extract_strided_slice %9 {offsets = [5, 0], sizes = [1, 128], strides = [1, 1]} : vector<27x128xf32> to vector<1x128xf32>
      %175 = vector.broadcast %174 : vector<1x128xf32> to vector<128x128xf32>
      %176 = arith.mulf %100, %175 : vector<128x128xf32>
      %177 = arith.mulf %176, %83 : vector<128x128xf32>
      %178 = vector.extract_strided_slice %10 {offsets = [5, 0], sizes = [1, 128], strides = [1, 1]} : vector<27x128xf32> to vector<1x128xf32>
      %179 = vector.broadcast %178 : vector<1x128xf32> to vector<128x128xf32>
      %180 = arith.mulf %120, %179 : vector<128x128xf32>
      %181 = arith.mulf %180, %84 : vector<128x128xf32>
      %182 = arith.addf %177, %181 : vector<128x128xf32>
      %183 = vector.extract_strided_slice %9 {offsets = [6, 0], sizes = [1, 128], strides = [1, 1]} : vector<27x128xf32> to vector<1x128xf32>
      %184 = vector.broadcast %183 : vector<1x128xf32> to vector<128x128xf32>
      %185 = arith.mulf %102, %184 : vector<128x128xf32>
      %186 = arith.mulf %185, %84 : vector<128x128xf32>
      %187 = vector.extract_strided_slice %10 {offsets = [6, 0], sizes = [1, 128], strides = [1, 1]} : vector<27x128xf32> to vector<1x128xf32>
      %188 = vector.broadcast %187 : vector<1x128xf32> to vector<128x128xf32>
      %189 = arith.mulf %122, %188 : vector<128x128xf32>
      %190 = arith.mulf %189, %85 : vector<128x128xf32>
      %191 = arith.addf %186, %190 : vector<128x128xf32>
      %192 = vector.extract_strided_slice %9 {offsets = [7, 0], sizes = [1, 128], strides = [1, 1]} : vector<27x128xf32> to vector<1x128xf32>
      %193 = vector.broadcast %192 : vector<1x128xf32> to vector<128x128xf32>
      %194 = arith.mulf %104, %193 : vector<128x128xf32>
      %195 = arith.mulf %194, %85 : vector<128x128xf32>
      %196 = vector.extract_strided_slice %10 {offsets = [7, 0], sizes = [1, 128], strides = [1, 1]} : vector<27x128xf32> to vector<1x128xf32>
      %197 = vector.broadcast %196 : vector<1x128xf32> to vector<128x128xf32>
      %198 = arith.mulf %124, %197 : vector<128x128xf32>
      %199 = arith.mulf %198, %86 : vector<128x128xf32>
      %200 = arith.addf %195, %199 : vector<128x128xf32>
      %201 = vector.extract_strided_slice %9 {offsets = [8, 0], sizes = [1, 128], strides = [1, 1]} : vector<27x128xf32> to vector<1x128xf32>
      %202 = vector.broadcast %201 : vector<1x128xf32> to vector<128x128xf32>
      %203 = arith.mulf %106, %202 : vector<128x128xf32>
      %204 = arith.mulf %203, %86 : vector<128x128xf32>
      %205 = vector.extract_strided_slice %10 {offsets = [8, 0], sizes = [1, 128], strides = [1, 1]} : vector<27x128xf32> to vector<1x128xf32>
      %206 = vector.broadcast %205 : vector<1x128xf32> to vector<128x128xf32>
      %207 = arith.mulf %126, %206 : vector<128x128xf32>
      %208 = arith.mulf %207, %87 : vector<128x128xf32>
      %209 = arith.addf %204, %208 : vector<128x128xf32>
      %210 = vector.extract_strided_slice %9 {offsets = [9, 0], sizes = [1, 128], strides = [1, 1]} : vector<27x128xf32> to vector<1x128xf32>
      %211 = vector.broadcast %210 : vector<1x128xf32> to vector<128x128xf32>
      %212 = arith.mulf %108, %211 : vector<128x128xf32>
      %213 = arith.mulf %212, %87 : vector<128x128xf32>
      %214 = vector.extract_strided_slice %10 {offsets = [9, 0], sizes = [1, 128], strides = [1, 1]} : vector<27x128xf32> to vector<1x128xf32>
      %215 = vector.broadcast %214 : vector<1x128xf32> to vector<128x128xf32>
      %216 = arith.mulf %128, %215 : vector<128x128xf32>
      %217 = arith.mulf %216, %88 : vector<128x128xf32>
      %218 = arith.addf %213, %217 : vector<128x128xf32>
      %219 = vector.extract_strided_slice %9 {offsets = [10, 0], sizes = [1, 128], strides = [1, 1]} : vector<27x128xf32> to vector<1x128xf32>
      %220 = vector.broadcast %219 : vector<1x128xf32> to vector<128x128xf32>
      %221 = arith.mulf %90, %220 : vector<128x128xf32>
      %222 = arith.mulf %221, %137 : vector<128x128xf32>
      %223 = vector.extract_strided_slice %10 {offsets = [10, 0], sizes = [1, 128], strides = [1, 1]} : vector<27x128xf32> to vector<1x128xf32>
      %224 = vector.broadcast %223 : vector<1x128xf32> to vector<128x128xf32>
      %225 = arith.mulf %112, %224 : vector<128x128xf32>
      %226 = arith.mulf %225, %146 : vector<128x128xf32>
      %227 = arith.addf %222, %226 : vector<128x128xf32>
      %228 = vector.extract_strided_slice %9 {offsets = [11, 0], sizes = [1, 128], strides = [1, 1]} : vector<27x128xf32> to vector<1x128xf32>
      %229 = vector.broadcast %228 : vector<1x128xf32> to vector<128x128xf32>
      %230 = arith.mulf %92, %229 : vector<128x128xf32>
      %231 = arith.mulf %230, %146 : vector<128x128xf32>
      %232 = vector.extract_strided_slice %10 {offsets = [11, 0], sizes = [1, 128], strides = [1, 1]} : vector<27x128xf32> to vector<1x128xf32>
      %233 = vector.broadcast %232 : vector<1x128xf32> to vector<128x128xf32>
      %234 = arith.mulf %114, %233 : vector<128x128xf32>
      %235 = arith.mulf %234, %155 : vector<128x128xf32>
      %236 = arith.addf %231, %235 : vector<128x128xf32>
      %237 = vector.extract_strided_slice %9 {offsets = [12, 0], sizes = [1, 128], strides = [1, 1]} : vector<27x128xf32> to vector<1x128xf32>
      %238 = vector.broadcast %237 : vector<1x128xf32> to vector<128x128xf32>
      %239 = arith.mulf %94, %238 : vector<128x128xf32>
      %240 = arith.mulf %239, %155 : vector<128x128xf32>
      %241 = vector.extract_strided_slice %10 {offsets = [12, 0], sizes = [1, 128], strides = [1, 1]} : vector<27x128xf32> to vector<1x128xf32>
      %242 = vector.broadcast %241 : vector<1x128xf32> to vector<128x128xf32>
      %243 = arith.mulf %116, %242 : vector<128x128xf32>
      %244 = arith.mulf %243, %164 : vector<128x128xf32>
      %245 = arith.addf %240, %244 : vector<128x128xf32>
      %246 = vector.extract_strided_slice %9 {offsets = [13, 0], sizes = [1, 128], strides = [1, 1]} : vector<27x128xf32> to vector<1x128xf32>
      %247 = vector.broadcast %246 : vector<1x128xf32> to vector<128x128xf32>
      %248 = arith.mulf %96, %247 : vector<128x128xf32>
      %249 = arith.mulf %248, %164 : vector<128x128xf32>
      %250 = vector.extract_strided_slice %10 {offsets = [13, 0], sizes = [1, 128], strides = [1, 1]} : vector<27x128xf32> to vector<1x128xf32>
      %251 = vector.broadcast %250 : vector<1x128xf32> to vector<128x128xf32>
      %252 = arith.mulf %118, %251 : vector<128x128xf32>
      %253 = arith.mulf %252, %173 : vector<128x128xf32>
      %254 = arith.addf %249, %253 : vector<128x128xf32>
      %255 = vector.extract_strided_slice %9 {offsets = [14, 0], sizes = [1, 128], strides = [1, 1]} : vector<27x128xf32> to vector<1x128xf32>
      %256 = vector.broadcast %255 : vector<1x128xf32> to vector<128x128xf32>
      %257 = arith.mulf %98, %256 : vector<128x128xf32>
      %258 = arith.mulf %257, %173 : vector<128x128xf32>
      %259 = vector.extract_strided_slice %10 {offsets = [14, 0], sizes = [1, 128], strides = [1, 1]} : vector<27x128xf32> to vector<1x128xf32>
      %260 = vector.broadcast %259 : vector<1x128xf32> to vector<128x128xf32>
      %261 = arith.mulf %120, %260 : vector<128x128xf32>
      %262 = arith.mulf %261, %182 : vector<128x128xf32>
      %263 = arith.addf %258, %262 : vector<128x128xf32>
      %264 = vector.extract_strided_slice %9 {offsets = [15, 0], sizes = [1, 128], strides = [1, 1]} : vector<27x128xf32> to vector<1x128xf32>
      %265 = vector.broadcast %264 : vector<1x128xf32> to vector<128x128xf32>
      %266 = arith.mulf %100, %265 : vector<128x128xf32>
      %267 = arith.mulf %266, %182 : vector<128x128xf32>
      %268 = vector.extract_strided_slice %10 {offsets = [15, 0], sizes = [1, 128], strides = [1, 1]} : vector<27x128xf32> to vector<1x128xf32>
      %269 = vector.broadcast %268 : vector<1x128xf32> to vector<128x128xf32>
      %270 = arith.mulf %122, %269 : vector<128x128xf32>
      %271 = arith.mulf %270, %191 : vector<128x128xf32>
      %272 = arith.addf %267, %271 : vector<128x128xf32>
      %273 = vector.extract_strided_slice %9 {offsets = [16, 0], sizes = [1, 128], strides = [1, 1]} : vector<27x128xf32> to vector<1x128xf32>
      %274 = vector.broadcast %273 : vector<1x128xf32> to vector<128x128xf32>
      %275 = arith.mulf %102, %274 : vector<128x128xf32>
      %276 = arith.mulf %275, %191 : vector<128x128xf32>
      %277 = vector.extract_strided_slice %10 {offsets = [16, 0], sizes = [1, 128], strides = [1, 1]} : vector<27x128xf32> to vector<1x128xf32>
      %278 = vector.broadcast %277 : vector<1x128xf32> to vector<128x128xf32>
      %279 = arith.mulf %124, %278 : vector<128x128xf32>
      %280 = arith.mulf %279, %200 : vector<128x128xf32>
      %281 = arith.addf %276, %280 : vector<128x128xf32>
      %282 = vector.extract_strided_slice %9 {offsets = [17, 0], sizes = [1, 128], strides = [1, 1]} : vector<27x128xf32> to vector<1x128xf32>
      %283 = vector.broadcast %282 : vector<1x128xf32> to vector<128x128xf32>
      %284 = arith.mulf %104, %283 : vector<128x128xf32>
      %285 = arith.mulf %284, %200 : vector<128x128xf32>
      %286 = vector.extract_strided_slice %10 {offsets = [17, 0], sizes = [1, 128], strides = [1, 1]} : vector<27x128xf32> to vector<1x128xf32>
      %287 = vector.broadcast %286 : vector<1x128xf32> to vector<128x128xf32>
      %288 = arith.mulf %126, %287 : vector<128x128xf32>
      %289 = arith.mulf %288, %209 : vector<128x128xf32>
      %290 = arith.addf %285, %289 : vector<128x128xf32>
      %291 = vector.extract_strided_slice %9 {offsets = [18, 0], sizes = [1, 128], strides = [1, 1]} : vector<27x128xf32> to vector<1x128xf32>
      %292 = vector.broadcast %291 : vector<1x128xf32> to vector<128x128xf32>
      %293 = arith.mulf %106, %292 : vector<128x128xf32>
      %294 = arith.mulf %293, %209 : vector<128x128xf32>
      %295 = vector.extract_strided_slice %10 {offsets = [18, 0], sizes = [1, 128], strides = [1, 1]} : vector<27x128xf32> to vector<1x128xf32>
      %296 = vector.broadcast %295 : vector<1x128xf32> to vector<128x128xf32>
      %297 = arith.mulf %128, %296 : vector<128x128xf32>
      %298 = arith.mulf %297, %218 : vector<128x128xf32>
      %299 = arith.addf %294, %298 : vector<128x128xf32>
      %300 = vector.extract_strided_slice %9 {offsets = [19, 0], sizes = [1, 128], strides = [1, 1]} : vector<27x128xf32> to vector<1x128xf32>
      %301 = vector.broadcast %300 : vector<1x128xf32> to vector<128x128xf32>
      %302 = arith.mulf %90, %301 : vector<128x128xf32>
      %303 = arith.mulf %302, %227 : vector<128x128xf32>
      %304 = vector.extract_strided_slice %10 {offsets = [19, 0], sizes = [1, 128], strides = [1, 1]} : vector<27x128xf32> to vector<1x128xf32>
      %305 = vector.broadcast %304 : vector<1x128xf32> to vector<128x128xf32>
      %306 = arith.mulf %114, %305 : vector<128x128xf32>
      %307 = arith.mulf %306, %236 : vector<128x128xf32>
      %308 = arith.addf %303, %307 : vector<128x128xf32>
      %309 = vector.extract_strided_slice %9 {offsets = [20, 0], sizes = [1, 128], strides = [1, 1]} : vector<27x128xf32> to vector<1x128xf32>
      %310 = vector.broadcast %309 : vector<1x128xf32> to vector<128x128xf32>
      %311 = arith.mulf %92, %310 : vector<128x128xf32>
      %312 = arith.mulf %311, %236 : vector<128x128xf32>
      %313 = vector.extract_strided_slice %10 {offsets = [20, 0], sizes = [1, 128], strides = [1, 1]} : vector<27x128xf32> to vector<1x128xf32>
      %314 = vector.broadcast %313 : vector<1x128xf32> to vector<128x128xf32>
      %315 = arith.mulf %116, %314 : vector<128x128xf32>
      %316 = arith.mulf %315, %245 : vector<128x128xf32>
      %317 = arith.addf %312, %316 : vector<128x128xf32>
      %318 = vector.extract_strided_slice %9 {offsets = [21, 0], sizes = [1, 128], strides = [1, 1]} : vector<27x128xf32> to vector<1x128xf32>
      %319 = vector.broadcast %318 : vector<1x128xf32> to vector<128x128xf32>
      %320 = arith.mulf %94, %319 : vector<128x128xf32>
      %321 = arith.mulf %320, %245 : vector<128x128xf32>
      %322 = vector.extract_strided_slice %10 {offsets = [21, 0], sizes = [1, 128], strides = [1, 1]} : vector<27x128xf32> to vector<1x128xf32>
      %323 = vector.broadcast %322 : vector<1x128xf32> to vector<128x128xf32>
      %324 = arith.mulf %118, %323 : vector<128x128xf32>
      %325 = arith.mulf %324, %254 : vector<128x128xf32>
      %326 = arith.addf %321, %325 : vector<128x128xf32>
      %327 = vector.extract_strided_slice %9 {offsets = [22, 0], sizes = [1, 128], strides = [1, 1]} : vector<27x128xf32> to vector<1x128xf32>
      %328 = vector.broadcast %327 : vector<1x128xf32> to vector<128x128xf32>
      %329 = arith.mulf %96, %328 : vector<128x128xf32>
      %330 = arith.mulf %329, %254 : vector<128x128xf32>
      %331 = vector.extract_strided_slice %10 {offsets = [22, 0], sizes = [1, 128], strides = [1, 1]} : vector<27x128xf32> to vector<1x128xf32>
      %332 = vector.broadcast %331 : vector<1x128xf32> to vector<128x128xf32>
      %333 = arith.mulf %120, %332 : vector<128x128xf32>
      %334 = arith.mulf %333, %263 : vector<128x128xf32>
      %335 = arith.addf %330, %334 : vector<128x128xf32>
      %336 = vector.extract_strided_slice %9 {offsets = [23, 0], sizes = [1, 128], strides = [1, 1]} : vector<27x128xf32> to vector<1x128xf32>
      %337 = vector.broadcast %336 : vector<1x128xf32> to vector<128x128xf32>
      %338 = arith.mulf %98, %337 : vector<128x128xf32>
      %339 = arith.mulf %338, %263 : vector<128x128xf32>
      %340 = vector.extract_strided_slice %10 {offsets = [23, 0], sizes = [1, 128], strides = [1, 1]} : vector<27x128xf32> to vector<1x128xf32>
      %341 = vector.broadcast %340 : vector<1x128xf32> to vector<128x128xf32>
      %342 = arith.mulf %122, %341 : vector<128x128xf32>
      %343 = arith.mulf %342, %272 : vector<128x128xf32>
      %344 = arith.addf %339, %343 : vector<128x128xf32>
      %345 = vector.extract_strided_slice %9 {offsets = [24, 0], sizes = [1, 128], strides = [1, 1]} : vector<27x128xf32> to vector<1x128xf32>
      %346 = vector.broadcast %345 : vector<1x128xf32> to vector<128x128xf32>
      %347 = arith.mulf %100, %346 : vector<128x128xf32>
      %348 = arith.mulf %347, %272 : vector<128x128xf32>
      %349 = vector.extract_strided_slice %10 {offsets = [24, 0], sizes = [1, 128], strides = [1, 1]} : vector<27x128xf32> to vector<1x128xf32>
      %350 = vector.broadcast %349 : vector<1x128xf32> to vector<128x128xf32>
      %351 = arith.mulf %124, %350 : vector<128x128xf32>
      %352 = arith.mulf %351, %281 : vector<128x128xf32>
      %353 = arith.addf %348, %352 : vector<128x128xf32>
      %354 = vector.extract_strided_slice %9 {offsets = [25, 0], sizes = [1, 128], strides = [1, 1]} : vector<27x128xf32> to vector<1x128xf32>
      %355 = vector.broadcast %354 : vector<1x128xf32> to vector<128x128xf32>
      %356 = arith.mulf %102, %355 : vector<128x128xf32>
      %357 = arith.mulf %356, %281 : vector<128x128xf32>
      %358 = vector.extract_strided_slice %10 {offsets = [25, 0], sizes = [1, 128], strides = [1, 1]} : vector<27x128xf32> to vector<1x128xf32>
      %359 = vector.broadcast %358 : vector<1x128xf32> to vector<128x128xf32>
      %360 = arith.mulf %126, %359 : vector<128x128xf32>
      %361 = arith.mulf %360, %290 : vector<128x128xf32>
      %362 = arith.addf %357, %361 : vector<128x128xf32>
      %363 = vector.extract_strided_slice %9 {offsets = [26, 0], sizes = [1, 128], strides = [1, 1]} : vector<27x128xf32> to vector<1x128xf32>
      %364 = vector.broadcast %363 : vector<1x128xf32> to vector<128x128xf32>
      %365 = arith.mulf %104, %364 : vector<128x128xf32>
      %366 = arith.mulf %365, %290 : vector<128x128xf32>
      %367 = vector.extract_strided_slice %10 {offsets = [26, 0], sizes = [1, 128], strides = [1, 1]} : vector<27x128xf32> to vector<1x128xf32>
      %368 = vector.broadcast %367 : vector<1x128xf32> to vector<128x128xf32>
      %369 = arith.mulf %128, %368 : vector<128x128xf32>
      %370 = arith.mulf %369, %299 : vector<128x128xf32>
      %371 = arith.addf %366, %370 : vector<128x128xf32>
      %c0_17 = arith.constant 0 : index
      %c128 = arith.constant 128 : index
      %372 = vector.load %arg8[%c0_17, %c128] : memref<128x1152xf32, #tpu.memory_space<vmem>>, vector<128x128xf32>
      tpu.vector_store %arg8[%c0_17, %c128], %308 {strides = array<i32>} : memref<128x1152xf32, #tpu.memory_space<vmem>>, vector<128x128xf32>,
      %c0_18 = arith.constant 0 : index
      %c256 = arith.constant 256 : index
      %373 = vector.load %arg8[%c0_18, %c256] : memref<128x1152xf32, #tpu.memory_space<vmem>>, vector<128x128xf32>
      tpu.vector_store %arg8[%c0_18, %c256], %317 {strides = array<i32>} : memref<128x1152xf32, #tpu.memory_space<vmem>>, vector<128x128xf32>,
      %c0_19 = arith.constant 0 : index
      %c384 = arith.constant 384 : index
      %374 = vector.load %arg8[%c0_19, %c384] : memref<128x1152xf32, #tpu.memory_space<vmem>>, vector<128x128xf32>
      tpu.vector_store %arg8[%c0_19, %c384], %326 {strides = array<i32>} : memref<128x1152xf32, #tpu.memory_space<vmem>>, vector<128x128xf32>,
      %c0_20 = arith.constant 0 : index
      %c512 = arith.constant 512 : index
      %375 = vector.load %arg8[%c0_20, %c512] : memref<128x1152xf32, #tpu.memory_space<vmem>>, vector<128x128xf32>
      tpu.vector_store %arg8[%c0_20, %c512], %335 {strides = array<i32>} : memref<128x1152xf32, #tpu.memory_space<vmem>>, vector<128x128xf32>,
      %c0_21 = arith.constant 0 : index
      %c640 = arith.constant 640 : index
      %376 = vector.load %arg8[%c0_21, %c640] : memref<128x1152xf32, #tpu.memory_space<vmem>>, vector<128x128xf32>
      tpu.vector_store %arg8[%c0_21, %c640], %344 {strides = array<i32>} : memref<128x1152xf32, #tpu.memory_space<vmem>>, vector<128x128xf32>,
      %c0_22 = arith.constant 0 : index
      %c768 = arith.constant 768 : index
      %377 = vector.load %arg8[%c0_22, %c768] : memref<128x1152xf32, #tpu.memory_space<vmem>>, vector<128x128xf32>
      tpu.vector_store %arg8[%c0_22, %c768], %353 {strides = array<i32>} : memref<128x1152xf32, #tpu.memory_space<vmem>>, vector<128x128xf32>,
      %c0_23 = arith.constant 0 : index
      %c896 = arith.constant 896 : index
      %378 = vector.load %arg8[%c0_23, %c896] : memref<128x1152xf32, #tpu.memory_space<vmem>>, vector<128x128xf32>
      tpu.vector_store %arg8[%c0_23, %c896], %362 {strides = array<i32>} : memref<128x1152xf32, #tpu.memory_space<vmem>>, vector<128x128xf32>,
      %c0_24 = arith.constant 0 : index
      %c1024 = arith.constant 1024 : index
      %379 = vector.load %arg8[%c0_24, %c1024] : memref<128x1152xf32, #tpu.memory_space<vmem>>, vector<128x128xf32>
      tpu.vector_store %arg8[%c0_24, %c1024], %371 {strides = array<i32>} : memref<128x1152xf32, #tpu.memory_space<vmem>>, vector<128x128xf32>,
    } else {
    }
    %c0 = arith.constant 0 : index
    %c0_1 = arith.constant 0 : index
    %3 = vector.load %arg8[%c0, %c0_1] : memref<128x1152xf32, #tpu.memory_space<vmem>>, vector<128x1152xf32>
    %c0_2 = arith.constant 0 : index
    %c0_3 = arith.constant 0 : index
    %4 = vector.load %arg6[%c0_2, %c0_3] : memref<1152x128xf32, #tpu.memory_space<vmem>>, vector<1152x128xf32>
    %cst = arith.constant dense<0.000000e+00> : vector<128x128xf32>
    %5 = tpu.matmul %3, %4, %cst {dimension_numbers = #tpu.dot_dimension_numbers<[1], [0], [0], [1], [0, 0, 1, 1], [], []>} : vector<128x1152xf32>, vector<1152x128xf32>, vector<128x128xf32> -> vector<128x128xf32>
    %c0_4 = arith.constant 0 : index
    %c0_5 = arith.constant 0 : index
    %6 = vector.load %arg7[%c0_4, %c0_5] : memref<128x128xf32, #tpu.memory_space<vmem>>, vector<128x128xf32>
    tpu.vector_store %arg7[%c0_4, %c0_5], %5 {strides = array<i32>} : memref<128x128xf32, #tpu.memory_space<vmem>>, vector<128x128xf32>,
    return
  }
  func.func @transform_0(%arg0: i32, %arg1: i32) -> (i32, i32) {
    %c0_i32 = arith.constant 0 : i32
    %c0_i32_0 = arith.constant 0 : i32
    return %arg0, %c0_i32 : i32, i32
  }
  func.func @transform_1(%arg0: i32, %arg1: i32) -> (i32, i32) {
    %c0_i32 = arith.constant 0 : i32
    %c0_i32_0 = arith.constant 0 : i32
    %c0_i32_1 = arith.constant 0 : i32
    return %c0_i32, %c0_i32_0 : i32, i32
  }
  func.func @transform_2(%arg0: i32, %arg1: i32) -> (i32, i32) {
    %c0_i32 = arith.constant 0 : i32
    %c0_i32_0 = arith.constant 0 : i32
    %c0_i32_1 = arith.constant 0 : i32
    return %c0_i32, %c0_i32_0 : i32, i32
  }
  func.func @transform_3(%arg0: i32, %arg1: i32) -> (i32, i32) {
    %c0_i32 = arith.constant 0 : i32
    %c0_i32_0 = arith.constant 0 : i32
    %c0_i32_1 = arith.constant 0 : i32
    return %c0_i32, %c0_i32_0 : i32, i32
  }
  func.func @transform_4(%arg0: i32, %arg1: i32) -> (i32, i32) {
    %c0_i32 = arith.constant 0 : i32
    %c0_i32_0 = arith.constant 0 : i32
    return %c0_i32, %arg1 : i32, i32
  }
  func.func @transform_5(%arg0: i32, %arg1: i32) -> (i32, i32) {
    %c0_i32 = arith.constant 0 : i32
    return %arg0, %arg1 : i32, i32
  }
}

</mosaic_0001>

<bundles_post_ra>
// kernel: tpu_custom_call.1
= control target key start
LH: loop header
LB: loop body
LE: loop exit
PB: predicated region body
PF: predicated region fallthrough
CT: control target
= control target key end

     0   :  { %10 = vsyncpa [#allocation4], 0  ;;  %s9679_s0 = inlined_call_operand.hbm [shape: f32[128,128], index: 0, kind: input, shape index: {}]   ;;  %s9680_s1 = inlined_call_operand.hbm [shape: f32[12,128], index: 1, kind: input, shape index: {}]   ;;  %s9681_s2 = inlined_call_operand.hbm [shape: f32[27,128], index: 2, kind: input, shape index: {}]   ;;  %s9682_s3 = inlined_call_operand.hbm [shape: f32[27,128], index: 3, kind: input, shape index: {}]   ;;  %s9683_s4 = inlined_call_operand.hbm [shape: f32[1152,128], index: 4, kind: input, shape index: {}]   ;;  %s9684_s5 = inlined_call_operand.hbm [shape: f32[128,128], index: 5, kind: output, shape index: {}]  }
   0x1   :  { %11 = vsyncpa [#allocation7], 0 }
   0x2   :  { %12 = vsyncpa [#allocation10], 0 }
   0x3   :  { %13 = vsyncpa [#allocation5], 0  ;;  %s5805_s18 = smov [#allocation6]   ;;  %s5806_s20 = smov [#allocation9]  }
   0x4   :  { %s31_s19 = sshll.u32 %s5805_s18, 4  ;;  %s55_s21 = sshll.u32 %s5806_s20, 4  ;;  %s32_s19 = int_to_ptr.vmem [resolvable:$true] %s31_s19  ;;  %s56_s21 = int_to_ptr.vmem [resolvable:$true] %s55_s21 }
   0x5   :  { %s5685_s22 = scalar_lea.vmem %s32_s19, 256  ;;  %p5690_p1 = scmp.lt.s32.totalorder %s32_s19, %s32_s19 }
   0x6   :  { %p5686_p0 = scmp.ne.s32.totalorder %s32_s19, %s5685_s22  ;;  %p5691_p2 = scmp.lt.s32.totalorder %s5685_s22, %s5685_s22 }
   0x8   :  { %p5692_p3 = por %p5691_p2, %p5690_p1 }
   0xa   :  { %p5693_p4 = pnand %p5692_p3, %p5686_p0 }
   0xc   :  { %5696 = shalt.err (!%p5693_p4)
}
   0xd   :  { %s5807_s23 = smov 128   ;;  %s5808_s24 = smov 8  }
   0xe   :  { %37 = dma.hbm_to_vmem [thread:$0]  %s9680_s1, 256, %s32_s19, [#allocation7], %s5807_s23, %s5807_s23, %s5808_s24  }
   0xf   :  { %s5705_s27 = scalar_lea.vmem %s56_s21, 512  ;;  %p5710_p6 = scmp.lt.s32.totalorder %s56_s21, %s56_s21 }
  0x10   :  { %p5706_p5 = scmp.ne.s32.totalorder %s56_s21, %s5705_s27  ;;  %p5711_p7 = scmp.lt.s32.totalorder %s5705_s27, %s5705_s27 }
  0x12   :  { %p5712_p8 = por %p5711_p7, %p5710_p6 }
  0x14   :  { %p5713_p9 = pnand %p5712_p8, %p5706_p5 }
  0x16   :  { %5716 = shalt.err (!%p5713_p9)
}
  0x17   :  { %61 = dma.hbm_to_vmem [thread:$0]  %s9682_s3, 512, %s56_s21, [#allocation10], %s5807_s23, %s5807_s23, %s5808_s24  }
  0x18   :  { %s5809_s30 = smov [#allocation3]   ;;  %s5810_s7 = smov [#allocation8]  }
  0x19   :  { %s19_s6 = sshll.u32 %s5809_s30, 4  ;;  %s43_s8 = sshll.u32 %s5810_s7, 4  ;;  %s20_s6 = int_to_ptr.vmem [resolvable:$true] %s19_s6  ;;  %s44_s8 = int_to_ptr.vmem [resolvable:$true] %s43_s8 }
  0x1a   :  { %s5725_s1 = scalar_lea.vmem %s20_s6, 2048  ;;  %p5730_p11 = scmp.lt.s32.totalorder %s20_s6, %s20_s6 }
  0x1b   :  { %p5726_p10 = scmp.ne.s32.totalorder %s20_s6, %s5725_s1  ;;  %p5731_p12 = scmp.lt.s32.totalorder %s5725_s1, %s5725_s1 }
  0x1d   :  { %p5732_p13 = por %p5731_p12, %p5730_p11 }
  0x1f   :  { %p5733_p0 = pnand %p5732_p13, %p5726_p10 }
  0x21   :  { %5736 = shalt.err (!%p5733_p0)
}
  0x22   :  { %25 = dma.hbm_to_vmem [thread:$0]  %s9679_s0, 2048, %s20_s6, [#allocation4], %s5807_s23, %s5807_s23, %s5808_s24  }
  0x23   :  { %s5745_s3 = scalar_lea.vmem %s44_s8, 512  ;;  %p5750_p2 = scmp.lt.s32.totalorder %s44_s8, %s44_s8 }
  0x24   :  { %p5746_p1 = scmp.ne.s32.totalorder %s44_s8, %s5745_s3  ;;  %p5751_p3 = scmp.lt.s32.totalorder %s5745_s3, %s5745_s3 }
  0x26   :  { %p5752_p4 = por %p5751_p3, %p5750_p2 }
  0x28   :  { %p5753_p5 = pnand %p5752_p4, %p5746_p1 }
  0x2a   :  { %5756 = shalt.err (!%p5753_p5)
}
  0x2b   :  { %49 = dma.hbm_to_vmem [thread:$0]  %s9681_s2, 512, %s44_s8, [#allocation7], %s5807_s23, %s5807_s23, %s5808_s24  }
  0x2c   :  { %s5811_s13 = smov [#allocation11]  }
  0x2d   :  { %s67_s14 = sshll.u32 %s5811_s13, 4  ;;  %s68_s14 = int_to_ptr.vmem [resolvable:$true] %s67_s14 }
  0x2e   :  { %s5765_s15 = scalar_lea.vmem %s68_s14, 18432  ;;  %p5770_p7 = scmp.lt.s32.totalorder %s68_s14, %s68_s14 }
  0x2f   :  { %p5766_p6 = scmp.ne.s32.totalorder %s68_s14, %s5765_s15  ;;  %p5771_p8 = scmp.lt.s32.totalorder %s5765_s15, %s5765_s15 }
  0x31   :  { %p5772_p9 = por %p5771_p8, %p5770_p7 }
  0x33   :  { %p5773_p10 = pnand %p5772_p9, %p5766_p6 }
  0x35   :  { %5776 = shalt.err (!%p5773_p10)
}
  0x36   :  { %73 = dma.hbm_to_vmem [thread:$0]  %s9683_s4, 18432, %s68_s14, [#allocation10], %s5807_s23, %s5807_s23, %s5808_s24  }
  0x37   :  { %5797 = dma.done.wait [#allocation4], 2048  }
  0x38   :  { %5798 = vsyncadd [#allocation4], 4294965248 }
  0x39   :  { %5799 = dma.done.wait [#allocation7], 768  }
  0x3a   :  { %5800 = vsyncadd [#allocation7], 4294966528 }
  0x3b   :  { %5801 = dma.done.wait [#allocation10], 18944  }
  0x3c   :  { %5802 = vsyncadd [#allocation10], 4294948352  ;;  %v4078_v0 = vld [vmem:[#allocation11 + $0x1f8] sm:$0xff]  ;;  %v4077_v4 = vld [vmem:[#allocation11 + $0x1f0] sm:$0xff]  ;;  %v247_v26 = vlaneseq  ;;  %s5813_s2 = smov [#allocation12]  }
  0x3d   :  { %v4046_v1 = vld [vmem:[#allocation11 + $0xf8] sm:$0xff]  ;;  %5207 = vmatprep.subr.mxu1 %v4078_v0  ;;  %v4045_v5 = vld [vmem:[#allocation11 + $0xf0] sm:$0xff]  ;;  %v4076_v8 = vld [vmem:[#allocation11 + $0x1e8] sm:$0xff]  ;;  %s4905_s4 = sshll.u32 %s5813_s2, 4  ;;  %s4906_s4 = int_to_ptr.vmem [resolvable:$true] %s4905_s4 }
  0x3e   :  { %v4062_v2 = vld [vmem:[#allocation11 + $0x178] sm:$0xff]  ;;  %5127 = vmatprep.subr.mxu0 %v4046_v1  ;;  %v4061_v6 = vld [vmem:[#allocation11 + $0x170] sm:$0xff]  ;;  %v4044_v9 = vld [vmem:[#allocation11 + $0xe8] sm:$0xff]  ;;  %v248_v35 = vshrl.u32 %v247_v26, 7  ;;  %s5777_s17 = scalar_lea.vmem %s4906_s4, 2048  ;;  %p5782_p12 = scmp.lt.s32.totalorder %s4906_s4, %s4906_s4 }
  0x3f   :  { %v4030_v3 = vld [vmem:[#allocation11 + $0x78] sm:$0xff]  ;;  %5208 = vmatpush3.msra.mxu1 %v4062_v2  ;;  %v4029_v7 = vld [vmem:[#allocation11 + $0x70] sm:$0xff]  ;;  %v4060_v10 = vld [vmem:[#allocation11 + $0x168] sm:$0xff]  ;;  %p5778_p11 = scmp.ne.s32.totalorder %s4906_s4, %s5777_s17  ;;  %p5783_p13 = scmp.lt.s32.totalorder %s5777_s17, %s5777_s17 }
  0x40   :  { %5128 = vmatpush3.msra.mxu0 %v4030_v3  ;;  %5209 = vmatprep.subr.mxu1 %v4077_v4  ;;  %v4028_v11 = vld [vmem:[#allocation11 + $0x68] sm:$0xff]  ;;  %v4075_v12 = vld [vmem:[#allocation11 + $0x1e0] sm:$0xff]  ;;  %v4074_v16 = vld [vmem:[#allocation11 + $0x1d8] sm:$0xff]  ;;  %v5874_v44 = vsub.s32 1, %v248_v35  ;;  %v5876_v45 = vsub.s32 2, %v248_v35  ;;  %v5878_v46 = vsub.s32 3, %v248_v35 }
  0x41   :  { %5129 = vmatprep.subr.mxu0 %v4045_v5  ;;  %5210 = vmatpush3.msra.mxu1 %v4061_v6  ;;  %v4043_v13 = vld [vmem:[#allocation11 + $0xe0] sm:$0xff]  ;;  %v4042_v17 = vld [vmem:[#allocation11 + $0xd8] sm:$0xff]  ;;  %v4073_v20 = vld [vmem:[#allocation11 + $0x1d0] sm:$0xff]  ;;  %v5880_v49 = vsub.s32 4, %v248_v35  ;;  %v5882_v50 = vsub.s32 5, %v248_v35  ;;  %v5884_v51 = vsub.s32 6, %v248_v35  ;;  %p5784_p0 = por %p5783_p13, %p5782_p12 }
  0x42   :  { %5130 = vmatpush3.msra.mxu0 %v4029_v7  ;;  %5211 = vmatprep.subr.mxu1 %v4076_v8  ;;  %v4059_v14 = vld [vmem:[#allocation11 + $0x160] sm:$0xff]  ;;  %v4058_v18 = vld [vmem:[#allocation11 + $0x158] sm:$0xff]  ;;  %v4041_v21 = vld [vmem:[#allocation11 + $0xd0] sm:$0xff]  ;;  %9949 = vst [vmem:[#allocation17_spill] sm:$0xff] %v5874_v44  ;;  %v5890_v58 = vsub.s32 7, %v248_v35  ;;  %v5917_v6 = vsub.s32 0, %v248_v35 }
  0x43   :  { %5131 = vmatprep.subr.mxu0 %v4044_v9  ;;  %v4027_v15 = vld [vmem:[#allocation11 + $0x60] sm:$0xff]  ;;  %5212 = vmatpush3.msra.mxu1 %v4060_v10  ;;  %v4026_v19 = vld [vmem:[#allocation11 + $0x58] sm:$0xff]  ;;  %v4057_v22 = vld [vmem:[#allocation11 + $0x150] sm:$0xff]  ;;  %9950 = vst [vmem:[#allocation18_spill] sm:$0xff] %v5876_v45  ;;  %p5785_p1 = pnand %p5784_p0, %p5778_p11 }
  0x44   :  { %5132 = vmatpush3.msra.mxu0 %v4028_v11  ;;  %5213 = vmatprep.subr.mxu1 %v4075_v12  ;;  %v4025_v23 = vld [vmem:[#allocation11 + $0x50] sm:$0xff]  ;;  %v4072_v24 = vld [vmem:[#allocation11 + $0x1c8] sm:$0xff]  ;;  %v4071_v29 = vld [vmem:[#allocation11 + $0x1c0] sm:$0xff]  ;;  %9951 = vst [vmem:[#allocation19_spill] sm:$0xff] %v5884_v51  ;;  %v9685_v12 = vmov 0.0  }
  0x45   :  { %5133 = vmatprep.subr.mxu0 %v4043_v13  ;;  %5214 = vmatpush3.msra.mxu1 %v4059_v14  ;;  %v4040_v25 = vld [vmem:[#allocation11 + $0xc8] sm:$0xff]  ;;  %v4039_v30 = vld [vmem:[#allocation11 + $0xc0] sm:$0xff]  ;;  %v4070_v33 = vld [vmem:[#allocation11 + $0x1b8] sm:$0xff]  ;;  %9952 = vst [vmem:[#allocation20_spill] sm:$0xff] %v5890_v58 }
  0x46   :  { %5134 = vmatpush3.msra.mxu0 %v4027_v15  ;;  %5215 = vmatprep.subr.mxu1 %v4074_v16  ;;  %v4056_v27 = vld [vmem:[#allocation11 + $0x148] sm:$0xff]  ;;  %v4055_v31 = vld [vmem:[#allocation11 + $0x140] sm:$0xff]  ;;  %v4038_v34 = vld [vmem:[#allocation11 + $0xb8] sm:$0xff]  ;;  %9953 = vst [vmem:[#allocation21_spill] sm:$0xff] %v5917_v6 }
  0x47   :  { %5135 = vmatprep.subr.mxu0 %v4042_v17  ;;  %5216 = vmatpush3.msra.mxu1 %v4058_v18  ;;  %v4024_v28 = vld [vmem:[#allocation11 + $0x48] sm:$0xff]  ;;  %v4023_v32 = vld [vmem:[#allocation11 + $0x40] sm:$0xff]  ;;  %v4054_v36 = vld [vmem:[#allocation11 + $0x138] sm:$0xff] }
  0x48   :  { %5136 = vmatpush3.msra.mxu0 %v4026_v19  ;;  %5217 = vmatprep.subr.mxu1 %v4073_v20  ;;  %v4022_v37 = vld [vmem:[#allocation11 + $0x38] sm:$0xff]  ;;  %v4069_v38 = vld [vmem:[#allocation11 + $0x1b0] sm:$0xff]  ;;  %v4068_v42 = vld [vmem:[#allocation11 + $0x1a8] sm:$0xff] }
  0x49   :  { %5137 = vmatprep.subr.mxu0 %v4041_v21  ;;  %5218 = vmatpush3.msra.mxu1 %v4057_v22  ;;  %v4037_v39 = vld [vmem:[#allocation11 + $0xb0] sm:$0xff]  ;;  %v4036_v43 = vld [vmem:[#allocation11 + $0xa8] sm:$0xff]  ;;  %v4067_v52 = vld [vmem:[#allocation11 + $0x1a0] sm:$0xff] }
  0x4a   :  { %5138 = vmatpush3.msra.mxu0 %v4025_v23  ;;  %5219 = vmatprep.subr.mxu1 %v4072_v24  ;;  %v4053_v40 = vld [vmem:[#allocation11 + $0x130] sm:$0xff]  ;;  %v4052_v47 = vld [vmem:[#allocation11 + $0x128] sm:$0xff]  ;;  %v4035_v53 = vld [vmem:[#allocation11 + $0xa0] sm:$0xff] }
  0x4b   :  { %5139 = vmatprep.subr.mxu0 %v4040_v25  ;;  %5220 = vmatpush3.msra.mxu1 %v4056_v27  ;;  %v4021_v41 = vld [vmem:[#allocation11 + $0x30] sm:$0xff]  ;;  %v4020_v48 = vld [vmem:[#allocation11 + $0x28] sm:$0xff]  ;;  %v4051_v54 = vld [vmem:[#allocation11 + $0x120] sm:$0xff] }
  0x4c   :  { %5140 = vmatpush3.msra.mxu0 %v4024_v28  ;;  %5221 = vmatprep.subr.mxu1 %v4071_v29  ;;  %v4019_v55 = vld [vmem:[#allocation11 + $0x20] sm:$0xff]  ;;  %v5886_v56 = vld [vmem:[#allocation3] sm:$0xff]  ;;  %v4066_v59 = vld [vmem:[#allocation11 + $0x198] sm:$0xff] }
  0x4d   :  { %5141 = vmatprep.subr.mxu0 %v4039_v30  ;;  %5222 = vmatpush3.msra.mxu1 %v4055_v31  ;;  %v5888_v57 = vld [vmem:[#allocation6] sm:$0xff]  ;;  %v4034_v60 = vld [vmem:[#allocation11 + $0x98] sm:$0xff]  ;;  %v4919_v0 = vmul.f32 -1.442695, %v5886_v56  ;;  %v4064_v17 = vld [vmem:[#allocation11 + $0x188] sm:$0xff] }
  0x4e   :  { %5142 = vmatpush3.msra.mxu0 %v4023_v32  ;;  %5223 = vmatprep.subr.mxu1 %v4070_v33  ;;  %v5894_v61 = vrot.slane %v5888_v57, %v5874_v44  ;;  %v5898_v62 = vrot.slane %v5888_v57, %v5876_v45  ;;  %v5902_v63 = vrot.slane %v5888_v57, %v5878_v46  ;;  %v4050_v1 = vld [vmem:[#allocation11 + $0x118] sm:$0xff]  ;;  %v4065_v7 = vld [vmem:[#allocation11 + $0x190] sm:$0xff]  ;;  %v4032_v18 = vld [vmem:[#allocation11 + $0x88] sm:$0xff] }
  0x4f   :  { %5143 = vmatprep.subr.mxu0 %v4038_v34  ;;  %5224 = vmatpush3.msra.mxu1 %v4054_v36  ;;  %v4018_v2 = vld [vmem:[#allocation11 + $0x18] sm:$0xff]  ;;  %v5907_v3 = vrot.slane %v5888_v57, %v5880_v49  ;;  %v5911_v4 = vrot.slane %v5888_v57, %v5882_v50  ;;  %v5915_v5 = vrot.slane %v5888_v57, %v5884_v51  ;;  %v4033_v8 = vld [vmem:[#allocation11 + $0x90] sm:$0xff]  ;;  %5576 = vpow2.f32 %v4919_v0  ;;  %v4048_v21 = vld [vmem:[#allocation11 + $0x108] sm:$0xff] }
  0x50   :  { %5144 = vmatpush3.msra.mxu0 %v4022_v37  ;;  %5225 = vmatprep.subr.mxu1 %v4069_v38  ;;  %v5919_v9 = vld [vmem:[#allocation6 + $0x8] sm:$0xf]  ;;  %vm303_vm0 = vcmp.ge.f32.partialorder %v5886_v56, %v5894_v61  ;;  %vm355_vm1 = vcmp.ge.f32.partialorder %v5886_v56, %v5898_v62  ;;  %vm407_vm2 = vcmp.ge.f32.partialorder %v5886_v56, %v5902_v63  ;;  %v4049_v10 = vld [vmem:[#allocation11 + $0x110] sm:$0xff]  ;;  %v4016_v22 = vld [vmem:[#allocation11 + $0x8] sm:$0xff] }
  0x51   :  { %5145 = vmatprep.subr.mxu0 %v4037_v39  ;;  %5226 = vmatpush3.msra.mxu1 %v4053_v40  ;;  %v4017_v11 = vld [vmem:[#allocation11 + $0x10] sm:$0xff]  ;;  %v5928_v13 = vsel %vm303_vm0, 1.0, %v9685_v12  ;;  %v4967_v14 = vsel %vm355_vm1, 1.0, %v9685_v12  ;;  %v4983_v15 = vsel %vm407_vm2, 1.0, %v9685_v12  ;;  %vm459_vm3 = vcmp.ge.f32.partialorder %v5886_v56, %v5907_v3  ;;  %v5934_v16 = vld [vmem:[#allocation3 + $0x8] sm:$0xff]  ;;  %v4063_v27 = vld [vmem:[#allocation11 + $0x180] sm:$0xff] }
  0x52   :  { %5146 = vmatpush3.msra.mxu0 %v4021_v41  ;;  %5227 = vmatprep.subr.mxu1 %v4068_v42  ;;  %v4999_v19 = vsel %vm459_vm3, 1.0, %v9685_v12  ;;  %vm511_vm4 = vcmp.ge.f32.partialorder %v5886_v56, %v5911_v4  ;;  %vm563_vm5 = vcmp.ge.f32.partialorder %v5886_v56, %v5915_v5  ;;  %v5943_v20 = vrot.slane %v5888_v57, %v5890_v58  ;;  %v4031_v28 = vld [vmem:[#allocation11 + $0x80] sm:$0xff] }
  0x53   :  { %5147 = vmatprep.subr.mxu0 %v4036_v43  ;;  %5228 = vmatpush3.msra.mxu1 %v4052_v47  ;;  %v5015_v23 = vsel %vm511_vm4, 1.0, %v9685_v12  ;;  %v5031_v24 = vsel %vm563_vm5, 1.0, %v9685_v12  ;;  %v5949_v25 = vrot.slane %v5919_v9, %v5876_v45  ;;  %v5953_v26 = vrot.slane %v5919_v9, %v5878_v46  ;;  %v5963_v32 = vld [vmem:[#allocation3 + $0x10] sm:$0xff] }
  0x54   :  { %5148 = vmatpush3.msra.mxu0 %v4020_v48  ;;  %5229 = vmatprep.subr.mxu1 %v4067_v52  ;;  %9954 = vst [vmem:[#allocation22_spill] sm:$0xff] %v5943_v20  ;;  %vm615_vm6 = vcmp.ge.f32.partialorder %v5886_v56, %v5943_v20  ;;  %v5958_v29 = vsub.f32 %v5928_v13, %v4967_v14  ;;  %v4920_v31 = vmul.f32 -1.442695, %v5934_v16  ;;  %9957 = vst [vmem:[#allocation25_spill] sm:$0xff] %v5963_v32  ;;  %v4047_v33 = vld [vmem:[#allocation11 + $0x100] sm:$0xff] }
  0x55   :  { %5149 = vmatprep.subr.mxu0 %v4035_v53  ;;  %5230 = vmatpush3.msra.mxu1 %v4051_v54  ;;  %9955 = vst [vmem:[#allocation23_spill] sm:$0xff] %v5949_v25  ;;  %9956 = vst [vmem:[#allocation24_spill] sm:$0xff] %v5953_v26  ;;  %v5960_v30 = vsub.f32 %v4967_v14, %v4983_v15  ;;  %v5965_v34 = vld [vmem:[#allocation8] sm:$0xff]  ;;  %v5968_v35 = vsel %vm615_vm6, 1.0, %v9685_v12  ;;  %v919_v36 = vsub.f32 %v4983_v15, %v4999_v19  ;;  %v4110_v53 = vld [vmem:[#allocation11 + $0x2f8] sm:$0xff] }
  0x56   :  { %5150 = vmatpush3.msra.mxu0 %v4019_v55  ;;  %5231 = vmatprep.subr.mxu1 %v4066_v59  ;;  %9958 = vst [vmem:[#allocation26_spill] sm:$0xff] %v5968_v35  ;;  %v935_v37 = vsub.f32 %v4999_v19, %v5015_v23  ;;  %v951_v38 = vsub.f32 %v5015_v23, %v5031_v24  ;;  %v5970_v39 = vld [vmem:[#allocation9] sm:$0xff]  ;;  %5578 = vpow2.f32 %v4920_v31  ;;  %v5996_v54 = vmul.f32 -1.442695, %v5963_v32  ;;  %v6067_v25 = vld [vmem:[#allocation8 + $0x10] sm:$0xff] }
  0x57   :  { %5151 = vmatprep.subr.mxu0 %v4034_v60  ;;  %5232 = vmatpush3.msra.mxu1 %v4050_v1  ;;  %v5973_v40 = vsub.f32 %v5031_v24, %v5968_v35  ;;  %v5977_v41 = vsub.f32 %v5886_v56, %v5898_v62  ;;  %v5981_v42 = vsub.f32 %v5886_v56, %v5902_v63  ;;  %v4015_v43 = vld [vmem:[#allocation11] sm:$0xff]  ;;  %v4142_v1 = vld [vmem:[#allocation11 + $0x3f8] sm:$0xff]  ;;  %v6052_v24 = vld [vmem:[#allocation9 + $0x8] sm:$0xff] }
  0x58   :  { %5152 = vmatpush3.msra.mxu0 %v4018_v2  ;;  %5233 = vmatprep.subr.mxu1 %v4065_v7  ;;  %v5985_v47 = vsub.f32 %v5886_v56, %v5907_v3  ;;  %v5989_v48 = vsub.f32 %v5886_v56, %v5911_v4  ;;  %v5993_v52 = vsub.f32 %v5907_v3, %v5886_v56 }
  0x59   :  { %5153 = vmatprep.subr.mxu0 %v4033_v8  ;;  %5234 = vmatpush3.msra.mxu1 %v4049_v10  ;;  %9959 = vst [vmem:[#allocation27_spill] sm:$0xff] %v5973_v40  ;;  %9962 = vst [vmem:[#allocation30_spill] sm:$0xff] %v5996_v54  ;;  %v6000_v55 = vsub.f32 %v5911_v4, %v5886_v56  ;;  %v1271_v59 = vsub.f32 %v5915_v5, %v5886_v56 }
  0x5a   :  { %5154 = vmatpush3.msra.mxu0 %v4017_v11  ;;  %5235 = vmatprep.subr.mxu1 %v4064_v17  ;;  %9960 = vst [vmem:[#allocation28_spill] sm:$0xff] %v5985_v47  ;;  %9961 = vst [vmem:[#allocation29_spill] sm:$0xff] %v5989_v48  ;;  %v6006_v60 = vsub.f32 %v5943_v20, %v5886_v56  ;;  %v6010_v0 = vrot.slane %v5965_v34, %v5876_v45 }
  0x5b   :  { %5155 = vmatprep.subr.mxu0 %v4032_v18  ;;  %5236 = vmatpush3.msra.mxu1 %v4048_v21  ;;  %v6014_v2 = vrot.slane %v5970_v39, %v5876_v45  ;;  %v6018_v7 = vrot.slane %v5965_v34, %v5878_v46  ;;  %v6022_v8 = vrot.slane %v5970_v39, %v5878_v46  ;;  %v6042_v18 = vld [vmem:[#allocation8 + $0x8] sm:$0xff] }
  0x5c   :  { %5156 = vmatpush3.msra.mxu0 %v4016_v22  ;;  %5237 = vmatprep.subr.mxu1 %v4063_v27  ;;  %v6026_v10 = vrot.slane %v5965_v34, %v5880_v49  ;;  %v1547_v11 = vmul.f32 %v6010_v0, %v5977_v41  ;;  %v6032_v14 = vrot.slane %v5970_v39, %v5880_v49 }
  0x5d   :  { %5157 = vmatprep.subr.mxu0 %v4031_v28  ;;  %5238 = vmatpush3.msra.mxu1 %v4047_v33  ;;  %9963 = vst [vmem:[#allocation31_spill] sm:$0xff] %v6018_v7  ;;  %9964 = vst [vmem:[#allocation32_spill] sm:$0xff] %v6022_v8  ;;  %v6036_v15 = vrot.slane %v5965_v34, %v5882_v50  ;;  %v6040_v17 = vrot.slane %v5970_v39, %v5882_v50 }
  0x5e   :  { %9965 = vst [vmem:[#allocation33_spill] sm:$0xff] %v6026_v10  ;;  %5158 = vmatpush3.msra.mxu0 %v4015_v43  ;;  %9966 = vst [vmem:[#allocation34_spill] sm:$0xff] %v6032_v14  ;;  %v1583_v19 = vmul.f32 %v6014_v2, %v5993_v52  ;;  %v1635_v21 = vmul.f32 %v6018_v7, %v5981_v42  ;;  %v1671_v22 = vmul.f32 %v6022_v8, %v6000_v55  ;;  %v6060_v43 = vpop.eup %5576 }
  0x5f   :  { %9967 = vst [vmem:[#allocation35_spill] sm:$0xff] %v6036_v15  ;;  %9968 = vst [vmem:[#allocation36_spill] sm:$0xff] %v6040_v17  ;;  %5287 = vmatprep.subr.mxu0 %v4110_v53  ;;  %v1723_v23 = vmul.f32 %v6026_v10, %v5985_v47  ;;  %5367 = vmatprep.subr.mxu1 %v4142_v1  ;;  %v1563_v27 = vmul.f32 %v1547_v11, %v5960_v30 }
  0x60   :  { %v1759_v28 = vmul.f32 %v6032_v14, %v1271_v59  ;;  %v1811_v31 = vmul.f32 %v6036_v15, %v5989_v48  ;;  %v1847_v33 = vmul.f32 %v6040_v17, %v6006_v60  ;;  %v1599_v53 = vmul.f32 %v1583_v19, %v919_v36  ;;  %v6069_v15 = vld [vmem:[#allocation9 + $0x10] sm:$0xff] }
  0x61   :  { %v1651_v12 = vmul.f32 %v1635_v21, %v919_v36  ;;  %v1687_v26 = vmul.f32 %v1671_v22, %v935_v37  ;;  %v1739_v58 = vmul.f32 %v1723_v23, %v935_v37  ;;  %v6065_v11 = vrot.slane %v6042_v18, %v5880_v49 }
  0x62   :  { %v1775_v20 = vmul.f32 %v1759_v28, %v951_v38  ;;  %v1827_v1 = vmul.f32 %v1811_v31, %v951_v38  ;;  %v1863_v35 = vmul.f32 %v1847_v33, %v5973_v40  ;;  %v1615_v48 = vadd.f32 %v1599_v53, %v1563_v27 }
  0x63   :  { %9969 = vst [vmem:[#allocation37_spill] sm:$0xff] %v6065_v11  ;;  %v1703_v17 = vadd.f32 %v1687_v26, %v1651_v12  ;;  %v6073_v19 = vrot.slane %v6052_v24, %v5880_v49  ;;  %v6077_v36 = vrot.slane %v6042_v18, %v5882_v50  ;;  %v2427_v21 = vmul.f32 %v6065_v11, %v5977_v41  ;;  %v6108_v31 = vpop.eup %5578 }
  0x64   :  { %v1791_v37 = vadd.f32 %v1775_v20, %v1739_v58  ;;  %v6079_v38 = vadd.f32 %v1863_v35, %v1827_v1  ;;  %v6085_v22 = vrot.slane %v6052_v24, %v5882_v50  ;;  %v6093_v23 = vrot.slane %v6042_v18, %v5884_v51  ;;  %9974 = vst [vmem:[#allocation42_spill] sm:$0xff] %v6108_v31 }
  0x65   :  { %v2463_v12 = vmul.f32 %v6073_v19, %v6000_v55  ;;  %v2515_v26 = vmul.f32 %v6077_v36, %v5981_v42  ;;  %v6097_v58 = vrot.slane %v6052_v24, %v5884_v51  ;;  %v2443_v20 = vmul.f32 %v2427_v21, %v1615_v48 }
  0x66   :  { %9970 = vst [vmem:[#allocation38_spill] sm:$0xff] %v6079_v38  ;;  %9971 = vst [vmem:[#allocation39_spill] sm:$0xff] %v6085_v22  ;;  %v2551_v35 = vmul.f32 %v6085_v22, %v1271_v59  ;;  %v6102_v27 = vrot.slane %v6067_v25, %v5882_v50  ;;  %v6106_v28 = vrot.slane %v6069_v15, %v5882_v50 }
  0x67   :  { %9972 = vst [vmem:[#allocation40_spill] sm:$0xff] %v6093_v23  ;;  %9973 = vst [vmem:[#allocation41_spill] sm:$0xff] %v6097_v58  ;;  %v2479_v33 = vmul.f32 %v2463_v12, %v1703_v17  ;;  %v2531_v53 = vmul.f32 %v2515_v26, %v1703_v17  ;;  %v2603_v1 = vmul.f32 %v6093_v23, %v5985_v47 }
  0x68   :  { %v2639_v21 = vmul.f32 %v6097_v58, %v6006_v60  ;;  %v2567_v40 = vmul.f32 %v2551_v35, %v1791_v37  ;;  %v3219_v54 = vmul.f32 %v6102_v27, %v5977_v41  ;;  %v3255_v32 = vmul.f32 %v6106_v28, %v1271_v59 }
  0x69   :  { %v6119_v50 = vrot.slane %v6067_v25, %v5884_v51  ;;  %v2495_v22 = vadd.f32 %v2479_v33, %v2443_v20  ;;  %v2619_v31 = vmul.f32 %v2603_v1, %v1791_v37  ;;  %v6124_v12 = vrot.slane %v6069_v15, %v5884_v51 }
  0x6a   :  { %v2655_v17 = vmul.f32 %v2639_v21, %v6079_v38  ;;  %v2583_v26 = vadd.f32 %v2567_v40, %v2531_v53  ;;  %v6130_v41 = vrot.slane %v5919_v9, %v5874_v44  ;;  %v1063_v59 = vsub.f32 %v5886_v56, %v5894_v61  ;;  %v4139_v38 = vld [vmem:[#allocation11 + $0x3e0] sm:$0xff] }
  0x6b   :  { %9975 = vst [vmem:[#allocation43_spill] sm:$0xff] %v6119_v50  ;;  %9976 = vst [vmem:[#allocation44_spill] sm:$0xff] %v6124_v12  ;;  %v3307_v35 = vmul.f32 %v6119_v50, %v5981_v42  ;;  %v3235_v37 = vmul.f32 %v3219_v54, %v2495_v22  ;;  %v3343_v20 = vmul.f32 %v6124_v12, %v6006_v60 }
  0x6c   :  { %9977 = vst [vmem:[#allocation45_spill] sm:$0xff] %v6130_v41  ;;  %v6134_v58 = vadd.f32 %v2655_v17, %v2619_v31  ;;  %v1223_v33 = vsub.f32 %v5902_v63, %v5886_v56  ;;  %v3271_v40 = vmul.f32 %v3255_v32, %v2583_v26  ;;  %v6142_v42 = vrot.slane %v5965_v34, %v5874_v44 }
  0x6d   :  { %v3323_v53 = vmul.f32 %v3307_v35, %v2583_v26  ;;  %v6146_v1 = vrot.slane %v5970_v39, %v5874_v44  ;;  %v6151_v54 = vrot.slane %v6042_v18, %v5878_v46  ;;  %v6155_v60 = vrot.slane %v6052_v24, %v5878_v46 }
  0x6e   :  { %9978 = vst [vmem:[#allocation46_spill] sm:$0xff] %v6134_v58  ;;  %v3359_v31 = vmul.f32 %v3343_v20, %v6134_v58  ;;  %v6159_v32 = vrot.slane %v6067_v25, %v5880_v49  ;;  %v3287_v21 = vadd.f32 %v3271_v40, %v3235_v37  ;;  %v1459_v17 = vmul.f32 %v6142_v42, %v1063_v59 }
  0x6f   :  { %9979 = vst [vmem:[#allocation47_spill] sm:$0xff] %v6155_v60  ;;  %v1495_v26 = vmul.f32 %v6146_v1, %v1223_v33  ;;  %v6165_v35 = vrot.slane %v6069_v15, %v5880_v49  ;;  %v2339_v12 = vmul.f32 %v6151_v54, %v1063_v59  ;;  %v2375_v50 = vmul.f32 %v6155_v60, %v5993_v52 }
  0x70   :  { %v6167_v20 = vadd.f32 %v3359_v31, %v3323_v53  ;;  %v3131_v23 = vmul.f32 %v6159_v32, %v1063_v59  ;;  %4368 = vmatprep.mubr.f32.mxu1 %v3287_v21  ;;  %v1475_v37 = vmul.f32 %v1459_v17, %v5958_v29  ;;  %v6179_v49 = vrot.slane %v5888_v57, %v5917_v6 }
  0x71   :  { %v1511_v40 = vmul.f32 %v1495_v26, %v5960_v30  ;;  %v3167_v58 = vmul.f32 %v6165_v35, %v6000_v55  ;;  %v2391_v53 = vmul.f32 %v2375_v50, %v1615_v48  ;;  %v6183_v31 = vrot.slane %v5919_v9, %v5917_v6 }
  0x72   :  { %9980 = vst [vmem:[#allocation48_spill] sm:$0xff] %v6167_v20  ;;  %v1207_v59 = vsub.f32 %v5898_v62, %v5886_v56  ;;  %v6189_v21 = vrot.slane %v5965_v34, %v5917_v6  ;;  %vm251_vm7 = vcmp.ge.f32.partialorder %v5886_v56, %v6179_v49  ;;  %v1047_v57 = vsub.f32 %v5886_v56, %v6179_v49 }
  0x73   :  { %9981 = vst [vmem:[#allocation49_spill] sm:$0xff] %v6183_v31  ;;  %v1527_v30 = vadd.f32 %v1511_v40, %v1475_v37  ;;  %v3183_v17 = vmul.f32 %v3167_v58, %v2495_v22  ;;  %v9982_v48 = vmov 0.0   ;;  %v6198_v9 = vrot.slane %v5970_v39, %v5917_v6  ;;  %v4123_v31 = vld [vmem:[#allocation11 + $0x360] sm:$0xff] }
  0x74   :  { %v4935_v55 = vsel %vm251_vm7, 1.0, %v9982_v48  ;;  %v6202_v50 = vrot.slane %v6042_v18, %v5876_v45  ;;  %v6206_v34 = vrot.slane %v6052_v24, %v5876_v45  ;;  %v1371_v26 = vmul.f32 %v6189_v21, %v1047_v57 }
  0x75   :  { %v2355_v22 = vmul.f32 %v2339_v12, %v1527_v30  ;;  %v871_v58 = vsub.f32 %v4935_v55, %v5928_v13  ;;  %v6212_v37 = vrot.slane %v6067_v25, %v5878_v46  ;;  %v1407_v39 = vmul.f32 %v6198_v9, %v1207_v59 }
  0x76   :  { %v2251_v40 = vmul.f32 %v6202_v50, %v1047_v57  ;;  %v2287_v18 = vmul.f32 %v6206_v34, %v1223_v33  ;;  %v6219_v20 = vrot.slane %v6069_v15, %v5878_v46  ;;  %v167_v55 = vadd.f32 1.0, %v6060_v43 }
  0x77   :  { %v2407_v24 = vadd.f32 %v2391_v53, %v2355_v22  ;;  %v1387_v12 = vmul.f32 %v1371_v26, %v871_v58  ;;  %v3043_v13 = vmul.f32 %v6212_v37, %v1047_v57  ;;  %v1423_v45 = vmul.f32 %v1407_v39, %v5958_v29  ;;  %v4141_v58 = vld [vmem:[#allocation11 + $0x3f0] sm:$0xff] }
  0x78   :  { %v2303_v25 = vmul.f32 %v2287_v18, %v1527_v30  ;;  %v3079_v59 = vmul.f32 %v6219_v20, %v5993_v52  ;;  %vm356_vm8 = vcmp.ge.f32.partialorder %v5934_v16, %v5898_v62  ;;  %5580 = vrcp.f32 %v167_v55  ;;  %v4126_v52 = vld [vmem:[#allocation11 + $0x378] sm:$0xff] }
  0x79   :  { %v3147_v33 = vmul.f32 %v3131_v23, %v2407_v24  ;;  %v6229_v46 = vsel %vm356_vm8, 1.0, %v9982_v48  ;;  %vm408_vm9 = vcmp.ge.f32.partialorder %v5934_v16, %v5902_v63  ;;  %v1439_v15 = vadd.f32 %v1423_v45, %v1387_v12 }
  0x7a   :  { %v3095_v53 = vmul.f32 %v3079_v59, %v2407_v24  ;;  %v4984_v43 = vsel %vm408_vm9, 1.0, %v9982_v48  ;;  %vm460_vm10 = vcmp.ge.f32.partialorder %v5934_v16, %v5907_v3  ;;  %vm512_vm11 = vcmp.ge.f32.partialorder %v5934_v16, %v5911_v4  ;;  %v4125_v24 = vld [vmem:[#allocation11 + $0x370] sm:$0xff] }
  0x7b   :  { %v3199_v29 = vadd.f32 %v3183_v17, %v3147_v33  ;;  %v5000_v30 = vsel %vm460_vm10, 1.0, %v9982_v48  ;;  %vm564_vm12 = vcmp.ge.f32.partialorder %v5934_v16, %v5915_v5  ;;  %v2267_v23 = vmul.f32 %v2251_v40, %v1439_v15  ;;  %v4140_v33 = vld [vmem:[#allocation11 + $0x3e8] sm:$0xff] }
  0x7c   :  { %v5016_v57 = vsel %vm512_vm11, 1.0, %v9982_v48  ;;  %v6243_v45 = vsel %vm564_vm12, 1.0, %v9982_v48  ;;  %v6246_v22 = vsub.f32 %v6229_v46, %v4984_v43  ;;  %v920_v17 = vsub.f32 %v4984_v43, %v5000_v30 }
  0x7d   :  { %9983 = vst [vmem:[#allocation50_spill] sm:$0xff] %v6243_v45  ;;  %4369 = vmatmul.mubr.f32.vlgmr.msra.gmra.mxu1 %v3199_v29  ;;  %v936_v26 = vsub.f32 %v5000_v30, %v5016_v57  ;;  %v6249_v39 = vsub.f32 %v5016_v57, %v6243_v45  ;;  %v1080_v18 = vsub.f32 %v5934_v16, %v5898_v62 }
  0x7e   :  { %v2319_v40 = vadd.f32 %v2303_v25, %v2267_v23  ;;  %5368 = vmatpush3.msra.mxu1 %v4126_v52  ;;  %v6255_v12 = vsub.f32 %v5934_v16, %v5902_v63  ;;  %v6259_v55 = vsub.f32 %v5934_v16, %v5907_v3  ;;  %v6263_v59 = vsub.f32 %v5907_v3, %v5934_v16  ;;  %v4124_v52 = vld [vmem:[#allocation11 + $0x368] sm:$0xff] }
  0x7f   :  { %9984 = vst [vmem:[#allocation51_spill] sm:$0xff] %v6249_v39  ;;  %v6267_v15 = vsub.f32 %v5911_v4, %v5934_v16  ;;  %v1272_v25 = vsub.f32 %v5915_v5, %v5934_v16  ;;  %v1548_v43 = vmul.f32 %v6010_v0, %v1080_v18  ;;  %v2428_v29 = vmul.f32 %v6065_v11, %v1080_v18  ;;  %v9987_v11 = vld [vmem:[#allocation39_spill] sm:$0xff] }
  0x80   :  { %9985 = vst [vmem:[#allocation52_spill] sm:$0xff] %v6255_v12  ;;  %9986 = vst [vmem:[#allocation53_spill] sm:$0xff] %v6259_v55  ;;  %5369 = vmatprep.subr.mxu1 %v4141_v58  ;;  %v3059_v30 = vmul.f32 %v3043_v13, %v2319_v40  ;;  %v1584_v23 = vmul.f32 %v6014_v2, %v6263_v59  ;;  %v1636_v57 = vmul.f32 %v6018_v7, %v6255_v12 }
  0x81   :  { %v1724_v45 = vmul.f32 %v6026_v10, %v6259_v55  ;;  %5370 = vmatpush3.msra.mxu1 %v4125_v24  ;;  %v1564_v47 = vmul.f32 %v1548_v43, %v6246_v22  ;;  %v1672_v44 = vmul.f32 %v6022_v8, %v6267_v15  ;;  %v1760_v58 = vmul.f32 %v6032_v14, %v1272_v25  ;;  %v4138_v14 = vld [vmem:[#allocation11 + $0x3d8] sm:$0xff] }
  0x82   :  { %v2464_v13 = vmul.f32 %v6073_v19, %v6267_v15  ;;  %5371 = vmatprep.subr.mxu1 %v4140_v33  ;;  %v3111_v40 = vadd.f32 %v3095_v53, %v3059_v30  ;;  %v1600_v6 = vmul.f32 %v1584_v23, %v920_v17  ;;  %v1652_v51 = vmul.f32 %v1636_v57, %v920_v17 }
  0x83   :  { %v1740_v41 = vmul.f32 %v1724_v45, %v936_v26  ;;  %5372 = vmatpush3.msra.mxu1 %v4124_v52  ;;  %v1688_v55 = vmul.f32 %v1672_v44, %v936_v26  ;;  %v1776_v24 = vmul.f32 %v1760_v58, %v6249_v39  ;;  %v2516_v43 = vmul.f32 %v6077_v36, %v6255_v12  ;;  %v4122_v45 = vld [vmem:[#allocation11 + $0x358] sm:$0xff] }
  0x84   :  { %v2552_v8 = vmul.f32 %v9987_v11, %v1272_v25  ;;  %5373 = vmatprep.subr.mxu1 %v4139_v38  ;;  %4223 = vmatprep.mubr.f32.mxu0 %v3111_v40  ;;  %v1616_v10 = vadd.f32 %v1600_v6, %v1564_v47  ;;  %v3220_v33 = vmul.f32 %v6102_v27, %v1080_v18  ;;  %v4137_v38 = vld [vmem:[#allocation11 + $0x3d0] sm:$0xff] }
  0x85   :  { %v3256_v53 = vmul.f32 %v6106_v28, %v1272_v25  ;;  %vm304_vm13 = vcmp.ge.f32.partialorder %v5934_v16, %v5894_v61  ;;  %v1704_v44 = vadd.f32 %v1688_v55, %v1652_v51  ;;  %v6293_v17 = vadd.f32 %v1776_v24, %v1740_v41  ;;  %5374 = vmatpush3.msra.mxu1 %v4123_v31  ;;  %v5581_v30 = vpop.eup %5580  ;;  %v4094_v41 = vld [vmem:[#allocation11 + $0x278] sm:$0xff]  ;;  %v4109_v40 = vld [vmem:[#allocation11 + $0x2f0] sm:$0xff] }
  0x86   :  { %v4952_v26 = vsel %vm304_vm13, 1.0, %v9982_v48  ;;  %v1064_v52 = vsub.f32 %v5934_v16, %v5894_v61  ;;  %v2444_v6 = vmul.f32 %v2428_v29, %v1616_v10  ;;  %v1224_v18 = vsub.f32 %v5902_v63, %v5934_v16  ;;  %5375 = vmatprep.subr.mxu1 %v4138_v14 }
  0x87   :  { %9988 = vst [vmem:[#allocation39_spill] sm:$0xff] %v6293_v17  ;;  %v888_v47 = vsub.f32 %v4952_v26, %v6229_v46  ;;  %v2376_v25 = vmul.f32 %v6155_v60, %v6263_v59  ;;  %v215_v51 = vmul.f32 %v5581_v30, %v5886_v56  ;;  %v2480_v55 = vmul.f32 %v2464_v13, %v1704_v44 }
  0x88   :  { %v2532_v23 = vmul.f32 %v2516_v43, %v1704_v44  ;;  %v2568_v57 = vmul.f32 %v2552_v8, %v6293_v17  ;;  %5376 = vmatpush3.msra.mxu1 %v4122_v45  ;;  %v1460_v31 = vmul.f32 %v6142_v42, %v1064_v52  ;;  %v1496_v29 = vmul.f32 %v6146_v1, %v1224_v18  ;;  %v4093_v8 = vld [vmem:[#allocation11 + $0x270] sm:$0xff]  ;;  %v4108_v44 = vld [vmem:[#allocation11 + $0x2e8] sm:$0xff] }
  0x89   :  { %v2340_v46 = vmul.f32 %v6151_v54, %v1064_v52  ;;  %v2392_v58 = vmul.f32 %v2376_v25, %v1616_v10  ;;  %5377 = vmatprep.subr.mxu1 %v4137_v38  ;;  %4224 = vmatmul.mubr.f32.vlgmr.msra.gmra.mxu0 %v215_v51  ;;  %v2496_v24 = vadd.f32 %v2480_v55, %v2444_v6  ;;  %v4107_v55 = vld [vmem:[#allocation11 + $0x2e0] sm:$0xff] }
  0x8a   :  { %v6308_v14 = vadd.f32 %v2568_v57, %v2532_v23  ;;  %v3132_v56 = vmul.f32 %v6159_v32, %v1064_v52  ;;  %v3168_v13 = vmul.f32 %v6165_v35, %v6267_v15  ;;  %5288 = vmatpush3.msra.mxu0 %v4094_v41  ;;  %v1476_v43 = vmul.f32 %v1460_v31, %v888_v47  ;;  %v4092_v15 = vld [vmem:[#allocation11 + $0x268] sm:$0xff]  ;;  %v4091_v31 = vld [vmem:[#allocation11 + $0x260] sm:$0xff] }
  0x8b   :  { %v1512_v45 = vmul.f32 %v1496_v29, %v6246_v22  ;;  %vm252_vm14 = vcmp.ge.f32.partialorder %v5934_v16, %v6179_v49  ;;  %v1048_v10 = vsub.f32 %v5934_v16, %v6179_v49  ;;  %v3236_v38 = vmul.f32 %v3220_v33, %v2496_v24  ;;  %5289 = vmatprep.subr.mxu0 %v4109_v40 }
  0x8c   :  { %9989 = vst [vmem:[#allocation54_spill] sm:$0xff] %v6308_v14  ;;  %v3272_v30 = vmul.f32 %v3256_v53, %v6308_v14  ;;  %v3184_v6 = vmul.f32 %v3168_v13, %v2496_v24  ;;  %v4936_v52 = vsel %vm252_vm14, 1.0, %v9982_v48  ;;  %v1208_v22 = vsub.f32 %v5898_v62, %v5934_v16  ;;  %5290 = vmatpush3.msra.mxu0 %v4093_v8  ;;  %v4106_v13 = vld [vmem:[#allocation11 + $0x2d8] sm:$0xff] }
  0x8d   :  { %v1528_v25 = vadd.f32 %v1512_v45, %v1476_v43  ;;  %v872_v51 = vsub.f32 %v4936_v52, %v4952_v26  ;;  %v1372_v41 = vmul.f32 %v6189_v21, %v1048_v10  ;;  %v2252_v57 = vmul.f32 %v6202_v50, %v1048_v10  ;;  %5291 = vmatprep.subr.mxu0 %v4108_v44  ;;  %v9990_v43 = vld [vmem:[#allocation42_spill] sm:$0xff]  ;;  %v4105_v52 = vld [vmem:[#allocation11 + $0x2d0] sm:$0xff] }
  0x8e   :  { %v3288_v23 = vadd.f32 %v3272_v30, %v3236_v38  ;;  %v2288_v33 = vmul.f32 %v6206_v34, %v1224_v18  ;;  %v3044_v53 = vmul.f32 %v6212_v37, %v1048_v10  ;;  %v1408_v26 = vmul.f32 %v6198_v9, %v1208_v22  ;;  %5292 = vmatpush3.msra.mxu0 %v4092_v15  ;;  %v9991_v38 = vld [vmem:[#allocation25_spill] sm:$0xff]  ;;  %v4090_v18 = vld [vmem:[#allocation11 + $0x258] sm:$0xff] }
  0x8f   :  { %v2356_v29 = vmul.f32 %v2340_v46, %v1528_v25  ;;  %v1388_v40 = vmul.f32 %v1372_v41, %v872_v51  ;;  %v3080_v24 = vmul.f32 %v6219_v20, %v6263_v59  ;;  %v168_v45 = vadd.f32 1.0, %v9990_v43  ;;  %5293 = vmatprep.subr.mxu0 %v4107_v55  ;;  %v4121_v46 = vld [vmem:[#allocation11 + $0x350] sm:$0xff]  ;;  %v4104_v41 = vld [vmem:[#allocation11 + $0x2c8] sm:$0xff] }
  0x90   :  { %4373 = vmatprep.mubr.f32.mxu1 %v3288_v23  ;;  %v2304_v8 = vmul.f32 %v2288_v33, %v1528_v25  ;;  %vm357_vm15 = vcmp.ge.f32.partialorder %v9991_v38, %v5898_v62  ;;  %vm409_vm0 = vcmp.ge.f32.partialorder %v9991_v38, %v5902_v63  ;;  %v1424_v44 = vmul.f32 %v1408_v26, %v888_v47  ;;  %v4089_v47 = vld [vmem:[#allocation11 + $0x250] sm:$0xff] }
  0x91   :  { %v2408_v10 = vadd.f32 %v2392_v58, %v2356_v29  ;;  %v6335_v30 = vsel %vm357_vm15, 1.0, %v9982_v48  ;;  %v4985_v59 = vsel %vm409_vm0, 1.0, %v9982_v48  ;;  %5294 = vmatpush3.msra.mxu0 %v4091_v31  ;;  %5378 = vmatpush3.msra.mxu1 %v4121_v46  ;;  %5582 = vrcp.f32 %v168_v45  ;;  %v4136_v58 = vld [vmem:[#allocation11 + $0x3c8] sm:$0xff] }
  0x92   :  { %vm461_vm1 = vcmp.ge.f32.partialorder %v9991_v38, %v5907_v3  ;;  %vm513_vm2 = vcmp.ge.f32.partialorder %v9991_v38, %v5911_v4  ;;  %vm565_vm3 = vcmp.ge.f32.partialorder %v9991_v38, %v5915_v5  ;;  %5295 = vmatprep.subr.mxu0 %v4106_v13  ;;  %v1440_v25 = vadd.f32 %v1424_v44, %v1388_v40 }
  0x93   :  { %v3148_v15 = vmul.f32 %v3132_v56, %v2408_v10  ;;  %v3096_v51 = vmul.f32 %v3080_v24, %v2408_v10  ;;  %v5001_v22 = vsel %vm461_vm1, 1.0, %v9982_v48  ;;  %5296 = vmatpush3.msra.mxu0 %v4090_v18  ;;  %5379 = vmatprep.subr.mxu1 %v4136_v58  ;;  %v5017_v55 = vsel %vm513_vm2, 1.0, %v9982_v48 }
  0x94   :  { %v6347_v23 = vsel %vm565_vm3, 1.0, %v9982_v48  ;;  %v905_v33 = vsub.f32 %v6335_v30, %v4985_v59  ;;  %v921_v31 = vsub.f32 %v4985_v59, %v5001_v22  ;;  %5297 = vmatprep.subr.mxu0 %v4105_v52  ;;  %v2268_v26 = vmul.f32 %v2252_v57, %v1440_v25  ;;  %v9996_v59 = vld [vmem:[#allocation33_spill] sm:$0xff] }
  0x95   :  { %9992 = vst [vmem:[#allocation42_spill] sm:$0xff] %v6347_v23  ;;  %v3200_v29 = vadd.f32 %v3184_v6, %v3148_v15  ;;  %v937_v13 = vsub.f32 %v5001_v22, %v5017_v55  ;;  %v6351_v56 = vsub.f32 %v5017_v55, %v6347_v23  ;;  %5298 = vmatpush3.msra.mxu0 %v4089_v47  ;;  %v9997_v47 = vld [vmem:[#allocation32_spill] sm:$0xff]  ;;  %v9998_v15 = vld [vmem:[#allocation34_spill] sm:$0xff]  ;;  %v9999_v22 = vld [vmem:[#allocation37_spill] sm:$0xff] }
  0x96   :  { %v1081_v40 = vsub.f32 %v9991_v38, %v5898_v62  ;;  %v6357_v24 = vsub.f32 %v9991_v38, %v5902_v63  ;;  %v6361_v43 = vsub.f32 %v9991_v38, %v5907_v3  ;;  %v6365_v6 = vsub.f32 %v5907_v3, %v9991_v38  ;;  %5299 = vmatprep.subr.mxu0 %v4104_v41 }
  0x97   :  { %9993 = vst [vmem:[#allocation25_spill] sm:$0xff] %v6351_v56  ;;  %4374 = vmatmul.mubr.f32.gmra.mxu1 %v3200_v29  ;;  %v2320_v57 = vadd.f32 %v2304_v8, %v2268_v26  ;;  %v1257_v45 = vsub.f32 %v5911_v4, %v9991_v38  ;;  %v1273_v18 = vsub.f32 %v5915_v5, %v9991_v38 }
  0x98   :  { %9994 = vst [vmem:[#allocation55_spill] sm:$0xff] %v6357_v24  ;;  %9995 = vst [vmem:[#allocation56_spill] sm:$0xff] %v6361_v43  ;;  %vm305_vm4 = vcmp.ge.f32.partialorder %v9991_v38, %v5894_v61  ;;  %v1549_v46 = vmul.f32 %v6010_v0, %v1081_v40  ;;  %v1585_v10 = vmul.f32 %v6014_v2, %v6365_v6 }
  0x99   :  { %v1637_v44 = vmul.f32 %v6018_v7, %v6357_v24  ;;  %v1725_v8 = vmul.f32 %v9996_v59, %v6361_v43  ;;  %v3060_v52 = vmul.f32 %v3044_v53, %v2320_v57  ;;  %v1673_v58 = vmul.f32 %v9997_v47, %v1257_v45 }
  0x9a   :  { %v1761_v25 = vmul.f32 %v9998_v15, %v1273_v18  ;;  %v2429_v41 = vmul.f32 %v9999_v22, %v1081_v40  ;;  %v1565_v55 = vmul.f32 %v1549_v46, %v905_v33  ;;  %v1601_v29 = vmul.f32 %v1585_v10, %v921_v31 }
  0x9b   :  { %v1653_v26 = vmul.f32 %v1637_v44, %v921_v31  ;;  %v1741_v23 = vmul.f32 %v1725_v8, %v937_v13  ;;  %v3112_v14 = vadd.f32 %v3096_v51, %v3060_v52  ;;  %v1689_v17 = vmul.f32 %v1673_v58, %v937_v13 }
  0x9c   :  { %v1777_v12 = vmul.f32 %v1761_v25, %v6351_v56  ;;  %v2465_v39 = vmul.f32 %v6073_v19, %v1257_v45  ;;  %v1617_v7 = vadd.f32 %v1601_v29, %v1565_v55  ;;  %v2517_v53 = vmul.f32 %v6077_v36, %v6357_v24 }
  0x9d   :  { %v2553_v57 = vmul.f32 %v9987_v11, %v1273_v18  ;;  %v3221_v43 = vmul.f32 %v6102_v27, %v1081_v40  ;;  %4228 = vmatprep.mubr.f32.mxu0 %v3112_v14  ;;  %v1705_v22 = vadd.f32 %v1689_v17, %v1653_v26  ;;  %v3257_v31 = vmul.f32 %v6106_v28, %v1273_v18 }
  0x9e   :  { %v6389_v46 = vadd.f32 %v1777_v12, %v1741_v23  ;;  %v4953_v51 = vsel %vm305_vm4, 1.0, %v9982_v48  ;;  %v2445_v13 = vmul.f32 %v2429_v41, %v1617_v7  ;;  %v1065_v44 = vsub.f32 %v9991_v38, %v5894_v61  ;;  %v5583_v14 = vpop.eup %5582 }
  0x9f   :  { %v889_v10 = vsub.f32 %v4953_v51, %v6335_v30  ;;  %v1225_v40 = vsub.f32 %v5902_v63, %v9991_v38  ;;  %v2481_v17 = vmul.f32 %v2465_v39, %v1705_v22  ;;  %v2533_v12 = vmul.f32 %v2517_v53, %v1705_v22 }
  0xa0   :  { %10000 = vst [vmem:[#allocation33_spill] sm:$0xff] %v6389_v46  ;;  %v2569_v23 = vmul.f32 %v2553_v57, %v6389_v46  ;;  %v2377_v18 = vmul.f32 %v6155_v60, %v6365_v6  ;;  %v216_v8 = vmul.f32 %v5583_v14, %v5934_v16  ;;  %v1461_v52 = vmul.f32 %v6142_v42, %v1065_v44 }
  0xa1   :  { %v1497_v30 = vmul.f32 %v6146_v1, %v1225_v40  ;;  %v2341_v58 = vmul.f32 %v6151_v54, %v1065_v44  ;;  %v2497_v25 = vadd.f32 %v2481_v17, %v2445_v13  ;;  %v3133_v39 = vmul.f32 %v6159_v32, %v1065_v44 }
  0xa2   :  { %v6408_v41 = vadd.f32 %v2569_v23, %v2533_v12  ;;  %v2393_v55 = vmul.f32 %v2377_v18, %v1617_v7  ;;  %4229 = vmatmul.mubr.f32.gmra.mxu0 %v216_v8  ;;  %v1477_v22 = vmul.f32 %v1461_v52, %v889_v10  ;;  %v3169_v26 = vmul.f32 %v6165_v35, %v1257_v45  ;;  %v6427_v52 = vld [vmem:[#allocation3 + $0x18] sm:$0xff] }
  0xa3   :  { %v1513_v29 = vmul.f32 %v1497_v30, %v905_v33  ;;  %vm253_vm5 = vcmp.ge.f32.partialorder %v9991_v38, %v6179_v49  ;;  %v3237_v16 = vmul.f32 %v3221_v43, %v2497_v25  ;;  %v1049_v13 = vsub.f32 %v9991_v38, %v6179_v49  ;;  %v10002_v30 = vld [vmem:[#allocation30_spill] sm:$0xff] }
  0xa4   :  { %10001 = vst [vmem:[#allocation32_spill] sm:$0xff] %v6408_v41  ;;  %v3273_v53 = vmul.f32 %v3257_v31, %v6408_v41  ;;  %v4937_v57 = vsel %vm253_vm5, 1.0, %v9982_v48  ;;  %v3185_v7 = vmul.f32 %v3169_v26, %v2497_v25  ;;  %v1209_v44 = vsub.f32 %v5898_v62, %v9991_v38  ;;  %v4088_v25 = vld [vmem:[#allocation11 + $0x248] sm:$0xff] }
  0xa5   :  { %v1529_v14 = vadd.f32 %v1513_v29, %v1477_v22  ;;  %v873_v17 = vsub.f32 %v4937_v57, %v4953_v51  ;;  %v1373_v45 = vmul.f32 %v6189_v21, %v1049_v13  ;;  %v2253_v12 = vmul.f32 %v6202_v50, %v1049_v13  ;;  %5300 = vmatpush3.msra.mxu0 %v4088_v25  ;;  %v4135_v57 = vld [vmem:[#allocation11 + $0x3c0] sm:$0xff] }
  0xa6   :  { %v3289_v33 = vadd.f32 %v3273_v53, %v3237_v16  ;;  %v2289_v43 = vmul.f32 %v6206_v34, %v1225_v40  ;;  %v1409_v31 = vmul.f32 %v6198_v9, %v1209_v44  ;;  %v3045_v18 = vmul.f32 %v6212_v37, %v1049_v13  ;;  %v4120_v40 = vld [vmem:[#allocation11 + $0x348] sm:$0xff]  ;;  %v4103_v53 = vld [vmem:[#allocation11 + $0x2c0] sm:$0xff] }
  0xa7   :  { %v2357_v23 = vmul.f32 %v2341_v58, %v1529_v14  ;;  %v3081_v8 = vmul.f32 %v6219_v20, %v6365_v6  ;;  %v1389_v51 = vmul.f32 %v1373_v45, %v873_v17  ;;  %5584 = vpow2.f32 %v10002_v30  ;;  %5380 = vmatpush3.msra.mxu1 %v4120_v40  ;;  %5301 = vmatprep.subr.mxu0 %v4103_v53 }
  0xa8   :  { %4378 = vmatprep.mubr.f32.mxu1 %v3289_v33  ;;  %v2305_v38 = vmul.f32 %v2289_v43, %v1529_v14  ;;  %vm358_vm6 = vcmp.ge.f32.partialorder %v6427_v52, %v5898_v62  ;;  %v1425_v22 = vmul.f32 %v1409_v31, %v889_v10  ;;  %vm410_vm7 = vcmp.ge.f32.partialorder %v6427_v52, %v5902_v63 }
  0xa9   :  { %v2409_v58 = vadd.f32 %v2393_v55, %v2357_v23  ;;  %v4970_v29 = vsel %vm358_vm6, 1.0, %v9982_v48  ;;  %v4986_v6 = vsel %vm410_vm7, 1.0, %v9982_v48  ;;  %vm462_vm8 = vcmp.ge.f32.partialorder %v6427_v52, %v5907_v3  ;;  %5381 = vmatprep.subr.mxu1 %v4135_v57 }
  0xaa   :  { %vm514_vm9 = vcmp.ge.f32.partialorder %v6427_v52, %v5911_v4  ;;  %vm566_vm10 = vcmp.ge.f32.partialorder %v6427_v52, %v5915_v5  ;;  %v1441_v10 = vadd.f32 %v1425_v22, %v1389_v51  ;;  %v5002_v16 = vsel %vm462_vm8, 1.0, %v9982_v48 }
  0xab   :  { %v3149_v55 = vmul.f32 %v3133_v39, %v2409_v58  ;;  %v3097_v26 = vmul.f32 %v3081_v8, %v2409_v58  ;;  %v5018_v13 = vsel %vm514_vm9, 1.0, %v9982_v48  ;;  %v6445_v14 = vsel %vm566_vm10, 1.0, %v9982_v48  ;;  %v10007_v58 = vld [vmem:[#allocation31_spill] sm:$0xff] }
  0xac   :  { %10003 = vst [vmem:[#allocation30_spill] sm:$0xff] %v6445_v14  ;;  %v6447_v17 = vsub.f32 %v4970_v29, %v4986_v6  ;;  %v922_v44 = vsub.f32 %v4986_v6, %v5002_v16  ;;  %v2269_v45 = vmul.f32 %v2253_v12, %v1441_v10  ;;  %v938_v43 = vsub.f32 %v5002_v16, %v5018_v13  ;;  %v10008_v16 = vld [vmem:[#allocation37_spill] sm:$0xff] }
  0xad   :  { %v3201_v33 = vadd.f32 %v3185_v7, %v3149_v55  ;;  %v6450_v39 = vsub.f32 %v5018_v13, %v6445_v14  ;;  %v1082_v23 = vsub.f32 %v6427_v52, %v5898_v62  ;;  %v6456_v31 = vsub.f32 %v6427_v52, %v5902_v63 }
  0xae   :  { %v6460_v8 = vsub.f32 %v6427_v52, %v5907_v3  ;;  %v6464_v51 = vsub.f32 %v5907_v3, %v6427_v52  ;;  %v2321_v7 = vadd.f32 %v2305_v38, %v2269_v45  ;;  %v1258_v12 = vsub.f32 %v5911_v4, %v6427_v52 }
  0xaf   :  { %10004 = vst [vmem:[#allocation57_spill] sm:$0xff] %v6450_v39  ;;  %10005 = vst [vmem:[#allocation58_spill] sm:$0xff] %v6456_v31  ;;  %4379 = vmatmul.mubr.f32.gmra.mxu1 %v3201_v33  ;;  %v1274_v30 = vsub.f32 %v5915_v5, %v6427_v52  ;;  %vm306_vm11 = vcmp.ge.f32.partialorder %v6427_v52, %v5894_v61  ;;  %v1550_v25 = vmul.f32 %v6010_v0, %v1082_v23 }
  0xb0   :  { %10006 = vst [vmem:[#allocation59_spill] sm:$0xff] %v6460_v8  ;;  %v1586_v40 = vmul.f32 %v6014_v2, %v6464_v51  ;;  %v1638_v22 = vmul.f32 %v10007_v58, %v6456_v31  ;;  %v1726_v38 = vmul.f32 %v9996_v59, %v6460_v8  ;;  %v3061_v6 = vmul.f32 %v3045_v18, %v2321_v7 }
  0xb1   :  { %v1674_v55 = vmul.f32 %v9997_v47, %v1258_v12  ;;  %v1762_v10 = vmul.f32 %v9998_v15, %v1274_v30  ;;  %v2430_v53 = vmul.f32 %v10008_v16, %v1082_v23  ;;  %v1566_v57 = vmul.f32 %v1550_v25, %v6447_v17 }
  0xb2   :  { %v1602_v13 = vmul.f32 %v1586_v40, %v922_v44  ;;  %v1654_v33 = vmul.f32 %v1638_v22, %v922_v44  ;;  %v1742_v45 = vmul.f32 %v1726_v38, %v938_v43  ;;  %v3113_v14 = vadd.f32 %v3097_v26, %v3061_v6 }
  0xb3   :  { %v1690_v41 = vmul.f32 %v1674_v55, %v938_v43  ;;  %v1778_v24 = vmul.f32 %v1762_v10, %v6450_v39  ;;  %v2466_v46 = vmul.f32 %v6073_v19, %v1258_v12  ;;  %v2518_v18 = vmul.f32 %v6077_v36, %v6456_v31 }
  0xb4   :  { %v1618_v56 = vadd.f32 %v1602_v13, %v1566_v57  ;;  %v2554_v7 = vmul.f32 %v9987_v11, %v1274_v30  ;;  %v3222_v8 = vmul.f32 %v6102_v27, %v1082_v23  ;;  %v5585_v15 = vpop.eup %5584  ;;  %4233 = vmatprep.mubr.f32.mxu0 %v3113_v14  ;;  %v3258_v26 = vmul.f32 %v6106_v28, %v1274_v30 }
  0xb5   :  { %v1706_v25 = vadd.f32 %v1690_v41, %v1654_v33  ;;  %v6489_v40 = vadd.f32 %v1778_v24, %v1742_v45  ;;  %v4954_v44 = vsel %vm306_vm11, 1.0, %v9982_v48  ;;  %v169_v43 = vadd.f32 1.0, %v5585_v15 }
  0xb6   :  { %v2446_v22 = vmul.f32 %v2430_v53, %v1618_v56  ;;  %v890_v38 = vsub.f32 %v4954_v44, %v4970_v29  ;;  %v1066_v6 = vsub.f32 %v6427_v52, %v5894_v61  ;;  %v1226_v24 = vsub.f32 %v5902_v63, %v6427_v52 }
  0xb7   :  { %10009 = vst [vmem:[#allocation31_spill] sm:$0xff] %v6489_v40  ;;  %v2482_v55 = vmul.f32 %v2466_v46, %v1706_v25  ;;  %v2534_v23 = vmul.f32 %v2518_v18, %v1706_v25  ;;  %v2570_v14 = vmul.f32 %v2554_v7, %v6489_v40  ;;  %5586 = vrcp.f32 %v169_v43 }
  0xb8   :  { %v1462_v41 = vmul.f32 %v6142_v42, %v1066_v6  ;;  %v2342_v30 = vmul.f32 %v6151_v54, %v1066_v6  ;;  %v2378_v15 = vmul.f32 %v6155_v60, %v6464_v51  ;;  %v1498_v53 = vmul.f32 %v6146_v1, %v1226_v24 }
  0xb9   :  { %v2498_v10 = vadd.f32 %v2482_v55, %v2446_v22  ;;  %v6505_v29 = vadd.f32 %v2570_v14, %v2534_v23  ;;  %v3134_v46 = vmul.f32 %v6159_v32, %v1066_v6  ;;  %v3170_v33 = vmul.f32 %v6165_v35, %v1258_v12 }
  0xba   :  { %v1478_v57 = vmul.f32 %v1462_v41, %v890_v38  ;;  %v2394_v13 = vmul.f32 %v2378_v15, %v1618_v56  ;;  %vm254_vm12 = vcmp.ge.f32.partialorder %v6427_v52, %v6179_v49  ;;  %v1514_v7 = vmul.f32 %v1498_v53, %v6447_v17  ;;  %v6526_v41 = vld [vmem:[#allocation3 + $0x20] sm:$0xff] }
  0xbb   :  { %10010 = vst [vmem:[#allocation60_spill] sm:$0xff] %v6505_v29  ;;  %v3238_v45 = vmul.f32 %v3222_v8, %v2498_v10  ;;  %v3274_v18 = vmul.f32 %v3258_v26, %v6505_v29  ;;  %v4938_v25 = vsel %vm254_vm12, 1.0, %v9982_v48  ;;  %v3186_v43 = vmul.f32 %v3170_v33, %v2498_v10  ;;  %v4087_v33 = vld [vmem:[#allocation11 + $0x240] sm:$0xff] }
  0xbc   :  { %v874_v22 = vsub.f32 %v4938_v25, %v4954_v44  ;;  %v1050_v55 = vsub.f32 %v6427_v52, %v6179_v49  ;;  %v1210_v56 = vsub.f32 %v5898_v62, %v6427_v52  ;;  %v1530_v12 = vadd.f32 %v1514_v7, %v1478_v57  ;;  %5302 = vmatpush3.msra.mxu0 %v4087_v33  ;;  %v4102_v25 = vld [vmem:[#allocation11 + $0x2b8] sm:$0xff] }
  0xbd   :  { %v3290_v6 = vadd.f32 %v3274_v18, %v3238_v45  ;;  %v2290_v23 = vmul.f32 %v6206_v34, %v1226_v24  ;;  %v3082_v8 = vmul.f32 %v6219_v20, %v6464_v51  ;;  %v4922_v53 = vmul.f32 -1.442695, %v6427_v52  ;;  %v4119_v45 = vld [vmem:[#allocation11 + $0x340] sm:$0xff]  ;;  %5303 = vmatprep.subr.mxu0 %v4102_v25 }
  0xbe   :  { %v1374_v26 = vmul.f32 %v6189_v21, %v1050_v55  ;;  %v1410_v17 = vmul.f32 %v6198_v9, %v1210_v56  ;;  %v2254_v14 = vmul.f32 %v6202_v50, %v1050_v55  ;;  %v3046_v44 = vmul.f32 %v6212_v37, %v1050_v55  ;;  %5382 = vmatpush3.msra.mxu1 %v4119_v45 }
  0xbf   :  { %4383 = vmatprep.mubr.f32.mxu1 %v3290_v6  ;;  %v2358_v15 = vmul.f32 %v2342_v30, %v1530_v12  ;;  %v2306_v10 = vmul.f32 %v2290_v23, %v1530_v12  ;;  %vm359_vm13 = vcmp.ge.f32.partialorder %v6526_v41, %v5898_v62  ;;  %vm411_vm14 = vcmp.ge.f32.partialorder %v6526_v41, %v5902_v63 }
  0xc0   :  { %v1390_v24 = vmul.f32 %v1374_v26, %v874_v22  ;;  %v1426_v51 = vmul.f32 %v1410_v17, %v890_v38  ;;  %v6532_v57 = vsel %vm359_vm13, 1.0, %v9982_v48  ;;  %5588 = vpow2.f32 %v4922_v53  ;;  %v4134_v22 = vld [vmem:[#allocation11 + $0x3b8] sm:$0xff] }
  0xc1   :  { %v2410_v18 = vadd.f32 %v2394_v13, %v2358_v15  ;;  %v4987_v30 = vsel %vm411_vm14, 1.0, %v9982_v48  ;;  %vm463_vm15 = vcmp.ge.f32.partialorder %v6526_v41, %v5907_v3  ;;  %vm515_vm0 = vcmp.ge.f32.partialorder %v6526_v41, %v5911_v4  ;;  %5383 = vmatprep.subr.mxu1 %v4134_v22 }
  0xc2   :  { %v1442_v7 = vadd.f32 %v1426_v51, %v1390_v24  ;;  %v5003_v38 = vsel %vm463_vm15, 1.0, %v9982_v48  ;;  %vm567_vm1 = vcmp.ge.f32.partialorder %v6526_v41, %v5915_v5  ;;  %v5019_v56 = vsel %vm515_vm0, 1.0, %v9982_v48  ;;  %v5640_v51 = vld [vmem:[#allocation3 + $0x10] sm:$0xff] }
  0xc3   :  { %v3150_v13 = vmul.f32 %v3134_v46, %v2410_v18  ;;  %v3098_v55 = vmul.f32 %v3082_v8, %v2410_v18  ;;  %v6546_v6 = vsel %vm567_vm1, 1.0, %v9982_v48  ;;  %v907_v23 = vsub.f32 %v6532_v57, %v4987_v30 }
  0xc4   :  { %10011 = vst [vmem:[#allocation61_spill] sm:$0xff] %v6546_v6  ;;  %v2270_v12 = vmul.f32 %v2254_v14, %v1442_v7  ;;  %v923_v26 = vsub.f32 %v4987_v30, %v5003_v38  ;;  %v939_v17 = vsub.f32 %v5003_v38, %v5019_v56  ;;  %v5587_v15 = vpop.eup %5586  ;;  %v6550_v24 = vsub.f32 %v5019_v56, %v6546_v6 }
  0xc5   :  { %v3202_v53 = vadd.f32 %v3186_v43, %v3150_v13  ;;  %v1083_v46 = vsub.f32 %v6526_v41, %v5898_v62  ;;  %v6556_v8 = vsub.f32 %v6526_v41, %v5902_v63  ;;  %v217_v33 = vmul.f32 %v5640_v51, %v5587_v15 }
  0xc6   :  { %10012 = vst [vmem:[#allocation62_spill] sm:$0xff] %v6550_v24  ;;  %v2322_v45 = vadd.f32 %v2306_v10, %v2270_v12  ;;  %v6560_v14 = vsub.f32 %v6526_v41, %v5907_v3  ;;  %v6564_v43 = vsub.f32 %v5907_v3, %v6526_v41  ;;  %v1259_v18 = vsub.f32 %v5911_v4, %v6526_v41 }
  0xc7   :  { %10013 = vst [vmem:[#allocation63_spill] sm:$0xff] %v6556_v8  ;;  %4384 = vmatmul.mubr.f32.gmra.mxu1 %v3202_v53  ;;  %v1275_v30 = vsub.f32 %v5915_v5, %v6526_v41  ;;  %v1551_v7 = vmul.f32 %v6010_v0, %v1083_v46  ;;  %v1639_v10 = vmul.f32 %v10007_v58, %v6556_v8  ;;  %v10015_v53 = vld [vmem:[#allocation34_spill] sm:$0xff] }
  0xc8   :  { %10014 = vst [vmem:[#allocation64_spill] sm:$0xff] %v6560_v14  ;;  %4234 = vmatmul.mubr.f32.gmra.mxu0 %v217_v33  ;;  %v3062_v38 = vmul.f32 %v3046_v44, %v2322_v45  ;;  %v1587_v25 = vmul.f32 %v6014_v2, %v6564_v43  ;;  %v1727_v22 = vmul.f32 %v9996_v59, %v6560_v14 }
  0xc9   :  { %v2431_v13 = vmul.f32 %v10008_v16, %v1083_v46  ;;  %v1567_v56 = vmul.f32 %v1551_v7, %v907_v23  ;;  %v1655_v12 = vmul.f32 %v1639_v10, %v923_v26  ;;  %v1675_v15 = vmul.f32 %v9997_v47, %v1259_v18 }
  0xca   :  { %v1763_v51 = vmul.f32 %v10015_v53, %v1275_v30  ;;  %v3114_v6 = vadd.f32 %v3098_v55, %v3062_v38  ;;  %v1603_v29 = vmul.f32 %v1587_v25, %v923_v26  ;;  %v1743_v31 = vmul.f32 %v1727_v22, %v939_v17 }
  0xcb   :  { %v2467_v33 = vmul.f32 %v6073_v19, %v1259_v18  ;;  %v1691_v44 = vmul.f32 %v1675_v15, %v939_v17  ;;  %v2519_v40 = vmul.f32 %v6077_v36, %v6556_v8  ;;  %v2555_v14 = vmul.f32 %v9987_v11, %v1275_v30 }
  0xcc   :  { %v1779_v45 = vmul.f32 %v1763_v51, %v6550_v24  ;;  %4238 = vmatprep.mubr.f32.mxu0 %v3114_v6  ;;  %v1619_v7 = vadd.f32 %v1603_v29, %v1567_v56  ;;  %v3223_v10 = vmul.f32 %v6102_v27, %v1083_v46  ;;  %v3259_v39 = vmul.f32 %v6106_v28, %v1275_v30 }
  0xcd   :  { %vm307_vm2 = vcmp.ge.f32.partialorder %v6526_v41, %v5894_v61  ;;  %v1707_v55 = vadd.f32 %v1691_v44, %v1655_v12  ;;  %v1067_v38 = vsub.f32 %v6526_v41, %v5894_v61  ;;  %v5589_v25 = vpop.eup %5588  ;;  %v1227_v29 = vsub.f32 %v5902_v63, %v6526_v41 }
  0xce   :  { %v6589_v26 = vadd.f32 %v1779_v45, %v1743_v31  ;;  %v4955_v17 = vsel %vm307_vm2, 1.0, %v9982_v48  ;;  %v2447_v22 = vmul.f32 %v2431_v13, %v1619_v7  ;;  %v2379_v46 = vmul.f32 %v6155_v60, %v6564_v43 }
  0xcf   :  { %v891_v6 = vsub.f32 %v4955_v17, %v6532_v57  ;;  %v170_v30 = vadd.f32 1.0, %v5589_v25  ;;  %v2483_v56 = vmul.f32 %v2467_v33, %v1707_v55  ;;  %v2535_v12 = vmul.f32 %v2519_v40, %v1707_v55 }
  0xd0   :  { %10016 = vst [vmem:[#allocation34_spill] sm:$0xff] %v6589_v26  ;;  %v2571_v31 = vmul.f32 %v2555_v14, %v6589_v26  ;;  %v1463_v15 = vmul.f32 %v6142_v42, %v1067_v38  ;;  %v1499_v51 = vmul.f32 %v6146_v1, %v1227_v29  ;;  %v2343_v44 = vmul.f32 %v6151_v54, %v1067_v38 }
  0xd1   :  { %v2395_v13 = vmul.f32 %v2379_v46, %v1619_v7  ;;  %5590 = vrcp.f32 %v170_v30  ;;  %v2499_v57 = vadd.f32 %v2483_v56, %v2447_v22  ;;  %v3135_v8 = vmul.f32 %v6159_v32, %v1067_v38 }
  0xd2   :  { %v6603_v45 = vadd.f32 %v2571_v31, %v2535_v12  ;;  %v1479_v24 = vmul.f32 %v1463_v15, %v891_v6  ;;  %v1515_v60 = vmul.f32 %v1499_v51, %v907_v23  ;;  %v3171_v33 = vmul.f32 %v6165_v35, %v1259_v18 }
  0xd3   :  { %vm255_vm3 = vcmp.ge.f32.partialorder %v6526_v41, %v6179_v49  ;;  %v3239_v40 = vmul.f32 %v3223_v10, %v2499_v57  ;;  %v1051_v7 = vsub.f32 %v6526_v41, %v6179_v49  ;;  %v1211_v38 = vsub.f32 %v5898_v62, %v6526_v41 }
  0xd4   :  { %10017 = vst [vmem:[#allocation65_spill] sm:$0xff] %v6603_v45  ;;  %v3275_v14 = vmul.f32 %v3259_v39, %v6603_v45  ;;  %v4939_v55 = vsel %vm255_vm3, 1.0, %v9982_v48  ;;  %v1531_v25 = vadd.f32 %v1515_v60, %v1479_v24  ;;  %v3187_v22 = vmul.f32 %v3171_v33, %v2499_v57  ;;  %v6622_v24 = vld [vmem:[#allocation3 + $0x28] sm:$0xff] }
  0xd5   :  { %v875_v46 = vsub.f32 %v4939_v55, %v4955_v17  ;;  %v1375_v18 = vmul.f32 %v6189_v21, %v1051_v7  ;;  %v2255_v30 = vmul.f32 %v6202_v50, %v1051_v7  ;;  %v2291_v10 = vmul.f32 %v6206_v34, %v1227_v29  ;;  %v4086_v57 = vld [vmem:[#allocation11 + $0x238] sm:$0xff]  ;;  %v4101_v55 = vld [vmem:[#allocation11 + $0x2b0] sm:$0xff] }
  0xd6   :  { %v3291_v23 = vadd.f32 %v3275_v14, %v3239_v40  ;;  %v2359_v56 = vmul.f32 %v2343_v44, %v1531_v25  ;;  %v1411_v39 = vmul.f32 %v6198_v9, %v1211_v38  ;;  %v3047_v12 = vmul.f32 %v6212_v37, %v1051_v7  ;;  %5304 = vmatpush3.msra.mxu0 %v4086_v57  ;;  %v4133_v7 = vld [vmem:[#allocation11 + $0x3b0] sm:$0xff] }
  0xd7   :  { %v3083_v60 = vmul.f32 %v6219_v20, %v6564_v43  ;;  %v1391_v17 = vmul.f32 %v1375_v18, %v875_v46  ;;  %v2307_v31 = vmul.f32 %v2291_v10, %v1531_v25  ;;  %v4923_v15 = vmul.f32 -1.442695, %v6526_v41  ;;  %v4118_v43 = vld [vmem:[#allocation11 + $0x338] sm:$0xff]  ;;  %5305 = vmatprep.subr.mxu0 %v4101_v55 }
  0xd8   :  { %4388 = vmatprep.mubr.f32.mxu1 %v3291_v23  ;;  %vm360_vm4 = vcmp.ge.f32.partialorder %v6622_v24, %v5898_v62  ;;  %v2411_v51 = vadd.f32 %v2395_v13, %v2359_v56  ;;  %v1427_v29 = vmul.f32 %v1411_v39, %v891_v6  ;;  %vm412_vm5 = vcmp.ge.f32.partialorder %v6622_v24, %v5902_v63 }
  0xd9   :  { %v6628_v44 = vsel %vm360_vm4, 1.0, %v9982_v48  ;;  %5592 = vpow2.f32 %v4923_v15  ;;  %v4988_v33 = vsel %vm412_vm5, 1.0, %v9982_v48  ;;  %vm464_vm6 = vcmp.ge.f32.partialorder %v6622_v24, %v5907_v3  ;;  %5384 = vmatpush3.msra.mxu1 %v4118_v43 }
  0xda   :  { %vm516_vm7 = vcmp.ge.f32.partialorder %v6622_v24, %v5911_v4  ;;  %v3151_v6 = vmul.f32 %v3135_v8, %v2411_v51  ;;  %v1443_v13 = vadd.f32 %v1427_v29, %v1391_v17  ;;  %v3099_v40 = vmul.f32 %v3083_v60, %v2411_v51  ;;  %5385 = vmatprep.subr.mxu1 %v4133_v7 }
  0xdb   :  { %v5004_v14 = vsel %vm464_vm6, 1.0, %v9982_v48  ;;  %v5020_v25 = vsel %vm516_vm7, 1.0, %v9982_v48  ;;  %vm568_vm8 = vcmp.ge.f32.partialorder %v6622_v24, %v5915_v5  ;;  %v908_v46 = vsub.f32 %v6628_v44, %v4988_v33 }
  0xdc   :  { %v924_v38 = vsub.f32 %v4988_v33, %v5004_v14  ;;  %v3203_v23 = vadd.f32 %v3187_v22, %v3151_v6  ;;  %v2271_v18 = vmul.f32 %v2255_v30, %v1443_v13  ;;  %v6643_v8 = vsel %vm568_vm8, 1.0, %v9982_v48 }
  0xdd   :  { %10018 = vst [vmem:[#allocation66_spill] sm:$0xff] %v6643_v8  ;;  %v940_v10 = vsub.f32 %v5004_v14, %v5020_v25  ;;  %v6646_v56 = vsub.f32 %v5020_v25, %v6643_v8  ;;  %v1084_v39 = vsub.f32 %v6622_v24, %v5898_v62  ;;  %v6652_v60 = vsub.f32 %v6622_v24, %v5902_v63 }
  0xde   :  { %v6656_v17 = vsub.f32 %v6622_v24, %v5907_v3  ;;  %v5591_v22 = vpop.eup %5590  ;;  %4389 = vmatmul.mubr.f32.gmra.mxu1 %v3203_v23  ;;  %v2323_v30 = vadd.f32 %v2307_v31, %v2271_v18  ;;  %v6660_v15 = vsub.f32 %v5907_v3, %v6622_v24  ;;  %v1260_v51 = vsub.f32 %v5911_v4, %v6622_v24 }
  0xdf   :  { %10019 = vst [vmem:[#allocation67_spill] sm:$0xff] %v6646_v56  ;;  %10020 = vst [vmem:[#allocation68_spill] sm:$0xff] %v6652_v60  ;;  %v1276_v29 = vsub.f32 %v5915_v5, %v6622_v24  ;;  %v218_v57 = vmul.f32 %v5591_v22, %v6427_v52  ;;  %v1552_v43 = vmul.f32 %v6010_v0, %v1084_v39 }
  0xe0   :  { %10021 = vst [vmem:[#allocation69_spill] sm:$0xff] %v6656_v17  ;;  %v1640_v33 = vmul.f32 %v10007_v58, %v6652_v60  ;;  %v1728_v31 = vmul.f32 %v9996_v59, %v6656_v17  ;;  %v3063_v6 = vmul.f32 %v3047_v12, %v2323_v30  ;;  %v1588_v13 = vmul.f32 %v6014_v2, %v6660_v15 }
  0xe1   :  { %v1676_v14 = vmul.f32 %v9997_v47, %v1260_v51  ;;  %v1764_v55 = vmul.f32 %v10015_v53, %v1276_v29  ;;  %4239 = vmatmul.mubr.f32.gmra.mxu0 %v218_v57  ;;  %v1568_v7 = vmul.f32 %v1552_v43, %v908_v46  ;;  %v2432_v23 = vmul.f32 %v10008_v16, %v1084_v39 }
  0xe2   :  { %v1656_v25 = vmul.f32 %v1640_v33, %v924_v38  ;;  %v1744_v52 = vmul.f32 %v1728_v31, %v940_v10  ;;  %v3115_v18 = vadd.f32 %v3099_v40, %v3063_v6  ;;  %v1604_v22 = vmul.f32 %v1588_v13, %v924_v38  ;;  %v10023_v31 = vld [vmem:[#allocation47_spill] sm:$0xff] }
  0xe3   :  { %v1692_v8 = vmul.f32 %v1676_v14, %v940_v10  ;;  %v1780_v45 = vmul.f32 %v1764_v55, %v6646_v56  ;;  %v2468_v12 = vmul.f32 %v6073_v19, %v1260_v51  ;;  %v2520_v30 = vmul.f32 %v6077_v36, %v6652_v60 }
  0xe4   :  { %v2556_v17 = vmul.f32 %v9987_v11, %v1276_v29  ;;  %v3224_v26 = vmul.f32 %v6102_v27, %v1084_v39  ;;  %4243 = vmatprep.mubr.f32.mxu0 %v3115_v18  ;;  %v1620_v57 = vadd.f32 %v1604_v22, %v1568_v7  ;;  %v3260_v40 = vmul.f32 %v6106_v28, %v1276_v29 }
  0xe5   :  { %v1708_v43 = vadd.f32 %v1692_v8, %v1656_v25  ;;  %v6683_v33 = vadd.f32 %v1780_v45, %v1744_v52  ;;  %vm308_vm9 = vcmp.ge.f32.partialorder %v6622_v24, %v5894_v61  ;;  %v1068_v38 = vsub.f32 %v6622_v24, %v5894_v61 }
  0xe6   :  { %v1228_v10 = vsub.f32 %v5902_v63, %v6622_v24  ;;  %v2380_v6 = vmul.f32 %v10023_v31, %v6660_v15  ;;  %v5593_v39 = vpop.eup %5592  ;;  %v2448_v13 = vmul.f32 %v2432_v23, %v1620_v57  ;;  %v4956_v29 = vsel %vm308_vm9, 1.0, %v9982_v48 }
  0xe7   :  { %10022 = vst [vmem:[#allocation70_spill] sm:$0xff] %v6683_v33  ;;  %v2484_v14 = vmul.f32 %v2468_v12, %v1708_v43  ;;  %v2536_v8 = vmul.f32 %v2520_v30, %v1708_v43  ;;  %v2572_v45 = vmul.f32 %v2556_v17, %v6683_v33  ;;  %v171_v55 = vadd.f32 1.0, %v5593_v39 }
  0xe8   :  { %v1464_v7 = vmul.f32 %v6142_v42, %v1068_v38  ;;  %v1500_v25 = vmul.f32 %v6146_v1, %v1228_v10  ;;  %v892_v22 = vsub.f32 %v4956_v29, %v6628_v44  ;;  %v2344_v60 = vmul.f32 %v6151_v54, %v1068_v38 }
  0xe9   :  { %v2500_v52 = vadd.f32 %v2484_v14, %v2448_v13  ;;  %v6698_v18 = vadd.f32 %v2572_v45, %v2536_v8  ;;  %5594 = vrcp.f32 %v171_v55  ;;  %v2396_v12 = vmul.f32 %v2380_v6, %v1620_v57 }
  0xea   :  { %v1516_v23 = vmul.f32 %v1500_v25, %v908_v46  ;;  %v3136_v30 = vmul.f32 %v6159_v32, %v1068_v38  ;;  %v1480_v39 = vmul.f32 %v1464_v7, %v892_v22  ;;  %v3172_v33 = vmul.f32 %v6165_v35, %v1260_v51  ;;  %v6719_v25 = vld [vmem:[#allocation3 + $0x30] sm:$0xff] }
  0xeb   :  { %10024 = vst [vmem:[#allocation71_spill] sm:$0xff] %v6698_v18  ;;  %v3240_v17 = vmul.f32 %v3224_v26, %v2500_v52  ;;  %v3276_v43 = vmul.f32 %v3260_v40, %v6698_v18  ;;  %vm256_vm10 = vcmp.ge.f32.partialorder %v6622_v24, %v6179_v49  ;;  %v1052_v13 = vsub.f32 %v6622_v24, %v6179_v49 }
  0xec   :  { %v1212_v44 = vsub.f32 %v5898_v62, %v6622_v24  ;;  %v2292_v46 = vmul.f32 %v6206_v34, %v1228_v10  ;;  %v1532_v6 = vadd.f32 %v1516_v23, %v1480_v39  ;;  %v3188_v38 = vmul.f32 %v3172_v33, %v2500_v52 }
  0xed   :  { %v3292_v57 = vadd.f32 %v3276_v43, %v3240_v17  ;;  %v4940_v26 = vsel %vm256_vm10, 1.0, %v9982_v48  ;;  %v1376_v14 = vmul.f32 %v6189_v21, %v1052_v13  ;;  %v2256_v8 = vmul.f32 %v6202_v50, %v1052_v13 }
  0xee   :  { %v876_v40 = vsub.f32 %v4940_v26, %v4956_v29  ;;  %v1412_v51 = vmul.f32 %v6198_v9, %v1212_v44  ;;  %v2360_v45 = vmul.f32 %v2344_v60, %v1532_v6  ;;  %v2308_v55 = vmul.f32 %v2292_v46, %v1532_v6  ;;  %v4085_v60 = vld [vmem:[#allocation11 + $0x230] sm:$0xff]  ;;  %v4100_v44 = vld [vmem:[#allocation11 + $0x2a8] sm:$0xff] }
  0xef   :  { %4393 = vmatprep.mubr.f32.mxu1 %v3292_v57  ;;  %v3048_v7 = vmul.f32 %v6212_v37, %v1052_v13  ;;  %v3084_v10 = vmul.f32 %v6219_v20, %v6660_v15  ;;  %v4924_v29 = vmul.f32 -1.442695, %v6622_v24  ;;  %vm361_vm11 = vcmp.ge.f32.partialorder %v6719_v25, %v5898_v62  ;;  %v4117_v15 = vld [vmem:[#allocation11 + $0x330] sm:$0xff]  ;;  %5306 = vmatpush3.msra.mxu0 %v4085_v60  ;;  %v4132_v46 = vld [vmem:[#allocation11 + $0x3a8] sm:$0xff] }
  0xf0   :  { %v1392_v33 = vmul.f32 %v1376_v14, %v876_v40  ;;  %v1428_v52 = vmul.f32 %v1412_v51, %v892_v22  ;;  %v2412_v23 = vadd.f32 %v2396_v12, %v2360_v45  ;;  %v6725_v17 = vsel %vm361_vm11, 1.0, %v9982_v48  ;;  %5386 = vmatpush3.msra.mxu1 %v4117_v15  ;;  %5307 = vmatprep.subr.mxu0 %v4100_v44 }
  0xf1   :  { %vm413_vm12 = vcmp.ge.f32.partialorder %v6719_v25, %v5902_v63  ;;  %vm465_vm13 = vcmp.ge.f32.partialorder %v6719_v25, %v5907_v3  ;;  %5596 = vpow2.f32 %v4924_v29  ;;  %vm517_vm14 = vcmp.ge.f32.partialorder %v6719_v25, %v5911_v4  ;;  %5387 = vmatprep.subr.mxu1 %v4132_v46 }
  0xf2   :  { %v1444_v43 = vadd.f32 %v1428_v52, %v1392_v33  ;;  %v4989_v22 = vsel %vm413_vm12, 1.0, %v9982_v48  ;;  %v5005_v39 = vsel %vm465_vm13, 1.0, %v9982_v48  ;;  %v3152_v12 = vmul.f32 %v3136_v30, %v2412_v23 }
  0xf3   :  { %v3100_v13 = vmul.f32 %v3084_v10, %v2412_v23  ;;  %vm569_vm15 = vcmp.ge.f32.partialorder %v6719_v25, %v5915_v5  ;;  %v5021_v6 = vsel %vm517_vm14, 1.0, %v9982_v48  ;;  %v909_v40 = vsub.f32 %v6725_v17, %v4989_v22 }
  0xf4   :  { %v2272_v57 = vmul.f32 %v2256_v8, %v1444_v43  ;;  %v6739_v26 = vsel %vm569_vm15, 1.0, %v9982_v48  ;;  %v3204_v30 = vadd.f32 %v3188_v38, %v3152_v12  ;;  %v925_v14 = vsub.f32 %v4989_v22, %v5005_v39 }
  0xf5   :  { %10025 = vst [vmem:[#allocation72_spill] sm:$0xff] %v6739_v26  ;;  %v941_v51 = vsub.f32 %v5005_v39, %v5021_v6  ;;  %v6743_v45 = vsub.f32 %v5021_v6, %v6739_v26  ;;  %v1085_v33 = vsub.f32 %v6719_v25, %v5898_v62  ;;  %v6749_v8 = vsub.f32 %v6719_v25, %v5902_v63 }
  0xf6   :  { %v2324_v10 = vadd.f32 %v2308_v55, %v2272_v57  ;;  %v6753_v52 = vsub.f32 %v6719_v25, %v5907_v3  ;;  %v5595_v29 = vpop.eup %5594  ;;  %4394 = vmatmul.mubr.f32.gmra.mxu1 %v3204_v30  ;;  %v6757_v38 = vsub.f32 %v5907_v3, %v6719_v25  ;;  %v1261_v55 = vsub.f32 %v5911_v4, %v6719_v25 }
  0xf7   :  { %10026 = vst [vmem:[#allocation73_spill] sm:$0xff] %v6743_v45  ;;  %10027 = vst [vmem:[#allocation74_spill] sm:$0xff] %v6749_v8  ;;  %v1277_v23 = vsub.f32 %v5915_v5, %v6719_v25  ;;  %vm309_vm0 = vcmp.ge.f32.partialorder %v6719_v25, %v5894_v61  ;;  %v219_v60 = vmul.f32 %v5595_v29, %v6526_v41 }
  0xf8   :  { %10028 = vst [vmem:[#allocation75_spill] sm:$0xff] %v6753_v52  ;;  %v3064_v15 = vmul.f32 %v3048_v7, %v2324_v10  ;;  %v1553_v43 = vmul.f32 %v6010_v0, %v1085_v33  ;;  %v1641_v22 = vmul.f32 %v10007_v58, %v6749_v8  ;;  %v1589_v39 = vmul.f32 %v6014_v2, %v6757_v38 }
  0xf9   :  { %v1677_v12 = vmul.f32 %v9997_v47, %v1261_v55  ;;  %v1729_v44 = vmul.f32 %v9996_v59, %v6753_v52  ;;  %v1765_v46 = vmul.f32 %v10015_v53, %v1277_v23  ;;  %4244 = vmatmul.mubr.f32.gmra.mxu0 %v219_v60  ;;  %v2433_v7 = vmul.f32 %v10008_v16, %v1085_v33 }
  0xfa   :  { %v3116_v57 = vadd.f32 %v3100_v13, %v3064_v15  ;;  %v1569_v6 = vmul.f32 %v1553_v43, %v909_v40  ;;  %v1657_v41 = vmul.f32 %v1641_v22, %v925_v14  ;;  %v1605_v30 = vmul.f32 %v1589_v39, %v925_v14 }
  0xfb   :  { %v1693_v10 = vmul.f32 %v1677_v12, %v941_v51  ;;  %v1745_v29 = vmul.f32 %v1729_v44, %v941_v51  ;;  %v1781_v26 = vmul.f32 %v1765_v46, %v6743_v45  ;;  %v2469_v18 = vmul.f32 %v6073_v19, %v1261_v55 }
  0xfc   :  { %4248 = vmatprep.mubr.f32.mxu0 %v3116_v57  ;;  %v2521_v56 = vmul.f32 %v6077_v36, %v6749_v8  ;;  %v2557_v52 = vmul.f32 %v9987_v11, %v1277_v23  ;;  %v3225_v60 = vmul.f32 %v6102_v27, %v1085_v33  ;;  %v1621_v13 = vadd.f32 %v1605_v30, %v1569_v6 }
  0xfd   :  { %v1709_v15 = vadd.f32 %v1693_v10, %v1657_v41  ;;  %v6782_v43 = vadd.f32 %v1781_v26, %v1745_v29  ;;  %v3261_v14 = vmul.f32 %v6106_v28, %v1277_v23  ;;  %v4957_v51 = vsel %vm309_vm0, 1.0, %v9982_v48 }
  0xfe   :  { %v1069_v22 = vsub.f32 %v6719_v25, %v5894_v61  ;;  %v1229_v39 = vsub.f32 %v5902_v63, %v6719_v25  ;;  %v2381_v33 = vmul.f32 %v10023_v31, %v6757_v38  ;;  %v5597_v12 = vpop.eup %5596  ;;  %v2449_v44 = vmul.f32 %v2433_v7, %v1621_v13 }
  0xff   :  { %10029 = vst [vmem:[#allocation76_spill] sm:$0xff] %v6782_v43  ;;  %v2485_v26 = vmul.f32 %v2469_v18, %v1709_v15  ;;  %v2537_v46 = vmul.f32 %v2521_v56, %v1709_v15  ;;  %v2573_v23 = vmul.f32 %v2557_v52, %v6782_v43  ;;  %v172_v57 = vadd.f32 1.0, %v5597_v12 }
 0x100   :  { %v893_v6 = vsub.f32 %v4957_v51, %v6725_v17  ;;  %v1465_v41 = vmul.f32 %v6142_v42, %v1069_v22  ;;  %v1501_v30 = vmul.f32 %v6146_v1, %v1229_v39  ;;  %v2345_v8 = vmul.f32 %v6151_v54, %v1069_v22 }
 0x101   :  { %v2501_v10 = vadd.f32 %v2485_v26, %v2449_v44  ;;  %v6799_v29 = vadd.f32 %v2573_v23, %v2537_v46  ;;  %v2397_v45 = vmul.f32 %v2381_v33, %v1621_v13  ;;  %5598 = vrcp.f32 %v172_v57 }
 0x102   :  { %v1481_v31 = vmul.f32 %v1465_v41, %v893_v6  ;;  %v1517_v7 = vmul.f32 %v1501_v30, %v909_v40  ;;  %v3137_v56 = vmul.f32 %v6159_v32, %v1069_v22  ;;  %v3173_v17 = vmul.f32 %v6165_v35, %v1261_v55  ;;  %v6820_v30 = vld [vmem:[#allocation3 + $0x38] sm:$0xff] }
 0x103   :  { %10030 = vst [vmem:[#allocation77_spill] sm:$0xff] %v6799_v29  ;;  %v3241_v18 = vmul.f32 %v3225_v60, %v2501_v10  ;;  %v3277_v52 = vmul.f32 %v3261_v14, %v6799_v29  ;;  %vm257_vm1 = vcmp.ge.f32.partialorder %v6719_v25, %v6179_v49  ;;  %v1053_v44 = vsub.f32 %v6719_v25, %v6179_v49 }
 0x104   :  { %v1533_v15 = vadd.f32 %v1517_v7, %v1481_v31  ;;  %v4941_v12 = vsel %vm257_vm1, 1.0, %v9982_v48  ;;  %v1213_v13 = vsub.f32 %v5898_v62, %v6719_v25  ;;  %v3189_v33 = vmul.f32 %v3173_v17, %v2501_v10  ;;  %v4084_v10 = vld [vmem:[#allocation11 + $0x228] sm:$0xff] }
 0x105   :  { %v3293_v40 = vadd.f32 %v3277_v52, %v3241_v18  ;;  %v877_v22 = vsub.f32 %v4941_v12, %v4957_v51  ;;  %v2293_v60 = vmul.f32 %v6206_v34, %v1229_v39  ;;  %v1377_v55 = vmul.f32 %v6189_v21, %v1053_v44  ;;  %v4116_v7 = vld [vmem:[#allocation11 + $0x328] sm:$0xff]  ;;  %5308 = vmatpush3.msra.mxu0 %v4084_v10  ;;  %v4099_v12 = vld [vmem:[#allocation11 + $0x2a0] sm:$0xff] }
 0x106   :  { %v2361_v14 = vmul.f32 %v2345_v8, %v1533_v15  ;;  %v1413_v26 = vmul.f32 %v6198_v9, %v1213_v13  ;;  %v2257_v31 = vmul.f32 %v6202_v50, %v1053_v44  ;;  %v3049_v23 = vmul.f32 %v6212_v37, %v1053_v44  ;;  %5388 = vmatpush3.msra.mxu1 %v4116_v7  ;;  %v4131_v44 = vld [vmem:[#allocation11 + $0x3a0] sm:$0xff] }
 0x107   :  { %4398 = vmatprep.mubr.f32.mxu1 %v3293_v40  ;;  %v2309_v46 = vmul.f32 %v2293_v60, %v1533_v15  ;;  %v3085_v57 = vmul.f32 %v6219_v20, %v6757_v38  ;;  %v4925_v41 = vmul.f32 -1.442695, %v6719_v25  ;;  %v1393_v39 = vmul.f32 %v1377_v55, %v877_v22  ;;  %5309 = vmatprep.subr.mxu0 %v4099_v12 }
 0x108   :  { %v2413_v51 = vadd.f32 %v2397_v45, %v2361_v14  ;;  %v1429_v8 = vmul.f32 %v1413_v26, %v893_v6  ;;  %vm362_vm2 = vcmp.ge.f32.partialorder %v6820_v30, %v5898_v62  ;;  %vm414_vm3 = vcmp.ge.f32.partialorder %v6820_v30, %v5902_v63  ;;  %5389 = vmatprep.subr.mxu1 %v4131_v44 }
 0x109   :  { %5600 = vpow2.f32 %v4925_v41  ;;  %v6825_v18 = vsel %vm362_vm2, 1.0, %v9982_v48  ;;  %vm466_vm4 = vcmp.ge.f32.partialorder %v6820_v30, %v5907_v3  ;;  %v4990_v52 = vsel %vm414_vm3, 1.0, %v9982_v48 }
 0x10a   :  { %v3153_v45 = vmul.f32 %v3137_v56, %v2413_v51  ;;  %v1445_v38 = vadd.f32 %v1429_v8, %v1393_v39  ;;  %v3101_v6 = vmul.f32 %v3085_v57, %v2413_v51  ;;  %v5006_v17 = vsel %vm466_vm4, 1.0, %v9982_v48 }
 0x10b   :  { %vm518_vm5 = vcmp.ge.f32.partialorder %v6820_v30, %v5911_v4  ;;  %vm570_vm6 = vcmp.ge.f32.partialorder %v6820_v30, %v5915_v5  ;;  %v6838_v15 = vsub.f32 %v6825_v18, %v4990_v52  ;;  %v926_v60 = vsub.f32 %v4990_v52, %v5006_v17 }
 0x10c   :  { %v3205_v13 = vadd.f32 %v3189_v33, %v3153_v45  ;;  %v2273_v40 = vmul.f32 %v2257_v31, %v1445_v38  ;;  %v5022_v56 = vsel %vm518_vm5, 1.0, %v9982_v48  ;;  %v6842_v22 = vsel %vm570_vm6, 1.0, %v9982_v48 }
 0x10d   :  { %10031 = vst [vmem:[#allocation78_spill] sm:$0xff] %v6842_v22  ;;  %v942_v14 = vsub.f32 %v5006_v17, %v5022_v56  ;;  %v6845_v55 = vsub.f32 %v5022_v56, %v6842_v22  ;;  %v1086_v26 = vsub.f32 %v6820_v30, %v5898_v62  ;;  %v6851_v33 = vsub.f32 %v6820_v30, %v5902_v63 }
 0x10e   :  { %4399 = vmatmul.mubr.f32.gmra.mxu1 %v3205_v13  ;;  %v2325_v57 = vadd.f32 %v2309_v46, %v2273_v40  ;;  %v6855_v31 = vsub.f32 %v6820_v30, %v5907_v3  ;;  %v6859_v41 = vsub.f32 %v5907_v3, %v6820_v30  ;;  %v5599_v51 = vpop.eup %5598  ;;  %v1262_v39 = vsub.f32 %v5911_v4, %v6820_v30 }
 0x10f   :  { %10032 = vst [vmem:[#allocation79_spill] sm:$0xff] %v6845_v55  ;;  %10033 = vst [vmem:[#allocation80_spill] sm:$0xff] %v6851_v33  ;;  %v1278_v8 = vsub.f32 %v5915_v5, %v6820_v30  ;;  %v1554_v46 = vmul.f32 %v6010_v0, %v1086_v26  ;;  %v2434_v10 = vmul.f32 %v10008_v16, %v1086_v26 }
 0x110   :  { %10034 = vst [vmem:[#allocation81_spill] sm:$0xff] %v6855_v31  ;;  %v220_v7 = vmul.f32 %v5599_v51, %v6622_v24  ;;  %v3065_v45 = vmul.f32 %v3049_v23, %v2325_v57  ;;  %v1590_v38 = vmul.f32 %v6014_v2, %v6859_v41  ;;  %v1642_v52 = vmul.f32 %v10007_v58, %v6851_v33 }
 0x111   :  { %v1570_v17 = vmul.f32 %v1554_v46, %v6838_v15  ;;  %v1678_v12 = vmul.f32 %v9997_v47, %v1262_v39  ;;  %v1730_v44 = vmul.f32 %v9996_v59, %v6855_v31  ;;  %v1766_v13 = vmul.f32 %v10015_v53, %v1278_v8 }
 0x112   :  { %4249 = vmatmul.mubr.f32.gmra.mxu0 %v220_v7  ;;  %v3117_v40 = vadd.f32 %v3101_v6, %v3065_v45  ;;  %v1606_v56 = vmul.f32 %v1590_v38, %v926_v60  ;;  %v1658_v24 = vmul.f32 %v1642_v52, %v926_v60  ;;  %v2470_v23 = vmul.f32 %v6073_v19, %v1262_v39 }
 0x113   :  { %v1694_v57 = vmul.f32 %v1678_v12, %v942_v14  ;;  %v1746_v51 = vmul.f32 %v1730_v44, %v942_v14  ;;  %v1782_v22 = vmul.f32 %v1766_v13, %v6845_v55  ;;  %v2522_v46 = vmul.f32 %v6077_v36, %v6851_v33 }
 0x114   :  { %4253 = vmatprep.mubr.f32.mxu0 %v3117_v40  ;;  %v1622_v29 = vadd.f32 %v1606_v56, %v1570_v17  ;;  %v2558_v43 = vmul.f32 %v9987_v11, %v1278_v8  ;;  %v3226_v31 = vmul.f32 %v6102_v27, %v1086_v26  ;;  %v3262_v7 = vmul.f32 %v6106_v28, %v1278_v8  ;;  %v10036_v26 = vld [vmem:[#allocation47_spill] sm:$0xff] }
 0x115   :  { %v1710_v6 = vadd.f32 %v1694_v57, %v1658_v24  ;;  %v6884_v45 = vadd.f32 %v1782_v22, %v1746_v51  ;;  %vm310_vm7 = vcmp.ge.f32.partialorder %v6820_v30, %v5894_v61  ;;  %v1070_v60 = vsub.f32 %v6820_v30, %v5894_v61 }
 0x116   :  { %v5601_v14 = vpop.eup %5600  ;;  %v2450_v38 = vmul.f32 %v2434_v10, %v1622_v29  ;;  %v4958_v52 = vsel %vm310_vm7, 1.0, %v9982_v48  ;;  %v1230_v17 = vsub.f32 %v5902_v63, %v6820_v30  ;;  %v2382_v12 = vmul.f32 %v10036_v26, %v6859_v41 }
 0x117   :  { %10035 = vst [vmem:[#allocation82_spill] sm:$0xff] %v6884_v45  ;;  %v173_v8 = vadd.f32 1.0, %v5601_v14  ;;  %v2486_v44 = vmul.f32 %v2470_v23, %v1710_v6  ;;  %v2538_v22 = vmul.f32 %v2522_v46, %v1710_v6  ;;  %v2574_v13 = vmul.f32 %v2558_v43, %v6884_v45 }
 0x118   :  { %v894_v40 = vsub.f32 %v4958_v52, %v6825_v18  ;;  %v1466_v56 = vmul.f32 %v6142_v42, %v1070_v60  ;;  %v1502_v24 = vmul.f32 %v6146_v1, %v1230_v17  ;;  %v2346_v10 = vmul.f32 %v6151_v54, %v1070_v60 }
 0x119   :  { %5602 = vrcp.f32 %v173_v8  ;;  %v2502_v57 = vadd.f32 %v2486_v44, %v2450_v38  ;;  %v6900_v51 = vadd.f32 %v2574_v13, %v2538_v22  ;;  %v2398_v33 = vmul.f32 %v2382_v12, %v1622_v29 }
 0x11a   :  { %v1482_v55 = vmul.f32 %v1466_v56, %v894_v40  ;;  %v1518_v14 = vmul.f32 %v1502_v24, %v6838_v15  ;;  %v3138_v23 = vmul.f32 %v6159_v32, %v1070_v60  ;;  %v3174_v43 = vmul.f32 %v6165_v35, %v1262_v39 }
 0x11b   :  { %10037 = vst [vmem:[#allocation83_spill] sm:$0xff] %v6900_v51  ;;  %v3242_v46 = vmul.f32 %v3226_v31, %v2502_v57  ;;  %v3278_v18 = vmul.f32 %v3262_v7, %v6900_v51  ;;  %vm258_vm8 = vcmp.ge.f32.partialorder %v6820_v30, %v6179_v49  ;;  %v1054_v6 = vsub.f32 %v6820_v30, %v6179_v49 }
 0x11c   :  { %v1534_v38 = vadd.f32 %v1518_v14, %v1482_v55  ;;  %v3190_v8 = vmul.f32 %v3174_v43, %v2502_v57  ;;  %v4942_v29 = vsel %vm258_vm8, 1.0, %v9982_v48  ;;  %v1214_v15 = vsub.f32 %v5898_v62, %v6820_v30  ;;  %v6918_v55 = vld [vmem:[#allocation3 + $0x40] sm:$0xff] }
 0x11d   :  { %v3294_v12 = vadd.f32 %v3278_v18, %v3242_v46  ;;  %v878_v60 = vsub.f32 %v4942_v29, %v4958_v52  ;;  %v1378_v39 = vmul.f32 %v6189_v21, %v1054_v6  ;;  %v2258_v31 = vmul.f32 %v6202_v50, %v1054_v6  ;;  %v4115_v46 = vld [vmem:[#allocation11 + $0x320] sm:$0xff] }
 0x11e   :  { %v2362_v7 = vmul.f32 %v2346_v10, %v1534_v38  ;;  %v1414_v44 = vmul.f32 %v6198_v9, %v1214_v15  ;;  %v2294_v22 = vmul.f32 %v6206_v34, %v1230_v17  ;;  %v3050_v13 = vmul.f32 %v6212_v37, %v1054_v6  ;;  %v4083_v17 = vld [vmem:[#allocation11 + $0x220] sm:$0xff]  ;;  %5390 = vmatpush3.msra.mxu1 %v4115_v46  ;;  %v4098_v6 = vld [vmem:[#allocation11 + $0x298] sm:$0xff] }
 0x11f   :  { %4403 = vmatprep.mubr.f32.mxu1 %v3294_v12  ;;  %v1394_v56 = vmul.f32 %v1378_v39, %v878_v60  ;;  %v3086_v24 = vmul.f32 %v6219_v20, %v6859_v41  ;;  %v4926_v52 = vmul.f32 -1.442695, %v6820_v30  ;;  %vm363_vm9 = vcmp.ge.f32.partialorder %v6918_v55, %v5898_v62  ;;  %5310 = vmatpush3.msra.mxu0 %v4083_v17 }
 0x120   :  { %v2414_v57 = vadd.f32 %v2398_v33, %v2362_v7  ;;  %v1430_v10 = vmul.f32 %v1414_v44, %v894_v40  ;;  %v2310_v14 = vmul.f32 %v2294_v22, %v1534_v38  ;;  %v6926_v43 = vsel %vm363_vm9, 1.0, %v9982_v48  ;;  %v4130_v38 = vld [vmem:[#allocation11 + $0x398] sm:$0xff]  ;;  %5311 = vmatprep.subr.mxu0 %v4098_v6 }
 0x121   :  { %5604 = vpow2.f32 %v4926_v52  ;;  %vm415_vm10 = vcmp.ge.f32.partialorder %v6918_v55, %v5902_v63  ;;  %vm467_vm11 = vcmp.ge.f32.partialorder %v6918_v55, %v5907_v3  ;;  %vm519_vm12 = vcmp.ge.f32.partialorder %v6918_v55, %v5911_v4  ;;  %5391 = vmatprep.subr.mxu1 %v4130_v38 }
 0x122   :  { %v3154_v33 = vmul.f32 %v3138_v23, %v2414_v57  ;;  %v1446_v41 = vadd.f32 %v1430_v10, %v1394_v56  ;;  %v3102_v40 = vmul.f32 %v3086_v24, %v2414_v57  ;;  %v4991_v18 = vsel %vm415_vm10, 1.0, %v9982_v48 }
 0x123   :  { %v5007_v29 = vsel %vm467_vm11, 1.0, %v9982_v48  ;;  %v5023_v15 = vsel %vm519_vm12, 1.0, %v9982_v48  ;;  %vm571_vm13 = vcmp.ge.f32.partialorder %v6918_v55, %v5915_v5  ;;  %v6940_v12 = vsub.f32 %v6926_v43, %v4991_v18 }
 0x124   :  { %v3206_v60 = vadd.f32 %v3190_v8, %v3154_v33  ;;  %v2274_v23 = vmul.f32 %v2258_v31, %v1446_v41  ;;  %v6943_v39 = vsel %vm571_vm13, 1.0, %v9982_v48  ;;  %v927_v7 = vsub.f32 %v4991_v18, %v5007_v29 }
 0x125   :  { %10038 = vst [vmem:[#allocation84_spill] sm:$0xff] %v6943_v39  ;;  %v943_v44 = vsub.f32 %v5007_v29, %v5023_v15  ;;  %v6946_v22 = vsub.f32 %v5023_v15, %v6943_v39  ;;  %v1087_v56 = vsub.f32 %v6918_v55, %v5898_v62  ;;  %v6952_v24 = vsub.f32 %v6918_v55, %v5902_v63 }
 0x126   :  { %v5603_v52 = vpop.eup %5602  ;;  %4404 = vmatmul.mubr.f32.gmra.mxu1 %v3206_v60  ;;  %v2326_v57 = vadd.f32 %v2310_v14, %v2274_v23  ;;  %v6956_v8 = vsub.f32 %v6918_v55, %v5907_v3  ;;  %v6960_v31 = vsub.f32 %v5907_v3, %v6918_v55  ;;  %v1263_v10 = vsub.f32 %v5911_v4, %v6918_v55 }
 0x127   :  { %10039 = vst [vmem:[#allocation85_spill] sm:$0xff] %v6946_v22  ;;  %10040 = vst [vmem:[#allocation86_spill] sm:$0xff] %v6952_v24  ;;  %v221_v17 = vmul.f32 %v5603_v52, %v6719_v25  ;;  %v1279_v46 = vsub.f32 %v5915_v5, %v6918_v55  ;;  %v1555_v33 = vmul.f32 %v6010_v0, %v1087_v56 }
 0x128   :  { %10041 = vst [vmem:[#allocation87_spill] sm:$0xff] %v6956_v8  ;;  %v1643_v14 = vmul.f32 %v10007_v58, %v6952_v24  ;;  %v3066_v41 = vmul.f32 %v3050_v13, %v2326_v57  ;;  %v1591_v18 = vmul.f32 %v6014_v2, %v6960_v31  ;;  %v1679_v6 = vmul.f32 %v9997_v47, %v1263_v10 }
 0x129   :  { %v1731_v38 = vmul.f32 %v9996_v59, %v6956_v8  ;;  %4254 = vmatmul.mubr.f32.gmra.mxu0 %v221_v17  ;;  %v1571_v25 = vmul.f32 %v1555_v33, %v6940_v12  ;;  %v1767_v15 = vmul.f32 %v10015_v53, %v1279_v46  ;;  %v2435_v60 = vmul.f32 %v10008_v16, %v1087_v56 }
 0x12a   :  { %v1659_v29 = vmul.f32 %v1643_v14, %v927_v7  ;;  %v3118_v23 = vadd.f32 %v3102_v40, %v3066_v41  ;;  %v1607_v52 = vmul.f32 %v1591_v18, %v927_v7  ;;  %v1695_v39 = vmul.f32 %v1679_v6, %v943_v44 }
 0x12b   :  { %v1747_v13 = vmul.f32 %v1731_v38, %v943_v44  ;;  %v1783_v57 = vmul.f32 %v1767_v15, %v6946_v22  ;;  %v2471_v51 = vmul.f32 %v6073_v19, %v1263_v10  ;;  %v2523_v45 = vmul.f32 %v6077_v36, %v6952_v24 }
 0x12c   :  { %v2559_v17 = vmul.f32 %v9987_v11, %v1279_v46  ;;  %4258 = vmatprep.mubr.f32.mxu0 %v3118_v23  ;;  %v1623_v33 = vadd.f32 %v1607_v52, %v1571_v25  ;;  %v1711_v14 = vadd.f32 %v1695_v39, %v1659_v29  ;;  %v3227_v8 = vmul.f32 %v6102_v27, %v1087_v56 }
 0x12d   :  { %v3263_v16 = vmul.f32 %v6106_v28, %v1279_v46  ;;  %v6985_v40 = vadd.f32 %v1783_v57, %v1747_v13  ;;  %vm311_vm14 = vcmp.ge.f32.partialorder %v6918_v55, %v5894_v61  ;;  %v1071_v7 = vsub.f32 %v6918_v55, %v5894_v61 }
 0x12e   :  { %v1231_v44 = vsub.f32 %v5902_v63, %v6918_v55  ;;  %v5605_v41 = vpop.eup %5604  ;;  %v2451_v18 = vmul.f32 %v2435_v60, %v1623_v33  ;;  %v2487_v6 = vmul.f32 %v2471_v51, %v1711_v14  ;;  %v2539_v38 = vmul.f32 %v2523_v45, %v1711_v14 }
 0x12f   :  { %10042 = vst [vmem:[#allocation88_spill] sm:$0xff] %v6985_v40  ;;  %v4959_v39 = vsel %vm311_vm14, 1.0, %v9982_v48  ;;  %v174_v56 = vadd.f32 1.0, %v5605_v41  ;;  %v2575_v46 = vmul.f32 %v2559_v17, %v6985_v40  ;;  %v1467_v29 = vmul.f32 %v6142_v42, %v1071_v7 }
 0x130   :  { %v895_v25 = vsub.f32 %v4959_v39, %v6926_v43  ;;  %v2503_v15 = vadd.f32 %v2487_v6, %v2451_v18  ;;  %v1503_v23 = vmul.f32 %v6146_v1, %v1231_v44  ;;  %v2347_v52 = vmul.f32 %v6151_v54, %v1071_v7 }
 0x131   :  { %v2383_v13 = vmul.f32 %v10036_v26, %v6960_v31  ;;  %5606 = vrcp.f32 %v174_v56  ;;  %v7001_v51 = vadd.f32 %v2575_v46, %v2539_v38  ;;  %v3139_v60 = vmul.f32 %v6159_v32, %v1071_v7 }
 0x132   :  { %v1483_v45 = vmul.f32 %v1467_v29, %v895_v25  ;;  %v3243_v57 = vmul.f32 %v3227_v8, %v2503_v15  ;;  %v1519_v17 = vmul.f32 %v1503_v23, %v6940_v12  ;;  %v3175_v14 = vmul.f32 %v6165_v35, %v1263_v10 }
 0x133   :  { %10043 = vst [vmem:[#allocation89_spill] sm:$0xff] %v7001_v51  ;;  %v2399_v43 = vmul.f32 %v2383_v13, %v1623_v33  ;;  %v3279_v41 = vmul.f32 %v3263_v16, %v7001_v51  ;;  %vm259_vm15 = vcmp.ge.f32.partialorder %v6918_v55, %v6179_v49  ;;  %v1055_v18 = vsub.f32 %v6918_v55, %v6179_v49 }
 0x134   :  { %v1215_v6 = vsub.f32 %v5898_v62, %v6918_v55  ;;  %v1535_v38 = vadd.f32 %v1519_v17, %v1483_v45  ;;  %v3191_v56 = vmul.f32 %v3175_v14, %v2503_v15  ;;  %v4943_v8 = vsel %vm259_vm15, 1.0, %v9982_v48  ;;  %v4114_v17 = vld [vmem:[#allocation11 + $0x318] sm:$0xff] }
 0x135   :  { %v2295_v12 = vmul.f32 %v6206_v34, %v1231_v44  ;;  %v3295_v33 = vadd.f32 %v3279_v41, %v3243_v57  ;;  %v879_v7 = vsub.f32 %v4943_v8, %v4959_v39  ;;  %v1379_v10 = vmul.f32 %v6189_v21, %v1055_v18  ;;  %v7022_v57 = vld [vmem:[#allocation3 + $0x48] sm:$0xff]  ;;  %5392 = vmatpush3.msra.mxu1 %v4114_v17 }
 0x136   :  { %v1415_v16 = vmul.f32 %v6198_v9, %v1215_v6  ;;  %v2363_v46 = vmul.f32 %v2347_v52, %v1535_v38  ;;  %v2259_v29 = vmul.f32 %v6202_v50, %v1055_v18  ;;  %v3051_v13 = vmul.f32 %v6212_v37, %v1055_v18  ;;  %v4082_v52 = vld [vmem:[#allocation11 + $0x218] sm:$0xff]  ;;  %v4097_v6 = vld [vmem:[#allocation11 + $0x290] sm:$0xff] }
 0x137   :  { %v2311_v23 = vmul.f32 %v2295_v12, %v1535_v38  ;;  %4408 = vmatprep.mubr.f32.mxu1 %v3295_v33  ;;  %v1395_v51 = vmul.f32 %v1379_v10, %v879_v7  ;;  %v3087_v15 = vmul.f32 %v6219_v20, %v6960_v31  ;;  %v4927_v44 = vmul.f32 -1.442695, %v6918_v55  ;;  %5312 = vmatpush3.msra.mxu0 %v4082_v52  ;;  %v4129_v38 = vld [vmem:[#allocation11 + $0x390] sm:$0xff] }
 0x138   :  { %v1431_v45 = vmul.f32 %v1415_v16, %v895_v25  ;;  %v2415_v39 = vadd.f32 %v2399_v43, %v2363_v46  ;;  %vm364_vm0 = vcmp.ge.f32.partialorder %v7022_v57, %v5898_v62  ;;  %vm416_vm1 = vcmp.ge.f32.partialorder %v7022_v57, %v5902_v63  ;;  %5313 = vmatprep.subr.mxu0 %v4097_v6 }
 0x139   :  { %vm468_vm2 = vcmp.ge.f32.partialorder %v7022_v57, %v5907_v3  ;;  %5608 = vpow2.f32 %v4927_v44  ;;  %v7031_v31 = vsel %vm364_vm0, 1.0, %v9982_v48  ;;  %v4992_v14 = vsel %vm416_vm1, 1.0, %v9982_v48  ;;  %5393 = vmatprep.subr.mxu1 %v4129_v38 }
 0x13a   :  { %v1447_v25 = vadd.f32 %v1431_v45, %v1395_v51  ;;  %v3155_v43 = vmul.f32 %v3139_v60, %v2415_v39  ;;  %v3103_v41 = vmul.f32 %v3087_v15, %v2415_v39  ;;  %v5008_v18 = vsel %vm468_vm2, 1.0, %v9982_v48 }
 0x13b   :  { %vm520_vm3 = vcmp.ge.f32.partialorder %v7022_v57, %v5911_v4  ;;  %vm572_vm4 = vcmp.ge.f32.partialorder %v7022_v57, %v5915_v5  ;;  %v912_v12 = vsub.f32 %v7031_v31, %v4992_v14  ;;  %v928_v7 = vsub.f32 %v4992_v14, %v5008_v18 }
 0x13c   :  { %v2275_v8 = vmul.f32 %v2259_v29, %v1447_v25  ;;  %v5024_v51 = vsel %vm520_vm3, 1.0, %v9982_v48  ;;  %v3207_v33 = vadd.f32 %v3191_v56, %v3155_v43  ;;  %v7042_v60 = vsel %vm572_vm4, 1.0, %v9982_v48 }
 0x13d   :  { %10044 = vst [vmem:[#allocation90_spill] sm:$0xff] %v7042_v60  ;;  %v944_v10 = vsub.f32 %v5008_v18, %v5024_v51  ;;  %v7045_v46 = vsub.f32 %v5024_v51, %v7042_v60  ;;  %v1088_v29 = vsub.f32 %v7022_v57, %v5898_v62  ;;  %v7051_v45 = vsub.f32 %v7022_v57, %v5902_v63 }
 0x13e   :  { %v2327_v16 = vadd.f32 %v2311_v23, %v2275_v8  ;;  %v5607_v15 = vpop.eup %5606  ;;  %4409 = vmatmul.mubr.f32.gmra.mxu1 %v3207_v33  ;;  %v7055_v56 = vsub.f32 %v7022_v57, %v5907_v3  ;;  %v7059_v44 = vsub.f32 %v5907_v3, %v7022_v57  ;;  %v1264_v23 = vsub.f32 %v5911_v4, %v7022_v57 }
 0x13f   :  { %10045 = vst [vmem:[#allocation91_spill] sm:$0xff] %v7045_v46  ;;  %10046 = vst [vmem:[#allocation92_spill] sm:$0xff] %v7051_v45  ;;  %v1280_v39 = vsub.f32 %v5915_v5, %v7022_v57  ;;  %v222_v52 = vmul.f32 %v5607_v15, %v6820_v30  ;;  %v1556_v25 = vmul.f32 %v6010_v0, %v1088_v29 }
 0x140   :  { %10047 = vst [vmem:[#allocation93_spill] sm:$0xff] %v7055_v56  ;;  %v3067_v17 = vmul.f32 %v3051_v13, %v2327_v16  ;;  %v1644_v14 = vmul.f32 %v10007_v58, %v7051_v45  ;;  %v1592_v43 = vmul.f32 %v6014_v2, %v7059_v44  ;;  %v1680_v18 = vmul.f32 %v9997_v47, %v1264_v23  ;;  %v10048_v13 = vld [vmem:[#allocation37_spill] sm:$0xff] }
 0x141   :  { %v1732_v6 = vmul.f32 %v9996_v59, %v7055_v56  ;;  %v1768_v38 = vmul.f32 %v10015_v53, %v1280_v39  ;;  %4259 = vmatmul.mubr.f32.gmra.mxu0 %v222_v52  ;;  %v1572_v51 = vmul.f32 %v1556_v25, %v912_v12  ;;  %v2436_v33 = vmul.f32 %v10048_v13, %v1088_v29 }
 0x142   :  { %v3119_v8 = vadd.f32 %v3103_v41, %v3067_v17  ;;  %v1660_v30 = vmul.f32 %v1644_v14, %v928_v7  ;;  %v1608_v16 = vmul.f32 %v1592_v43, %v928_v7  ;;  %v1696_v15 = vmul.f32 %v1680_v18, %v944_v10 }
 0x143   :  { %v1748_v60 = vmul.f32 %v1732_v6, %v944_v10  ;;  %v1784_v24 = vmul.f32 %v1768_v38, %v7045_v46  ;;  %v2472_v40 = vmul.f32 %v6073_v19, %v1264_v23  ;;  %v2524_v22 = vmul.f32 %v6077_v36, %v7051_v45 }
 0x144   :  { %4263 = vmatprep.mubr.f32.mxu0 %v3119_v8  ;;  %v2560_v56 = vmul.f32 %v9987_v11, %v1280_v39  ;;  %v3228_v52 = vmul.f32 %v6102_v27, %v1088_v29  ;;  %v1624_v41 = vadd.f32 %v1608_v16, %v1572_v51  ;;  %v1712_v17 = vadd.f32 %v1696_v15, %v1660_v30 }
 0x145   :  { %v7082_v25 = vadd.f32 %v1784_v24, %v1748_v60  ;;  %v3264_v7 = vmul.f32 %v6106_v28, %v1280_v39  ;;  %vm312_vm5 = vcmp.ge.f32.partialorder %v7022_v57, %v5894_v61  ;;  %v1072_v10 = vsub.f32 %v7022_v57, %v5894_v61 }
 0x146   :  { %v1232_v14 = vsub.f32 %v5902_v63, %v7022_v57  ;;  %v2384_v43 = vmul.f32 %v10036_v26, %v7059_v44  ;;  %v5609_v18 = vpop.eup %5608  ;;  %v2452_v29 = vmul.f32 %v2436_v33, %v1624_v41  ;;  %v2488_v6 = vmul.f32 %v2472_v40, %v1712_v17 }
 0x147   :  { %10049 = vst [vmem:[#allocation94_spill] sm:$0xff] %v7082_v25  ;;  %v2540_v38 = vmul.f32 %v2524_v22, %v1712_v17  ;;  %v2576_v24 = vmul.f32 %v2560_v56, %v7082_v25  ;;  %v175_v60 = vadd.f32 1.0, %v5609_v18  ;;  %v4960_v39 = vsel %vm312_vm5, 1.0, %v9982_v48 }
 0x148   :  { %v1468_v8 = vmul.f32 %v6142_v42, %v1072_v10  ;;  %v1504_v51 = vmul.f32 %v6146_v1, %v1232_v14  ;;  %v2504_v30 = vadd.f32 %v2488_v6, %v2452_v29  ;;  %v896_v15 = vsub.f32 %v4960_v39, %v7031_v31 }
 0x149   :  { %v7097_v16 = vadd.f32 %v2576_v24, %v2540_v38  ;;  %v2348_v45 = vmul.f32 %v6151_v54, %v1072_v10  ;;  %5610 = vrcp.f32 %v175_v60  ;;  %v2400_v40 = vmul.f32 %v2384_v43, %v1624_v41 }
 0x14a   :  { %v1520_v33 = vmul.f32 %v1504_v51, %v912_v12  ;;  %v3140_v22 = vmul.f32 %v6159_v32, %v1072_v10  ;;  %v3244_v56 = vmul.f32 %v3228_v52, %v2504_v30  ;;  %v1484_v18 = vmul.f32 %v1468_v8, %v896_v15  ;;  %v7118_v51 = vld [vmem:[#allocation3 + $0x50] sm:$0xff] }
 0x14b   :  { %10050 = vst [vmem:[#allocation95_spill] sm:$0xff] %v7097_v16  ;;  %v3280_v17 = vmul.f32 %v3264_v7, %v7097_v16  ;;  %v3176_v25 = vmul.f32 %v6165_v35, %v1264_v23  ;;  %vm260_vm6 = vcmp.ge.f32.partialorder %v7022_v57, %v6179_v49  ;;  %v1056_v29 = vsub.f32 %v7022_v57, %v6179_v49 }
 0x14c   :  { %v1216_v31 = vsub.f32 %v5898_v62, %v7022_v57  ;;  %v2296_v12 = vmul.f32 %v6206_v34, %v1232_v14  ;;  %v1536_v43 = vadd.f32 %v1520_v33, %v1484_v18  ;;  %v4944_v52 = vsel %vm260_vm6, 1.0, %v9982_v48 }
 0x14d   :  { %v3296_v41 = vadd.f32 %v3280_v17, %v3244_v56  ;;  %v3192_v10 = vmul.f32 %v3176_v25, %v2504_v30  ;;  %v880_v7 = vsub.f32 %v4944_v52, %v4960_v39  ;;  %v1380_v6 = vmul.f32 %v6189_v21, %v1056_v29 }
 0x14e   :  { %v1416_v23 = vmul.f32 %v6198_v9, %v1216_v31  ;;  %v2260_v38 = vmul.f32 %v6202_v50, %v1056_v29  ;;  %v2364_v24 = vmul.f32 %v2348_v45, %v1536_v43  ;;  %v2312_v60 = vmul.f32 %v2296_v12, %v1536_v43  ;;  %v4081_v45 = vld [vmem:[#allocation11 + $0x210] sm:$0xff]  ;;  %v4096_v31 = vld [vmem:[#allocation11 + $0x288] sm:$0xff] }
 0x14f   :  { %4413 = vmatprep.mubr.f32.mxu1 %v3296_v41  ;;  %v3052_v8 = vmul.f32 %v6212_v37, %v1056_v29  ;;  %v3088_v14 = vmul.f32 %v6219_v20, %v7059_v44  ;;  %v1396_v25 = vmul.f32 %v1380_v6, %v880_v7  ;;  %v4928_v39 = vmul.f32 -1.442695, %v7022_v57  ;;  %v4113_v44 = vld [vmem:[#allocation11 + $0x310] sm:$0xff]  ;;  %5314 = vmatpush3.msra.mxu0 %v4081_v45  ;;  %v4128_v12 = vld [vmem:[#allocation11 + $0x388] sm:$0xff] }
 0x150   :  { %v1432_v30 = vmul.f32 %v1416_v23, %v896_v15  ;;  %vm365_vm7 = vcmp.ge.f32.partialorder %v7118_v51, %v5898_v62  ;;  %v2416_v33 = vadd.f32 %v2400_v40, %v2364_v24  ;;  %vm417_vm8 = vcmp.ge.f32.partialorder %v7118_v51, %v5902_v63  ;;  %5394 = vmatpush3.msra.mxu1 %v4113_v44 }
 0x151   :  { %v7124_v56 = vsel %vm365_vm7, 1.0, %v9982_v48  ;;  %vm469_vm9 = vcmp.ge.f32.partialorder %v7118_v51, %v5907_v3  ;;  %5612 = vpow2.f32 %v4928_v39  ;;  %v4993_v15 = vsel %vm417_vm8, 1.0, %v9982_v48  ;;  %5315 = vmatprep.subr.mxu0 %v4096_v31  ;;  %5395 = vmatprep.subr.mxu1 %v4128_v12 }
 0x152   :  { %v1448_v17 = vadd.f32 %v1432_v30, %v1396_v25  ;;  %v5009_v18 = vsel %vm469_vm9, 1.0, %v9982_v48  ;;  %v3156_v40 = vmul.f32 %v3140_v22, %v2416_v33  ;;  %v3104_v29 = vmul.f32 %v3088_v14, %v2416_v33 }
 0x153   :  { %vm521_vm10 = vcmp.ge.f32.partialorder %v7118_v51, %v5911_v4  ;;  %vm573_vm11 = vcmp.ge.f32.partialorder %v7118_v51, %v5915_v5  ;;  %v913_v7 = vsub.f32 %v7124_v56, %v4993_v15  ;;  %v929_v6 = vsub.f32 %v4993_v15, %v5009_v18 }
 0x154   :  { %v2276_v41 = vmul.f32 %v2260_v38, %v1448_v17  ;;  %v5025_v43 = vsel %vm521_vm10, 1.0, %v9982_v48  ;;  %v7138_v52 = vsel %vm573_vm11, 1.0, %v9982_v48  ;;  %v3208_v22 = vadd.f32 %v3192_v10, %v3156_v40 }
 0x155   :  { %10051 = vst [vmem:[#allocation96_spill] sm:$0xff] %v7138_v52  ;;  %v945_v23 = vsub.f32 %v5009_v18, %v5025_v43  ;;  %v7142_v24 = vsub.f32 %v5025_v43, %v7138_v52  ;;  %v1089_v25 = vsub.f32 %v7118_v51, %v5898_v62  ;;  %v7148_v38 = vsub.f32 %v7118_v51, %v5902_v63 }
 0x156   :  { %v2328_v14 = vadd.f32 %v2312_v60, %v2276_v41  ;;  %v7152_v30 = vsub.f32 %v7118_v51, %v5907_v3  ;;  %v5611_v39 = vpop.eup %5610  ;;  %4414 = vmatmul.mubr.f32.gmra.mxu1 %v3208_v22  ;;  %v7156_v10 = vsub.f32 %v5907_v3, %v7118_v51  ;;  %v1265_v60 = vsub.f32 %v5911_v4, %v7118_v51 }
 0x157   :  { %10052 = vst [vmem:[#allocation97_spill] sm:$0xff] %v7142_v24  ;;  %10053 = vst [vmem:[#allocation98_spill] sm:$0xff] %v7148_v38  ;;  %v1281_v33 = vsub.f32 %v5915_v5, %v7118_v51  ;;  %vm313_vm12 = vcmp.ge.f32.partialorder %v7118_v51, %v5894_v61  ;;  %v223_v45 = vmul.f32 %v5611_v39, %v6918_v55 }
 0x158   :  { %10054 = vst [vmem:[#allocation99_spill] sm:$0xff] %v7152_v30  ;;  %v3068_v44 = vmul.f32 %v3052_v8, %v2328_v14  ;;  %v1557_v17 = vmul.f32 %v6010_v0, %v1089_v25  ;;  %v1645_v15 = vmul.f32 %v10007_v58, %v7148_v38  ;;  %v1593_v18 = vmul.f32 %v6014_v2, %v7156_v10 }
 0x159   :  { %v1681_v40 = vmul.f32 %v9997_v47, %v1265_v60  ;;  %v1733_v31 = vmul.f32 %v9996_v59, %v7152_v30  ;;  %v1769_v12 = vmul.f32 %v10015_v53, %v1281_v33  ;;  %4264 = vmatmul.mubr.f32.gmra.mxu0 %v223_v45  ;;  %v2437_v8 = vmul.f32 %v10048_v13, %v1089_v25 }
 0x15a   :  { %v3120_v41 = vadd.f32 %v3104_v29, %v3068_v44  ;;  %v1573_v43 = vmul.f32 %v1557_v17, %v913_v7  ;;  %v1661_v55 = vmul.f32 %v1645_v15, %v929_v6  ;;  %v1609_v22 = vmul.f32 %v1593_v18, %v929_v6 }
 0x15b   :  { %v1697_v14 = vmul.f32 %v1681_v40, %v945_v23  ;;  %v1749_v39 = vmul.f32 %v1733_v31, %v945_v23  ;;  %v1785_v52 = vmul.f32 %v1769_v12, %v7142_v24  ;;  %v2473_v16 = vmul.f32 %v6073_v19, %v1265_v60 }
 0x15c   :  { %4268 = vmatprep.mubr.f32.mxu0 %v3120_v41  ;;  %v2525_v46 = vmul.f32 %v6077_v36, %v7148_v38  ;;  %v2561_v30 = vmul.f32 %v9987_v11, %v1281_v33  ;;  %v3229_v45 = vmul.f32 %v6102_v27, %v1089_v25  ;;  %v1625_v29 = vadd.f32 %v1609_v22, %v1573_v43 }
 0x15d   :  { %v1713_v44 = vadd.f32 %v1697_v14, %v1661_v55  ;;  %v7181_v17 = vadd.f32 %v1785_v52, %v1749_v39  ;;  %v3265_v6 = vmul.f32 %v6106_v28, %v1281_v33  ;;  %v4961_v23 = vsel %vm313_vm12, 1.0, %v9982_v48 }
 0x15e   :  { %v1073_v15 = vsub.f32 %v7118_v51, %v5894_v61  ;;  %v1233_v18 = vsub.f32 %v5902_v63, %v7118_v51  ;;  %v2385_v25 = vmul.f32 %v10036_v26, %v7156_v10  ;;  %v5613_v40 = vpop.eup %5612  ;;  %v2453_v31 = vmul.f32 %v2437_v8, %v1625_v29 }
 0x15f   :  { %10055 = vst [vmem:[#allocation100_spill] sm:$0xff] %v7181_v17  ;;  %v2489_v52 = vmul.f32 %v2473_v16, %v1713_v44  ;;  %v2541_v12 = vmul.f32 %v2525_v46, %v1713_v44  ;;  %v2577_v33 = vmul.f32 %v2561_v30, %v7181_v17  ;;  %v176_v41 = vadd.f32 1.0, %v5613_v40 }
 0x160   :  { %v897_v43 = vsub.f32 %v4961_v23, %v7124_v56  ;;  %v1469_v55 = vmul.f32 %v6142_v42, %v1073_v15  ;;  %v1505_v22 = vmul.f32 %v6146_v1, %v1233_v18  ;;  %v2349_v38 = vmul.f32 %v6151_v54, %v1073_v15 }
 0x161   :  { %v2505_v14 = vadd.f32 %v2489_v52, %v2453_v31  ;;  %v7198_v39 = vadd.f32 %v2577_v33, %v2541_v12  ;;  %v2401_v24 = vmul.f32 %v2385_v25, %v1625_v29  ;;  %5614 = vrcp.f32 %v176_v41 }
 0x162   :  { %v1485_v26 = vmul.f32 %v1469_v55, %v897_v43  ;;  %v1521_v8 = vmul.f32 %v1505_v22, %v913_v7  ;;  %v3141_v46 = vmul.f32 %v6159_v32, %v1073_v15  ;;  %v3177_v56 = vmul.f32 %v6165_v35, %v1265_v60  ;;  %v7219_v22 = vld [vmem:[#allocation3 + $0x58] sm:$0xff] }
 0x163   :  { %10056 = vst [vmem:[#allocation101_spill] sm:$0xff] %v7198_v39  ;;  %v3245_v16 = vmul.f32 %v3229_v45, %v2505_v14  ;;  %v3281_v30 = vmul.f32 %v3265_v6, %v7198_v39  ;;  %vm261_vm13 = vcmp.ge.f32.partialorder %v7118_v51, %v6179_v49  ;;  %v1057_v31 = vsub.f32 %v7118_v51, %v6179_v49 }
 0x164   :  { %v1537_v44 = vadd.f32 %v1521_v8, %v1485_v26  ;;  %v4945_v40 = vsel %vm261_vm13, 1.0, %v9982_v48  ;;  %v1217_v29 = vsub.f32 %v5898_v62, %v7118_v51  ;;  %v3193_v25 = vmul.f32 %v3177_v56, %v2505_v14  ;;  %v4080_v14 = vld [vmem:[#allocation11 + $0x208] sm:$0xff] }
 0x165   :  { %v3297_v7 = vadd.f32 %v3281_v30, %v3245_v16  ;;  %v881_v15 = vsub.f32 %v4945_v40, %v4961_v23  ;;  %v2297_v45 = vmul.f32 %v6206_v34, %v1233_v18  ;;  %v1381_v60 = vmul.f32 %v6189_v21, %v1057_v31  ;;  %v4112_v8 = vld [vmem:[#allocation11 + $0x308] sm:$0xff]  ;;  %5316 = vmatpush3.msra.mxu0 %v4080_v14  ;;  %v4095_v40 = vld [vmem:[#allocation11 + $0x280] sm:$0xff] }
 0x166   :  { %v2365_v6 = vmul.f32 %v2349_v38, %v1537_v44  ;;  %v1417_v52 = vmul.f32 %v6198_v9, %v1217_v29  ;;  %v2261_v26 = vmul.f32 %v6202_v50, %v1057_v31  ;;  %v3053_v33 = vmul.f32 %v6212_v37, %v1057_v31  ;;  %5396 = vmatpush3.msra.mxu1 %v4112_v8  ;;  %v4127_v31 = vld [vmem:[#allocation11 + $0x380] sm:$0xff] }
 0x167   :  { %4418 = vmatprep.mubr.f32.mxu1 %v3297_v7  ;;  %v2313_v12 = vmul.f32 %v2297_v45, %v1537_v44  ;;  %v3089_v41 = vmul.f32 %v6219_v20, %v7156_v10  ;;  %v4929_v55 = vmul.f32 -1.442695, %v7118_v51  ;;  %v1397_v18 = vmul.f32 %v1381_v60, %v881_v15  ;;  %5317 = vmatprep.subr.mxu0 %v4095_v40 }
 0x168   :  { %v2417_v23 = vadd.f32 %v2401_v24, %v2365_v6  ;;  %v1433_v38 = vmul.f32 %v1417_v52, %v897_v43  ;;  %vm366_vm14 = vcmp.ge.f32.partialorder %v7219_v22, %v5898_v62  ;;  %vm418_vm15 = vcmp.ge.f32.partialorder %v7219_v22, %v5902_v63  ;;  %5397 = vmatprep.subr.mxu1 %v4127_v31 }
 0x169   :  { %5616 = vpow2.f32 %v4929_v55  ;;  %v7224_v16 = vsel %vm366_vm14, 1.0, %v9982_v48  ;;  %vm470_vm0 = vcmp.ge.f32.partialorder %v7219_v22, %v5907_v3  ;;  %v4994_v30 = vsel %vm418_vm15, 1.0, %v9982_v48 }
 0x16a   :  { %v3157_v24 = vmul.f32 %v3141_v46, %v2417_v23  ;;  %v1449_v10 = vadd.f32 %v1433_v38, %v1397_v18  ;;  %v3105_v43 = vmul.f32 %v3089_v41, %v2417_v23  ;;  %v5010_v56 = vsel %vm470_vm0, 1.0, %v9982_v48 }
 0x16b   :  { %vm522_vm1 = vcmp.ge.f32.partialorder %v7219_v22, %v5911_v4  ;;  %vm574_vm2 = vcmp.ge.f32.partialorder %v7219_v22, %v5915_v5  ;;  %v7237_v44 = vsub.f32 %v7224_v16, %v4994_v30  ;;  %v930_v45 = vsub.f32 %v4994_v30, %v5010_v56 }
 0x16c   :  { %v3209_v29 = vadd.f32 %v3193_v25, %v3157_v24  ;;  %v2277_v7 = vmul.f32 %v2261_v26, %v1449_v10  ;;  %v5026_v46 = vsel %vm522_vm1, 1.0, %v9982_v48  ;;  %v7241_v15 = vsel %vm574_vm2, 1.0, %v9982_v48 }
 0x16d   :  { %10057 = vst [vmem:[#allocation102_spill] sm:$0xff] %v7241_v15  ;;  %v946_v6 = vsub.f32 %v5010_v56, %v5026_v46  ;;  %v7244_v60 = vsub.f32 %v5026_v46, %v7241_v15  ;;  %v1090_v52 = vsub.f32 %v7219_v22, %v5898_v62  ;;  %v7250_v25 = vsub.f32 %v7219_v22, %v5902_v63 }
 0x16e   :  { %4419 = vmatmul.mubr.f32.gmra.mxu1 %v3209_v29  ;;  %v2329_v41 = vadd.f32 %v2313_v12, %v2277_v7  ;;  %v7254_v26 = vsub.f32 %v7219_v22, %v5907_v3  ;;  %v7258_v55 = vsub.f32 %v5907_v3, %v7219_v22  ;;  %v5615_v23 = vpop.eup %5614  ;;  %v1266_v18 = vsub.f32 %v5911_v4, %v7219_v22 }
 0x16f   :  { %10058 = vst [vmem:[#allocation103_spill] sm:$0xff] %v7244_v60  ;;  %10059 = vst [vmem:[#allocation104_spill] sm:$0xff] %v7250_v25  ;;  %v1282_v38 = vsub.f32 %v5915_v5, %v7219_v22  ;;  %v1558_v12 = vmul.f32 %v6010_v0, %v1090_v52  ;;  %v2438_v14 = vmul.f32 %v10048_v13, %v1090_v52 }
 0x170   :  { %10060 = vst [vmem:[#allocation105_spill] sm:$0xff] %v7254_v26  ;;  %v224_v8 = vmul.f32 %v5615_v23, %v7022_v57  ;;  %v3069_v24 = vmul.f32 %v3053_v33, %v2329_v41  ;;  %v1594_v10 = vmul.f32 %v6014_v2, %v7258_v55  ;;  %v1646_v30 = vmul.f32 %v10007_v58, %v7250_v25 }
 0x171   :  { %v1574_v56 = vmul.f32 %v1558_v12, %v7237_v44  ;;  %v1682_v40 = vmul.f32 %v9997_v47, %v1266_v18  ;;  %v1734_v31 = vmul.f32 %v9996_v59, %v7254_v26  ;;  %v1770_v29 = vmul.f32 %v10015_v53, %v1282_v38 }
 0x172   :  { %4269 = vmatmul.mubr.f32.gmra.mxu0 %v224_v8  ;;  %v3121_v7 = vadd.f32 %v3105_v43, %v3069_v24  ;;  %v1610_v46 = vmul.f32 %v1594_v10, %v930_v45  ;;  %v1662_v57 = vmul.f32 %v1646_v30, %v930_v45  ;;  %v2474_v33 = vmul.f32 %v6073_v19, %v1266_v18 }
 0x173   :  { %v1698_v41 = vmul.f32 %v1682_v40, %v946_v6  ;;  %v1750_v23 = vmul.f32 %v1734_v31, %v946_v6  ;;  %v1786_v15 = vmul.f32 %v1770_v29, %v7244_v60  ;;  %v2526_v12 = vmul.f32 %v6077_v36, %v7250_v25 }
 0x174   :  { %4273 = vmatprep.mubr.f32.mxu0 %v3121_v7  ;;  %v1626_v39 = vadd.f32 %v1610_v46, %v1574_v56  ;;  %v2562_v17 = vmul.f32 %v9987_v11, %v1282_v38  ;;  %v3230_v26 = vmul.f32 %v6102_v27, %v1090_v52  ;;  %v3266_v8 = vmul.f32 %v6106_v28, %v1282_v38  ;;  %v10062_v52 = vld [vmem:[#allocation47_spill] sm:$0xff] }
 0x175   :  { %v1714_v43 = vadd.f32 %v1698_v41, %v1662_v57  ;;  %v7283_v24 = vadd.f32 %v1786_v15, %v1750_v23  ;;  %vm314_vm3 = vcmp.ge.f32.partialorder %v7219_v22, %v5894_v61  ;;  %v1074_v45 = vsub.f32 %v7219_v22, %v5894_v61 }
 0x176   :  { %v5617_v6 = vpop.eup %5616  ;;  %v2454_v10 = vmul.f32 %v2438_v14, %v1626_v39  ;;  %v4962_v30 = vsel %vm314_vm3, 1.0, %v9982_v48  ;;  %v1234_v56 = vsub.f32 %v5902_v63, %v7219_v22  ;;  %v2386_v40 = vmul.f32 %v10062_v52, %v7258_v55 }
 0x177   :  { %10061 = vst [vmem:[#allocation106_spill] sm:$0xff] %v7283_v24  ;;  %v177_v38 = vadd.f32 1.0, %v5617_v6  ;;  %v2490_v31 = vmul.f32 %v2474_v33, %v1714_v43  ;;  %v2542_v15 = vmul.f32 %v2526_v12, %v1714_v43  ;;  %v2578_v29 = vmul.f32 %v2562_v17, %v7283_v24 }
 0x178   :  { %v898_v7 = vsub.f32 %v4962_v30, %v7224_v16  ;;  %v1470_v46 = vmul.f32 %v6142_v42, %v1074_v45  ;;  %v1506_v57 = vmul.f32 %v6146_v1, %v1234_v56  ;;  %v2350_v14 = vmul.f32 %v6151_v54, %v1074_v45 }
 0x179   :  { %5618 = vrcp.f32 %v177_v38  ;;  %v2506_v41 = vadd.f32 %v2490_v31, %v2454_v10  ;;  %v7299_v23 = vadd.f32 %v2578_v29, %v2542_v15  ;;  %v2402_v25 = vmul.f32 %v2386_v40, %v1626_v39 }
 0x17a   :  { %v1486_v60 = vmul.f32 %v1470_v46, %v898_v7  ;;  %v1522_v6 = vmul.f32 %v1506_v57, %v7237_v44  ;;  %v3142_v33 = vmul.f32 %v6159_v32, %v1074_v45  ;;  %v3178_v17 = vmul.f32 %v6165_v35, %v1266_v18 }
 0x17b   :  { %10063 = vst [vmem:[#allocation107_spill] sm:$0xff] %v7299_v23  ;;  %v3246_v12 = vmul.f32 %v3230_v26, %v2506_v41  ;;  %v3282_v16 = vmul.f32 %v3266_v8, %v7299_v23  ;;  %vm262_vm4 = vcmp.ge.f32.partialorder %v7219_v22, %v6179_v49  ;;  %v1058_v43 = vsub.f32 %v7219_v22, %v6179_v49 }
 0x17c   :  { %v1538_v10 = vadd.f32 %v1522_v6, %v1486_v60  ;;  %v3194_v38 = vmul.f32 %v3178_v17, %v2506_v41  ;;  %v4946_v39 = vsel %vm262_vm4, 1.0, %v9982_v48  ;;  %v1218_v44 = vsub.f32 %v5898_v62, %v7219_v22  ;;  %v7317_v60 = vld [vmem:[#allocation3 + $0x60] sm:$0xff] }
 0x17d   :  { %v3298_v40 = vadd.f32 %v3282_v16, %v3246_v12  ;;  %v882_v45 = vsub.f32 %v4946_v39, %v4962_v30  ;;  %v1382_v18 = vmul.f32 %v6189_v21, %v1058_v43  ;;  %v2262_v26 = vmul.f32 %v6202_v50, %v1058_v43  ;;  %v4111_v12 = vld [vmem:[#allocation11 + $0x300] sm:$0xff] }
 0x17e   :  { %v2366_v8 = vmul.f32 %v2350_v14, %v1538_v10  ;;  %v1418_v31 = vmul.f32 %v6198_v9, %v1218_v44  ;;  %v2298_v15 = vmul.f32 %v6206_v34, %v1234_v56  ;;  %v3054_v29 = vmul.f32 %v6212_v37, %v1058_v43  ;;  %v4079_v56 = vld [vmem:[#allocation11 + $0x200] sm:$0xff]  ;;  %5398 = vmatpush3.msra.mxu1 %v4111_v12 }
 0x17f   :  { %4423 = vmatprep.mubr.f32.mxu1 %v3298_v40  ;;  %v1398_v46 = vmul.f32 %v1382_v18, %v882_v45  ;;  %v3090_v57 = vmul.f32 %v6219_v20, %v7258_v55  ;;  %v4930_v30 = vmul.f32 -1.442695, %v7219_v22  ;;  %vm367_vm5 = vcmp.ge.f32.partialorder %v7317_v60, %v5898_v62  ;;  %5318 = vmatpush3.msra.mxu0 %v4079_v56 }
 0x180   :  { %v2418_v41 = vadd.f32 %v2402_v25, %v2366_v8  ;;  %v1434_v14 = vmul.f32 %v1418_v31, %v898_v7  ;;  %v2314_v6 = vmul.f32 %v2298_v15, %v1538_v10  ;;  %v7325_v17 = vsel %vm367_vm5, 1.0, %v9982_v48  ;;  %v4158_v25 = vld [vmem:[#allocation11 + $0x478] sm:$0xff] }
 0x181   :  { %5620 = vpow2.f32 %v4930_v30  ;;  %vm419_vm6 = vcmp.ge.f32.partialorder %v7317_v60, %v5902_v63  ;;  %vm471_vm7 = vcmp.ge.f32.partialorder %v7317_v60, %v5907_v3  ;;  %vm523_vm8 = vcmp.ge.f32.partialorder %v7317_v60, %v5911_v4  ;;  %5479 = vmatprep.subr.mxu0 %v4158_v25  ;;  %5535 = vmatprep.subr.mxu1 %v4158_v25 }
 0x182   :  { %v3158_v55 = vmul.f32 %v3142_v33, %v2418_v41  ;;  %v1450_v7 = vadd.f32 %v1434_v14, %v1398_v46  ;;  %v3106_v16 = vmul.f32 %v3090_v57, %v2418_v41  ;;  %v4995_v43 = vsel %vm419_vm6, 1.0, %v9982_v48 }
 0x183   :  { %v5011_v10 = vsel %vm471_vm7, 1.0, %v9982_v48  ;;  %v5027_v39 = vsel %vm523_vm8, 1.0, %v9982_v48  ;;  %vm575_vm9 = vcmp.ge.f32.partialorder %v7317_v60, %v5915_v5  ;;  %v7339_v44 = vsub.f32 %v7325_v17, %v4995_v43 }
 0x184   :  { %v3210_v40 = vadd.f32 %v3194_v38, %v3158_v55  ;;  %v2278_v45 = vmul.f32 %v2262_v26, %v1450_v7  ;;  %v7342_v33 = vsel %vm575_vm9, 1.0, %v9982_v48  ;;  %v931_v18 = vsub.f32 %v4995_v43, %v5011_v10 }
 0x185   :  { %10064 = vst [vmem:[#allocation108_spill] sm:$0xff] %v7342_v33  ;;  %v947_v8 = vsub.f32 %v5011_v10, %v5027_v39  ;;  %v7345_v31 = vsub.f32 %v5027_v39, %v7342_v33  ;;  %v1091_v15 = vsub.f32 %v7317_v60, %v5898_v62  ;;  %v7351_v46 = vsub.f32 %v7317_v60, %v5902_v63 }
 0x186   :  { %v5619_v57 = vpop.eup %5618  ;;  %4424 = vmatmul.mubr.f32.gmra.mxu1 %v3210_v40  ;;  %v2330_v30 = vadd.f32 %v2314_v6, %v2278_v45  ;;  %v7355_v38 = vsub.f32 %v7317_v60, %v5907_v3  ;;  %v7359_v26 = vsub.f32 %v5907_v3, %v7317_v60  ;;  %v1267_v41 = vsub.f32 %v5911_v4, %v7317_v60 }
 0x187   :  { %10065 = vst [vmem:[#allocation109_spill] sm:$0xff] %v7345_v31  ;;  %10066 = vst [vmem:[#allocation110_spill] sm:$0xff] %v7351_v46  ;;  %v225_v14 = vmul.f32 %v5619_v57, %v7118_v51  ;;  %v1283_v56 = vsub.f32 %v5915_v5, %v7317_v60  ;;  %v1559_v12 = vmul.f32 %v6010_v0, %v1091_v15 }
 0x188   :  { %10067 = vst [vmem:[#allocation111_spill] sm:$0xff] %v7355_v38  ;;  %v1647_v6 = vmul.f32 %v10007_v58, %v7351_v46  ;;  %v3070_v25 = vmul.f32 %v3054_v29, %v2330_v30  ;;  %v1595_v55 = vmul.f32 %v6014_v2, %v7359_v26  ;;  %v1683_v7 = vmul.f32 %v9997_v47, %v1267_v41 }
 0x189   :  { %v1735_v43 = vmul.f32 %v9996_v59, %v7355_v38  ;;  %4274 = vmatmul.mubr.f32.gmra.mxu0 %v225_v14  ;;  %v1575_v51 = vmul.f32 %v1559_v12, %v7339_v44  ;;  %v1771_v39 = vmul.f32 %v10015_v53, %v1283_v56  ;;  %v2439_v40 = vmul.f32 %v10048_v13, %v1091_v15 }
 0x18a   :  { %v1663_v10 = vmul.f32 %v1647_v6, %v931_v18  ;;  %v3122_v45 = vadd.f32 %v3106_v16, %v3070_v25  ;;  %v1611_v57 = vmul.f32 %v1595_v55, %v931_v18  ;;  %v1699_v33 = vmul.f32 %v1683_v7, %v947_v8 }
 0x18b   :  { %v1751_v29 = vmul.f32 %v1735_v43, %v947_v8  ;;  %v1787_v30 = vmul.f32 %v1771_v39, %v7345_v31  ;;  %v2475_v23 = vmul.f32 %v6073_v19, %v1267_v41  ;;  %v2527_v24 = vmul.f32 %v6077_v36, %v7351_v46 }
 0x18c   :  { %v2563_v14 = vmul.f32 %v9987_v11, %v1283_v56  ;;  %4278 = vmatprep.mubr.f32.mxu0 %v3122_v45  ;;  %v1627_v12 = vadd.f32 %v1611_v57, %v1575_v51  ;;  %v1715_v6 = vadd.f32 %v1699_v33, %v1663_v10  ;;  %v3231_v38 = vmul.f32 %v6102_v27, %v1091_v15 }
 0x18d   :  { %v3267_v13 = vmul.f32 %v6106_v28, %v1283_v56  ;;  %v7384_v16 = vadd.f32 %v1787_v30, %v1751_v29  ;;  %vm315_vm10 = vcmp.ge.f32.partialorder %v7317_v60, %v5894_v61  ;;  %v1075_v18 = vsub.f32 %v7317_v60, %v5894_v61 }
 0x18e   :  { %v1235_v8 = vsub.f32 %v5902_v63, %v7317_v60  ;;  %v5621_v25 = vpop.eup %5620  ;;  %v2455_v55 = vmul.f32 %v2439_v40, %v1627_v12  ;;  %v2491_v7 = vmul.f32 %v2475_v23, %v1715_v6  ;;  %v2543_v43 = vmul.f32 %v2527_v24, %v1715_v6 }
 0x18f   :  { %10068 = vst [vmem:[#allocation112_spill] sm:$0xff] %v7384_v16  ;;  %v4963_v33 = vsel %vm315_vm10, 1.0, %v9982_v48  ;;  %v178_v15 = vadd.f32 1.0, %v5621_v25  ;;  %v2579_v56 = vmul.f32 %v2563_v14, %v7384_v16  ;;  %v1471_v10 = vmul.f32 %v6142_v42, %v1075_v18 }
 0x190   :  { %v899_v51 = vsub.f32 %v4963_v33, %v7325_v17  ;;  %v2507_v39 = vadd.f32 %v2491_v7, %v2455_v55  ;;  %v1507_v45 = vmul.f32 %v6146_v1, %v1235_v8  ;;  %v2351_v57 = vmul.f32 %v6151_v54, %v1075_v18 }
 0x191   :  { %v2387_v29 = vmul.f32 %v10062_v52, %v7359_v26  ;;  %5622 = vrcp.f32 %v178_v15  ;;  %v7400_v23 = vadd.f32 %v2579_v56, %v2543_v43  ;;  %v3143_v40 = vmul.f32 %v6159_v32, %v1075_v18 }
 0x192   :  { %v1487_v24 = vmul.f32 %v1471_v10, %v899_v51  ;;  %v3247_v30 = vmul.f32 %v3231_v38, %v2507_v39  ;;  %v1523_v14 = vmul.f32 %v1507_v45, %v7339_v44  ;;  %v3179_v6 = vmul.f32 %v6165_v35, %v1267_v41 }
 0x193   :  { %10069 = vst [vmem:[#allocation113_spill] sm:$0xff] %v7400_v23  ;;  %v2403_v17 = vmul.f32 %v2387_v29, %v1627_v12  ;;  %v3283_v25 = vmul.f32 %v3267_v13, %v7400_v23  ;;  %vm263_vm11 = vcmp.ge.f32.partialorder %v7317_v60, %v6179_v49  ;;  %v1059_v55 = vsub.f32 %v7317_v60, %v6179_v49 }
 0x194   :  { %v1219_v7 = vsub.f32 %v5898_v62, %v7317_v60  ;;  %v1539_v43 = vadd.f32 %v1523_v14, %v1487_v24  ;;  %v3195_v15 = vmul.f32 %v3179_v6, %v2507_v39  ;;  %v4947_v38 = vsel %vm263_vm11, 1.0, %v9982_v48 }
 0x195   :  { %v2299_v44 = vmul.f32 %v6206_v34, %v1235_v8  ;;  %v3299_v12 = vadd.f32 %v3283_v25, %v3247_v30  ;;  %v883_v18 = vsub.f32 %v4947_v38, %v4963_v33  ;;  %v1383_v41 = vmul.f32 %v6189_v21, %v1059_v55  ;;  %v7421_v30 = vld [vmem:[#allocation3 + $0x68] sm:$0xff] }
 0x196   :  { %v1419_v13 = vmul.f32 %v6198_v9, %v1219_v7  ;;  %v2367_v56 = vmul.f32 %v2351_v57, %v1539_v43  ;;  %v2263_v10 = vmul.f32 %v6202_v50, %v1059_v55  ;;  %v3055_v29 = vmul.f32 %v6212_v37, %v1059_v55 }
 0x197   :  { %v2315_v45 = vmul.f32 %v2299_v44, %v1539_v43  ;;  %4428 = vmatprep.mubr.f32.mxu1 %v3299_v12  ;;  %v1399_v23 = vmul.f32 %v1383_v41, %v883_v18  ;;  %v3091_v39 = vmul.f32 %v6219_v20, %v7359_v26  ;;  %v4931_v8 = vmul.f32 -1.442695, %v7317_v60 }
 0x198   :  { %v1435_v24 = vmul.f32 %v1419_v13, %v899_v51  ;;  %v2419_v33 = vadd.f32 %v2403_v17, %v2367_v56  ;;  %vm368_vm12 = vcmp.ge.f32.partialorder %v7421_v30, %v5898_v62  ;;  %vm420_vm13 = vcmp.ge.f32.partialorder %v7421_v30, %v5902_v63 }
 0x199   :  { %vm472_vm14 = vcmp.ge.f32.partialorder %v7421_v30, %v5907_v3  ;;  %5624 = vpow2.f32 %v4931_v8  ;;  %v7430_v51 = vsel %vm368_vm12, 1.0, %v9982_v48  ;;  %v4996_v26 = vsel %vm420_vm13, 1.0, %v9982_v48 }
 0x19a   :  { %v1451_v57 = vadd.f32 %v1435_v24, %v1399_v23  ;;  %v3159_v14 = vmul.f32 %v3143_v40, %v2419_v33  ;;  %v3107_v6 = vmul.f32 %v3091_v39, %v2419_v33  ;;  %v5012_v17 = vsel %vm472_vm14, 1.0, %v9982_v48 }
 0x19b   :  { %vm524_vm15 = vcmp.ge.f32.partialorder %v7421_v30, %v5911_v4  ;;  %vm576_vm0 = vcmp.ge.f32.partialorder %v7421_v30, %v5915_v5  ;;  %v916_v23 = vsub.f32 %v7430_v51, %v4996_v26  ;;  %v932_v38 = vsub.f32 %v4996_v26, %v5012_v17 }
 0x19c   :  { %v2279_v25 = vmul.f32 %v2263_v10, %v1451_v57  ;;  %v5028_v55 = vsel %vm524_vm15, 1.0, %v9982_v48  ;;  %v3211_v7 = vadd.f32 %v3195_v15, %v3159_v14  ;;  %v7441_v43 = vsel %vm576_vm0, 1.0, %v9982_v48 }
 0x19d   :  { %10070 = vst [vmem:[#allocation114_spill] sm:$0xff] %v7441_v43  ;;  %v948_v40 = vsub.f32 %v5012_v17, %v5028_v55  ;;  %v7444_v12 = vsub.f32 %v5028_v55, %v7441_v43  ;;  %v1092_v18 = vsub.f32 %v7421_v30, %v5898_v62  ;;  %v7450_v41 = vsub.f32 %v7421_v30, %v5902_v63 }
 0x19e   :  { %v2331_v44 = vadd.f32 %v2315_v45, %v2279_v25  ;;  %v5623_v13 = vpop.eup %5622  ;;  %4429 = vmatmul.mubr.f32.gmra.mxu1 %v3211_v7  ;;  %v7454_v15 = vsub.f32 %v7421_v30, %v5907_v3  ;;  %v7458_v56 = vsub.f32 %v5907_v3, %v7421_v30  ;;  %v1268_v10 = vsub.f32 %v5911_v4, %v7421_v30 }
 0x19f   :  { %10071 = vst [vmem:[#allocation115_spill] sm:$0xff] %v7444_v12  ;;  %10072 = vst [vmem:[#allocation116_spill] sm:$0xff] %v7450_v41  ;;  %v1284_v45 = vsub.f32 %v5915_v5, %v7421_v30  ;;  %v226_v24 = vmul.f32 %v5623_v13, %v7219_v22  ;;  %v1560_v8 = vmul.f32 %v6010_v0, %v1092_v18 }
 0x1a0   :  { %10073 = vst [vmem:[#allocation117_spill] sm:$0xff] %v7454_v15  ;;  %v3071_v39 = vmul.f32 %v3055_v29, %v2331_v44  ;;  %v1648_v33 = vmul.f32 %v10007_v58, %v7450_v41  ;;  %v1596_v57 = vmul.f32 %v6014_v2, %v7458_v56  ;;  %v1684_v26 = vmul.f32 %v9997_v47, %v1268_v10  ;;  %v10074_v29 = vld [vmem:[#allocation37_spill] sm:$0xff] }
 0x1a1   :  { %v1736_v14 = vmul.f32 %v9996_v59, %v7454_v15  ;;  %v1772_v17 = vmul.f32 %v10015_v53, %v1284_v45  ;;  %4279 = vmatmul.mubr.f32.gmra.mxu0 %v226_v24  ;;  %v1576_v55 = vmul.f32 %v1560_v8, %v916_v23  ;;  %v2440_v7 = vmul.f32 %v10074_v29, %v1092_v18 }
 0x1a2   :  { %v3123_v25 = vadd.f32 %v3107_v6, %v3071_v39  ;;  %v1664_v22 = vmul.f32 %v1648_v33, %v932_v38  ;;  %v1612_v44 = vmul.f32 %v1596_v57, %v932_v38  ;;  %v1700_v13 = vmul.f32 %v1684_v26, %v948_v40 }
 0x1a3   :  { %v1752_v43 = vmul.f32 %v1736_v14, %v948_v40  ;;  %v1788_v46 = vmul.f32 %v1772_v17, %v7444_v12  ;;  %v2476_v16 = vmul.f32 %v6073_v19, %v1268_v10  ;;  %v2528_v31 = vmul.f32 %v6077_v36, %v7450_v41 }
 0x1a4   :  { %4283 = vmatprep.mubr.f32.mxu0 %v3123_v25  ;;  %v2564_v15 = vmul.f32 %v9987_v11, %v1284_v45  ;;  %v3232_v24 = vmul.f32 %v6102_v27, %v1092_v18  ;;  %v1628_v6 = vadd.f32 %v1612_v44, %v1576_v55  ;;  %v1716_v39 = vadd.f32 %v1700_v13, %v1664_v22 }
 0x1a5   :  { %v7481_v8 = vadd.f32 %v1788_v46, %v1752_v43  ;;  %v3268_v38 = vmul.f32 %v6106_v28, %v1284_v45  ;;  %vm316_vm1 = vcmp.ge.f32.partialorder %v7421_v30, %v5894_v61  ;;  %v1076_v40 = vsub.f32 %v7421_v30, %v5894_v61 }
 0x1a6   :  { %v1236_v33 = vsub.f32 %v5902_v63, %v7421_v30  ;;  %v2388_v57 = vmul.f32 %v10062_v52, %v7458_v56  ;;  %v5625_v26 = vpop.eup %5624  ;;  %v2456_v18 = vmul.f32 %v2440_v7, %v1628_v6  ;;  %v2492_v14 = vmul.f32 %v2476_v16, %v1716_v39 }
 0x1a7   :  { %10075 = vst [vmem:[#allocation37_spill] sm:$0xff] %v7481_v8  ;;  %v2544_v17 = vmul.f32 %v2528_v31, %v1716_v39  ;;  %v2580_v46 = vmul.f32 %v2564_v15, %v7481_v8  ;;  %v179_v43 = vadd.f32 1.0, %v5625_v26  ;;  %v4964_v45 = vsel %vm316_vm1, 1.0, %v9982_v48 }
 0x1a8   :  { %v1472_v25 = vmul.f32 %v6142_v42, %v1076_v40  ;;  %v1508_v55 = vmul.f32 %v6146_v1, %v1236_v33  ;;  %v2508_v22 = vadd.f32 %v2492_v14, %v2456_v18  ;;  %v900_v13 = vsub.f32 %v4964_v45, %v7430_v51 }
 0x1a9   :  { %v7496_v44 = vadd.f32 %v2580_v46, %v2544_v17  ;;  %v2352_v41 = vmul.f32 %v6151_v54, %v1076_v40  ;;  %5626 = vrcp.f32 %v179_v43  ;;  %v2404_v16 = vmul.f32 %v2388_v57, %v1628_v6 }
 0x1aa   :  { %v1524_v7 = vmul.f32 %v1508_v55, %v916_v23  ;;  %v3144_v31 = vmul.f32 %v6159_v32, %v1076_v40  ;;  %v3248_v15 = vmul.f32 %v3232_v24, %v2508_v22  ;;  %v1488_v26 = vmul.f32 %v1472_v25, %v900_v13  ;;  %v7517_v55 = vld [vmem:[#allocation3 + $0x70] sm:$0xff] }
 0x1ab   :  { %10076 = vst [vmem:[#allocation118_spill] sm:$0xff] %v7496_v44  ;;  %v3284_v39 = vmul.f32 %v3268_v38, %v7496_v44  ;;  %v3180_v8 = vmul.f32 %v6165_v35, %v1268_v10  ;;  %vm264_vm2 = vcmp.ge.f32.partialorder %v7421_v30, %v6179_v49  ;;  %v1060_v18 = vsub.f32 %v7421_v30, %v6179_v49 }
 0x1ac   :  { %v1220_v51 = vsub.f32 %v5898_v62, %v7421_v30  ;;  %v2300_v23 = vmul.f32 %v6206_v34, %v1236_v33  ;;  %v1540_v57 = vadd.f32 %v1524_v7, %v1488_v26  ;;  %v4948_v24 = vsel %vm264_vm2, 1.0, %v9982_v48 }
 0x1ad   :  { %v3300_v6 = vadd.f32 %v3284_v39, %v3248_v15  ;;  %v3196_v40 = vmul.f32 %v3180_v8, %v2508_v22  ;;  %v884_v38 = vsub.f32 %v4948_v24, %v4964_v45  ;;  %v1384_v14 = vmul.f32 %v6189_v21, %v1060_v18 }
 0x1ae   :  { %v1420_v10 = vmul.f32 %v6198_v9, %v1220_v51  ;;  %v2264_v17 = vmul.f32 %v6202_v50, %v1060_v18  ;;  %v2368_v46 = vmul.f32 %v2352_v41, %v1540_v57  ;;  %v2316_v43 = vmul.f32 %v2300_v23, %v1540_v57 }
 0x1af   :  { %4433 = vmatprep.mubr.f32.mxu1 %v3300_v6  ;;  %v3056_v25 = vmul.f32 %v6212_v37, %v1060_v18  ;;  %v3092_v33 = vmul.f32 %v6219_v20, %v7458_v56  ;;  %v1400_v8 = vmul.f32 %v1384_v14, %v884_v38  ;;  %v4932_v45 = vmul.f32 -1.442695, %v7421_v30 }
 0x1b0   :  { %v1436_v22 = vmul.f32 %v1420_v10, %v900_v13  ;;  %vm369_vm3 = vcmp.ge.f32.partialorder %v7517_v55, %v5898_v62  ;;  %v2420_v7 = vadd.f32 %v2404_v16, %v2368_v46  ;;  %vm421_vm4 = vcmp.ge.f32.partialorder %v7517_v55, %v5902_v63 }
 0x1b1   :  { %v7523_v15 = vsel %vm369_vm3, 1.0, %v9982_v48  ;;  %vm473_vm5 = vcmp.ge.f32.partialorder %v7517_v55, %v5907_v3  ;;  %5628 = vpow2.f32 %v4932_v45  ;;  %v4997_v56 = vsel %vm421_vm4, 1.0, %v9982_v48 }
 0x1b2   :  { %v1452_v41 = vadd.f32 %v1436_v22, %v1400_v8  ;;  %v5013_v13 = vsel %vm473_vm5, 1.0, %v9982_v48  ;;  %v3160_v39 = vmul.f32 %v3144_v31, %v2420_v7  ;;  %v3108_v26 = vmul.f32 %v3092_v33, %v2420_v7 }
 0x1b3   :  { %vm525_vm6 = vcmp.ge.f32.partialorder %v7517_v55, %v5911_v4  ;;  %vm577_vm7 = vcmp.ge.f32.partialorder %v7517_v55, %v5915_v5  ;;  %v917_v23 = vsub.f32 %v7523_v15, %v4997_v56  ;;  %v933_v57 = vsub.f32 %v4997_v56, %v5013_v13 }
 0x1b4   :  { %v2280_v16 = vmul.f32 %v2264_v17, %v1452_v41  ;;  %v5029_v18 = vsel %vm525_vm6, 1.0, %v9982_v48  ;;  %v7537_v51 = vsel %vm577_vm7, 1.0, %v9982_v48  ;;  %v3212_v6 = vadd.f32 %v3196_v40, %v3160_v39 }
 0x1b5   :  { %10077 = vst [vmem:[#allocation119_spill] sm:$0xff] %v7537_v51  ;;  %v949_v24 = vsub.f32 %v5013_v13, %v5029_v18  ;;  %v7541_v31 = vsub.f32 %v5029_v18, %v7537_v51  ;;  %v1093_v14 = vsub.f32 %v7517_v55, %v5898_v62  ;;  %v7547_v10 = vsub.f32 %v7517_v55, %v5902_v63 }
 0x1b6   :  { %v2332_v38 = vadd.f32 %v2316_v43, %v2280_v16  ;;  %v7551_v17 = vsub.f32 %v7517_v55, %v5907_v3  ;;  %v5627_v46 = vpop.eup %5626  ;;  %4434 = vmatmul.mubr.f32.gmra.mxu1 %v3212_v6  ;;  %v7555_v40 = vsub.f32 %v5907_v3, %v7517_v55  ;;  %v1269_v43 = vsub.f32 %v5911_v4, %v7517_v55 }
 0x1b7   :  { %10078 = vst [vmem:[#allocation120_spill] sm:$0xff] %v7541_v31  ;;  %10079 = vst [vmem:[#allocation121_spill] sm:$0xff] %v7547_v10  ;;  %v1285_v33 = vsub.f32 %v5915_v5, %v7517_v55  ;;  %vm317_vm8 = vcmp.ge.f32.partialorder %v7517_v55, %v5894_v61  ;;  %v227_v8 = vmul.f32 %v5627_v46, %v7317_v60 }
 0x1b8   :  { %10080 = vst [vmem:[#allocation122_spill] sm:$0xff] %v7551_v17  ;;  %v3072_v22 = vmul.f32 %v3056_v25, %v2332_v38  ;;  %v1561_v45 = vmul.f32 %v6010_v0, %v1093_v14  ;;  %v1649_v7 = vmul.f32 %v10007_v58, %v7547_v10  ;;  %v1597_v41 = vmul.f32 %v6014_v2, %v7555_v40 }
 0x1b9   :  { %v1685_v56 = vmul.f32 %v9997_v47, %v1269_v43  ;;  %v1737_v13 = vmul.f32 %v9996_v59, %v7551_v17  ;;  %v1773_v39 = vmul.f32 %v10015_v53, %v1285_v33  ;;  %4284 = vmatmul.mubr.f32.gmra.mxu0 %v227_v8  ;;  %v2441_v25 = vmul.f32 %v10074_v29, %v1093_v14 }
 0x1ba   :  { %v3124_v16 = vadd.f32 %v3108_v26, %v3072_v22  ;;  %v1577_v18 = vmul.f32 %v1561_v45, %v917_v23  ;;  %v1665_v60 = vmul.f32 %v1649_v7, %v933_v57  ;;  %v1613_v6 = vmul.f32 %v1597_v41, %v933_v57 }
 0x1bb   :  { %v1701_v38 = vmul.f32 %v1685_v56, %v949_v24  ;;  %v1753_v46 = vmul.f32 %v1737_v13, %v949_v24  ;;  %v1789_v51 = vmul.f32 %v1773_v39, %v7541_v31  ;;  %v2477_v44 = vmul.f32 %v6073_v19, %v1269_v43 }
 0x1bc   :  { %4288 = vmatprep.mubr.f32.mxu0 %v3124_v16  ;;  %v2529_v12 = vmul.f32 %v6077_v36, %v7547_v10  ;;  %v2565_v17 = vmul.f32 %v9987_v11, %v1285_v33  ;;  %v3233_v8 = vmul.f32 %v6102_v27, %v1093_v14  ;;  %v1629_v26 = vadd.f32 %v1613_v6, %v1577_v18 }
 0x1bd   :  { %v1717_v22 = vadd.f32 %v1701_v38, %v1665_v60  ;;  %v7580_v45 = vadd.f32 %v1789_v51, %v1753_v46  ;;  %v3269_v57 = vmul.f32 %v6106_v28, %v1285_v33  ;;  %v4965_v24 = vsel %vm317_vm8, 1.0, %v9982_v48 }
 0x1be   :  { %v1077_v7 = vsub.f32 %v7517_v55, %v5894_v61  ;;  %v1237_v41 = vsub.f32 %v5902_v63, %v7517_v55  ;;  %v2389_v14 = vmul.f32 %v10062_v52, %v7555_v40  ;;  %v5629_v56 = vpop.eup %5628  ;;  %v2457_v13 = vmul.f32 %v2441_v25, %v1629_v26 }
 0x1bf   :  { %10081 = vst [vmem:[#allocation123_spill] sm:$0xff] %v7580_v45  ;;  %v2493_v51 = vmul.f32 %v2477_v44, %v1717_v22  ;;  %v2545_v39 = vmul.f32 %v2529_v12, %v1717_v22  ;;  %v2581_v33 = vmul.f32 %v2565_v17, %v7580_v45  ;;  %v180_v16 = vadd.f32 1.0, %v5629_v56 }
 0x1c0   :  { %v901_v18 = vsub.f32 %v4965_v24, %v7523_v15  ;;  %v1473_v60 = vmul.f32 %v6142_v42, %v1077_v7  ;;  %v1509_v6 = vmul.f32 %v6146_v1, %v1237_v41  ;;  %v2353_v10 = vmul.f32 %v6151_v54, %v1077_v7 }
 0x1c1   :  { %v2509_v38 = vadd.f32 %v2493_v51, %v2457_v13  ;;  %v7597_v46 = vadd.f32 %v2581_v33, %v2545_v39  ;;  %v2405_v31 = vmul.f32 %v2389_v14, %v1629_v26  ;;  %5630 = vrcp.f32 %v180_v16 }
 0x1c2   :  { %v1489_v52 = vmul.f32 %v1473_v60, %v901_v18  ;;  %v1525_v25 = vmul.f32 %v1509_v6, %v917_v23  ;;  %v3145_v12 = vmul.f32 %v6159_v32, %v1077_v7  ;;  %v3181_v15 = vmul.f32 %v6165_v35, %v1269_v43  ;;  %v7618_v6 = vld [vmem:[#allocation3 + $0x78] sm:$0xff] }
 0x1c3   :  { %10082 = vst [vmem:[#allocation124_spill] sm:$0xff] %v7597_v46  ;;  %v3249_v44 = vmul.f32 %v3233_v8, %v2509_v38  ;;  %v3285_v17 = vmul.f32 %v3269_v57, %v7597_v46  ;;  %vm265_vm9 = vcmp.ge.f32.partialorder %v7517_v55, %v6179_v49  ;;  %v1061_v13 = vsub.f32 %v7517_v55, %v6179_v49 }
 0x1c4   :  { %v1541_v22 = vadd.f32 %v1525_v25, %v1489_v52  ;;  %v4949_v56 = vsel %vm265_vm9, 1.0, %v9982_v48  ;;  %v1221_v26 = vsub.f32 %v5898_v62, %v7517_v55  ;;  %v3197_v14 = vmul.f32 %v3181_v15, %v2509_v38 }
 0x1c5   :  { %v3301_v23 = vadd.f32 %v3285_v17, %v3249_v44  ;;  %v885_v7 = vsub.f32 %v4949_v56, %v4965_v24  ;;  %v2301_v8 = vmul.f32 %v6206_v34, %v1237_v41  ;;  %v1385_v43 = vmul.f32 %v6189_v21, %v1061_v13 }
 0x1c6   :  { %v2369_v57 = vmul.f32 %v2353_v10, %v1541_v22  ;;  %v1421_v51 = vmul.f32 %v6198_v9, %v1221_v26  ;;  %v2265_v52 = vmul.f32 %v6202_v50, %v1061_v13  ;;  %v3057_v33 = vmul.f32 %v6212_v37, %v1061_v13 }
 0x1c7   :  { %4438 = vmatprep.mubr.f32.mxu1 %v3301_v23  ;;  %v2317_v39 = vmul.f32 %v2301_v8, %v1541_v22  ;;  %v3093_v16 = vmul.f32 %v6219_v20, %v7555_v40  ;;  %v4933_v60 = vmul.f32 -1.442695, %v7517_v55  ;;  %v1401_v41 = vmul.f32 %v1385_v43, %v885_v7 }
 0x1c8   :  { %v2421_v24 = vadd.f32 %v2405_v31, %v2369_v57  ;;  %v1437_v10 = vmul.f32 %v1421_v51, %v901_v18  ;;  %vm370_vm10 = vcmp.ge.f32.partialorder %v7618_v6, %v5898_v62  ;;  %vm422_vm11 = vcmp.ge.f32.partialorder %v7618_v6, %v5902_v63 }
 0x1c9   :  { %5632 = vpow2.f32 %v4933_v60  ;;  %v7623_v38 = vsel %vm370_vm10, 1.0, %v9982_v48  ;;  %vm474_vm12 = vcmp.ge.f32.partialorder %v7618_v6, %v5907_v3  ;;  %v4998_v31 = vsel %vm422_vm11, 1.0, %v9982_v48 }
 0x1ca   :  { %v3161_v40 = vmul.f32 %v3145_v12, %v2421_v24  ;;  %v1453_v25 = vadd.f32 %v1437_v10, %v1401_v41  ;;  %v3109_v44 = vmul.f32 %v3093_v16, %v2421_v24  ;;  %v5014_v18 = vsel %vm474_vm12, 1.0, %v9982_v48 }
 0x1cb   :  { %vm526_vm13 = vcmp.ge.f32.partialorder %v7618_v6, %v5911_v4  ;;  %vm578_vm14 = vcmp.ge.f32.partialorder %v7618_v6, %v5915_v5  ;;  %v7636_v17 = vsub.f32 %v7623_v38, %v4998_v31  ;;  %v934_v13 = vsub.f32 %v4998_v31, %v5014_v18 }
 0x1cc   :  { %v3213_v15 = vadd.f32 %v3197_v14, %v3161_v40  ;;  %v2281_v22 = vmul.f32 %v2265_v52, %v1453_v25  ;;  %v5030_v56 = vsel %vm526_vm13, 1.0, %v9982_v48  ;;  %v7640_v12 = vsel %vm578_vm14, 1.0, %v9982_v48 }
 0x1cd   :  { %10083 = vst [vmem:[#allocation125_spill] sm:$0xff] %v7640_v12  ;;  %v950_v26 = vsub.f32 %v5014_v18, %v5030_v56  ;;  %v7643_v23 = vsub.f32 %v5030_v56, %v7640_v12  ;;  %v1094_v7 = vsub.f32 %v7618_v6, %v5898_v62  ;;  %v7649_v57 = vsub.f32 %v7618_v6, %v5902_v63 }
 0x1ce   :  { %4439 = vmatmul.mubr.f32.gmra.mxu1 %v3213_v15  ;;  %v2333_v8 = vadd.f32 %v2317_v39, %v2281_v22  ;;  %v7653_v14 = vsub.f32 %v7618_v6, %v5907_v3  ;;  %v7657_v43 = vsub.f32 %v5907_v3, %v7618_v6  ;;  %v5631_v51 = vpop.eup %5630  ;;  %v1270_v52 = vsub.f32 %v5911_v4, %v7618_v6 }
 0x1cf   :  { %10084 = vst [vmem:[#allocation126_spill] sm:$0xff] %v7643_v23  ;;  %10085 = vst [vmem:[#allocation127_spill] sm:$0xff] %v7649_v57  ;;  %v1286_v16 = vsub.f32 %v5915_v5, %v7618_v6  ;;  %v1562_v39 = vmul.f32 %v6010_v0, %v1094_v7  ;;  %v2442_v60 = vmul.f32 %v10074_v29, %v1094_v7 }
 0x1d0   :  { %10086 = vst [vmem:[#allocation128_spill] sm:$0xff] %v7653_v14  ;;  %v228_v24 = vmul.f32 %v5631_v51, %v7421_v30  ;;  %v3073_v41 = vmul.f32 %v3057_v33, %v2333_v8  ;;  %v1598_v10 = vmul.f32 %v6014_v2, %v7657_v43  ;;  %v1650_v3 = vmul.f32 %v10007_v58, %v7649_v57 }
 0x1d1   :  { %v1578_v40 = vmul.f32 %v1562_v39, %v7636_v17  ;;  %v1686_v25 = vmul.f32 %v9997_v47, %v1270_v52  ;;  %v1738_v31 = vmul.f32 %v9996_v59, %v7653_v14  ;;  %v1774_v0 = vmul.f32 %v10015_v53, %v1286_v16 }
 0x1d2   :  { %4289 = vmatmul.mubr.f32.gmra.mxu0 %v228_v24  ;;  %v3125_v29 = vadd.f32 %v3109_v44, %v3073_v41  ;;  %v1614_v18 = vmul.f32 %v1598_v10, %v934_v13  ;;  %v1666_v30 = vmul.f32 %v1650_v3, %v934_v13  ;;  %v2478_v33 = vmul.f32 %v6073_v19, %v1270_v52 }
 0x1d3   :  { %v1702_v15 = vmul.f32 %v1686_v25, %v950_v26  ;;  %v1754_v2 = vmul.f32 %v1738_v31, %v950_v26  ;;  %v1790_v22 = vmul.f32 %v1774_v0, %v7643_v23  ;;  %v2530_v58 = vmul.f32 %v6077_v36, %v7649_v57 }
 0x1d4   :  { %4293 = vmatprep.mubr.f32.mxu0 %v3125_v29  ;;  %v1630_v47 = vadd.f32 %v1614_v18, %v1578_v40  ;;  %v2566_v56 = vmul.f32 %v9987_v11, %v1286_v16  ;;  %v3234_v59 = vmul.f32 %v6102_v27, %v1094_v7  ;;  %v3270_v53 = vmul.f32 %v6106_v28, %v1286_v16  ;;  %v10088_v27 = vld [vmem:[#allocation47_spill] sm:$0xff] }
 0x1d5   :  { %v1718_v44 = vadd.f32 %v1702_v15, %v1666_v30  ;;  %v7682_v8 = vadd.f32 %v1790_v22, %v1754_v2  ;;  %vm318_vm15 = vcmp.ge.f32.partialorder %v7618_v6, %v5894_v61  ;;  %v1078_v19 = vsub.f32 %v7618_v6, %v5894_v61 }
 0x1d6   :  { %v5633_v13 = vpop.eup %5632  ;;  %v2458_v26 = vmul.f32 %v2442_v60, %v1630_v47  ;;  %v4966_v36 = vsel %vm318_vm15, 1.0, %v9982_v48  ;;  %v1238_v11 = vsub.f32 %v5902_v63, %v7618_v6  ;;  %v2390_v7 = vmul.f32 %v10088_v27, %v7657_v43  ;;  %v10095_v27 = vld [vmem:[#allocation22_spill] sm:$0xff] }
 0x1d7   :  { %10087 = vst [vmem:[#allocation129_spill] sm:$0xff] %v7682_v8  ;;  %v181_v28 = vadd.f32 1.0, %v5633_v13  ;;  %v2494_v51 = vmul.f32 %v2478_v33, %v1718_v44  ;;  %v2546_v16 = vmul.f32 %v2530_v58, %v1718_v44  ;;  %v2582_v39 = vmul.f32 %v2566_v56, %v7682_v8  ;;  %v10090_v56 = vld [vmem:[#allocation49_spill] sm:$0xff] }
 0x1d8   :  { %v902_v24 = vsub.f32 %v4966_v36, %v7623_v38  ;;  %v1474_v41 = vmul.f32 %v6142_v42, %v1078_v19  ;;  %v1510_v61 = vmul.f32 %v6146_v1, %v1238_v11  ;;  %v2354_v60 = vmul.f32 %v6151_v54, %v1078_v19 }
 0x1d9   :  { %5634 = vrcp.f32 %v181_v28  ;;  %v2510_v10 = vadd.f32 %v2494_v51, %v2458_v26  ;;  %v7698_v3 = vadd.f32 %v2582_v39, %v2546_v16  ;;  %v2406_v63 = vmul.f32 %v2390_v7, %v1630_v47  ;;  %v5641_v47 = vld [vmem:[#allocation3] sm:$0xff] }
 0x1da   :  { %v1490_v40 = vmul.f32 %v1474_v41, %v902_v24  ;;  %v1526_v25 = vmul.f32 %v1510_v61, %v7636_v17  ;;  %v3146_v31 = vmul.f32 %v6159_v32, %v1078_v19  ;;  %v3182_v0 = vmul.f32 %v6165_v35, %v1270_v52 }
 0x1db   :  { %10089 = vst [vmem:[#allocation47_spill] sm:$0xff] %v7698_v3  ;;  %v3250_v29 = vmul.f32 %v3234_v59, %v2510_v10  ;;  %v3286_v38 = vmul.f32 %v3270_v53, %v7698_v3  ;;  %vm266_vm0 = vcmp.ge.f32.partialorder %v7618_v6, %v6179_v49  ;;  %v1062_v42 = vsub.f32 %v7618_v6, %v6179_v49 }
 0x1dc   :  { %v1542_v1 = vadd.f32 %v1526_v25, %v1490_v40  ;;  %v3198_v54 = vmul.f32 %v3182_v0, %v2510_v10  ;;  %v4950_v18 = vsel %vm266_vm0, 1.0, %v9982_v48  ;;  %v1222_v17 = vsub.f32 %v5898_v62, %v7618_v6  ;;  %v10099_v10 = vld [vmem:[#allocation19_spill] sm:$0xff] }
 0x1dd   :  { %v3302_v30 = vadd.f32 %v3286_v38, %v3250_v29  ;;  %v886_v32 = vsub.f32 %v4950_v18, %v4966_v36  ;;  %v1386_v35 = vmul.f32 %v6189_v21, %v1062_v42  ;;  %v2266_v52 = vmul.f32 %v6202_v50, %v1062_v42  ;;  %v10100_v29 = vld [vmem:[#allocation20_spill] sm:$0xff]  ;;  %v7762_v18 = vld [vmem:[#allocation8 + $0x8] sm:$0xff] }
 0x1de   :  { %v2370_v33 = vmul.f32 %v2354_v60, %v1542_v1  ;;  %v1422_v15 = vmul.f32 %v6198_v9, %v1222_v17  ;;  %v2302_v2 = vmul.f32 %v6206_v34, %v1238_v11  ;;  %v3058_v49 = vmul.f32 %v6212_v37, %v1062_v42  ;;  %v10091_v9 = vld [vmem:[#allocation45_spill] sm:$0xff]  ;;  %v10092_v34 = vld [vmem:[#allocation23_spill] sm:$0xff]  ;;  %v10093_v37 = vld [vmem:[#allocation26_spill] sm:$0xff] }
 0x1df   :  { %4443 = vmatprep.mubr.f32.mxu1 %v3302_v30  ;;  %v1402_v22 = vmul.f32 %v1386_v35, %v886_v32  ;;  %v3094_v58 = vmul.f32 %v6219_v20, %v7657_v43  ;;  %v4934_v62 = vmul.f32 -1.442695, %v7618_v6  ;;  %vm667_vm1 = vcmp.ge.f32.partialorder %v5641_v47, %v10090_v56  ;;  %v5642_v60 = vld [vmem:[#allocation8] sm:$0xff]  ;;  %v7768_v32 = vld [vmem:[#allocation9 + $0x8] sm:$0xff] }
 0x1e0   :  { %v2422_v21 = vadd.f32 %v2406_v63, %v2370_v33  ;;  %v1438_v59 = vmul.f32 %v1422_v15, %v902_v24  ;;  %v2318_v50 = vmul.f32 %v2302_v2, %v1542_v1  ;;  %v5063_v53 = vsel %vm667_vm1, 1.0, %v9982_v48  ;;  %v10101_v17 = vld [vmem:[#allocation21_spill] sm:$0xff]  ;;  %v10104_v2 = vld [vmem:[#allocation27_spill] sm:$0xff] }
 0x1e1   :  { %5636 = vpow2.f32 %v4934_v62  ;;  %vm719_vm2 = vcmp.ge.f32.partialorder %v5641_v47, %v10091_v9  ;;  %vm771_vm3 = vcmp.ge.f32.partialorder %v5641_v47, %v10092_v34  ;;  %v983_v44 = vsub.f32 %v10093_v37, %v5063_v53  ;;  %v118_v37 = vld [vmem:[#allocation9 + $0x18] sm:$0x7] }
 0x1e2   :  { %v3162_v19 = vmul.f32 %v3146_v31, %v2422_v21  ;;  %v1454_v13 = vadd.f32 %v1438_v59, %v1402_v22  ;;  %v3110_v20 = vmul.f32 %v3094_v58, %v2422_v21  ;;  %v5079_v43 = vsel %vm719_vm2, 1.0, %v9982_v48  ;;  %v5643_v31 = vld [vmem:[#allocation9] sm:$0xff]  ;;  %v7788_v21 = vld [vmem:[#allocation8 + $0x18] sm:$0x7] }
 0x1e3   :  { %v7726_v26 = vsel %vm771_vm3, 1.0, %v9982_v48  ;;  %v999_v36 = vsub.f32 %v5063_v53, %v5079_v43  ;;  %v7729_v11 = vsub.f32 %v5641_v47, %v5915_v5  ;;  %v7732_v7 = vsub.f32 %v5641_v47, %v10095_v27 }
 0x1e4   :  { %10094 = vst [vmem:[#allocation49_spill] sm:$0xff] %v7726_v26  ;;  %v3214_v28 = vadd.f32 %v3198_v54, %v3162_v19  ;;  %v2282_v51 = vmul.f32 %v2266_v52, %v1454_v13  ;;  %v7735_v16 = vsub.f32 %v5079_v43, %v7726_v26  ;;  %v7738_v39 = vsub.f32 %v5641_v47, %v10090_v56 }
 0x1e5   :  { %10096 = vst [vmem:[#allocation45_spill] sm:$0xff] %v7732_v7  ;;  %v7741_v24 = vsub.f32 %v10090_v56, %v5641_v47  ;;  %v1319_v41 = vsub.f32 %v10091_v9, %v5641_v47  ;;  %v7745_v61 = vsub.f32 %v10092_v34, %v5641_v47  ;;  %v7748_v63 = vrot.slane %v5642_v60, %v10099_v10 }
 0x1e6   :  { %10097 = vst [vmem:[#allocation23_spill] sm:$0xff] %v7735_v16  ;;  %10098 = vst [vmem:[#allocation26_spill] sm:$0xff] %v7738_v39  ;;  %v5635_v40 = vpop.eup %5634  ;;  %4444 = vmatmul.mubr.f32.gmra.mxu1 %v3214_v28  ;;  %v2334_v25 = vadd.f32 %v2318_v50, %v2282_v51  ;;  %v7751_v0 = vrot.slane %v5643_v31, %v10099_v10  ;;  %v7754_v38 = vrot.slane %v5642_v60, %v10100_v29  ;;  %v7793_v28 = vld [vmem:[#allocation8 + $0x10] sm:$0xff] }
 0x1e7   :  { %v7757_v42 = vrot.slane %v5643_v31, %v10100_v29  ;;  %v229_v1 = vmul.f32 %v5635_v40, %v7517_v55  ;;  %v1899_v54 = vmul.f32 %v7748_v63, %v7729_v11  ;;  %v7766_v30 = vrot.slane %v7762_v18, %v10101_v17  ;;  %v5647_v10 = vld [vmem:[#allocation9 + $0x10] sm:$0xff]  ;;  %v10105_v40 = vld [vmem:[#allocation17_spill] sm:$0xff] }
 0x1e8   :  { %v7772_v35 = vrot.slane %v7768_v32, %v10101_v17  ;;  %v3074_v52 = vmul.f32 %v3058_v49, %v2334_v25  ;;  %v1935_v33 = vmul.f32 %v7751_v0, %v7741_v24  ;;  %v1987_v55 = vmul.f32 %v7754_v38, %v7732_v7 }
 0x1e9   :  { %10102 = vst [vmem:[#allocation22_spill] sm:$0xff] %v7766_v30  ;;  %v2023_v15 = vmul.f32 %v7757_v42, %v1319_v41  ;;  %4294 = vmatmul.mubr.f32.gmra.mxu0 %v229_v1  ;;  %v1915_v22 = vmul.f32 %v1899_v54, %v10104_v2  ;;  %v2075_v58 = vmul.f32 %v7766_v30, %v7738_v39  ;;  %v5649_v39 = vld [vmem:[#allocation11 + $0x478] sm:$0xff] }
 0x1ea   :  { %10103 = vst [vmem:[#allocation19_spill] sm:$0xff] %v7772_v35  ;;  %v2111_v62 = vmul.f32 %v7772_v35, %v7745_v61  ;;  %v7786_v49 = vrot.slane %v7768_v32, %v10100_v29  ;;  %v3126_v47 = vadd.f32 %v3110_v20, %v3074_v52  ;;  %v1951_v59 = vmul.f32 %v1935_v33, %v983_v44 }
 0x1eb   :  { %v2003_v50 = vmul.f32 %v1987_v55, %v983_v44  ;;  %v2039_v53 = vmul.f32 %v2023_v15, %v999_v36  ;;  %v2091_v19 = vmul.f32 %v2075_v58, %v999_v36  ;;  %v7797_v51 = vrot.slane %v7793_v28, %v10101_v17 }
 0x1ec   :  { %v2127_v13 = vmul.f32 %v2111_v62, %v7735_v16  ;;  %v2727_v43 = vmul.f32 %v7786_v49, %v7741_v24  ;;  %4298 = vmatprep.mubr.f32.mxu0 %v3126_v47  ;;  %v1967_v20 = vadd.f32 %v1951_v59, %v1915_v22  ;;  %v7800_v44 = vrot.slane %v5647_v10, %v10101_v17 }
 0x1ed   :  { %v2055_v60 = vadd.f32 %v2039_v53, %v2003_v50  ;;  %v7804_v36 = vrot.slane %v7793_v28, %v10105_v40  ;;  %v2779_v31 = vmul.f32 %v7797_v51, %v7729_v11  ;;  %v7811_v1 = vrot.slane %v5647_v10, %v10105_v40 }
 0x1ee   :  { %v7806_v25 = vadd.f32 %v2127_v13, %v2091_v19  ;;  %v7815_v54 = vrot.slane %v7788_v21, %v10101_v17  ;;  %v5637_v52 = vpop.eup %5636  ;;  %v2743_v33 = vmul.f32 %v2727_v43, %v1967_v20  ;;  %v2815_v55 = vmul.f32 %v7800_v44, %v1319_v41 }
 0x1ef   :  { %v2867_v15 = vmul.f32 %v7804_v36, %v7732_v7  ;;  %v7821_v2 = vrot.slane %v118_v37, %v10101_v17  ;;  %v182_v22 = vadd.f32 1.0, %v5637_v52  ;;  %v2795_v58 = vmul.f32 %v2779_v31, %v1967_v20 }
 0x1f0   :  { %10106 = vst [vmem:[#allocation20_spill] sm:$0xff] %v7806_v25  ;;  %v2903_v62 = vmul.f32 %v7811_v1, %v7745_v61  ;;  %v7827_v47 = vrot.slane %v7788_v21, %v10105_v40  ;;  %v2831_v59 = vmul.f32 %v2815_v55, %v2055_v60  ;;  %v7831_v19 = vrot.slane %v118_v37, %v10105_v40 }
 0x1f1   :  { %v2883_v50 = vmul.f32 %v2867_v15, %v2055_v60  ;;  %v3519_v53 = vmul.f32 %v7821_v2, %v1319_v41  ;;  %5638 = vrcp.f32 %v182_v22  ;;  %v7838_v43 = vrot.slane %v7762_v18, %v10100_v29  ;;  %v10107_v60 = vld [vmem:[#allocation29_spill] sm:$0xff]  ;;  %v7855_v15 = vld [vmem:[#allocation3 + $0x8] sm:$0xff] }
 0x1f2   :  { %v2919_v17 = vmul.f32 %v2903_v62, %v7806_v25  ;;  %v3571_v13 = vmul.f32 %v7827_v47, %v7729_v11  ;;  %v2847_v20 = vadd.f32 %v2831_v59, %v2795_v58  ;;  %v3607_v31 = vmul.f32 %v7831_v19, %v7745_v61  ;;  %v10109_v58 = vld [vmem:[#allocation28_spill] sm:$0xff] }
 0x1f3   :  { %v3483_v41 = vmul.f32 %v7815_v54, %v10107_v60  ;;  %v7846_v37 = vrot.slane %v7793_v28, %v10100_v29  ;;  %v2691_v11 = vmul.f32 %v7838_v43, %v10107_v60  ;;  %v7853_v55 = vrot.slane %v5647_v10, %v10100_v29  ;;  %v10111_v10 = vld [vmem:[#allocation46_spill] sm:$0xff] }
 0x1f4   :  { %v7848_v52 = vadd.f32 %v2919_v17, %v2883_v50  ;;  %vm616_vm4 = vcmp.ge.f32.partialorder %v7855_v15, %v10095_v27  ;;  %v3535_v61 = vmul.f32 %v3519_v53, %v2847_v20  ;;  %v3587_v22 = vmul.f32 %v3571_v13, %v2847_v20  ;;  %v10110_v17 = vld [vmem:[#allocation38_spill] sm:$0xff] }
 0x1f5   :  { %v3395_v62 = vmul.f32 %v7846_v37, %v10109_v58  ;;  %v5048_v59 = vsel %vm616_vm4, 1.0, %v9982_v48  ;;  %v2707_v7 = vmul.f32 %v2691_v11, %v10110_v17  ;;  %v3431_v29 = vmul.f32 %v7853_v55, %v7741_v24  ;;  %v10113_v24 = vld [vmem:[#allocation24_spill] sm:$0xff]  ;;  %v10114_v58 = vld [vmem:[#allocation50_spill] sm:$0xff] }
 0x1f6   :  { %10108 = vst [vmem:[#allocation21_spill] sm:$0xff] %v7848_v52  ;;  %v3623_v50 = vmul.f32 %v3607_v31, %v7848_v52  ;;  %vm668_vm5 = vcmp.ge.f32.partialorder %v7855_v15, %v10090_v56  ;;  %vm720_vm6 = vcmp.ge.f32.partialorder %v7855_v15, %v10091_v9  ;;  %vm772_vm7 = vcmp.ge.f32.partialorder %v7855_v15, %v10092_v34 }
 0x1f7   :  { %v3411_v60 = vmul.f32 %v3395_v62, %v10111_v10  ;;  %v5064_v53 = vsel %vm668_vm5, 1.0, %v9982_v48  ;;  %v2759_v20 = vadd.f32 %v2743_v33, %v2707_v7  ;;  %v5080_v31 = vsel %vm720_vm6, 1.0, %v9982_v48 }
 0x1f8   :  { %v3639_v13 = vadd.f32 %v3623_v50, %v3587_v22  ;;  %v7876_v11 = vsel %vm772_vm7, 1.0, %v9982_v48  ;;  %vm824_vm8 = vcmp.ge.f32.partialorder %v7855_v15, %v10113_v24  ;;  %v7881_v62 = vsub.f32 %v10114_v58, %v5048_v59 }
 0x1f9   :  { %10112 = vst [vmem:[#allocation27_spill] sm:$0xff] %v7876_v11  ;;  %v984_v17 = vsub.f32 %v5048_v59, %v5064_v53  ;;  %v3499_v10 = vmul.f32 %v3483_v41, %v2759_v20  ;;  %v3447_v52 = vmul.f32 %v3431_v29, %v2759_v20  ;;  %v7884_v25 = vsel %vm824_vm8, 1.0, %v9982_v48 }
 0x1fa   :  { %4658 = vmatprep.mubr.f32.mxu1 %v3639_v13  ;;  %10115 = vst [vmem:[#allocation17_spill] sm:$0xff] %v7884_v25  ;;  %v1000_v22 = vsub.f32 %v5064_v53, %v5080_v31  ;;  %v1016_v7 = vsub.f32 %v5080_v31, %v7876_v11  ;;  %v1144_v33 = vsub.f32 %v7855_v15, %v5915_v5  ;;  %v4156_v11 = vld [vmem:[#allocation11 + $0x468] sm:$0xff] }
 0x1fb   :  { %v1160_v50 = vsub.f32 %v7855_v15, %v10095_v27  ;;  %v1176_v58 = vsub.f32 %v7855_v15, %v10090_v56  ;;  %v3551_v16 = vadd.f32 %v3535_v61, %v3499_v10  ;;  %v3463_v59 = vadd.f32 %v3447_v52, %v3411_v60  ;;  %v7906_v61 = vld [vmem:[#allocation11 + $0x470] sm:$0xff] }
 0x1fc   :  { %v7897_v29 = vsub.f32 %v10090_v56, %v7855_v15  ;;  %v1192_v53 = vsub.f32 %v7855_v15, %v10091_v9  ;;  %v1320_v13 = vsub.f32 %v10091_v9, %v7855_v15  ;;  %v1336_v20 = vsub.f32 %v10092_v34, %v7855_v15 }
 0x1fd   :  { %v1900_v31 = vmul.f32 %v7748_v63, %v1144_v33  ;;  %4659 = vmatmul.mubr.f32.vlgmr.msra.gmra.mxu1 %v3551_v16  ;;  %v7910_v52 = vsub.f32 %v10113_v24, %v7855_v15  ;;  %v1988_v10 = vmul.f32 %v7754_v38, %v1160_v50  ;;  %v2076_v41 = vmul.f32 %v7766_v30, %v1176_v58 }
 0x1fe   :  { %v1936_v60 = vmul.f32 %v7751_v0, %v7897_v29  ;;  %v5639_v26 = vpop.eup %5638  ;;  %5551 = vmatpush3.msra.mxu1 %v5649_v39  ;;  %v2024_v57 = vmul.f32 %v7757_v42, %v1320_v13  ;;  %v2112_v16 = vmul.f32 %v7772_v35, %v1336_v20  ;;  %v7921_v8 = vrot.slane %v7762_v18, %v10105_v40 }
 0x1ff   :  { %10116 = vst [vmem:[#allocation29_spill] sm:$0xff] %v7910_v52  ;;  %v1916_v3 = vmul.f32 %v1900_v31, %v7881_v62  ;;  %v230_v14 = vmul.f32 %v5639_v26, %v7618_v6  ;;  %v2004_v12 = vmul.f32 %v1988_v10, %v984_v17  ;;  %v2092_v46 = vmul.f32 %v2076_v41, %v1000_v22 }
 0x200   :  { %10117 = vst [vmem:[#allocation28_spill] sm:$0xff] %v7921_v8  ;;  %v1952_v23 = vmul.f32 %v1936_v60, %v984_v17  ;;  %5536 = vmatprep.subr.mxu1 %v7906_v61  ;;  %v2040_v45 = vmul.f32 %v2024_v57, %v1000_v22  ;;  %v2128_v24 = vmul.f32 %v2112_v16, %v1016_v7 }
 0x201   :  { %v2164_v25 = vmul.f32 %v7921_v8, %v1192_v53  ;;  %v7928_v31 = vrot.slane %v7768_v32, %v10105_v40  ;;  %5552 = vmatpush3.msra.mxu1 %v7906_v61  ;;  %4299 = vmatmul.mubr.f32.gmra.mxu0 %v230_v14  ;;  %v2780_v6 = vmul.f32 %v7797_v51, %v1144_v33  ;;  %v10121_v14 = vld [vmem:[#allocation18_spill] sm:$0xff] }
 0x202   :  { %v1968_v18 = vadd.f32 %v1952_v23, %v1916_v3  ;;  %v2816_v26 = vmul.f32 %v7800_v44, %v1320_v13  ;;  %v2868_v17 = vmul.f32 %v7804_v36, %v1160_v50  ;;  %4513 = vmatprep.mubr.f32.mxu0 %v3463_v59  ;;  %v2056_v57 = vadd.f32 %v2040_v45, %v2004_v12  ;;  %v10124_v12 = vld [vmem:[#allocation48_spill] sm:$0xff] }
 0x203   :  { %10118 = vst [vmem:[#allocation38_spill] sm:$0xff] %v7928_v31  ;;  %v2144_v22 = vadd.f32 %v2128_v24, %v2092_v46  ;;  %v7934_v41 = vmul.f32 %v2164_v25, %v1016_v7  ;;  %v7938_v32 = vmul.f32 %v7928_v31, %v7910_v52  ;;  %v2904_v53 = vmul.f32 %v7811_v1, %v1336_v20  ;;  %v10132_v52 = vld [vmem:[#allocation41_spill] sm:$0xff] }
 0x204   :  { %v2796_v40 = vmul.f32 %v2780_v6, %v1968_v18  ;;  %v7943_v23 = vrot.slane %v7793_v28, %v10121_v14  ;;  %v3572_v3 = vmul.f32 %v7827_v47, %v1144_v33  ;;  %5537 = vmatprep.subr.mxu1 %v4156_v11  ;;  %v2832_v60 = vmul.f32 %v2816_v26, %v2056_v57  ;;  %v10126_v26 = vld [vmem:[#allocation35_spill] sm:$0xff] }
 0x205   :  { %10119 = vst [vmem:[#allocation46_spill] sm:$0xff] %v7934_v41  ;;  %10120 = vst [vmem:[#allocation50_spill] sm:$0xff] %v7938_v32  ;;  %v2884_v59 = vmul.f32 %v2868_v17, %v2056_v57  ;;  %v3608_v45 = vmul.f32 %v7831_v19, %v1336_v20  ;;  %v7949_v46 = vrot.slane %v7788_v21, %v10121_v14  ;;  %5553 = vmatpush3.msra.mxu1 %v4156_v11  ;;  %v10127_v17 = vld [vmem:[#allocation36_spill] sm:$0xff] }
 0x206   :  { %10122 = vst [vmem:[#allocation130_spill] sm:$0xff] %v7943_v23  ;;  %4514 = vmatmul.mubr.f32.vlgmr.msra.gmra.mxu0 %v10124_v12  ;;  %v2920_v25 = vmul.f32 %v2904_v53, %v2144_v22  ;;  %v2956_v24 = vmul.f32 %v7943_v23, %v1176_v58  ;;  %v1128_v28 = vsub.f32 %v7855_v15, %v5911_v4  ;;  %v4155_v12 = vld [vmem:[#allocation11 + $0x460] sm:$0xff] }
 0x207   :  { %10123 = vst [vmem:[#allocation131_spill] sm:$0xff] %v7949_v46  ;;  %v1288_v7 = vsub.f32 %v10095_v27, %v7855_v15  ;;  %5480 = vmatpush3.msra.mxu0 %v5649_v39  ;;  %v2848_v33 = vadd.f32 %v2832_v60, %v2796_v40  ;;  %v3660_v20 = vmul.f32 %v7949_v46, %v1160_v50 }
 0x208   :  { %v2728_v21 = vmul.f32 %v7786_v49, %v7897_v29  ;;  %v3520_v10 = vmul.f32 %v7821_v2, %v1320_v13  ;;  %v2936_v16 = vadd.f32 %v2920_v25, %v2884_v59  ;;  %v7961_v6 = vmul.f32 %v2956_v24, %v2144_v22  ;;  %5481 = vmatprep.subr.mxu0 %v7906_v61  ;;  %v10129_v13 = vld [vmem:[#allocation51_spill] sm:$0xff]  ;;  %v10130_v24 = vld [vmem:[#allocation53_spill] sm:$0xff] }
 0x209   :  { %v1812_v58 = vmul.f32 %v10126_v26, %v1128_v28  ;;  %v1848_v57 = vmul.f32 %v10127_v17, %v1288_v7  ;;  %v3588_v53 = vmul.f32 %v3572_v3, %v2848_v33  ;;  %v2692_v39 = vmul.f32 %v7838_v43, %v1128_v28  ;;  %5482 = vmatpush3.msra.mxu0 %v7906_v61 }
 0x20a   :  { %10125 = vst [vmem:[#allocation48_spill] sm:$0xff] %v7961_v6  ;;  %v2744_v15 = vmul.f32 %v2728_v21, %v1968_v18  ;;  %v3484_v50 = vmul.f32 %v7815_v54, %v1128_v28  ;;  %v3624_v40 = vmul.f32 %v3608_v45, %v2936_v16  ;;  %v7969_v60 = vmul.f32 %v3660_v20, %v2936_v16  ;;  %v10131_v6 = vld [vmem:[#allocation40_spill] sm:$0xff]  ;;  %v10134_v21 = vld [vmem:[#allocation43_spill] sm:$0xff] }
 0x20b   :  { %v1828_v22 = vmul.f32 %v1812_v58, %v10129_v13  ;;  %v1864_v59 = vmul.f32 %v1848_v57, %v7881_v62  ;;  %5483 = vmatprep.subr.mxu0 %v4156_v11  ;;  %v3536_v25 = vmul.f32 %v3520_v10, %v2848_v33  ;;  %v2604_v3 = vmul.f32 %v10131_v6, %v10130_v24  ;;  %v10133_v20 = vld [vmem:[#allocation52_spill] sm:$0xff]  ;;  %v10135_v16 = vld [vmem:[#allocation39_spill] sm:$0xff]  ;;  %v7984_v57 = vld [vmem:[#allocation3 + $0x10] sm:$0xff] }
 0x20c   :  { %10128 = vst [vmem:[#allocation35_spill] sm:$0xff] %v7969_v60  ;;  %v2640_v41 = vmul.f32 %v10132_v52, %v1288_v7  ;;  %v3396_v18 = vmul.f32 %v7846_v37, %v10130_v24  ;;  %5484 = vmatpush3.msra.mxu0 %v4156_v11  ;;  %v3640_v61 = vadd.f32 %v3624_v40, %v3588_v53  ;;  %v10136_v10 = vld [vmem:[#allocation44_spill] sm:$0xff]  ;;  %v10137_v40 = vld [vmem:[#allocation54_spill] sm:$0xff] }
 0x20d   :  { %v1880_v45 = vadd.f32 %v1864_v59, %v1828_v22  ;;  %v3432_v28 = vmul.f32 %v7853_v55, %v7897_v29  ;;  %v3308_v62 = vmul.f32 %v10134_v21, %v10133_v20  ;;  %5485 = vmatprep.subr.mxu0 %v4155_v12  ;;  %v2620_v33 = vmul.f32 %v2604_v3, %v10135_v16  ;;  %v4154_v11 = vld [vmem:[#allocation11 + $0x458] sm:$0xff]  ;;  %v10138_v59 = vld [vmem:[#allocation42_spill] sm:$0xff] }
 0x20e   :  { %v3344_v58 = vmul.f32 %v10136_v10, %v1288_v7  ;;  %vm617_vm9 = vcmp.ge.f32.partialorder %v7984_v57, %v10095_v27  ;;  %vm669_vm10 = vcmp.ge.f32.partialorder %v7984_v57, %v10090_v56  ;;  %5538 = vmatprep.subr.mxu1 %v4155_v12  ;;  %4663 = vmatprep.mubr.f32.mxu1 %v3640_v61 }
 0x20f   :  { %v2708_v29 = vmul.f32 %v2692_v39, %v1880_v45  ;;  %v2656_v53 = vmul.f32 %v2640_v41, %v1880_v45  ;;  %v3324_v13 = vmul.f32 %v3308_v62, %v10137_v40  ;;  %v5049_v22 = vsel %vm617_vm9, 1.0, %v9982_v48  ;;  %5486 = vmatpush3.msra.mxu0 %v4155_v12  ;;  %5554 = vmatpush3.msra.mxu1 %v4155_v12  ;;  %v4153_v45 = vld [vmem:[#allocation11 + $0x450] sm:$0xff] }
 0x210   :  { %v5065_v7 = vsel %vm669_vm10, 1.0, %v9982_v48  ;;  %vm721_vm11 = vcmp.ge.f32.partialorder %v7984_v57, %v10091_v9  ;;  %vm773_vm12 = vcmp.ge.f32.partialorder %v7984_v57, %v10092_v34  ;;  %v7998_v24 = vsub.f32 %v10138_v59, %v5049_v22  ;;  %5487 = vmatprep.subr.mxu0 %v4154_v11  ;;  %5539 = vmatprep.subr.mxu1 %v4154_v11 }
 0x211   :  { %v2760_v39 = vadd.f32 %v2744_v15, %v2708_v29  ;;  %v2672_v41 = vadd.f32 %v2656_v53, %v2620_v33  ;;  %v5081_v3 = vsel %vm721_vm11, 1.0, %v9982_v48  ;;  %v8002_v61 = vsel %vm773_vm12, 1.0, %v9982_v48  ;;  %5488 = vmatpush3.msra.mxu0 %v4154_v11  ;;  %5555 = vmatpush3.msra.mxu1 %v4154_v11 }
 0x212   :  { %10139 = vst [vmem:[#allocation36_spill] sm:$0xff] %v8002_v61  ;;  %v985_v20 = vsub.f32 %v5049_v22, %v5065_v7  ;;  %v1001_v62 = vsub.f32 %v5065_v7, %v5081_v3  ;;  %v8005_v16 = vsub.f32 %v5081_v3, %v8002_v61  ;;  %v1145_v40 = vsub.f32 %v7984_v57, %v5915_v5 }
 0x213   :  { %v3500_v12 = vmul.f32 %v3484_v50, %v2760_v39  ;;  %v3412_v15 = vmul.f32 %v3396_v18, %v2672_v41  ;;  %v3448_v33 = vmul.f32 %v3432_v28, %v2760_v39  ;;  %v3360_v29 = vmul.f32 %v3344_v58, %v2672_v41  ;;  %5489 = vmatprep.subr.mxu0 %v4153_v45 }
 0x214   :  { %10140 = vst [vmem:[#allocation51_spill] sm:$0xff] %v8005_v16  ;;  %v8011_v53 = vsub.f32 %v7984_v57, %v10095_v27  ;;  %v8015_v22 = vsub.f32 %v7984_v57, %v10090_v56  ;;  %v8019_v7 = vsub.f32 %v10090_v56, %v7984_v57  ;;  %v1321_v11 = vsub.f32 %v10091_v9, %v7984_v57 }
 0x215   :  { %5540 = vmatprep.subr.mxu1 %v4153_v45  ;;  %v3552_v50 = vadd.f32 %v3536_v25, %v3500_v12  ;;  %v3464_v18 = vadd.f32 %v3448_v33, %v3412_v15  ;;  %v3376_v28 = vadd.f32 %v3360_v29, %v3324_v13  ;;  %v1337_v58 = vsub.f32 %v10092_v34, %v7984_v57  ;;  %v4152_v15 = vld [vmem:[#allocation11 + $0x448] sm:$0xff] }
 0x216   :  { %10141 = vst [vmem:[#allocation53_spill] sm:$0xff] %v8011_v53  ;;  %10142 = vst [vmem:[#allocation40_spill] sm:$0xff] %v8015_v22  ;;  %5490 = vmatpush3.msra.mxu0 %v4153_v45  ;;  %v1901_v59 = vmul.f32 %v7748_v63, %v1145_v40  ;;  %v1937_v39 = vmul.f32 %v7751_v0, %v8019_v7  ;;  %v1989_v41 = vmul.f32 %v7754_v38, %v8011_v53 }
 0x217   :  { %v2025_v3 = vmul.f32 %v7757_v42, %v1321_v11  ;;  %5556 = vmatpush3.msra.mxu1 %v4153_v45  ;;  %4518 = vmatprep.mubr.f32.mxu0 %v3464_v18  ;;  %v2077_v25 = vmul.f32 %v7766_v30, %v8015_v22  ;;  %v2113_v13 = vmul.f32 %v7772_v35, %v1337_v58 }
 0x218   :  { %4664 = vmatmul.mubr.f32.gmra.mxu1 %v3552_v50  ;;  %v2781_v12 = vmul.f32 %v7797_v51, %v1145_v40  ;;  %4519 = vmatmul.mubr.f32.gmra.mxu0 %v3376_v28  ;;  %v1917_v33 = vmul.f32 %v1901_v59, %v7998_v24  ;;  %v1953_v29 = vmul.f32 %v1937_v39, %v985_v20 }
 0x219   :  { %v2005_v61 = vmul.f32 %v1989_v41, %v985_v20  ;;  %v2041_v60 = vmul.f32 %v2025_v3, %v1001_v62  ;;  %v2093_v14 = vmul.f32 %v2077_v25, %v1001_v62  ;;  %v2129_v46 = vmul.f32 %v2113_v13, %v8005_v16  ;;  %5491 = vmatprep.subr.mxu0 %v4152_v15  ;;  %v4151_v41 = vld [vmem:[#allocation11 + $0x440] sm:$0xff] }
 0x21a   :  { %v2817_v45 = vmul.f32 %v7800_v44, %v1321_v11  ;;  %v2869_v50 = vmul.f32 %v7804_v36, %v8011_v53  ;;  %v1969_v18 = vadd.f32 %v1953_v29, %v1917_v33  ;;  %v2905_v23 = vmul.f32 %v7811_v1, %v1337_v58  ;;  %5541 = vmatprep.subr.mxu1 %v4152_v15  ;;  %v10145_v29 = vld [vmem:[#allocation25_spill] sm:$0xff] }
 0x21b   :  { %v2057_v22 = vadd.f32 %v2041_v60, %v2005_v61  ;;  %v3573_v28 = vmul.f32 %v7827_v47, %v1145_v40  ;;  %v8042_v59 = vadd.f32 %v2129_v46, %v2093_v14  ;;  %v3609_v20 = vmul.f32 %v7831_v19, %v1337_v58  ;;  %5492 = vmatpush3.msra.mxu0 %v4152_v15 }
 0x21c   :  { %v1129_v62 = vsub.f32 %v7984_v57, %v5911_v4  ;;  %v1289_v39 = vsub.f32 %v10095_v27, %v7984_v57  ;;  %v2797_v3 = vmul.f32 %v2781_v12, %v1969_v18  ;;  %v2729_v61 = vmul.f32 %v7786_v49, %v8019_v7  ;;  %5557 = vmatpush3.msra.mxu1 %v4152_v15 }
 0x21d   :  { %10143 = vst [vmem:[#allocation41_spill] sm:$0xff] %v8042_v59  ;;  %v2833_v25 = vmul.f32 %v2817_v45, %v2057_v22  ;;  %v2885_v60 = vmul.f32 %v2869_v50, %v2057_v22  ;;  %v2921_v14 = vmul.f32 %v2905_v23, %v8042_v59  ;;  %5493 = vmatprep.subr.mxu0 %v4151_v41  ;;  %v10146_v45 = vld [vmem:[#allocation56_spill] sm:$0xff] }
 0x21e   :  { %v1813_v46 = vmul.f32 %v10126_v26, %v1129_v62  ;;  %v1849_v40 = vmul.f32 %v10127_v17, %v1289_v39  ;;  %v2693_v58 = vmul.f32 %v7838_v43, %v1129_v62  ;;  %v2745_v57 = vmul.f32 %v2729_v61, %v1969_v18  ;;  %5542 = vmatprep.subr.mxu1 %v4151_v41  ;;  %v10148_v61 = vld [vmem:[#allocation55_spill] sm:$0xff] }
 0x21f   :  { %v2849_v13 = vadd.f32 %v2833_v25, %v2797_v3  ;;  %v3485_v33 = vmul.f32 %v7815_v54, %v1129_v62  ;;  %v3521_v12 = vmul.f32 %v7821_v2, %v1321_v11  ;;  %v8057_v22 = vadd.f32 %v2921_v14, %v2885_v60  ;;  %5494 = vmatpush3.msra.mxu0 %v4151_v41  ;;  %v10147_v25 = vld [vmem:[#allocation33_spill] sm:$0xff] }
 0x220   :  { %v1829_v15 = vmul.f32 %v1813_v46, %v10145_v29  ;;  %v1865_v23 = vmul.f32 %v1849_v40, %v7998_v24  ;;  %v2605_v50 = vmul.f32 %v10131_v6, %v10146_v45  ;;  %v2641_v3 = vmul.f32 %v10132_v52, %v1289_v39  ;;  %5558 = vmatpush3.msra.mxu1 %v4151_v41  ;;  %v5651_v46 = vld [vmem:[#allocation3 + $0x18] sm:$0xff] }
 0x221   :  { %10144 = vst [vmem:[#allocation52_spill] sm:$0xff] %v8057_v22  ;;  %v3589_v59 = vmul.f32 %v3573_v28, %v2849_v13  ;;  %v3537_v53 = vmul.f32 %v3521_v12, %v2849_v13  ;;  %v3397_v18 = vmul.f32 %v7846_v37, %v10146_v45  ;;  %v3625_v11 = vmul.f32 %v3609_v20, %v8057_v22  ;;  %v10149_v12 = vld [vmem:[#allocation32_spill] sm:$0xff] }
 0x222   :  { %v1881_v62 = vadd.f32 %v1865_v23, %v1829_v15  ;;  %v2621_v60 = vmul.f32 %v2605_v50, %v10147_v25  ;;  %v3433_v24 = vmul.f32 %v7853_v55, %v8019_v7  ;;  %v3309_v14 = vmul.f32 %v10134_v21, %v10148_v61 }
 0x223   :  { %v3345_v28 = vmul.f32 %v10136_v10, %v1289_v39  ;;  %vm618_vm13 = vcmp.ge.f32.partialorder %v5651_v46, %v10095_v27  ;;  %vm670_vm14 = vcmp.ge.f32.partialorder %v5651_v46, %v10090_v56  ;;  %v3641_v40 = vadd.f32 %v3625_v11, %v3589_v59  ;;  %v4150_v59 = vld [vmem:[#allocation11 + $0x438] sm:$0xff] }
 0x224   :  { %v2709_v41 = vmul.f32 %v2693_v58, %v1881_v62  ;;  %v2657_v13 = vmul.f32 %v2641_v3, %v1881_v62  ;;  %v5050_v20 = vsel %vm618_vm13, 1.0, %v9982_v48  ;;  %v3325_v29 = vmul.f32 %v3309_v14, %v10149_v12  ;;  %v10151_v58 = vld [vmem:[#allocation30_spill] sm:$0xff]  ;;  %5495 = vmatprep.subr.mxu0 %v4150_v59  ;;  %5543 = vmatprep.subr.mxu1 %v4150_v59 }
 0x225   :  { %v5066_v15 = vsel %vm670_vm14, 1.0, %v9982_v48  ;;  %vm722_vm15 = vcmp.ge.f32.partialorder %v5651_v46, %v10091_v9  ;;  %vm774_vm0 = vcmp.ge.f32.partialorder %v5651_v46, %v10092_v34  ;;  %4668 = vmatprep.mubr.f32.mxu1 %v3641_v40  ;;  %v970_v50 = vsub.f32 %v10151_v58, %v5050_v20  ;;  %5496 = vmatpush3.msra.mxu0 %v4150_v59 }
 0x226   :  { %v2761_v7 = vadd.f32 %v2745_v57, %v2709_v41  ;;  %v2673_v39 = vadd.f32 %v2657_v13, %v2621_v60  ;;  %v5082_v23 = vsel %vm722_vm15, 1.0, %v9982_v48  ;;  %v8082_v45 = vsel %vm774_vm0, 1.0, %v9982_v48  ;;  %5559 = vmatpush3.msra.mxu1 %v4150_v59 }
 0x227   :  { %10150 = vst [vmem:[#allocation43_spill] sm:$0xff] %v8082_v45  ;;  %v986_v3 = vsub.f32 %v5050_v20, %v5066_v15  ;;  %v1002_v11 = vsub.f32 %v5066_v15, %v5082_v23  ;;  %v8086_v62 = vsub.f32 %v5082_v23, %v8082_v45  ;;  %v1146_v57 = vsub.f32 %v5651_v46, %v5915_v5 }
 0x228   :  { %v3501_v25 = vmul.f32 %v3485_v33, %v2761_v7  ;;  %v3413_v61 = vmul.f32 %v3397_v18, %v2673_v39  ;;  %v3449_v14 = vmul.f32 %v3433_v24, %v2761_v7  ;;  %v3361_v40 = vmul.f32 %v3345_v28, %v2673_v39 }
 0x229   :  { %10152 = vst [vmem:[#allocation39_spill] sm:$0xff] %v8086_v62  ;;  %v8090_v60 = vsub.f32 %v5651_v46, %v10095_v27  ;;  %v8093_v41 = vsub.f32 %v5651_v46, %v10090_v56  ;;  %v1306_v13 = vsub.f32 %v10090_v56, %v5651_v46  ;;  %v1322_v33 = vsub.f32 %v10091_v9, %v5651_v46 }
 0x22a   :  { %v3553_v20 = vadd.f32 %v3537_v53, %v3501_v25  ;;  %v3465_v12 = vadd.f32 %v3449_v14, %v3413_v61  ;;  %v3377_v15 = vadd.f32 %v3361_v40, %v3325_v29  ;;  %v1338_v18 = vsub.f32 %v10092_v34, %v5651_v46 }
 0x22b   :  { %10153 = vst [vmem:[#allocation44_spill] sm:$0xff] %v8090_v60  ;;  %10154 = vst [vmem:[#allocation54_spill] sm:$0xff] %v8093_v41  ;;  %v1902_v24 = vmul.f32 %v7748_v63, %v1146_v57  ;;  %v1938_v28 = vmul.f32 %v7751_v0, %v1306_v13  ;;  %v1990_v7 = vmul.f32 %v7754_v38, %v8090_v60 }
 0x22c   :  { %4669 = vmatmul.mubr.f32.gmra.mxu1 %v3553_v20  ;;  %4523 = vmatprep.mubr.f32.mxu0 %v3465_v12  ;;  %v2026_v39 = vmul.f32 %v7757_v42, %v1322_v33  ;;  %v2078_v53 = vmul.f32 %v7766_v30, %v8093_v41  ;;  %v2782_v29 = vmul.f32 %v7797_v51, %v1146_v57 }
 0x22d   :  { %4524 = vmatmul.mubr.f32.gmra.mxu0 %v3377_v15  ;;  %v1918_v23 = vmul.f32 %v1902_v24, %v970_v50  ;;  %v1954_v59 = vmul.f32 %v1938_v28, %v986_v3  ;;  %v2006_v58 = vmul.f32 %v1990_v7, %v986_v3  ;;  %v2114_v25 = vmul.f32 %v7772_v35, %v1338_v18 }
 0x22e   :  { %v2042_v61 = vmul.f32 %v2026_v39, %v1002_v11  ;;  %v2094_v14 = vmul.f32 %v2078_v53, %v1002_v11  ;;  %v2818_v40 = vmul.f32 %v7800_v44, %v1322_v33  ;;  %v2870_v20 = vmul.f32 %v7804_v36, %v8090_v60 }
 0x22f   :  { %v1970_v12 = vadd.f32 %v1954_v59, %v1918_v23  ;;  %v2130_v22 = vmul.f32 %v2114_v25, %v8086_v62  ;;  %v2906_v41 = vmul.f32 %v7811_v1, %v1338_v18  ;;  %v3574_v45 = vmul.f32 %v7827_v47, %v1146_v57  ;;  %v10157_v62 = vld [vmem:[#allocation59_spill] sm:$0xff] }
 0x230   :  { %v2058_v15 = vadd.f32 %v2042_v61, %v2006_v58  ;;  %v3610_v24 = vmul.f32 %v7831_v19, %v1338_v18  ;;  %v1130_v3 = vsub.f32 %v5651_v46, %v5911_v4  ;;  %v1290_v28 = vsub.f32 %v10095_v27, %v5651_v46 }
 0x231   :  { %v8116_v11 = vadd.f32 %v2130_v22, %v2094_v14  ;;  %v2798_v7 = vmul.f32 %v2782_v29, %v1970_v12  ;;  %v2730_v39 = vmul.f32 %v7786_v49, %v1306_v13  ;;  %v3522_v53 = vmul.f32 %v7821_v2, %v1322_v33  ;;  %v10156_v14 = vld [vmem:[#allocation57_spill] sm:$0xff] }
 0x232   :  { %v2834_v23 = vmul.f32 %v2818_v40, %v2058_v15  ;;  %v2886_v59 = vmul.f32 %v2870_v20, %v2058_v15  ;;  %v1814_v25 = vmul.f32 %v10126_v26, %v1130_v3  ;;  %v1850_v57 = vmul.f32 %v10127_v17, %v1290_v28 }
 0x233   :  { %10155 = vst [vmem:[#allocation42_spill] sm:$0xff] %v8116_v11  ;;  %v2922_v58 = vmul.f32 %v2906_v41, %v8116_v11  ;;  %v2694_v18 = vmul.f32 %v7838_v43, %v1130_v3  ;;  %v2746_v61 = vmul.f32 %v2730_v39, %v1970_v12  ;;  %v3486_v46 = vmul.f32 %v7815_v54, %v1130_v3  ;;  %v10159_v3 = vld [vmem:[#allocation31_spill] sm:$0xff] }
 0x234   :  { %v2850_v22 = vadd.f32 %v2834_v23, %v2798_v7  ;;  %v1830_v29 = vmul.f32 %v1814_v25, %v10156_v14  ;;  %v1866_v60 = vmul.f32 %v1850_v57, %v970_v50  ;;  %v2606_v33 = vmul.f32 %v10131_v6, %v10157_v62  ;;  %v10160_v50 = vld [vmem:[#allocation58_spill] sm:$0xff]  ;;  %v5652_v57 = vld [vmem:[#allocation3 + $0x20] sm:$0xff] }
 0x235   :  { %v8128_v40 = vadd.f32 %v2922_v58, %v2886_v59  ;;  %v2642_v20 = vmul.f32 %v10132_v52, %v1290_v28  ;;  %v3398_v15 = vmul.f32 %v7846_v37, %v10157_v62  ;;  %v3434_v41 = vmul.f32 %v7853_v55, %v1306_v13 }
 0x236   :  { %v3590_v11 = vmul.f32 %v3574_v45, %v2850_v22  ;;  %v1882_v12 = vadd.f32 %v1866_v60, %v1830_v29  ;;  %v3538_v39 = vmul.f32 %v3522_v53, %v2850_v22  ;;  %v2622_v7 = vmul.f32 %v2606_v33, %v10159_v3  ;;  %v10161_v60 = vld [vmem:[#allocation60_spill] sm:$0xff]  ;;  %v10163_v29 = vld [vmem:[#allocation61_spill] sm:$0xff] }
 0x237   :  { %10158 = vst [vmem:[#allocation25_spill] sm:$0xff] %v8128_v40  ;;  %v3626_v23 = vmul.f32 %v3610_v24, %v8128_v40  ;;  %v3310_v25 = vmul.f32 %v10134_v21, %v10160_v50  ;;  %v3346_v59 = vmul.f32 %v10136_v10, %v1290_v28  ;;  %vm619_vm1 = vcmp.ge.f32.partialorder %v5652_v57, %v10095_v27 }
 0x238   :  { %v2710_v58 = vmul.f32 %v2694_v18, %v1882_v12  ;;  %v2658_v14 = vmul.f32 %v2642_v20, %v1882_v12  ;;  %v5051_v62 = vsel %vm619_vm1, 1.0, %v9982_v48  ;;  %vm671_vm2 = vcmp.ge.f32.partialorder %v5652_v57, %v10090_v56 }
 0x239   :  { %v3642_v45 = vadd.f32 %v3626_v23, %v3590_v11  ;;  %v3326_v13 = vmul.f32 %v3310_v25, %v10161_v60  ;;  %v5067_v53 = vsel %vm671_vm2, 1.0, %v9982_v48  ;;  %vm723_vm3 = vcmp.ge.f32.partialorder %v5652_v57, %v10091_v9 }
 0x23a   :  { %v2762_v24 = vadd.f32 %v2746_v61, %v2710_v58  ;;  %v2674_v22 = vadd.f32 %v2658_v14, %v2622_v7  ;;  %v5083_v28 = vsel %vm723_vm3, 1.0, %v9982_v48  ;;  %vm775_vm4 = vcmp.ge.f32.partialorder %v5652_v57, %v10092_v34 }
 0x23b   :  { %4673 = vmatprep.mubr.f32.mxu1 %v3642_v45  ;;  %v8148_v18 = vsel %vm775_vm4, 1.0, %v9982_v48  ;;  %v971_v33 = vsub.f32 %v10163_v29, %v5051_v62  ;;  %v987_v20 = vsub.f32 %v5051_v62, %v5067_v53  ;;  %v1003_v11 = vsub.f32 %v5067_v53, %v5083_v28 }
 0x23c   :  { %10162 = vst [vmem:[#allocation56_spill] sm:$0xff] %v8148_v18  ;;  %v3502_v12 = vmul.f32 %v3486_v46, %v2762_v24  ;;  %v3414_v3 = vmul.f32 %v3398_v15, %v2674_v22  ;;  %v3450_v23 = vmul.f32 %v3434_v41, %v2762_v24  ;;  %v3362_v50 = vmul.f32 %v3346_v59, %v2674_v22  ;;  %v4149_v46 = vld [vmem:[#allocation11 + $0x430] sm:$0xff] }
 0x23d   :  { %v8152_v25 = vsub.f32 %v5083_v28, %v8148_v18  ;;  %v1147_v61 = vsub.f32 %v5652_v57, %v5915_v5  ;;  %v8156_v7 = vsub.f32 %v5652_v57, %v10095_v27  ;;  %v8159_v58 = vsub.f32 %v5652_v57, %v10090_v56  ;;  %5497 = vmatprep.subr.mxu0 %v4149_v46 }
 0x23e   :  { %v3554_v14 = vadd.f32 %v3538_v39, %v3502_v12  ;;  %v3466_v45 = vadd.f32 %v3450_v23, %v3414_v3  ;;  %v3378_v60 = vadd.f32 %v3362_v50, %v3326_v13  ;;  %v1307_v62 = vsub.f32 %v10090_v56, %v5652_v57  ;;  %5544 = vmatprep.subr.mxu1 %v4149_v46 }
 0x23f   :  { %10164 = vst [vmem:[#allocation33_spill] sm:$0xff] %v8152_v25  ;;  %10165 = vst [vmem:[#allocation55_spill] sm:$0xff] %v8156_v7  ;;  %v1323_v15 = vsub.f32 %v10091_v9, %v5652_v57  ;;  %v1339_v41 = vsub.f32 %v10092_v34, %v5652_v57  ;;  %v1903_v59 = vmul.f32 %v7748_v63, %v1147_v61  ;;  %5498 = vmatpush3.msra.mxu0 %v4149_v46 }
 0x240   :  { %10166 = vst [vmem:[#allocation32_spill] sm:$0xff] %v8159_v58  ;;  %v1991_v53 = vmul.f32 %v7754_v38, %v8156_v7  ;;  %4674 = vmatmul.mubr.f32.gmra.mxu1 %v3554_v14  ;;  %4528 = vmatprep.mubr.f32.mxu0 %v3466_v45  ;;  %v1939_v24 = vmul.f32 %v7751_v0, %v1307_v62 }
 0x241   :  { %v2079_v39 = vmul.f32 %v7766_v30, %v8159_v58  ;;  %v2783_v13 = vmul.f32 %v7797_v51, %v1147_v61  ;;  %4529 = vmatmul.mubr.f32.gmra.mxu0 %v3378_v60  ;;  %v1919_v22 = vmul.f32 %v1903_v59, %v971_v33  ;;  %v2027_v29 = vmul.f32 %v7757_v42, %v1323_v15 }
 0x242   :  { %v2007_v28 = vmul.f32 %v1991_v53, %v987_v20  ;;  %v2115_v12 = vmul.f32 %v7772_v35, %v1339_v41  ;;  %v1955_v3 = vmul.f32 %v1939_v24, %v987_v20  ;;  %v2819_v50 = vmul.f32 %v7800_v44, %v1323_v15  ;;  %5560 = vmatpush3.msra.mxu1 %v4149_v46  ;;  %v10168_v46 = vld [vmem:[#allocation62_spill] sm:$0xff] }
 0x243   :  { %v2095_v23 = vmul.f32 %v2079_v39, %v1003_v11  ;;  %v2871_v14 = vmul.f32 %v7804_v36, %v8156_v7  ;;  %v2043_v45 = vmul.f32 %v2027_v29, %v1003_v11  ;;  %v2907_v18 = vmul.f32 %v7811_v1, %v1339_v41 }
 0x244   :  { %v2131_v58 = vmul.f32 %v2115_v12, %v8152_v25  ;;  %v3575_v60 = vmul.f32 %v7827_v47, %v1147_v61  ;;  %v1971_v59 = vadd.f32 %v1955_v3, %v1919_v22  ;;  %v3611_v53 = vmul.f32 %v7831_v19, %v1339_v41 }
 0x245   :  { %v1131_v20 = vsub.f32 %v5652_v57, %v5911_v4  ;;  %v1291_v24 = vsub.f32 %v10095_v27, %v5652_v57  ;;  %v2059_v39 = vadd.f32 %v2043_v45, %v2007_v28  ;;  %v2731_v11 = vmul.f32 %v7786_v49, %v1307_v62  ;;  %v10169_v45 = vld [vmem:[#allocation64_spill] sm:$0xff] }
 0x246   :  { %v8182_v40 = vadd.f32 %v2131_v58, %v2095_v23  ;;  %v3523_v29 = vmul.f32 %v7821_v2, %v1323_v15  ;;  %v2799_v12 = vmul.f32 %v2783_v13, %v1971_v59  ;;  %v2607_v15 = vmul.f32 %v10131_v6, %v10169_v45 }
 0x247   :  { %v1815_v7 = vmul.f32 %v10126_v26, %v1131_v20  ;;  %v1851_v61 = vmul.f32 %v10127_v17, %v1291_v24  ;;  %v2695_v22 = vmul.f32 %v7838_v43, %v1131_v20  ;;  %v2835_v41 = vmul.f32 %v2819_v50, %v2059_v39 }
 0x248   :  { %10167 = vst [vmem:[#allocation30_spill] sm:$0xff] %v8182_v40  ;;  %v2887_v3 = vmul.f32 %v2871_v14, %v2059_v39  ;;  %v2923_v25 = vmul.f32 %v2907_v18, %v8182_v40  ;;  %v2747_v57 = vmul.f32 %v2731_v11, %v1971_v59  ;;  %v3487_v23 = vmul.f32 %v7815_v54, %v1131_v20  ;;  %v10171_v39 = vld [vmem:[#allocation34_spill] sm:$0xff]  ;;  %v5653_v40 = vld [vmem:[#allocation3 + $0x28] sm:$0xff] }
 0x249   :  { %v1831_v28 = vmul.f32 %v1815_v7, %v10168_v46  ;;  %v1867_v58 = vmul.f32 %v1851_v61, %v971_v33  ;;  %v2851_v13 = vadd.f32 %v2835_v41, %v2799_v12  ;;  %v2643_v31 = vmul.f32 %v10132_v52, %v1291_v24  ;;  %v10172_v7 = vld [vmem:[#allocation63_spill] sm:$0xff] }
 0x24a   :  { %v8194_v16 = vadd.f32 %v2923_v25, %v2887_v3  ;;  %v3399_v50 = vmul.f32 %v7846_v37, %v10169_v45  ;;  %v2623_v18 = vmul.f32 %v2607_v15, %v10171_v39  ;;  %v3435_v59 = vmul.f32 %v7853_v55, %v1307_v62  ;;  %v10173_v3 = vld [vmem:[#allocation65_spill] sm:$0xff] }
 0x24b   :  { %v1883_v14 = vadd.f32 %v1867_v58, %v1831_v28  ;;  %v3311_v33 = vmul.f32 %v10134_v21, %v10172_v7  ;;  %v3591_v20 = vmul.f32 %v3575_v60, %v2851_v13  ;;  %v3539_v61 = vmul.f32 %v3523_v29, %v2851_v13 }
 0x24c   :  { %10170 = vst [vmem:[#allocation57_spill] sm:$0xff] %v8194_v16  ;;  %v3627_v11 = vmul.f32 %v3611_v53, %v8194_v16  ;;  %v3347_v25 = vmul.f32 %v10136_v10, %v1291_v24  ;;  %vm620_vm5 = vcmp.ge.f32.partialorder %v5653_v40, %v10095_v27  ;;  %vm672_vm6 = vcmp.ge.f32.partialorder %v5653_v40, %v10090_v56 }
 0x24d   :  { %v2711_v12 = vmul.f32 %v2695_v22, %v1883_v14  ;;  %v2659_v41 = vmul.f32 %v2643_v31, %v1883_v14  ;;  %v3327_v46 = vmul.f32 %v3311_v33, %v10173_v3  ;;  %v5052_v58 = vsel %vm620_vm5, 1.0, %v9982_v48  ;;  %v10174_v31 = vld [vmem:[#allocation66_spill] sm:$0xff] }
 0x24e   :  { %v3643_v28 = vadd.f32 %v3627_v11, %v3591_v20  ;;  %vm724_vm7 = vcmp.ge.f32.partialorder %v5653_v40, %v10091_v9  ;;  %v5068_v53 = vsel %vm672_vm6, 1.0, %v9982_v48  ;;  %vm776_vm8 = vcmp.ge.f32.partialorder %v5653_v40, %v10092_v34 }
 0x24f   :  { %v2763_v62 = vadd.f32 %v2747_v57, %v2711_v12  ;;  %v2675_v60 = vadd.f32 %v2659_v41, %v2623_v18  ;;  %v5084_v24 = vsel %vm724_vm7, 1.0, %v9982_v48  ;;  %v972_v29 = vsub.f32 %v10174_v31, %v5052_v58 }
 0x250   :  { %4678 = vmatprep.mubr.f32.mxu1 %v3643_v28  ;;  %v988_v22 = vsub.f32 %v5052_v58, %v5068_v53  ;;  %v1004_v45 = vsub.f32 %v5068_v53, %v5084_v24  ;;  %v8215_v7 = vsel %vm776_vm8, 1.0, %v9982_v48  ;;  %v1148_v57 = vsub.f32 %v5653_v40, %v5915_v5 }
 0x251   :  { %v3503_v15 = vmul.f32 %v3487_v23, %v2763_v62  ;;  %v3415_v13 = vmul.f32 %v3399_v50, %v2675_v60  ;;  %v3451_v14 = vmul.f32 %v3435_v59, %v2763_v62  ;;  %v3363_v39 = vmul.f32 %v3347_v25, %v2675_v60  ;;  %10175 = vst [vmem:[#allocation59_spill] sm:$0xff] %v8215_v7  ;;  %v4148_v23 = vld [vmem:[#allocation11 + $0x428] sm:$0xff] }
 0x252   :  { %v8219_v18 = vsub.f32 %v5653_v40, %v10095_v27  ;;  %v8222_v33 = vsub.f32 %v5653_v40, %v10090_v56  ;;  %v8225_v41 = vsub.f32 %v5084_v24, %v8215_v7  ;;  %v1308_v50 = vsub.f32 %v10090_v56, %v5653_v40  ;;  %5499 = vmatprep.subr.mxu0 %v4148_v23  ;;  %v10182_v7 = vld [vmem:[#allocation69_spill] sm:$0xff] }
 0x253   :  { %v3555_v20 = vadd.f32 %v3539_v61, %v3503_v15  ;;  %v3467_v11 = vadd.f32 %v3451_v14, %v3415_v13  ;;  %v3379_v12 = vadd.f32 %v3363_v39, %v3327_v46  ;;  %v1324_v59 = vsub.f32 %v10091_v9, %v5653_v40  ;;  %5545 = vmatprep.subr.mxu1 %v4148_v23 }
 0x254   :  { %10176 = vst [vmem:[#allocation31_spill] sm:$0xff] %v8219_v18  ;;  %10177 = vst [vmem:[#allocation58_spill] sm:$0xff] %v8222_v33  ;;  %v1340_v25 = vsub.f32 %v10092_v34, %v5653_v40  ;;  %v1904_v3 = vmul.f32 %v7748_v63, %v1148_v57  ;;  %v1992_v61 = vmul.f32 %v7754_v38, %v8219_v18  ;;  %5500 = vmatpush3.msra.mxu0 %v4148_v23 }
 0x255   :  { %10178 = vst [vmem:[#allocation60_spill] sm:$0xff] %v8225_v41  ;;  %4679 = vmatmul.mubr.f32.gmra.mxu1 %v3555_v20  ;;  %4533 = vmatprep.mubr.f32.mxu0 %v3467_v11  ;;  %v2080_v46 = vmul.f32 %v7766_v30, %v8222_v33  ;;  %v2784_v28 = vmul.f32 %v7797_v51, %v1148_v57 }
 0x256   :  { %4534 = vmatmul.mubr.f32.gmra.mxu0 %v3379_v12  ;;  %v1920_v58 = vmul.f32 %v1904_v3, %v972_v29  ;;  %v1940_v62 = vmul.f32 %v7751_v0, %v1308_v50  ;;  %v2028_v60 = vmul.f32 %v7757_v42, %v1324_v59  ;;  %v2116_v53 = vmul.f32 %v7772_v35, %v1340_v25 }
 0x257   :  { %v2008_v24 = vmul.f32 %v1992_v61, %v988_v22  ;;  %v2096_v31 = vmul.f32 %v2080_v46, %v1004_v45  ;;  %v2820_v15 = vmul.f32 %v7800_v44, %v1324_v59  ;;  %v2872_v13 = vmul.f32 %v7804_v36, %v8219_v18  ;;  %5561 = vmatpush3.msra.mxu1 %v4148_v23  ;;  %v10180_v23 = vld [vmem:[#allocation67_spill] sm:$0xff] }
 0x258   :  { %v1956_v14 = vmul.f32 %v1940_v62, %v988_v22  ;;  %v2044_v39 = vmul.f32 %v2028_v60, %v1004_v45  ;;  %v2132_v20 = vmul.f32 %v2116_v53, %v8225_v41  ;;  %v2908_v11 = vmul.f32 %v7811_v1, %v1340_v25 }
 0x259   :  { %v3576_v12 = vmul.f32 %v7827_v47, %v1148_v57  ;;  %v3612_v3 = vmul.f32 %v7831_v19, %v1340_v25  ;;  %v1132_v61 = vsub.f32 %v5653_v40, %v5911_v4  ;;  %v1292_v46 = vsub.f32 %v10095_v27, %v5653_v40 }
 0x25a   :  { %v1972_v16 = vadd.f32 %v1956_v14, %v1920_v58  ;;  %v2060_v33 = vadd.f32 %v2044_v39, %v2008_v24  ;;  %v8248_v18 = vadd.f32 %v2132_v20, %v2096_v31  ;;  %v2732_v22 = vmul.f32 %v7786_v49, %v1308_v50 }
 0x25b   :  { %v1816_v45 = vmul.f32 %v10126_v26, %v1132_v61  ;;  %v1852_v62 = vmul.f32 %v10127_v17, %v1292_v46  ;;  %v2696_v60 = vmul.f32 %v7838_v43, %v1132_v61  ;;  %v3488_v57 = vmul.f32 %v7815_v54, %v1132_v61 }
 0x25c   :  { %10179 = vst [vmem:[#allocation61_spill] sm:$0xff] %v8248_v18  ;;  %v2800_v25 = vmul.f32 %v2784_v28, %v1972_v16  ;;  %v2836_v53 = vmul.f32 %v2820_v15, %v2060_v33  ;;  %v2888_v41 = vmul.f32 %v2872_v13, %v2060_v33  ;;  %v2924_v40 = vmul.f32 %v2908_v11, %v8248_v18  ;;  %v10183_v15 = vld [vmem:[#allocation68_spill] sm:$0xff] }
 0x25d   :  { %v1832_v58 = vmul.f32 %v1816_v45, %v10180_v23  ;;  %v1868_v24 = vmul.f32 %v1852_v62, %v972_v29  ;;  %v2748_v31 = vmul.f32 %v2732_v22, %v1972_v16  ;;  %v3524_v14 = vmul.f32 %v7821_v2, %v1324_v59  ;;  %v10185_v62 = vld [vmem:[#allocation71_spill] sm:$0xff]  ;;  %v5654_v23 = vld [vmem:[#allocation3 + $0x30] sm:$0xff] }
 0x25e   :  { %v2852_v39 = vadd.f32 %v2836_v53, %v2800_v25  ;;  %v8258_v20 = vadd.f32 %v2924_v40, %v2888_v41  ;;  %v2608_v8 = vmul.f32 %v10131_v6, %v10182_v7  ;;  %v2644_v32 = vmul.f32 %v10132_v52, %v1292_v46  ;;  %v10184_v41 = vld [vmem:[#allocation70_spill] sm:$0xff] }
 0x25f   :  { %v1884_v61 = vadd.f32 %v1868_v24, %v1832_v58  ;;  %v3400_v33 = vmul.f32 %v7846_v37, %v10182_v7  ;;  %v3436_v28 = vmul.f32 %v7853_v55, %v1308_v50  ;;  %v3312_v29 = vmul.f32 %v10134_v21, %v10183_v15 }
 0x260   :  { %10181 = vst [vmem:[#allocation62_spill] sm:$0xff] %v8258_v20  ;;  %v3592_v16 = vmul.f32 %v3576_v12, %v2852_v39  ;;  %v3628_v59 = vmul.f32 %v3612_v3, %v8258_v20  ;;  %v3540_v13 = vmul.f32 %v3524_v14, %v2852_v39  ;;  %v2624_v11 = vmul.f32 %v2608_v8, %v10184_v41  ;;  %v10186_v3 = vld [vmem:[#allocation72_spill] sm:$0xff]  ;;  %v10218_v20 = vld [vmem:[#allocation50_spill] sm:$0xff] }
 0x261   :  { %v2712_v22 = vmul.f32 %v2696_v60, %v1884_v61  ;;  %v2660_v45 = vmul.f32 %v2644_v32, %v1884_v61  ;;  %v3328_v25 = vmul.f32 %v3312_v29, %v10185_v62  ;;  %v3348_v53 = vmul.f32 %v10136_v10, %v1292_v46 }
 0x262   :  { %v3644_v40 = vadd.f32 %v3628_v59, %v3592_v16  ;;  %vm621_vm9 = vcmp.ge.f32.partialorder %v5654_v23, %v10095_v27  ;;  %vm673_vm10 = vcmp.ge.f32.partialorder %v5654_v23, %v10090_v56  ;;  %vm725_vm11 = vcmp.ge.f32.partialorder %v5654_v23, %v10091_v9 }
 0x263   :  { %v2764_v7 = vadd.f32 %v2748_v31, %v2712_v22  ;;  %v2676_v50 = vadd.f32 %v2660_v45, %v2624_v11  ;;  %v5053_v12 = vsel %vm621_vm9, 1.0, %v9982_v48  ;;  %v5069_v8 = vsel %vm673_vm10, 1.0, %v9982_v48  ;;  %v4147_v22 = vld [vmem:[#allocation11 + $0x420] sm:$0xff] }
 0x264   :  { %4683 = vmatprep.mubr.f32.mxu1 %v3644_v40  ;;  %v5085_v32 = vsel %vm725_vm11, 1.0, %v9982_v48  ;;  %vm777_vm12 = vcmp.ge.f32.partialorder %v5654_v23, %v10092_v34  ;;  %v8280_v46 = vsub.f32 %v10186_v3, %v5053_v12  ;;  %v989_v60 = vsub.f32 %v5053_v12, %v5069_v8  ;;  %5501 = vmatprep.subr.mxu0 %v4147_v22 }
 0x265   :  { %v3504_v58 = vmul.f32 %v3488_v57, %v2764_v7  ;;  %v3416_v24 = vmul.f32 %v3400_v33, %v2676_v50  ;;  %v3452_v14 = vmul.f32 %v3436_v28, %v2764_v7  ;;  %v3364_v39 = vmul.f32 %v3348_v53, %v2676_v50  ;;  %5546 = vmatprep.subr.mxu1 %v4147_v22 }
 0x266   :  { %v8283_v31 = vsel %vm777_vm12, 1.0, %v9982_v48  ;;  %v1005_v61 = vsub.f32 %v5069_v8, %v5085_v32  ;;  %v1149_v15 = vsub.f32 %v5654_v23, %v5915_v5  ;;  %v8287_v29 = vsub.f32 %v5654_v23, %v10095_v27  ;;  %5502 = vmatpush3.msra.mxu0 %v4147_v22  ;;  %5562 = vmatpush3.msra.mxu1 %v4147_v22  ;;  %v10192_v22 = vld [vmem:[#allocation73_spill] sm:$0xff] }
 0x267   :  { %10187 = vst [vmem:[#allocation64_spill] sm:$0xff] %v8283_v31  ;;  %v3556_v16 = vadd.f32 %v3540_v13, %v3504_v58  ;;  %v3468_v59 = vadd.f32 %v3452_v14, %v3416_v24  ;;  %v3380_v41 = vadd.f32 %v3364_v39, %v3328_v25  ;;  %v8290_v11 = vsub.f32 %v5085_v32, %v8283_v31 }
 0x268   :  { %10188 = vst [vmem:[#allocation34_spill] sm:$0xff] %v8287_v29  ;;  %v8293_v57 = vsub.f32 %v5654_v23, %v10090_v56  ;;  %v1309_v33 = vsub.f32 %v10090_v56, %v5654_v23  ;;  %v1325_v28 = vsub.f32 %v10091_v9, %v5654_v23  ;;  %v1341_v45 = vsub.f32 %v10092_v34, %v5654_v23 }
 0x269   :  { %10189 = vst [vmem:[#allocation63_spill] sm:$0xff] %v8290_v11  ;;  %4684 = vmatmul.mubr.f32.gmra.mxu1 %v3556_v16  ;;  %4538 = vmatprep.mubr.f32.mxu0 %v3468_v59  ;;  %v1905_v13 = vmul.f32 %v7748_v63, %v1149_v15  ;;  %v1993_v62 = vmul.f32 %v7754_v38, %v8287_v29 }
 0x26a   :  { %10190 = vst [vmem:[#allocation65_spill] sm:$0xff] %v8293_v57  ;;  %v2785_v25 = vmul.f32 %v7797_v51, %v1149_v15  ;;  %4539 = vmatmul.mubr.f32.gmra.mxu0 %v3380_v41  ;;  %v1941_v53 = vmul.f32 %v7751_v0, %v1309_v33  ;;  %v2029_v40 = vmul.f32 %v7757_v42, %v1325_v28 }
 0x26b   :  { %v2081_v7 = vmul.f32 %v7766_v30, %v8293_v57  ;;  %v2117_v50 = vmul.f32 %v7772_v35, %v1341_v45  ;;  %v1921_v12 = vmul.f32 %v1905_v13, %v8280_v46  ;;  %v2009_v8 = vmul.f32 %v1993_v62, %v989_v60 }
 0x26c   :  { %v2821_v32 = vmul.f32 %v7800_v44, %v1325_v28  ;;  %v2873_v3 = vmul.f32 %v7804_v36, %v8287_v29  ;;  %v1957_v58 = vmul.f32 %v1941_v53, %v989_v60  ;;  %v2045_v24 = vmul.f32 %v2029_v40, %v1005_v61 }
 0x26d   :  { %v2097_v14 = vmul.f32 %v2081_v7, %v1005_v61  ;;  %v2133_v39 = vmul.f32 %v2117_v50, %v8290_v11  ;;  %v2909_v16 = vmul.f32 %v7811_v1, %v1341_v45  ;;  %v3577_v59 = vmul.f32 %v7827_v47, %v1149_v15 }
 0x26e   :  { %v3613_v41 = vmul.f32 %v7831_v19, %v1341_v45  ;;  %v1133_v13 = vsub.f32 %v5654_v23, %v5911_v4  ;;  %v1973_v62 = vadd.f32 %v1957_v58, %v1921_v12  ;;  %v2061_v57 = vadd.f32 %v2045_v24, %v2009_v8 }
 0x26f   :  { %v8316_v31 = vadd.f32 %v2133_v39, %v2097_v14  ;;  %v1293_v60 = vsub.f32 %v10095_v27, %v5654_v23  ;;  %v2733_v40 = vmul.f32 %v7786_v49, %v1309_v33  ;;  %v3525_v23 = vmul.f32 %v7821_v2, %v1325_v28  ;;  %v10194_v39 = vld [vmem:[#allocation75_spill] sm:$0xff] }
 0x270   :  { %v1817_v61 = vmul.f32 %v10126_v26, %v1133_v13  ;;  %v2697_v53 = vmul.f32 %v7838_v43, %v1133_v13  ;;  %v3489_v7 = vmul.f32 %v7815_v54, %v1133_v13  ;;  %v2801_v15 = vmul.f32 %v2785_v25, %v1973_v62 }
 0x271   :  { %10191 = vst [vmem:[#allocation66_spill] sm:$0xff] %v8316_v31  ;;  %v2837_v50 = vmul.f32 %v2821_v32, %v2061_v57  ;;  %v2889_v45 = vmul.f32 %v2873_v3, %v2061_v57  ;;  %v2925_v29 = vmul.f32 %v2909_v16, %v8316_v31  ;;  %v1853_v8 = vmul.f32 %v10127_v17, %v1293_v60  ;;  %v10195_v3 = vld [vmem:[#allocation74_spill] sm:$0xff] }
 0x272   :  { %v1833_v12 = vmul.f32 %v1817_v61, %v10192_v22  ;;  %v2749_v58 = vmul.f32 %v2733_v40, %v1973_v62  ;;  %v2609_v11 = vmul.f32 %v10131_v6, %v10194_v39  ;;  %v2645_v13 = vmul.f32 %v10132_v52, %v1293_v60  ;;  %v10196_v61 = vld [vmem:[#allocation76_spill] sm:$0xff] }
 0x273   :  { %v2853_v24 = vadd.f32 %v2837_v50, %v2801_v15  ;;  %v8327_v14 = vadd.f32 %v2925_v29, %v2889_v45  ;;  %v1869_v25 = vmul.f32 %v1853_v8, %v8280_v46  ;;  %v3401_v57 = vmul.f32 %v7846_v37, %v10194_v39  ;;  %v10197_v50 = vld [vmem:[#allocation77_spill] sm:$0xff]  ;;  %v8342_v46 = vld [vmem:[#allocation3 + $0x38] sm:$0xff] }
 0x274   :  { %v3437_v32 = vmul.f32 %v7853_v55, %v1309_v33  ;;  %v3313_v16 = vmul.f32 %v10134_v21, %v10195_v3  ;;  %v2625_v40 = vmul.f32 %v2609_v11, %v10196_v61  ;;  %v3349_v22 = vmul.f32 %v10136_v10, %v1293_v60 }
 0x275   :  { %10193 = vst [vmem:[#allocation67_spill] sm:$0xff] %v8327_v14  ;;  %v3593_v62 = vmul.f32 %v3577_v59, %v2853_v24  ;;  %v3629_v28 = vmul.f32 %v3613_v41, %v8327_v14  ;;  %v3541_v29 = vmul.f32 %v3525_v23, %v2853_v24  ;;  %v1885_v15 = vadd.f32 %v1869_v25, %v1833_v12  ;;  %v10198_v12 = vld [vmem:[#allocation78_spill] sm:$0xff] }
 0x276   :  { %v3329_v45 = vmul.f32 %v3313_v16, %v10197_v50  ;;  %vm622_vm13 = vcmp.ge.f32.partialorder %v8342_v46, %v10095_v27  ;;  %vm674_vm14 = vcmp.ge.f32.partialorder %v8342_v46, %v10090_v56  ;;  %vm726_vm15 = vcmp.ge.f32.partialorder %v8342_v46, %v10091_v9 }
 0x277   :  { %v3645_v33 = vadd.f32 %v3629_v28, %v3593_v62  ;;  %v5054_v8 = vsel %vm622_vm13, 1.0, %v9982_v48  ;;  %v2713_v11 = vmul.f32 %v2697_v53, %v1885_v15  ;;  %v2661_v59 = vmul.f32 %v2645_v13, %v1885_v15 }
 0x278   :  { %v5070_v41 = vsel %vm674_vm14, 1.0, %v9982_v48  ;;  %v5086_v60 = vsel %vm726_vm15, 1.0, %v9982_v48  ;;  %vm778_vm0 = vcmp.ge.f32.partialorder %v8342_v46, %v10092_v34  ;;  %v8356_v23 = vsub.f32 %v10198_v12, %v5054_v8 }
 0x279   :  { %4688 = vmatprep.mubr.f32.mxu1 %v3645_v33  ;;  %v990_v24 = vsub.f32 %v5054_v8, %v5070_v41  ;;  %v1006_v39 = vsub.f32 %v5070_v41, %v5086_v60  ;;  %v2765_v25 = vadd.f32 %v2749_v58, %v2713_v11  ;;  %v2677_v3 = vadd.f32 %v2661_v59, %v2625_v40  ;;  %v4146_v33 = vld [vmem:[#allocation11 + $0x418] sm:$0xff] }
 0x27a   :  { %v8359_v16 = vsel %vm778_vm0, 1.0, %v9982_v48  ;;  %v1150_v53 = vsub.f32 %v8342_v46, %v5915_v5  ;;  %v8368_v62 = vsub.f32 %v8342_v46, %v10095_v27  ;;  %v8372_v28 = vsub.f32 %v8342_v46, %v10090_v56  ;;  %5503 = vmatprep.subr.mxu0 %v4146_v33  ;;  %5547 = vmatprep.subr.mxu1 %v4146_v33 }
 0x27b   :  { %10199 = vst [vmem:[#allocation69_spill] sm:$0xff] %v8359_v16  ;;  %v8364_v13 = vsub.f32 %v5086_v60, %v8359_v16  ;;  %v1310_v58 = vsub.f32 %v10090_v56, %v8342_v46  ;;  %v3505_v61 = vmul.f32 %v3489_v7, %v2765_v25  ;;  %v3417_v40 = vmul.f32 %v3401_v57, %v2677_v3  ;;  %v10216_v16 = vld [vmem:[#allocation17_spill] sm:$0xff] }
 0x27c   :  { %10201 = vst [vmem:[#allocation70_spill] sm:$0xff] %v8368_v62  ;;  %10202 = vst [vmem:[#allocation71_spill] sm:$0xff] %v8372_v28  ;;  %v3453_v15 = vmul.f32 %v3437_v32, %v2765_v25  ;;  %v3365_v50 = vmul.f32 %v3349_v22, %v2677_v3  ;;  %v1326_v8 = vsub.f32 %v10091_v9, %v8342_v46  ;;  %5504 = vmatpush3.msra.mxu0 %v4146_v33 }
 0x27d   :  { %10200 = vst [vmem:[#allocation68_spill] sm:$0xff] %v8364_v13  ;;  %v1342_v11 = vsub.f32 %v10092_v34, %v8342_v46  ;;  %v1906_v59 = vmul.f32 %v7748_v63, %v1150_v53  ;;  %v1942_v41 = vmul.f32 %v7751_v0, %v1310_v58  ;;  %v3557_v60 = vadd.f32 %v3541_v29, %v3505_v61 }
 0x27e   :  { %v3469_v12 = vadd.f32 %v3453_v15, %v3417_v40  ;;  %v3381_v14 = vadd.f32 %v3365_v50, %v3329_v45  ;;  %v1994_v7 = vmul.f32 %v7754_v38, %v8368_v62  ;;  %v2030_v22 = vmul.f32 %v7757_v42, %v1326_v8  ;;  %5563 = vmatpush3.msra.mxu1 %v4146_v33 }
 0x27f   :  { %v1922_v57 = vmul.f32 %v1906_v59, %v8356_v23  ;;  %v1958_v32 = vmul.f32 %v1942_v41, %v990_v24  ;;  %v2082_v25 = vmul.f32 %v7766_v30, %v8372_v28  ;;  %4689 = vmatmul.mubr.f32.gmra.mxu1 %v3557_v60  ;;  %v2118_v29 = vmul.f32 %v7772_v35, %v1342_v11 }
 0x280   :  { %4543 = vmatprep.mubr.f32.mxu0 %v3469_v12  ;;  %v2010_v3 = vmul.f32 %v1994_v7, %v990_v24  ;;  %v2786_v45 = vmul.f32 %v7797_v51, %v1150_v53  ;;  %v2046_v40 = vmul.f32 %v2030_v22, %v1006_v39  ;;  %v2822_v50 = vmul.f32 %v7800_v44, %v1326_v8 }
 0x281   :  { %4544 = vmatmul.mubr.f32.gmra.mxu0 %v3381_v14  ;;  %v1974_v61 = vadd.f32 %v1958_v32, %v1922_v57  ;;  %v2098_v15 = vmul.f32 %v2082_v25, %v1006_v39  ;;  %v2134_v59 = vmul.f32 %v2118_v29, %v8364_v13  ;;  %v2874_v41 = vmul.f32 %v7804_v36, %v8368_v62  ;;  %v10205_v62 = vld [vmem:[#allocation81_spill] sm:$0xff] }
 0x282   :  { %v2910_v28 = vmul.f32 %v7811_v1, %v1342_v11  ;;  %v3578_v60 = vmul.f32 %v7827_v47, %v1150_v53  ;;  %v2062_v24 = vadd.f32 %v2046_v40, %v2010_v3  ;;  %v3614_v7 = vmul.f32 %v7831_v19, %v1342_v11 }
 0x283   :  { %v2802_v12 = vmul.f32 %v2786_v45, %v1974_v61  ;;  %v1134_v14 = vsub.f32 %v8342_v46, %v5911_v4  ;;  %v8399_v39 = vadd.f32 %v2134_v59, %v2098_v15  ;;  %v1294_v57 = vsub.f32 %v10095_v27, %v8342_v46  ;;  %v10204_v59 = vld [vmem:[#allocation79_spill] sm:$0xff] }
 0x284   :  { %v2734_v32 = vmul.f32 %v7786_v49, %v1310_v58  ;;  %v3526_v22 = vmul.f32 %v7821_v2, %v1326_v8  ;;  %v2838_v25 = vmul.f32 %v2822_v50, %v2062_v24  ;;  %v2890_v29 = vmul.f32 %v2874_v41, %v2062_v24 }
 0x285   :  { %10203 = vst [vmem:[#allocation72_spill] sm:$0xff] %v8399_v39  ;;  %v1818_v53 = vmul.f32 %v10126_v26, %v1134_v14  ;;  %v2698_v33 = vmul.f32 %v7838_v43, %v1134_v14  ;;  %v2926_v11 = vmul.f32 %v2910_v28, %v8399_v39  ;;  %v1854_v3 = vmul.f32 %v10127_v17, %v1294_v57 }
 0x286   :  { %v2750_v45 = vmul.f32 %v2734_v32, %v1974_v61  ;;  %v3490_v40 = vmul.f32 %v7815_v54, %v1134_v14  ;;  %v2854_v15 = vadd.f32 %v2838_v25, %v2802_v12  ;;  %v2610_v13 = vmul.f32 %v10131_v6, %v10205_v62  ;;  %v10207_v14 = vld [vmem:[#allocation82_spill] sm:$0xff]  ;;  %v10208_v25 = vld [vmem:[#allocation80_spill] sm:$0xff] }
 0x287   :  { %v1834_v46 = vmul.f32 %v1818_v53, %v10204_v59  ;;  %v2646_v8 = vmul.f32 %v10132_v52, %v1294_v57  ;;  %v8414_v50 = vadd.f32 %v2926_v11, %v2890_v29  ;;  %v1870_v41 = vmul.f32 %v1854_v3, %v8356_v23  ;;  %v8425_v11 = vld [vmem:[#allocation3 + $0x40] sm:$0xff]  ;;  %v10210_v3 = vld [vmem:[#allocation84_spill] sm:$0xff] }
 0x288   :  { %v3402_v28 = vmul.f32 %v7846_v37, %v10205_v62  ;;  %v3438_v24 = vmul.f32 %v7853_v55, %v1310_v58  ;;  %v3594_v61 = vmul.f32 %v3578_v60, %v2854_v15  ;;  %v3542_v32 = vmul.f32 %v3526_v22, %v2854_v15  ;;  %v10209_v23 = vld [vmem:[#allocation83_spill] sm:$0xff] }
 0x289   :  { %10206 = vst [vmem:[#allocation73_spill] sm:$0xff] %v8414_v50  ;;  %v2626_v12 = vmul.f32 %v2610_v13, %v10207_v14  ;;  %v3314_v53 = vmul.f32 %v10134_v21, %v10208_v25  ;;  %v3630_v59 = vmul.f32 %v3614_v7, %v8414_v50  ;;  %v1886_v39 = vadd.f32 %v1870_v41, %v1834_v46 }
 0x28a   :  { %v3350_v29 = vmul.f32 %v10136_v10, %v1294_v57  ;;  %vm623_vm1 = vcmp.ge.f32.partialorder %v8425_v11, %v10095_v27  ;;  %vm675_vm2 = vcmp.ge.f32.partialorder %v8425_v11, %v10090_v56  ;;  %vm727_vm3 = vcmp.ge.f32.partialorder %v8425_v11, %v10091_v9 }
 0x28b   :  { %v3330_v62 = vmul.f32 %v3314_v53, %v10209_v23  ;;  %v5055_v58 = vsel %vm623_vm1, 1.0, %v9982_v48  ;;  %v3646_v13 = vadd.f32 %v3630_v59, %v3594_v61  ;;  %v2714_v60 = vmul.f32 %v2698_v33, %v1886_v39 }
 0x28c   :  { %v2662_v7 = vmul.f32 %v2646_v8, %v1886_v39  ;;  %v5071_v57 = vsel %vm675_vm2, 1.0, %v9982_v48  ;;  %v5087_v22 = vsel %vm727_vm3, 1.0, %v9982_v48  ;;  %vm779_vm4 = vcmp.ge.f32.partialorder %v8425_v11, %v10092_v34 }
 0x28d   :  { %v8440_v15 = vsub.f32 %v10210_v3, %v5055_v58  ;;  %v991_v46 = vsub.f32 %v5055_v58, %v5071_v57  ;;  %4693 = vmatprep.mubr.f32.mxu1 %v3646_v13  ;;  %v2766_v41 = vadd.f32 %v2750_v45, %v2714_v60  ;;  %v8443_v25 = vsel %vm779_vm4, 1.0, %v9982_v48  ;;  %v4145_v58 = vld [vmem:[#allocation11 + $0x410] sm:$0xff] }
 0x28e   :  { %v2678_v14 = vadd.f32 %v2662_v7, %v2626_v12  ;;  %10211 = vst [vmem:[#allocation75_spill] sm:$0xff] %v8443_v25  ;;  %v1007_v61 = vsub.f32 %v5071_v57, %v5087_v22  ;;  %v8446_v39 = vsub.f32 %v5087_v22, %v8443_v25  ;;  %v1151_v33 = vsub.f32 %v8425_v11, %v5915_v5  ;;  %v10232_v25 = vld [vmem:[#allocation38_spill] sm:$0xff] }
 0x28f   :  { %v8452_v8 = vsub.f32 %v8425_v11, %v10095_v27  ;;  %v8456_v53 = vsub.f32 %v8425_v11, %v10090_v56  ;;  %v3506_v45 = vmul.f32 %v3490_v40, %v2766_v41  ;;  %v3454_v59 = vmul.f32 %v3438_v24, %v2766_v41  ;;  %5505 = vmatprep.subr.mxu0 %v4145_v58 }
 0x290   :  { %10212 = vst [vmem:[#allocation74_spill] sm:$0xff] %v8446_v39  ;;  %v3418_v12 = vmul.f32 %v3402_v28, %v2678_v14  ;;  %v3366_v23 = vmul.f32 %v3350_v29, %v2678_v14  ;;  %v1311_v13 = vsub.f32 %v10090_v56, %v8425_v11  ;;  %v1327_v60 = vsub.f32 %v10091_v9, %v8425_v11 }
 0x291   :  { %10213 = vst [vmem:[#allocation76_spill] sm:$0xff] %v8452_v8  ;;  %10214 = vst [vmem:[#allocation77_spill] sm:$0xff] %v8456_v53  ;;  %v1343_v7 = vsub.f32 %v10092_v34, %v8425_v11  ;;  %v1907_v57 = vmul.f32 %v7748_v63, %v1151_v33  ;;  %v3558_v22 = vadd.f32 %v3542_v32, %v3506_v45  ;;  %5548 = vmatprep.subr.mxu1 %v4145_v58 }
 0x292   :  { %v3470_v3 = vadd.f32 %v3454_v59, %v3418_v12  ;;  %v3382_v50 = vadd.f32 %v3366_v23, %v3330_v62  ;;  %v1995_v40 = vmul.f32 %v7754_v38, %v8452_v8  ;;  %v1943_v24 = vmul.f32 %v7751_v0, %v1311_v13  ;;  %5506 = vmatpush3.msra.mxu0 %v4145_v58 }
 0x293   :  { %v1923_v28 = vmul.f32 %v1907_v57, %v8440_v15  ;;  %v2031_v29 = vmul.f32 %v7757_v42, %v1327_v60  ;;  %v2083_v41 = vmul.f32 %v7766_v30, %v8456_v53  ;;  %4694 = vmatmul.mubr.f32.gmra.mxu1 %v3558_v22  ;;  %v2119_v32 = vmul.f32 %v7772_v35, %v1343_v7  ;;  %v10215_v57 = vld [vmem:[#allocation27_spill] sm:$0xff] }
 0x294   :  { %4548 = vmatprep.mubr.f32.mxu0 %v3470_v3  ;;  %v2011_v14 = vmul.f32 %v1995_v40, %v991_v46  ;;  %v2787_v62 = vmul.f32 %v7797_v51, %v1151_v33  ;;  %v1959_v45 = vmul.f32 %v1943_v24, %v991_v46  ;;  %v2823_v23 = vmul.f32 %v7800_v44, %v1327_v60 }
 0x295   :  { %4549 = vmatmul.mubr.f32.gmra.mxu0 %v3382_v50  ;;  %v2047_v12 = vmul.f32 %v2031_v29, %v1007_v61  ;;  %v2099_v59 = vmul.f32 %v2083_v41, %v1007_v61  ;;  %v10217_v31 = vsub.f32 %v10215_v57, %v10216_v16  ;;  %v2135_v22 = vmul.f32 %v2119_v32, %v8446_v39 }
 0x296   :  { %v2875_v3 = vmul.f32 %v7804_v36, %v8452_v8  ;;  %v2911_v40 = vmul.f32 %v7811_v1, %v1343_v7  ;;  %5564 = vmatpush3.msra.mxu1 %v4145_v58  ;;  %v1975_v50 = vadd.f32 %v1959_v45, %v1923_v28  ;;  %v3579_v61 = vmul.f32 %v7827_v47, %v1151_v33 }
 0x297   :  { %v8479_v18 = vmul.f32 %v10218_v20, %v10217_v31  ;;  %v2063_v46 = vadd.f32 %v2047_v12, %v2011_v14  ;;  %v1135_v24 = vsub.f32 %v8425_v11, %v5911_v4  ;;  %v8488_v29 = vadd.f32 %v2135_v22, %v2099_v59  ;;  %v10221_v59 = vld [vmem:[#allocation85_spill] sm:$0xff] }
 0x298   :  { %v1295_v20 = vsub.f32 %v10095_v27, %v8425_v11  ;;  %v2735_v31 = vmul.f32 %v7786_v49, %v1311_v13  ;;  %v3527_v16 = vmul.f32 %v7821_v2, %v1327_v60  ;;  %v2803_v41 = vmul.f32 %v2787_v62, %v1975_v50 }
 0x299   :  { %10219 = vst [vmem:[#allocation78_spill] sm:$0xff] %v8479_v18  ;;  %10220 = vst [vmem:[#allocation79_spill] sm:$0xff] %v8488_v29  ;;  %v2839_v32 = vmul.f32 %v2823_v23, %v2063_v46  ;;  %v2891_v57 = vmul.f32 %v2875_v3, %v2063_v46  ;;  %v1819_v58 = vmul.f32 %v10126_v26, %v1135_v24  ;;  %v10222_v18 = vld [vmem:[#allocation87_spill] sm:$0xff] }
 0x29a   :  { %v2927_v28 = vmul.f32 %v2911_v40, %v8488_v29  ;;  %v3615_v33 = vmul.f32 %v7831_v19, %v1343_v7  ;;  %v1855_v14 = vmul.f32 %v10127_v17, %v1295_v20  ;;  %v2699_v45 = vmul.f32 %v7838_v43, %v1135_v24  ;;  %v10224_v29 = vld [vmem:[#allocation88_spill] sm:$0xff] }
 0x29b   :  { %v2855_v12 = vadd.f32 %v2839_v32, %v2803_v41  ;;  %v1835_v11 = vmul.f32 %v1819_v58, %v10221_v59  ;;  %v2751_v22 = vmul.f32 %v2735_v31, %v1975_v50  ;;  %v2611_v60 = vmul.f32 %v10131_v6, %v10222_v18 }
 0x29c   :  { %v8502_v62 = vadd.f32 %v2927_v28, %v2891_v57  ;;  %v1871_v23 = vmul.f32 %v1855_v14, %v8440_v15  ;;  %v3491_v3 = vmul.f32 %v7815_v54, %v1135_v24  ;;  %v2647_v40 = vmul.f32 %v10132_v52, %v1295_v20  ;;  %v10225_v57 = vld [vmem:[#allocation86_spill] sm:$0xff]  ;;  %v8514_v15 = vld [vmem:[#allocation3 + $0x48] sm:$0xff] }
 0x29d   :  { %v3595_v7 = vmul.f32 %v3579_v61, %v2855_v12  ;;  %v3543_v46 = vmul.f32 %v3527_v16, %v2855_v12  ;;  %v2627_v8 = vmul.f32 %v2611_v60, %v10224_v29  ;;  %v3403_v41 = vmul.f32 %v7846_v37, %v10222_v18  ;;  %v10226_v29 = vld [vmem:[#allocation89_spill] sm:$0xff]  ;;  %v10227_v60 = vld [vmem:[#allocation24_spill] sm:$0xff] }
 0x29e   :  { %10223 = vst [vmem:[#allocation81_spill] sm:$0xff] %v8502_v62  ;;  %v3631_v50 = vmul.f32 %v3615_v33, %v8502_v62  ;;  %v1887_v31 = vadd.f32 %v1871_v23, %v1835_v11  ;;  %v3439_v32 = vmul.f32 %v7853_v55, %v1311_v13  ;;  %v3315_v58 = vmul.f32 %v10134_v21, %v10225_v57 }
 0x29f   :  { %vm624_vm5 = vcmp.ge.f32.partialorder %v8514_v15, %v10095_v27  ;;  %vm676_vm6 = vcmp.ge.f32.partialorder %v8514_v15, %v10090_v56  ;;  %vm728_vm7 = vcmp.ge.f32.partialorder %v8514_v15, %v10091_v9  ;;  %vm780_vm8 = vcmp.ge.f32.partialorder %v8514_v15, %v10092_v34 }
 0x2a0   :  { %v3647_v18 = vadd.f32 %v3631_v50, %v3595_v7  ;;  %v2715_v61 = vmul.f32 %v2699_v45, %v1887_v31  ;;  %v2663_v13 = vmul.f32 %v2647_v40, %v1887_v31  ;;  %v3351_v24 = vmul.f32 %v10136_v10, %v1295_v20  ;;  %v10229_v20 = vld [vmem:[#allocation90_spill] sm:$0xff] }
 0x2a1   :  { %v3331_v16 = vmul.f32 %v3315_v58, %v10226_v29  ;;  %v5056_v28 = vsel %vm624_vm5, 1.0, %v9982_v48  ;;  %v5072_v33 = vsel %vm676_vm6, 1.0, %v9982_v48  ;;  %v5088_v14 = vsel %vm728_vm7, 1.0, %v9982_v48 }
 0x2a2   :  { %4698 = vmatprep.mubr.f32.mxu1 %v3647_v18  ;;  %v2767_v12 = vadd.f32 %v2751_v22, %v2715_v61  ;;  %v2679_v59 = vadd.f32 %v2663_v13, %v2627_v8  ;;  %v8530_v11 = vsel %vm780_vm8, 1.0, %v9982_v48  ;;  %vm832_vm9 = vcmp.ge.f32.partialorder %v8514_v15, %v10227_v60  ;;  %v4144_v22 = vld [vmem:[#allocation11 + $0x408] sm:$0xff] }
 0x2a3   :  { %v8535_v45 = vsel %vm832_vm9, 1.0, %v9982_v48  ;;  %v8538_v23 = vsub.f32 %v10229_v20, %v5056_v28  ;;  %v992_v40 = vsub.f32 %v5056_v28, %v5072_v33  ;;  %v1008_v7 = vsub.f32 %v5072_v33, %v5088_v14  ;;  %5507 = vmatprep.subr.mxu0 %v4144_v22  ;;  %5549 = vmatprep.subr.mxu1 %v4144_v22 }
 0x2a4   :  { %10228 = vst [vmem:[#allocation82_spill] sm:$0xff] %v8535_v45  ;;  %v3507_v50 = vmul.f32 %v3491_v3, %v2767_v12  ;;  %v3419_v31 = vmul.f32 %v3403_v41, %v2679_v59  ;;  %v3455_v57 = vmul.f32 %v3439_v32, %v2767_v12  ;;  %v3367_v58 = vmul.f32 %v3351_v24, %v2679_v59 }
 0x2a5   :  { %v1024_v8 = vsub.f32 %v5088_v14, %v8530_v11  ;;  %v1152_v18 = vsub.f32 %v8514_v15, %v5915_v5  ;;  %v1168_v61 = vsub.f32 %v8514_v15, %v10095_v27  ;;  %v1184_v13 = vsub.f32 %v8514_v15, %v10090_v56  ;;  %5508 = vmatpush3.msra.mxu0 %v4144_v22 }
 0x2a6   :  { %v3559_v29 = vadd.f32 %v3543_v46, %v3507_v50  ;;  %v3471_v28 = vadd.f32 %v3455_v57, %v3419_v31  ;;  %v3383_v33 = vadd.f32 %v3367_v58, %v3331_v16  ;;  %v1200_v3 = vsub.f32 %v8514_v15, %v10091_v9  ;;  %v10231_v31 = vld [vmem:[#allocation28_spill] sm:$0xff]  ;;  %5565 = vmatpush3.msra.mxu1 %v4144_v22 }
 0x2a7   :  { %v8551_v41 = vsub.f32 %v10090_v56, %v8514_v15  ;;  %v1328_v32 = vsub.f32 %v10091_v9, %v8514_v15  ;;  %v1344_v24 = vsub.f32 %v10092_v34, %v8514_v15  ;;  %v8559_v14 = vsub.f32 %v10227_v60, %v8514_v15 }
 0x2a8   :  { %4699 = vmatmul.mubr.f32.gmra.mxu1 %v3559_v29  ;;  %4553 = vmatprep.mubr.f32.mxu0 %v3471_v28  ;;  %v1908_v46 = vmul.f32 %v7748_v63, %v1152_v18  ;;  %v1996_v16 = vmul.f32 %v7754_v38, %v1168_v61  ;;  %v2084_v12 = vmul.f32 %v7766_v30, %v1184_v13 }
 0x2a9   :  { %10230 = vst [vmem:[#allocation80_spill] sm:$0xff] %v8559_v14  ;;  %4554 = vmatmul.mubr.f32.gmra.mxu0 %v3383_v33  ;;  %v1944_v59 = vmul.f32 %v7751_v0, %v8551_v41  ;;  %v2032_v20 = vmul.f32 %v7757_v42, %v1328_v32  ;;  %v2120_v50 = vmul.f32 %v7772_v35, %v1344_v24 }
 0x2aa   :  { %v2172_v57 = vmul.f32 %v10231_v31, %v1200_v3  ;;  %v1924_v29 = vmul.f32 %v1908_v46, %v8538_v23  ;;  %v2012_v28 = vmul.f32 %v1996_v16, %v992_v40  ;;  %v2100_v62 = vmul.f32 %v2084_v12, %v1008_v7 }
 0x2ab   :  { %v1960_v39 = vmul.f32 %v1944_v59, %v992_v40  ;;  %v2048_v53 = vmul.f32 %v2032_v20, %v1008_v7  ;;  %v2136_v33 = vmul.f32 %v2120_v50, %v1024_v8  ;;  %v8574_v60 = vmul.f32 %v10232_v25, %v8559_v14  ;;  %v10235_v40 = vld [vmem:[#allocation130_spill] sm:$0xff]  ;;  %v10236_v20 = vld [vmem:[#allocation131_spill] sm:$0xff] }
 0x2ac   :  { %v8576_v30 = vmul.f32 %v2172_v57, %v1024_v8  ;;  %v2788_v35 = vmul.f32 %v7797_v51, %v1152_v18  ;;  %v2824_v3 = vmul.f32 %v7800_v44, %v1328_v32  ;;  %v2876_v58 = vmul.f32 %v7804_v36, %v1168_v61 }
 0x2ad   :  { %10233 = vst [vmem:[#allocation83_spill] sm:$0xff] %v8574_v60  ;;  %v1976_v31 = vadd.f32 %v1960_v39, %v1924_v29  ;;  %v2064_v46 = vadd.f32 %v2048_v53, %v2012_v28  ;;  %v2152_v16 = vadd.f32 %v2136_v33, %v2100_v62  ;;  %v2912_v22 = vmul.f32 %v7811_v1, %v1344_v24  ;;  %v10267_v60 = vld [vmem:[#allocation106_spill] sm:$0xff] }
 0x2ae   :  { %10234 = vst [vmem:[#allocation84_spill] sm:$0xff] %v8576_v30  ;;  %v2964_v7 = vmul.f32 %v10235_v40, %v1184_v13  ;;  %v3580_v12 = vmul.f32 %v7827_v47, %v1152_v18  ;;  %v3616_v59 = vmul.f32 %v7831_v19, %v1344_v24  ;;  %v3668_v8 = vmul.f32 %v10236_v20, %v1168_v61  ;;  %v10238_v61 = vld [vmem:[#allocation93_spill] sm:$0xff] }
 0x2af   :  { %v2804_v50 = vmul.f32 %v2788_v35, %v1976_v31  ;;  %v2840_v57 = vmul.f32 %v2824_v3, %v2064_v46  ;;  %v2892_v14 = vmul.f32 %v2876_v58, %v2064_v46  ;;  %v2928_v30 = vmul.f32 %v2912_v22, %v2152_v16  ;;  %v10240_v22 = vld [vmem:[#allocation91_spill] sm:$0xff] }
 0x2b0   :  { %v8586_v25 = vmul.f32 %v2964_v7, %v2152_v16  ;;  %v1136_v39 = vsub.f32 %v8514_v15, %v5911_v4  ;;  %v1296_v53 = vsub.f32 %v10095_v27, %v8514_v15  ;;  %v2736_v62 = vmul.f32 %v7786_v49, %v8551_v41  ;;  %v10241_v7 = vld [vmem:[#allocation94_spill] sm:$0xff] }
 0x2b1   :  { %v2856_v18 = vadd.f32 %v2840_v57, %v2804_v50  ;;  %v2944_v13 = vadd.f32 %v2928_v30, %v2892_v14  ;;  %v3528_v24 = vmul.f32 %v7821_v2, %v1328_v32  ;;  %v2612_v35 = vmul.f32 %v10131_v6, %v10238_v61 }
 0x2b2   :  { %10237 = vst [vmem:[#allocation27_spill] sm:$0xff] %v8586_v25  ;;  %v1820_v58 = vmul.f32 %v10126_v26, %v1136_v39  ;;  %v1856_v29 = vmul.f32 %v10127_v17, %v1296_v53  ;;  %v2700_v28 = vmul.f32 %v7838_v43, %v1136_v39  ;;  %v2752_v33 = vmul.f32 %v2736_v62, %v1976_v31  ;;  %v8614_v62 = vld [vmem:[#allocation3 + $0x50] sm:$0xff] }
 0x2b3   :  { %v3596_v3 = vmul.f32 %v3580_v12, %v2856_v18  ;;  %v3632_v46 = vmul.f32 %v3616_v59, %v2944_v13  ;;  %v8600_v15 = vmul.f32 %v3668_v8, %v2944_v13  ;;  %v3492_v16 = vmul.f32 %v7815_v54, %v1136_v39  ;;  %v10242_v59 = vld [vmem:[#allocation92_spill] sm:$0xff] }
 0x2b4   :  { %v1836_v30 = vmul.f32 %v1820_v58, %v10240_v22  ;;  %v1872_v32 = vmul.f32 %v1856_v29, %v8538_v23  ;;  %v3544_v14 = vmul.f32 %v3528_v24, %v2856_v18  ;;  %v2628_v50 = vmul.f32 %v2612_v35, %v10241_v7  ;;  %v10245_v29 = vld [vmem:[#allocation96_spill] sm:$0xff] }
 0x2b5   :  { %10239 = vst [vmem:[#allocation17_spill] sm:$0xff] %v8600_v15  ;;  %v3648_v57 = vadd.f32 %v3632_v46, %v3596_v3  ;;  %v2648_v25 = vmul.f32 %v10132_v52, %v1296_v53  ;;  %v3404_v20 = vmul.f32 %v7846_v37, %v10238_v61  ;;  %v3440_v31 = vmul.f32 %v7853_v55, %v8551_v41  ;;  %v4143_v61 = vld [vmem:[#allocation11 + $0x400] sm:$0xff] }
 0x2b6   :  { %v1888_v12 = vadd.f32 %v1872_v32, %v1836_v30  ;;  %v3316_v8 = vmul.f32 %v10134_v21, %v10242_v59  ;;  %v3352_v39 = vmul.f32 %v10136_v10, %v1296_v53  ;;  %vm625_vm10 = vcmp.ge.f32.partialorder %v8614_v62, %v10095_v27  ;;  %v10243_v53 = vld [vmem:[#allocation95_spill] sm:$0xff]  ;;  %5509 = vmatprep.subr.mxu0 %v4143_v61 }
 0x2b7   :  { %4703 = vmatprep.mubr.f32.mxu1 %v3648_v57  ;;  %v5057_v23 = vsel %vm625_vm10, 1.0, %v9982_v48  ;;  %vm677_vm11 = vcmp.ge.f32.partialorder %v8614_v62, %v10090_v56  ;;  %vm729_vm12 = vcmp.ge.f32.partialorder %v8614_v62, %v10091_v9  ;;  %vm781_vm13 = vcmp.ge.f32.partialorder %v8614_v62, %v10092_v34  ;;  %5550 = vmatprep.subr.mxu1 %v4143_v61 }
 0x2b8   :  { %v2716_v41 = vmul.f32 %v2700_v28, %v1888_v12  ;;  %v2664_v18 = vmul.f32 %v2648_v25, %v1888_v12  ;;  %v3332_v13 = vmul.f32 %v3316_v8, %v10243_v53  ;;  %v5073_v24 = vsel %vm677_vm11, 1.0, %v9982_v48  ;;  %5510 = vmatpush3.msra.mxu0 %v4143_v61  ;;  %5566 = vmatpush3.msra.mxu1 %v4143_v61 }
 0x2b9   :  { %v5089_v35 = vsel %vm729_vm12, 1.0, %v9982_v48  ;;  %v8629_v58 = vsel %vm781_vm13, 1.0, %v9982_v48  ;;  %v8632_v3 = vsub.f32 %v10245_v29, %v5057_v23  ;;  %v993_v46 = vsub.f32 %v5057_v23, %v5073_v24 }
 0x2ba   :  { %10244 = vst [vmem:[#allocation50_spill] sm:$0xff] %v8629_v58  ;;  %v2768_v22 = vadd.f32 %v2752_v33, %v2716_v41  ;;  %v2680_v30 = vadd.f32 %v2664_v18, %v2628_v50  ;;  %v1009_v28 = vsub.f32 %v5073_v24, %v5089_v35  ;;  %v8635_v25 = vsub.f32 %v5089_v35, %v8629_v58  ;;  %v10250_v58 = vld [vmem:[#allocation19_spill] sm:$0xff] }
 0x2bb   :  { %v1153_v32 = vsub.f32 %v8614_v62, %v5915_v5  ;;  %v8641_v7 = vsub.f32 %v8614_v62, %v10095_v27  ;;  %v8645_v57 = vsub.f32 %v8614_v62, %v10090_v56  ;;  %v1313_v33 = vsub.f32 %v10090_v56, %v8614_v62 }
 0x2bc   :  { %10246 = vst [vmem:[#allocation85_spill] sm:$0xff] %v8635_v25  ;;  %v3508_v50 = vmul.f32 %v3492_v16, %v2768_v22  ;;  %v3420_v12 = vmul.f32 %v3404_v20, %v2680_v30  ;;  %v3456_v59 = vmul.f32 %v3440_v31, %v2768_v22  ;;  %v3368_v8 = vmul.f32 %v3352_v39, %v2680_v30  ;;  %v10249_v39 = vld [vmem:[#allocation22_spill] sm:$0xff] }
 0x2bd   :  { %10247 = vst [vmem:[#allocation87_spill] sm:$0xff] %v8641_v7  ;;  %10248 = vst [vmem:[#allocation88_spill] sm:$0xff] %v8645_v57  ;;  %v1329_v23 = vsub.f32 %v10091_v9, %v8614_v62  ;;  %v1345_v41 = vsub.f32 %v10092_v34, %v8614_v62  ;;  %v1909_v18 = vmul.f32 %v7748_v63, %v1153_v32 }
 0x2be   :  { %v1945_v53 = vmul.f32 %v7751_v0, %v1313_v33  ;;  %v3560_v24 = vadd.f32 %v3544_v14, %v3508_v50  ;;  %v3472_v35 = vadd.f32 %v3456_v59, %v3420_v12  ;;  %v3384_v29 = vadd.f32 %v3368_v8, %v3332_v13 }
 0x2bf   :  { %v1997_v61 = vmul.f32 %v7754_v38, %v8641_v7  ;;  %v1925_v20 = vmul.f32 %v1909_v18, %v8632_v3  ;;  %v2033_v31 = vmul.f32 %v7757_v42, %v1329_v23  ;;  %v2085_v22 = vmul.f32 %v10249_v39, %v8645_v57 }
 0x2c0   :  { %v1961_v16 = vmul.f32 %v1945_v53, %v993_v46  ;;  %4704 = vmatmul.mubr.f32.gmra.mxu1 %v3560_v24  ;;  %4558 = vmatprep.mubr.f32.mxu0 %v3472_v35  ;;  %v2121_v15 = vmul.f32 %v10250_v58, %v1345_v41  ;;  %v2789_v14 = vmul.f32 %v7797_v51, %v1153_v32 }
 0x2c1   :  { %v2013_v30 = vmul.f32 %v1997_v61, %v993_v46  ;;  %4559 = vmatmul.mubr.f32.gmra.mxu0 %v3384_v29  ;;  %v2049_v50 = vmul.f32 %v2033_v31, %v1009_v28  ;;  %v2101_v12 = vmul.f32 %v2085_v22, %v1009_v28  ;;  %v2825_v59 = vmul.f32 %v7800_v44, %v1329_v23 }
 0x2c2   :  { %v1977_v13 = vadd.f32 %v1961_v16, %v1925_v20  ;;  %v2137_v8 = vmul.f32 %v2121_v15, %v8635_v25  ;;  %v2877_v18 = vmul.f32 %v7804_v36, %v8641_v7  ;;  %v2913_v53 = vmul.f32 %v7811_v1, %v1345_v41  ;;  %v10252_v7 = vld [vmem:[#allocation97_spill] sm:$0xff]  ;;  %v10253_v25 = vld [vmem:[#allocation99_spill] sm:$0xff] }
 0x2c3   :  { %v3581_v24 = vmul.f32 %v7827_v47, %v1153_v32  ;;  %v2065_v46 = vadd.f32 %v2049_v50, %v2013_v30  ;;  %v3617_v61 = vmul.f32 %v7831_v19, %v1345_v41  ;;  %v1137_v29 = vsub.f32 %v8614_v62, %v5911_v4 }
 0x2c4   :  { %v2805_v35 = vmul.f32 %v2789_v14, %v1977_v13  ;;  %v8672_v20 = vadd.f32 %v2137_v8, %v2101_v12  ;;  %v1297_v28 = vsub.f32 %v10095_v27, %v8614_v62  ;;  %v2737_v15 = vmul.f32 %v7786_v49, %v1313_v33 }
 0x2c5   :  { %v3529_v16 = vmul.f32 %v7821_v2, %v1329_v23  ;;  %v2841_v31 = vmul.f32 %v2825_v59, %v2065_v46  ;;  %v2893_v22 = vmul.f32 %v2877_v18, %v2065_v46  ;;  %v1821_v32 = vmul.f32 %v10126_v26, %v1137_v29 }
 0x2c6   :  { %10251 = vst [vmem:[#allocation86_spill] sm:$0xff] %v8672_v20  ;;  %v2701_v30 = vmul.f32 %v7838_v43, %v1137_v29  ;;  %v2929_v41 = vmul.f32 %v2913_v53, %v8672_v20  ;;  %v1857_v14 = vmul.f32 %v10127_v17, %v1297_v28  ;;  %v2753_v50 = vmul.f32 %v2737_v15, %v1977_v13 }
 0x2c7   :  { %v3493_v12 = vmul.f32 %v7815_v54, %v1137_v29  ;;  %v2857_v8 = vadd.f32 %v2841_v31, %v2805_v35  ;;  %v1837_v62 = vmul.f32 %v1821_v32, %v10252_v7  ;;  %v2613_v57 = vmul.f32 %v10131_v6, %v10253_v25  ;;  %v10255_v29 = vld [vmem:[#allocation100_spill] sm:$0xff]  ;;  %v10256_v31 = vld [vmem:[#allocation98_spill] sm:$0xff] }
 0x2c8   :  { %v2649_v23 = vmul.f32 %v10132_v52, %v1297_v28  ;;  %v8687_v59 = vadd.f32 %v2929_v41, %v2893_v22  ;;  %v1873_v18 = vmul.f32 %v1857_v14, %v8632_v3  ;;  %v3405_v53 = vmul.f32 %v7846_v37, %v10253_v25  ;;  %v5659_v41 = vld [vmem:[#allocation3 + $0x58] sm:$0xff]  ;;  %v10257_v3 = vld [vmem:[#allocation101_spill] sm:$0xff] }
 0x2c9   :  { %v3441_v46 = vmul.f32 %v7853_v55, %v1313_v33  ;;  %v3597_v13 = vmul.f32 %v3581_v24, %v2857_v8  ;;  %v3545_v15 = vmul.f32 %v3529_v16, %v2857_v8  ;;  %v2629_v35 = vmul.f32 %v2613_v57, %v10255_v29 }
 0x2ca   :  { %10254 = vst [vmem:[#allocation89_spill] sm:$0xff] %v8687_v59  ;;  %v3317_v7 = vmul.f32 %v10134_v21, %v10256_v31  ;;  %v3633_v32 = vmul.f32 %v3617_v61, %v8687_v59  ;;  %v1889_v20 = vadd.f32 %v1873_v18, %v1837_v62  ;;  %v3353_v22 = vmul.f32 %v10136_v10, %v1297_v28  ;;  %v10258_v28 = vld [vmem:[#allocation102_spill] sm:$0xff] }
 0x2cb   :  { %vm626_vm14 = vcmp.ge.f32.partialorder %v5659_v41, %v10095_v27  ;;  %vm678_vm15 = vcmp.ge.f32.partialorder %v5659_v41, %v10090_v56  ;;  %vm730_vm0 = vcmp.ge.f32.partialorder %v5659_v41, %v10091_v9  ;;  %vm782_vm1 = vcmp.ge.f32.partialorder %v5659_v41, %v10092_v34 }
 0x2cc   :  { %v3333_v14 = vmul.f32 %v3317_v7, %v10257_v3  ;;  %v5058_v25 = vsel %vm626_vm14, 1.0, %v9982_v48  ;;  %v3649_v57 = vadd.f32 %v3633_v32, %v3597_v13  ;;  %v2717_v33 = vmul.f32 %v2701_v30, %v1889_v20 }
 0x2cd   :  { %v2665_v24 = vmul.f32 %v2649_v23, %v1889_v20  ;;  %v5074_v16 = vsel %vm678_vm15, 1.0, %v9982_v48  ;;  %v5090_v61 = vsel %vm730_vm0, 1.0, %v9982_v48  ;;  %v978_v8 = vsub.f32 %v10258_v28, %v5058_v25 }
 0x2ce   :  { %v994_v62 = vsub.f32 %v5058_v25, %v5074_v16  ;;  %4708 = vmatprep.mubr.f32.mxu1 %v3649_v57  ;;  %v2769_v18 = vadd.f32 %v2753_v50, %v2717_v33  ;;  %v8708_v31 = vsel %vm782_vm1, 1.0, %v9982_v48  ;;  %v1010_v7 = vsub.f32 %v5074_v16, %v5090_v61 }
 0x2cf   :  { %v2681_v29 = vadd.f32 %v2665_v24, %v2629_v35  ;;  %10259 = vst [vmem:[#allocation90_spill] sm:$0xff] %v8708_v31  ;;  %v8711_v13 = vsub.f32 %v5090_v61, %v8708_v31  ;;  %v1154_v20 = vsub.f32 %v5659_v41, %v5915_v5  ;;  %v8715_v30 = vsub.f32 %v5659_v41, %v10095_v27 }
 0x2d0   :  { %v8718_v23 = vsub.f32 %v5659_v41, %v10090_v56  ;;  %v3509_v32 = vmul.f32 %v3493_v12, %v2769_v18  ;;  %v3457_v25 = vmul.f32 %v3441_v46, %v2769_v18  ;;  %v1314_v35 = vsub.f32 %v10090_v56, %v5659_v41 }
 0x2d1   :  { %10260 = vst [vmem:[#allocation130_spill] sm:$0xff] %v8711_v13  ;;  %10261 = vst [vmem:[#allocation93_spill] sm:$0xff] %v8715_v30  ;;  %v3421_v3 = vmul.f32 %v3405_v53, %v2681_v29  ;;  %v3369_v50 = vmul.f32 %v3353_v22, %v2681_v29  ;;  %v1330_v57 = vsub.f32 %v10091_v9, %v5659_v41 }
 0x2d2   :  { %10262 = vst [vmem:[#allocation91_spill] sm:$0xff] %v8718_v23  ;;  %v1346_v33 = vsub.f32 %v10092_v34, %v5659_v41  ;;  %v1910_v24 = vmul.f32 %v7748_v63, %v1154_v20  ;;  %v3561_v16 = vadd.f32 %v3545_v15, %v3509_v32  ;;  %v1998_v59 = vmul.f32 %v7754_v38, %v8715_v30 }
 0x2d3   :  { %v3473_v61 = vadd.f32 %v3457_v25, %v3421_v3  ;;  %v3385_v28 = vadd.f32 %v3369_v50, %v3333_v14  ;;  %v1946_v12 = vmul.f32 %v7751_v0, %v1314_v35  ;;  %v2034_v53 = vmul.f32 %v7757_v42, %v1330_v57 }
 0x2d4   :  { %v1926_v31 = vmul.f32 %v1910_v24, %v978_v8  ;;  %v2086_v46 = vmul.f32 %v10249_v39, %v8718_v23  ;;  %4709 = vmatmul.mubr.f32.gmra.mxu1 %v3561_v16  ;;  %v2014_v22 = vmul.f32 %v1998_v59, %v994_v62  ;;  %v2122_v18 = vmul.f32 %v10250_v58, %v1346_v33 }
 0x2d5   :  { %4563 = vmatprep.mubr.f32.mxu0 %v3473_v61  ;;  %v2790_v15 = vmul.f32 %v7797_v51, %v1154_v20  ;;  %v1962_v14 = vmul.f32 %v1946_v12, %v994_v62  ;;  %v2050_v29 = vmul.f32 %v2034_v53, %v1010_v7  ;;  %v2826_v3 = vmul.f32 %v7800_v44, %v1330_v57 }
 0x2d6   :  { %4564 = vmatmul.mubr.f32.gmra.mxu0 %v3385_v28  ;;  %v2102_v32 = vmul.f32 %v2086_v46, %v1010_v7  ;;  %v2138_v25 = vmul.f32 %v2122_v18, %v8711_v13  ;;  %v2878_v50 = vmul.f32 %v7804_v36, %v8715_v30  ;;  %v2914_v24 = vmul.f32 %v7811_v1, %v1346_v33 }
 0x2d7   :  { %v3582_v16 = vmul.f32 %v7827_v47, %v1154_v20  ;;  %v1978_v59 = vadd.f32 %v1962_v14, %v1926_v31  ;;  %v2066_v61 = vadd.f32 %v2050_v29, %v2014_v22  ;;  %v3618_v23 = vmul.f32 %v7831_v19, %v1346_v33  ;;  %v10264_v29 = vld [vmem:[#allocation103_spill] sm:$0xff] }
 0x2d8   :  { %v1138_v28 = vsub.f32 %v5659_v41, %v5911_v4  ;;  %v8740_v62 = vadd.f32 %v2138_v25, %v2102_v32  ;;  %v1298_v7 = vsub.f32 %v10095_v27, %v5659_v41  ;;  %v2738_v12 = vmul.f32 %v7786_v49, %v1314_v35  ;;  %v10265_v25 = vld [vmem:[#allocation105_spill] sm:$0xff] }
 0x2d9   :  { %v3530_v53 = vmul.f32 %v7821_v2, %v1330_v57  ;;  %v2806_v46 = vmul.f32 %v2790_v15, %v1978_v59  ;;  %v2842_v18 = vmul.f32 %v2826_v3, %v2066_v61  ;;  %v2894_v13 = vmul.f32 %v2878_v50, %v2066_v61 }
 0x2da   :  { %10263 = vst [vmem:[#allocation94_spill] sm:$0xff] %v8740_v62  ;;  %v1822_v30 = vmul.f32 %v10126_v26, %v1138_v28  ;;  %v2930_v31 = vmul.f32 %v2914_v24, %v8740_v62  ;;  %v1858_v20 = vmul.f32 %v10127_v17, %v1298_v7  ;;  %v2702_v33 = vmul.f32 %v7838_v43, %v1138_v28 }
 0x2db   :  { %v2754_v22 = vmul.f32 %v2738_v12, %v1978_v59  ;;  %v2858_v14 = vadd.f32 %v2842_v18, %v2806_v46  ;;  %v3494_v41 = vmul.f32 %v7815_v54, %v1138_v28  ;;  %v2614_v57 = vmul.f32 %v10131_v6, %v10265_v25  ;;  %v10268_v46 = vld [vmem:[#allocation104_spill] sm:$0xff] }
 0x2dc   :  { %v1838_v32 = vmul.f32 %v1822_v30, %v10264_v29  ;;  %v8753_v15 = vadd.f32 %v2930_v31, %v2894_v13  ;;  %v1874_v3 = vmul.f32 %v1858_v20, %v978_v8  ;;  %v2650_v50 = vmul.f32 %v10132_v52, %v1298_v7  ;;  %v5660_v8 = vld [vmem:[#allocation3 + $0x60] sm:$0xff] }
 0x2dd   :  { %v3406_v24 = vmul.f32 %v7846_v37, %v10265_v25  ;;  %v3598_v61 = vmul.f32 %v3582_v16, %v2858_v14  ;;  %v3546_v62 = vmul.f32 %v3530_v53, %v2858_v14  ;;  %v2630_v59 = vmul.f32 %v2614_v57, %v10267_v60  ;;  %v10269_v53 = vld [vmem:[#allocation107_spill] sm:$0xff]  ;;  %v10271_v25 = vld [vmem:[#allocation108_spill] sm:$0xff] }
 0x2de   :  { %10266 = vst [vmem:[#allocation92_spill] sm:$0xff] %v8753_v15  ;;  %v3442_v12 = vmul.f32 %v7853_v55, %v1314_v35  ;;  %v3634_v30 = vmul.f32 %v3618_v23, %v8753_v15  ;;  %v1890_v28 = vadd.f32 %v1874_v3, %v1838_v32  ;;  %v3318_v18 = vmul.f32 %v10134_v21, %v10268_v46 }
 0x2df   :  { %v3354_v13 = vmul.f32 %v10136_v10, %v1298_v7  ;;  %vm627_vm2 = vcmp.ge.f32.partialorder %v5660_v8, %v10095_v27  ;;  %vm679_vm3 = vcmp.ge.f32.partialorder %v5660_v8, %v10090_v56  ;;  %vm731_vm4 = vcmp.ge.f32.partialorder %v5660_v8, %v10091_v9 }
 0x2e0   :  { %vm783_vm5 = vcmp.ge.f32.partialorder %v5660_v8, %v10092_v34  ;;  %v3650_v60 = vadd.f32 %v3634_v30, %v3598_v61  ;;  %v2718_v16 = vmul.f32 %v2702_v33, %v1890_v28  ;;  %v2666_v35 = vmul.f32 %v2650_v50, %v1890_v28 }
 0x2e1   :  { %v3334_v23 = vmul.f32 %v3318_v18, %v10269_v53  ;;  %v5059_v31 = vsel %vm627_vm2, 1.0, %v9982_v48  ;;  %v5075_v20 = vsel %vm679_vm3, 1.0, %v9982_v48  ;;  %v5091_v7 = vsel %vm731_vm4, 1.0, %v9982_v48 }
 0x2e2   :  { %v8773_v14 = vsel %vm783_vm5, 1.0, %v9982_v48  ;;  %4713 = vmatprep.mubr.f32.mxu1 %v3650_v60  ;;  %v2770_v29 = vadd.f32 %v2754_v22, %v2718_v16  ;;  %v2682_v32 = vadd.f32 %v2666_v35, %v2630_v59  ;;  %v979_v57 = vsub.f32 %v10271_v25, %v5059_v31 }
 0x2e3   :  { %10270 = vst [vmem:[#allocation95_spill] sm:$0xff] %v8773_v14  ;;  %v995_v3 = vsub.f32 %v5059_v31, %v5075_v20  ;;  %v1011_v61 = vsub.f32 %v5075_v20, %v5091_v7  ;;  %v8777_v33 = vsub.f32 %v5091_v7, %v8773_v14  ;;  %v1155_v50 = vsub.f32 %v5660_v8, %v5915_v5 }
 0x2e4   :  { %v8781_v30 = vsub.f32 %v5660_v8, %v10095_v27  ;;  %v3510_v28 = vmul.f32 %v3494_v41, %v2770_v29  ;;  %v3422_v46 = vmul.f32 %v3406_v24, %v2682_v32  ;;  %v3458_v18 = vmul.f32 %v3442_v12, %v2770_v29 }
 0x2e5   :  { %10272 = vst [vmem:[#allocation96_spill] sm:$0xff] %v8777_v33  ;;  %v3370_v53 = vmul.f32 %v3354_v13, %v2682_v32  ;;  %v8784_v60 = vsub.f32 %v5660_v8, %v10090_v56  ;;  %v1315_v22 = vsub.f32 %v10090_v56, %v5660_v8  ;;  %v1331_v59 = vsub.f32 %v10091_v9, %v5660_v8 }
 0x2e6   :  { %10273 = vst [vmem:[#allocation22_spill] sm:$0xff] %v8781_v30  ;;  %v1347_v16 = vsub.f32 %v10092_v34, %v5660_v8  ;;  %v3562_v35 = vadd.f32 %v3546_v62, %v3510_v28  ;;  %v3474_v31 = vadd.f32 %v3458_v18, %v3422_v46  ;;  %v1911_v7 = vmul.f32 %v7748_v63, %v1155_v50 }
 0x2e7   :  { %10274 = vst [vmem:[#allocation19_spill] sm:$0xff] %v8784_v60  ;;  %v3386_v20 = vadd.f32 %v3370_v53, %v3334_v23  ;;  %v1947_v25 = vmul.f32 %v7751_v0, %v1315_v22  ;;  %v1999_v41 = vmul.f32 %v7754_v38, %v8781_v30  ;;  %v2035_v24 = vmul.f32 %v7757_v42, %v1331_v59 }
 0x2e8   :  { %v2087_v12 = vmul.f32 %v10249_v39, %v8784_v60  ;;  %4714 = vmatmul.mubr.f32.gmra.mxu1 %v3562_v35  ;;  %4568 = vmatprep.mubr.f32.mxu0 %v3474_v31  ;;  %v1927_v13 = vmul.f32 %v1911_v7, %v979_v57  ;;  %v2123_v29 = vmul.f32 %v10250_v58, %v1347_v16 }
 0x2e9   :  { %v2791_v62 = vmul.f32 %v7797_v51, %v1155_v50  ;;  %4569 = vmatmul.mubr.f32.gmra.mxu0 %v3386_v20  ;;  %v1963_v23 = vmul.f32 %v1947_v25, %v995_v3  ;;  %v2015_v32 = vmul.f32 %v1999_v41, %v995_v3  ;;  %v2051_v28 = vmul.f32 %v2035_v24, %v1011_v61 }
 0x2ea   :  { %v2103_v46 = vmul.f32 %v2087_v12, %v1011_v61  ;;  %v2139_v18 = vmul.f32 %v2123_v29, %v8777_v33  ;;  %v2827_v53 = vmul.f32 %v7800_v44, %v1331_v59  ;;  %v2879_v14 = vmul.f32 %v7804_v36, %v8781_v30  ;;  %v10279_v30 = vld [vmem:[#allocation112_spill] sm:$0xff] }
 0x2eb   :  { %v2915_v35 = vmul.f32 %v7811_v1, %v1347_v16  ;;  %v1979_v31 = vadd.f32 %v1963_v23, %v1927_v13  ;;  %v2067_v7 = vadd.f32 %v2051_v28, %v2015_v32  ;;  %v3583_v60 = vmul.f32 %v7827_v47, %v1155_v50 }
 0x2ec   :  { %v3619_v15 = vmul.f32 %v7831_v19, %v1347_v16  ;;  %v8805_v20 = vadd.f32 %v2139_v18, %v2103_v46  ;;  %v1139_v3 = vsub.f32 %v5660_v8, %v5911_v4  ;;  %v1299_v61 = vsub.f32 %v10095_v27, %v5660_v8  ;;  %v10276_v8 = vld [vmem:[#allocation111_spill] sm:$0xff] }
 0x2ed   :  { %v2739_v25 = vmul.f32 %v7786_v49, %v1315_v22  ;;  %v2807_v41 = vmul.f32 %v2791_v62, %v1979_v31  ;;  %v2843_v24 = vmul.f32 %v2827_v53, %v2067_v7  ;;  %v2895_v12 = vmul.f32 %v2879_v14, %v2067_v7  ;;  %v10278_v14 = vld [vmem:[#allocation109_spill] sm:$0xff] }
 0x2ee   :  { %10275 = vst [vmem:[#allocation97_spill] sm:$0xff] %v8805_v20  ;;  %v3531_v29 = vmul.f32 %v7821_v2, %v1331_v59  ;;  %v2931_v13 = vmul.f32 %v2915_v35, %v8805_v20  ;;  %v1823_v23 = vmul.f32 %v10126_v26, %v1139_v3  ;;  %v1859_v50 = vmul.f32 %v10127_v17, %v1299_v61 }
 0x2ef   :  { %v2703_v16 = vmul.f32 %v7838_v43, %v1139_v3  ;;  %v2859_v32 = vadd.f32 %v2843_v24, %v2807_v41  ;;  %v2755_v28 = vmul.f32 %v2739_v25, %v1979_v31  ;;  %v3495_v46 = vmul.f32 %v7815_v54, %v1139_v3  ;;  %v10280_v24 = vld [vmem:[#allocation110_spill] sm:$0xff] }
 0x2f0   :  { %v2615_v18 = vmul.f32 %v10131_v6, %v10276_v8  ;;  %v8818_v62 = vadd.f32 %v2931_v13, %v2895_v12  ;;  %v1839_v53 = vmul.f32 %v1823_v23, %v10278_v14  ;;  %v1875_v59 = vmul.f32 %v1859_v50, %v979_v57  ;;  %v8830_v57 = vld [vmem:[#allocation3 + $0x68] sm:$0xff]  ;;  %v10283_v14 = vld [vmem:[#allocation114_spill] sm:$0xff] }
 0x2f1   :  { %v2651_v35 = vmul.f32 %v10132_v52, %v1299_v61  ;;  %v3599_v7 = vmul.f32 %v3583_v60, %v2859_v32  ;;  %v3547_v20 = vmul.f32 %v3531_v29, %v2859_v32  ;;  %v3407_v41 = vmul.f32 %v7846_v37, %v10276_v8 }
 0x2f2   :  { %10277 = vst [vmem:[#allocation99_spill] sm:$0xff] %v8818_v62  ;;  %v2631_v33 = vmul.f32 %v2615_v18, %v10279_v30  ;;  %v3635_v31 = vmul.f32 %v3619_v15, %v8818_v62  ;;  %v1891_v3 = vadd.f32 %v1875_v59, %v1839_v53  ;;  %v3443_v25 = vmul.f32 %v7853_v55, %v1315_v22  ;;  %v10281_v22 = vld [vmem:[#allocation113_spill] sm:$0xff] }
 0x2f3   :  { %v3319_v12 = vmul.f32 %v10134_v21, %v10280_v24  ;;  %v3355_v13 = vmul.f32 %v10136_v10, %v1299_v61  ;;  %vm628_vm6 = vcmp.ge.f32.partialorder %v8830_v57, %v10095_v27  ;;  %vm680_vm7 = vcmp.ge.f32.partialorder %v8830_v57, %v10090_v56 }
 0x2f4   :  { %vm732_vm8 = vcmp.ge.f32.partialorder %v8830_v57, %v10091_v9  ;;  %v3651_v15 = vadd.f32 %v3635_v31, %v3599_v7  ;;  %v2719_v30 = vmul.f32 %v2703_v16, %v1891_v3  ;;  %v2667_v60 = vmul.f32 %v2651_v35, %v1891_v3 }
 0x2f5   :  { %v3335_v29 = vmul.f32 %v3319_v12, %v10281_v22  ;;  %v5060_v23 = vsel %vm628_vm6, 1.0, %v9982_v48  ;;  %v5076_v61 = vsel %vm680_vm7, 1.0, %v9982_v48  ;;  %v5092_v50 = vsel %vm732_vm8, 1.0, %v9982_v48 }
 0x2f6   :  { %vm784_vm9 = vcmp.ge.f32.partialorder %v8830_v57, %v10092_v34  ;;  %4718 = vmatprep.mubr.f32.mxu1 %v3651_v15  ;;  %v2771_v32 = vadd.f32 %v2755_v28, %v2719_v30  ;;  %v2683_v8 = vadd.f32 %v2667_v60, %v2631_v33  ;;  %v980_v16 = vsub.f32 %v10283_v14, %v5060_v23 }
 0x2f7   :  { %v8845_v18 = vsel %vm784_vm9, 1.0, %v9982_v48  ;;  %v996_v53 = vsub.f32 %v5060_v23, %v5076_v61  ;;  %v1012_v59 = vsub.f32 %v5076_v61, %v5092_v50  ;;  %v1156_v7 = vsub.f32 %v8830_v57, %v5915_v5 }
 0x2f8   :  { %10282 = vst [vmem:[#allocation100_spill] sm:$0xff] %v8845_v18  ;;  %v8849_v35 = vsub.f32 %v5092_v50, %v8845_v18  ;;  %v3511_v31 = vmul.f32 %v3495_v46, %v2771_v32  ;;  %v3423_v3 = vmul.f32 %v3407_v41, %v2683_v8  ;;  %v3459_v24 = vmul.f32 %v3443_v25, %v2771_v32 }
 0x2f9   :  { %v3371_v12 = vmul.f32 %v3355_v13, %v2683_v8  ;;  %v8855_v33 = vsub.f32 %v8830_v57, %v10095_v27  ;;  %v8859_v28 = vsub.f32 %v8830_v57, %v10090_v56  ;;  %v1316_v15 = vsub.f32 %v10090_v56, %v8830_v57 }
 0x2fa   :  { %v1332_v30 = vsub.f32 %v10091_v9, %v8830_v57  ;;  %v3563_v60 = vadd.f32 %v3547_v20, %v3511_v31  ;;  %v3475_v22 = vadd.f32 %v3459_v24, %v3423_v3  ;;  %v1348_v41 = vsub.f32 %v10092_v34, %v8830_v57 }
 0x2fb   :  { %10284 = vst [vmem:[#allocation98_spill] sm:$0xff] %v8855_v33  ;;  %10285 = vst [vmem:[#allocation101_spill] sm:$0xff] %v8859_v28  ;;  %v3387_v46 = vadd.f32 %v3371_v12, %v3335_v29  ;;  %v1912_v25 = vmul.f32 %v7748_v63, %v1156_v7  ;;  %v1948_v13 = vmul.f32 %v7751_v0, %v1316_v15 }
 0x2fc   :  { %v2000_v23 = vmul.f32 %v7754_v38, %v8855_v33  ;;  %v2036_v61 = vmul.f32 %v7757_v42, %v1332_v30  ;;  %4719 = vmatmul.mubr.f32.gmra.mxu1 %v3563_v60  ;;  %4573 = vmatprep.mubr.f32.mxu0 %v3475_v22  ;;  %v2088_v50 = vmul.f32 %v10249_v39, %v8859_v28 }
 0x2fd   :  { %v2124_v20 = vmul.f32 %v10250_v58, %v1348_v41  ;;  %v2792_v29 = vmul.f32 %v7797_v51, %v1156_v7  ;;  %4574 = vmatmul.mubr.f32.gmra.mxu0 %v3387_v46  ;;  %v1928_v32 = vmul.f32 %v1912_v25, %v980_v16  ;;  %v1964_v8 = vmul.f32 %v1948_v13, %v996_v53 }
 0x2fe   :  { %v2016_v14 = vmul.f32 %v2000_v23, %v996_v53  ;;  %v2052_v31 = vmul.f32 %v2036_v61, %v1012_v59  ;;  %v2104_v3 = vmul.f32 %v2088_v50, %v1012_v59  ;;  %v2828_v12 = vmul.f32 %v7800_v44, %v1332_v30 }
 0x2ff   :  { %v2140_v24 = vmul.f32 %v2124_v20, %v8849_v35  ;;  %v2880_v60 = vmul.f32 %v7804_v36, %v8855_v33  ;;  %v1980_v22 = vadd.f32 %v1964_v8, %v1928_v32  ;;  %v2916_v28 = vmul.f32 %v7811_v1, %v1348_v41 }
 0x300   :  { %v2068_v62 = vadd.f32 %v2052_v31, %v2016_v14  ;;  %v3584_v18 = vmul.f32 %v7827_v47, %v1156_v7  ;;  %v3620_v46 = vmul.f32 %v7831_v19, %v1348_v41  ;;  %v1140_v53 = vsub.f32 %v8830_v57, %v5911_v4 }
 0x301   :  { %v8882_v45 = vadd.f32 %v2140_v24, %v2104_v3  ;;  %v1300_v59 = vsub.f32 %v10095_v27, %v8830_v57  ;;  %v2808_v25 = vmul.f32 %v2792_v29, %v1980_v22  ;;  %v2740_v61 = vmul.f32 %v7786_v49, %v1316_v15  ;;  %v10288_v29 = vld [vmem:[#allocation115_spill] sm:$0xff] }
 0x302   :  { %v2844_v13 = vmul.f32 %v2828_v12, %v2068_v62  ;;  %v2896_v23 = vmul.f32 %v2880_v60, %v2068_v62  ;;  %v1824_v20 = vmul.f32 %v10126_v26, %v1140_v53  ;;  %v2704_v32 = vmul.f32 %v7838_v43, %v1140_v53  ;;  %v10289_v12 = vld [vmem:[#allocation117_spill] sm:$0xff] }
 0x303   :  { %10286 = vst [vmem:[#allocation102_spill] sm:$0xff] %v8882_v45  ;;  %v2932_v50 = vmul.f32 %v2916_v28, %v8882_v45  ;;  %v1860_v7 = vmul.f32 %v10127_v17, %v1300_v59  ;;  %v2756_v8 = vmul.f32 %v2740_v61, %v1980_v22  ;;  %v3496_v14 = vmul.f32 %v7815_v54, %v1140_v53  ;;  %v10291_v61 = vld [vmem:[#allocation116_spill] sm:$0xff] }
 0x304   :  { %v2860_v41 = vadd.f32 %v2844_v13, %v2808_v25  ;;  %v3532_v31 = vmul.f32 %v7821_v2, %v1332_v30  ;;  %v1840_v62 = vmul.f32 %v1824_v20, %v10288_v29  ;;  %v2616_v28 = vmul.f32 %v10131_v6, %v10289_v12  ;;  %v10290_v13 = vld [vmem:[#allocation37_spill] sm:$0xff]  ;;  %v10295_v29 = vld [vmem:[#allocation118_spill] sm:$0xff] }
 0x305   :  { %v8896_v3 = vadd.f32 %v2932_v50, %v2896_v23  ;;  %v1876_v24 = vmul.f32 %v1860_v7, %v980_v16  ;;  %v2652_v33 = vmul.f32 %v10132_v52, %v1300_v59  ;;  %v3408_v25 = vmul.f32 %v7846_v37, %v10289_v12  ;;  %v8910_v20 = vld [vmem:[#allocation3 + $0x70] sm:$0xff] }
 0x306   :  { %v3600_v60 = vmul.f32 %v3584_v18, %v2860_v41  ;;  %v3548_v45 = vmul.f32 %v3532_v31, %v2860_v41  ;;  %v2632_v30 = vmul.f32 %v2616_v28, %v10290_v13  ;;  %v3444_v23 = vmul.f32 %v7853_v55, %v1316_v15  ;;  %10292 = vst [vmem:[#allocation105_spill] sm:$0xff] %v8910_v20  ;;  %v8916_v18 = vpop.f32.mrf.mxu1 }
 0x307   :  { %10287 = vst [vmem:[#allocation103_spill] sm:$0xff] %v8896_v3  ;;  %v3636_v22 = vmul.f32 %v3620_v46, %v8896_v3  ;;  %v1892_v53 = vadd.f32 %v1876_v24, %v1840_v62  ;;  %v3320_v16 = vmul.f32 %v10134_v21, %v10291_v61  ;;  %v3356_v50 = vmul.f32 %v10136_v10, %v1300_v59  ;;  %v8918_v46 = vpop.f32.mrf.mxu0 }
 0x308   :  { %vm629_vm10 = vcmp.ge.f32.partialorder %v8910_v20, %v10095_v27  ;;  %vm681_vm11 = vcmp.ge.f32.partialorder %v8910_v20, %v10090_v56  ;;  %10293 = vst [vmem:[#allocation106_spill] sm:$0xff] %v8916_v18  ;;  %10294 = vst [vmem:[#allocation104_spill] sm:$0xff] %v8918_v46  ;;  %vm733_vm12 = vcmp.ge.f32.partialorder %v8910_v20, %v10091_v9  ;;  %v8927_v24 = vpop.f32.mrf.mxu1 }
 0x309   :  { %v3652_v7 = vadd.f32 %v3636_v22, %v3600_v60  ;;  %v2720_v41 = vmul.f32 %v2704_v32, %v1892_v53  ;;  %v2668_v15 = vmul.f32 %v2652_v33, %v1892_v53  ;;  %v5061_v31 = vsel %vm629_vm10, 1.0, %v9982_v48  ;;  %10296 = vst [vmem:[#allocation107_spill] sm:$0xff] %v8927_v24  ;;  %v8929_v12 = vpop.f32.mrf.mxu0  ;;  %v10299_v22 = vld [vmem:[#allocation119_spill] sm:$0xff] }
 0x30a   :  { %v3336_v62 = vmul.f32 %v3320_v16, %v10295_v29  ;;  %v5077_v59 = vsel %vm681_vm11, 1.0, %v9982_v48  ;;  %vm785_vm13 = vcmp.ge.f32.partialorder %v8910_v20, %v10092_v34  ;;  %10297 = vst [vmem:[#allocation108_spill] sm:$0xff] %v8929_v12  ;;  %v5093_v33 = vsel %vm733_vm12, 1.0, %v9982_v48  ;;  %v8941_v29 = vpop.f32.mrf.mxu1 }
 0x30b   :  { %4723 = vmatprep.mubr.f32.mxu1 %v3652_v7  ;;  %v2772_v28 = vadd.f32 %v2756_v8, %v2720_v41  ;;  %v2684_v32 = vadd.f32 %v2668_v15, %v2632_v30  ;;  %v8933_v60 = vsel %vm785_vm13, 1.0, %v9982_v48  ;;  %v8936_v53 = vsub.f32 %v10299_v22, %v5061_v31  ;;  %10301 = vst [vmem:[#allocation112_spill] sm:$0xff] %v8941_v29  ;;  %v8943_v24 = vpop.f32.mrf.mxu0 }
 0x30c   :  { %10298 = vst [vmem:[#allocation111_spill] sm:$0xff] %v8933_v60  ;;  %v997_v13 = vsub.f32 %v5061_v31, %v5077_v59  ;;  %v1013_v61 = vsub.f32 %v5077_v59, %v5093_v33  ;;  %v8939_v16 = vsub.f32 %v5093_v33, %v8933_v60  ;;  %10302 = vst [vmem:[#allocation110_spill] sm:$0xff] %v8943_v24  ;;  %v8957_v33 = vpop.f32.mrf.mxu1 }
 0x30d   :  { %v3512_v7 = vmul.f32 %v3496_v14, %v2772_v28  ;;  %v3424_v8 = vmul.f32 %v3408_v25, %v2684_v32  ;;  %v3460_v30 = vmul.f32 %v3444_v23, %v2772_v28  ;;  %v3372_v41 = vmul.f32 %v3356_v50, %v2684_v32  ;;  %10305 = vst [vmem:[#allocation115_spill] sm:$0xff] %v8957_v33  ;;  %v8959_v14 = vpop.f32.mrf.mxu0 }
 0x30e   :  { %10300 = vst [vmem:[#allocation109_spill] sm:$0xff] %v8939_v16  ;;  %v1157_v15 = vsub.f32 %v8910_v20, %v5915_v5  ;;  %v8949_v22 = vsub.f32 %v8910_v20, %v10095_v27  ;;  %v8953_v31 = vsub.f32 %v8910_v20, %v10090_v56  ;;  %v1317_v59 = vsub.f32 %v10090_v56, %v8910_v20  ;;  %v8969_v46 = vpop.f32.mrf.mxu1 }
 0x30f   :  { %10306 = vst [vmem:[#allocation117_spill] sm:$0xff] %v8959_v14  ;;  %v3564_v25 = vadd.f32 %v3548_v45, %v3512_v7  ;;  %v3476_v23 = vadd.f32 %v3460_v30, %v3424_v8  ;;  %v3388_v50 = vadd.f32 %v3372_v41, %v3336_v62  ;;  %v1333_v28 = vsub.f32 %v10091_v9, %v8910_v20  ;;  %v8971_v33 = vpop.f32.mrf.mxu0 }
 0x310   :  { %10303 = vst [vmem:[#allocation113_spill] sm:$0xff] %v8949_v22  ;;  %10304 = vst [vmem:[#allocation114_spill] sm:$0xff] %v8953_v31  ;;  %v1349_v32 = vsub.f32 %v10092_v34, %v8910_v20  ;;  %v1913_v18 = vmul.f32 %v7748_v63, %v1157_v15  ;;  %v1949_v29 = vmul.f32 %v7751_v0, %v1317_v59  ;;  %v8979_v24 = vpop.f32.mrf.mxu1 }
 0x311   :  { %v2001_v12 = vmul.f32 %v7754_v38, %v8949_v22  ;;  %10307 = vst [vmem:[#allocation37_spill] sm:$0xff] %v8969_v46  ;;  %10308 = vst [vmem:[#allocation116_spill] sm:$0xff] %v8971_v33  ;;  %4724 = vmatmul.mubr.f32.gmra.mxu1 %v3564_v25  ;;  %4578 = vmatprep.mubr.f32.mxu0 %v3476_v23  ;;  %v2037_v45 = vmul.f32 %v7757_v42, %v1333_v28  ;;  %v8981_v46 = vpop.f32.mrf.mxu0 }
 0x312   :  { %v2089_v62 = vmul.f32 %v10249_v39, %v8953_v31  ;;  %v2793_v7 = vmul.f32 %v7797_v51, %v1157_v15  ;;  %4579 = vmatmul.mubr.f32.gmra.mxu0 %v3388_v50  ;;  %v1929_v8 = vmul.f32 %v1913_v18, %v8936_v53  ;;  %v1965_v30 = vmul.f32 %v1949_v29, %v997_v13 }
 0x313   :  { %v2017_v41 = vmul.f32 %v2001_v12, %v997_v13  ;;  %v2125_v14 = vmul.f32 %v10250_v58, %v1349_v32  ;;  %10309 = vst [vmem:[#allocation118_spill] sm:$0xff] %v8979_v24  ;;  %10310 = vst [vmem:[#allocation119_spill] sm:$0xff] %v8981_v46  ;;  %v2053_v25 = vmul.f32 %v2037_v45, %v1013_v61  ;;  %v8989_v13 = vpop.f32.mrf.mxu1  ;;  %v8991_v29 = vpop.f32.mrf.mxu0 }
 0x314   :  { %v2105_v23 = vmul.f32 %v2089_v62, %v1013_v61  ;;  %v2829_v33 = vmul.f32 %v7800_v44, %v1333_v28  ;;  %v2881_v31 = vmul.f32 %v7804_v36, %v8949_v22  ;;  %v1981_v60 = vadd.f32 %v1965_v30, %v1929_v8  ;;  %10311 = vst [vmem:[#allocation132_spill] sm:$0xff] %v8989_v13 }
 0x315   :  { %v2141_v50 = vmul.f32 %v2125_v14, %v8939_v16  ;;  %v2917_v18 = vmul.f32 %v7811_v1, %v1349_v32  ;;  %v3585_v12 = vmul.f32 %v7827_v47, %v1157_v15  ;;  %10312 = vst [vmem:[#allocation133_spill] sm:$0xff] %v8991_v29  ;;  %v2069_v24 = vadd.f32 %v2053_v25, %v2017_v41  ;;  %v9002_v46 = vpop.f32.mrf.mxu1  ;;  %v9004_v13 = vpop.f32.mrf.mxu0 }
 0x316   :  { %v3621_v45 = vmul.f32 %v7831_v19, %v1349_v32  ;;  %v1141_v61 = vsub.f32 %v8910_v20, %v5911_v4  ;;  %v1301_v62 = vsub.f32 %v10095_v27, %v8910_v20  ;;  %v2809_v14 = vmul.f32 %v2793_v7, %v1981_v60  ;;  %10314 = vst [vmem:[#allocation135_spill] sm:$0xff] %v9002_v46  ;;  %v10318_v20 = vld [vmem:[#allocation120_spill] sm:$0xff] }
 0x317   :  { %v8998_v8 = vadd.f32 %v2141_v50, %v2105_v23  ;;  %v2741_v30 = vmul.f32 %v7786_v49, %v1317_v59  ;;  %v3533_v15 = vmul.f32 %v7821_v2, %v1333_v28  ;;  %10315 = vst [vmem:[#allocation136_spill] sm:$0xff] %v9004_v13  ;;  %v2845_v41 = vmul.f32 %v2829_v33, %v2069_v24  ;;  %v9011_v16 = vpop.f32.mrf.mxu1  ;;  %v9013_v28 = vpop.f32.mrf.mxu0 }
 0x318   :  { %v2897_v25 = vmul.f32 %v2881_v31, %v2069_v24  ;;  %v1825_v32 = vmul.f32 %v10126_v26, %v1141_v61  ;;  %v1861_v29 = vmul.f32 %v10127_v17, %v1301_v62  ;;  %v2705_v23 = vmul.f32 %v7838_v43, %v1141_v61  ;;  %10316 = vst [vmem:[#allocation137_spill] sm:$0xff] %v9011_v16  ;;  %v10319_v31 = vld [vmem:[#allocation122_spill] sm:$0xff] }
 0x319   :  { %10313 = vst [vmem:[#allocation134_spill] sm:$0xff] %v8998_v8  ;;  %v2933_v22 = vmul.f32 %v2917_v18, %v8998_v8  ;;  %v2757_v50 = vmul.f32 %v2741_v30, %v1981_v60  ;;  %v3497_v7 = vmul.f32 %v7815_v54, %v1141_v61  ;;  %10317 = vst [vmem:[#allocation138_spill] sm:$0xff] %v9013_v28  ;;  %v9025_v30 = vpop.f32.mrf.mxu1  ;;  %v9027_v16 = vpop.f32.mrf.mxu0  ;;  %v9034_v8 = vld [vmem:[#allocation3 + $0x78] sm:$0xff] }
 0x31a   :  { %v2861_v46 = vadd.f32 %v2845_v41, %v2809_v14  ;;  %v1841_v13 = vmul.f32 %v1825_v32, %v10318_v20  ;;  %v1877_v24 = vmul.f32 %v1861_v29, %v8936_v53  ;;  %v2617_v33 = vmul.f32 %v10131_v6, %v10319_v31  ;;  %v10320_v53 = vld [vmem:[#allocation123_spill] sm:$0xff] }
 0x31b   :  { %v9019_v3 = vadd.f32 %v2933_v22, %v2897_v25  ;;  %v2653_v18 = vmul.f32 %v10132_v52, %v1301_v62  ;;  %v3409_v60 = vmul.f32 %v7846_v37, %v10319_v31  ;;  %v3445_v61 = vmul.f32 %v7853_v55, %v1317_v59  ;;  %v10321_v22 = vld [vmem:[#allocation121_spill] sm:$0xff]  ;;  %v9038_v59 = vpop.f32.mrf.mxu1  ;;  %v9040_v31 = vpop.f32.mrf.mxu0 }
 0x31c   :  { %v3601_v14 = vmul.f32 %v3585_v12, %v2861_v46  ;;  %v1893_v20 = vadd.f32 %v1877_v24, %v1841_v13  ;;  %v3549_v41 = vmul.f32 %v3533_v15, %v2861_v46  ;;  %v2633_v29 = vmul.f32 %v2617_v33, %v10320_v53  ;;  %10322 = vst [vmem:[#allocation120_spill] sm:$0xff] %v9038_v59  ;;  %v10323_v15 = vld [vmem:[#allocation124_spill] sm:$0xff] }
 0x31d   :  { %v3637_v32 = vmul.f32 %v3621_v45, %v9019_v3  ;;  %v3321_v25 = vmul.f32 %v10134_v21, %v10321_v22  ;;  %v3357_v28 = vmul.f32 %v10136_v10, %v1301_v62  ;;  %vm630_vm14 = vcmp.ge.f32.partialorder %v9034_v8, %v10095_v27  ;;  %v9049_v33 = vpop.f32.mrf.mxu1  ;;  %v9051_v53 = vpop.f32.mrf.mxu0 }
 0x31e   :  { %v2721_v12 = vmul.f32 %v2705_v23, %v1893_v20  ;;  %v2669_v46 = vmul.f32 %v2653_v18, %v1893_v20  ;;  %v5062_v13 = vsel %vm630_vm14, 1.0, %v9982_v48  ;;  %vm682_vm15 = vcmp.ge.f32.partialorder %v9034_v8, %v10090_v56  ;;  %10324 = vst [vmem:[#allocation122_spill] sm:$0xff] %v9049_v33  ;;  %10325 = vst [vmem:[#allocation123_spill] sm:$0xff] %v9051_v53  ;;  %v10326_v20 = vld [vmem:[#allocation125_spill] sm:$0xff] }
 0x31f   :  { %v3653_v45 = vadd.f32 %v3637_v32, %v3601_v14  ;;  %v3337_v24 = vmul.f32 %v3321_v25, %v10323_v15  ;;  %v5078_v62 = vsel %vm682_vm15, 1.0, %v9982_v48  ;;  %vm734_vm0 = vcmp.ge.f32.partialorder %v9034_v8, %v10091_v9  ;;  %v9062_v59 = vpop.f32.mrf.mxu1  ;;  %v9064_v33 = vpop.f32.mrf.mxu0 }
 0x320   :  { %v2773_v22 = vadd.f32 %v2757_v50, %v2721_v12  ;;  %v2685_v23 = vadd.f32 %v2669_v46, %v2633_v29  ;;  %v5094_v18 = vsel %vm734_vm0, 1.0, %v9982_v48  ;;  %vm786_vm1 = vcmp.ge.f32.partialorder %v9034_v8, %v10092_v34  ;;  %10327 = vst [vmem:[#allocation121_spill] sm:$0xff] %v9062_v59 }
 0x321   :  { %4728 = vmatprep.mubr.f32.mxu1 %v3653_v45  ;;  %v9057_v14 = vsel %vm786_vm1, 1.0, %v9982_v48  ;;  %v9060_v32 = vsub.f32 %v10326_v20, %v5062_v13  ;;  %v998_v25 = vsub.f32 %v5062_v13, %v5078_v62  ;;  %v1014_v15 = vsub.f32 %v5078_v62, %v5094_v18  ;;  %v9079_v62 = vpop.f32.mrf.mxu1 }
 0x322   :  { %v3513_v50 = vmul.f32 %v3497_v7, %v2773_v22  ;;  %v3425_v29 = vmul.f32 %v3409_v60, %v2685_v23  ;;  %v3461_v12 = vmul.f32 %v3445_v61, %v2773_v22  ;;  %v3373_v46 = vmul.f32 %v3357_v28, %v2685_v23  ;;  %10328 = vst [vmem:[#allocation124_spill] sm:$0xff] %v9079_v62  ;;  %v9081_v7 = vpop.f32.mrf.mxu0 }
 0x323   :  { %v9067_v53 = vsub.f32 %v5094_v18, %v9057_v14  ;;  %v1158_v45 = vsub.f32 %v9034_v8, %v5915_v5  ;;  %v9073_v20 = vsub.f32 %v9034_v8, %v10095_v27  ;;  %v9077_v13 = vsub.f32 %v9034_v8, %v10090_v56  ;;  %10329 = vst [vmem:[#allocation125_spill] sm:$0xff] %v9081_v7  ;;  %v9092_v62 = vpop.f32.mrf.mxu1 }
 0x324   :  { %v3565_v60 = vadd.f32 %v3549_v41, %v3513_v50  ;;  %v3477_v28 = vadd.f32 %v3461_v12, %v3425_v29  ;;  %v3389_v61 = vadd.f32 %v3373_v46, %v3337_v24  ;;  %v1318_v22 = vsub.f32 %v10090_v56, %v9034_v8  ;;  %v9094_v7 = vpop.f32.mrf.mxu0 }
 0x325   :  { %v1334_v5 = vsub.f32 %v10091_v9, %v9034_v8  ;;  %v1350_v23 = vsub.f32 %v10092_v34, %v9034_v8  ;;  %v1914_v18 = vmul.f32 %v7748_v63, %v1158_v45  ;;  %v2002_v59 = vmul.f32 %v7754_v38, %v9073_v20  ;;  %v9103_v29 = vpop.f32.mrf.mxu1 }
 0x326   :  { %4729 = vmatmul.mubr.f32.gmra.mxu1 %v3565_v60  ;;  %4583 = vmatprep.mubr.f32.mxu0 %v3477_v28  ;;  %v1950_v41 = vmul.f32 %v7751_v0, %v1318_v22  ;;  %v2090_v56 = vmul.f32 %v10249_v39, %v9077_v13  ;;  %v2794_v24 = vmul.f32 %v7797_v51, %v1158_v45  ;;  %v9105_v12 = vpop.f32.mrf.mxu0 }
 0x327   :  { %4584 = vmatmul.mubr.f32.gmra.mxu0 %v3389_v61  ;;  %v1930_v34 = vmul.f32 %v1914_v18, %v9060_v32  ;;  %v2018_v63 = vmul.f32 %v2002_v59, %v998_v25  ;;  %v2038_v50 = vmul.f32 %v7757_v42, %v1334_v5  ;;  %v2126_v38 = vmul.f32 %v10250_v58, %v1350_v23  ;;  %v9113_v61 = vpop.f32.mrf.mxu1 }
 0x328   :  { %v1966_v46 = vmul.f32 %v1950_v41, %v998_v25  ;;  %v2106_v60 = vmul.f32 %v2090_v56, %v1014_v15  ;;  %v2830_v0 = vmul.f32 %v7800_v44, %v1334_v5  ;;  %v2882_v39 = vmul.f32 %v7804_v36, %v9073_v20  ;;  %10330 = vst [vmem:[#allocation139_spill] sm:$0xff] %v9113_v61  ;;  %v9115_v58 = vpop.f32.mrf.mxu0 }
 0x329   :  { %v2054_v51 = vmul.f32 %v2038_v50, %v1014_v15  ;;  %v2142_v28 = vmul.f32 %v2126_v38, %v9067_v53  ;;  %v2918_v59 = vmul.f32 %v7811_v1, %v1350_v23  ;;  %v3586_v42 = vmul.f32 %v7827_v47, %v1158_v45  ;;  %v9126_v45 = vpop.f32.mrf.mxu1 }
 0x32a   :  { %v1982_v18 = vadd.f32 %v1966_v46, %v1930_v34  ;;  %v3622_v25 = vmul.f32 %v7831_v19, %v1350_v23  ;;  %v1142_v44 = vsub.f32 %v9034_v8, %v5911_v4  ;;  %v1302_v36 = vsub.f32 %v10095_v27, %v9034_v8  ;;  %10331 = vst [vmem:[#allocation140_spill] sm:$0xff] %v9126_v45  ;;  %v9128_v56 = vpop.f32.mrf.mxu0 }
 0x32b   :  { %v2070_v15 = vadd.f32 %v2054_v51, %v2018_v63  ;;  %v9122_v41 = vadd.f32 %v2142_v28, %v2106_v60  ;;  %v2742_v1 = vmul.f32 %v7786_v49, %v1318_v22  ;;  %v3534_v47 = vmul.f32 %v7821_v2, %v1334_v5  ;;  %10332 = vst [vmem:[#allocation141_spill] sm:$0xff] %v9128_v56  ;;  %v9134_v46 = vpop.f32.mrf.mxu1  ;;  %v10334_v2 = vld [vmem:[#allocation126_spill] sm:$0xff] }
 0x32c   :  { %v2810_v34 = vmul.f32 %v2794_v24, %v1982_v18  ;;  %v1826_v19 = vmul.f32 %v10126_v26, %v1142_v44  ;;  %v1862_v23 = vmul.f32 %v10127_v17, %v1302_v36  ;;  %v2706_v4 = vmul.f32 %v7838_v43, %v1142_v44  ;;  %10333 = vst [vmem:[#allocation142_spill] sm:$0xff] %v9134_v46  ;;  %v9136_v49 = vpop.f32.mrf.mxu0  ;;  %v10335_v26 = vld [vmem:[#allocation128_spill] sm:$0xff] }
 0x32d   :  { %v2846_v50 = vmul.f32 %v2830_v0, %v2070_v15  ;;  %v2898_v27 = vmul.f32 %v2882_v39, %v2070_v15  ;;  %v2934_v63 = vmul.f32 %v2918_v59, %v9122_v41  ;;  %v2758_v38 = vmul.f32 %v2742_v1, %v1982_v18  ;;  %v9148_v28 = vpop.f32.mrf.mxu1  ;;  %v10337_v15 = vld [vmem:[#allocation129_spill] sm:$0xff] }
 0x32e   :  { %v1842_v5 = vmul.f32 %v1826_v19, %v10334_v2  ;;  %v1878_v60 = vmul.f32 %v1862_v23, %v9060_v32  ;;  %v3498_v24 = vmul.f32 %v7815_v54, %v1142_v44  ;;  %v2618_v17 = vmul.f32 %v10131_v6, %v10335_v26  ;;  %10336 = vst [vmem:[#allocation126_spill] sm:$0xff] %v9148_v28  ;;  %v9150_v59 = vpop.f32.mrf.mxu0  ;;  %v10338_v44 = vld [vmem:[#allocation127_spill] sm:$0xff]  ;;  %v10447_v28 = vld [vmem:[#allocation62_spill] sm:$0xff] }
 0x32f   :  { %v2862_v51 = vadd.f32 %v2846_v50, %v2810_v34  ;;  %v9143_v43 = vadd.f32 %v2934_v63, %v2898_v27  ;;  %v2654_v0 = vmul.f32 %v10132_v52, %v1302_v36  ;;  %v3410_v39 = vmul.f32 %v7846_v37, %v10335_v26  ;;  %v9158_v23 = vpop.f32.mrf.mxu1  ;;  %v10341_v63 = vld [vmem:[#allocation47_spill] sm:$0xff] }
 0x330   :  { %v1894_v18 = vadd.f32 %v1878_v60, %v1842_v5  ;;  %v2634_v32 = vmul.f32 %v2618_v17, %v10337_v15  ;;  %v3446_v54 = vmul.f32 %v7853_v55, %v1318_v22  ;;  %v3322_v6 = vmul.f32 %v10134_v21, %v10338_v44  ;;  %10339 = vst [vmem:[#allocation128_spill] sm:$0xff] %v9158_v23  ;;  %v9160_v37 = vpop.f32.mrf.mxu0  ;;  %v5664_v5 = vld [vmem:[#allocation3 + $0x40] sm:$0xff]  ;;  %v10342_v60 = vld [vmem:[#allocation24_spill] sm:$0xff]  ;;  %v10346_v17 = vld [vmem:[#allocation77_spill] sm:$0xff] }
 0x331   :  { %v3602_v1 = vmul.f32 %v3586_v42, %v2862_v51  ;;  %v3638_v34 = vmul.f32 %v3622_v25, %v9143_v43  ;;  %v3550_v19 = vmul.f32 %v3534_v47, %v2862_v51  ;;  %v3358_v52 = vmul.f32 %v10136_v10, %v1302_v36  ;;  %10340 = vst [vmem:[#allocation129_spill] sm:$0xff] %v9160_v37  ;;  %v9167_v25 = vpop.f32.mrf.mxu1  ;;  %v10349_v15 = vld [vmem:[#allocation83_spill] sm:$0xff] }
 0x332   :  { %v2722_v50 = vmul.f32 %v2706_v4, %v1894_v18  ;;  %v2670_v27 = vmul.f32 %v2654_v0, %v1894_v18  ;;  %v3338_v2 = vmul.f32 %v3322_v6, %v10341_v63  ;;  %vm831_vm2 = vcmp.ge.f32.partialorder %v5664_v5, %v10342_v60  ;;  %10343 = vst [vmem:[#allocation127_spill] sm:$0xff] %v9167_v25  ;;  %v9169_v10 = vpop.f32.mrf.mxu0  ;;  %v10345_v4 = vld [vmem:[#allocation75_spill] sm:$0xff]  ;;  %v10347_v0 = vld [vmem:[#allocation82_spill] sm:$0xff]  ;;  %v10350_v6 = vld [vmem:[#allocation28_spill] sm:$0xff] }
 0x333   :  { %v3654_v55 = vadd.f32 %v3638_v34, %v3602_v1  ;;  %v5119_v21 = vsel %vm831_vm2, 1.0, %v9982_v48  ;;  %v1199_v22 = vsub.f32 %v5664_v5, %v10091_v9  ;;  %v1359_v42 = vsub.f32 %v10342_v60, %v5664_v5  ;;  %10344 = vst [vmem:[#allocation47_spill] sm:$0xff] %v9169_v10  ;;  %v10351_v34 = vld [vmem:[#allocation38_spill] sm:$0xff]  ;;  %v5665_v5 = vld [vmem:[#allocation9 + $0x10] sm:$0xff] }
 0x334   :  { %v2774_v36 = vadd.f32 %v2758_v38, %v2722_v50  ;;  %v2686_v47 = vadd.f32 %v2670_v27, %v2634_v32  ;;  %v1039_v26 = vsub.f32 %v10345_v4, %v5119_v21  ;;  %v2963_v51 = vmul.f32 %v10235_v40, %v10346_v17  ;;  %v10352_v25 = vld [vmem:[#allocation18_spill] sm:$0xff]  ;;  %v9183_v38 = vpop.f32.mrf.mxu1  ;;  %v9185_v32 = vpop.f32.mrf.mxu0 }
 0x335   :  { %v10348_v18 = vsub.f32 %v8530_v11, %v10347_v0  ;;  %4733 = vmatprep.mubr.f32.mxu1 %v3654_v55  ;;  %v2171_v1 = vmul.f32 %v10350_v6, %v1199_v22  ;;  %v2207_v63 = vmul.f32 %v10351_v34, %v1359_v42  ;;  %v9181_v23 = vrot.slane %v5665_v5, %v10352_v25  ;;  %v10355_v11 = vld [vmem:[#allocation74_spill] sm:$0xff]  ;;  %v10356_v22 = vld [vmem:[#allocation76_spill] sm:$0xff] }
 0x336   :  { %10353 = vst [vmem:[#allocation24_spill] sm:$0xff] %v9183_v38  ;;  %10354 = vst [vmem:[#allocation75_spill] sm:$0xff] %v9185_v32  ;;  %v3514_v50 = vmul.f32 %v3498_v24, %v2774_v36  ;;  %v3426_v27 = vmul.f32 %v3410_v39, %v2686_v47  ;;  %v3462_v21 = vmul.f32 %v3446_v54, %v2774_v36  ;;  %v9191_v10 = vpop.f32.mrf.mxu1  ;;  %v9193_v5 = vpop.f32.mrf.mxu0  ;;  %v10360_v32 = vld [vmem:[#allocation79_spill] sm:$0xff]  ;;  %v5666_v54 = vld [vmem:[#allocation9 + $0x18] sm:$0x7] }
 0x337   :  { %v2224_v44 = vmul.f32 %v10349_v15, %v10348_v18  ;;  %v3374_v4 = vmul.f32 %v3358_v52, %v2686_v47  ;;  %v2187_v17 = vmul.f32 %v2171_v1, %v10355_v11  ;;  %v2223_v0 = vmul.f32 %v2207_v63, %v1039_v26  ;;  %v10357_v18 = vld [vmem:[#allocation131_spill] sm:$0xff]  ;;  %10358 = vst [vmem:[#allocation77_spill] sm:$0xff] %v9191_v10  ;;  %v10361_v36 = vld [vmem:[#allocation84_spill] sm:$0xff] }
 0x338   :  { %v2999_v55 = vmul.f32 %v9181_v23, %v1359_v42  ;;  %v3667_v15 = vmul.f32 %v10357_v18, %v10356_v22  ;;  %10359 = vst [vmem:[#allocation82_spill] sm:$0xff] %v9193_v5  ;;  %v3566_v37 = vadd.f32 %v3550_v19, %v3514_v50  ;;  %v3478_v38 = vadd.f32 %v3462_v21, %v3426_v27  ;;  %v10362_v26 = vld [vmem:[#allocation80_spill] sm:$0xff]  ;;  %v9202_v63 = vpop.f32.mrf.mxu1  ;;  %v9204_v11 = vpop.f32.mrf.mxu0  ;;  %v5667_v19 = vld [vmem:[#allocation3] sm:$0xff]  ;;  %v10419_v5 = vld [vmem:[#allocation25_spill] sm:$0xff] }
 0x339   :  { %v3390_v45 = vadd.f32 %v3374_v4, %v3338_v2  ;;  %v2979_v24 = vmul.f32 %v2963_v51, %v10360_v32  ;;  %v2239_v39 = vadd.f32 %v2223_v0, %v2187_v17  ;;  %v9197_v52 = vrot.slane %v5666_v54, %v10352_v25  ;;  %10363 = vst [vmem:[#allocation83_spill] sm:$0xff] %v9202_v63  ;;  %v10367_v17 = vld [vmem:[#allocation26_spill] sm:$0xff]  ;;  %v10369_v22 = vld [vmem:[#allocation27_spill] sm:$0xff]  ;;  %v10370_v54 = vld [vmem:[#allocation49_spill] sm:$0xff] }
 0x33a   :  { %v2240_v47 = vadd.f32 %v2224_v44, %v10361_v36  ;;  %v3000_v1 = vmul.f32 %v9181_v23, %v10362_v26  ;;  %10364 = vst [vmem:[#allocation28_spill] sm:$0xff] %v9204_v11  ;;  %4734 = vmatmul.mubr.f32.gmra.mxu1 %v3566_v37  ;;  %4588 = vmatprep.mubr.f32.mxu0 %v3478_v38  ;;  %v9212_v27 = vpop.f32.mrf.mxu1  ;;  %v9214_v21 = vpop.f32.mrf.mxu0  ;;  %v10394_v10 = vld [vmem:[#allocation87_spill] sm:$0xff] }
 0x33b   :  { %vm823_vm3 = vcmp.ge.f32.partialorder %v5667_v19, %v10342_v60  ;;  %v1191_v2 = vsub.f32 %v5667_v19, %v10091_v9  ;;  %v1351_v51 = vsub.f32 %v10342_v60, %v5667_v19  ;;  %4589 = vmatmul.mubr.f32.gmra.mxu0 %v3390_v45  ;;  %v3015_v25 = vmul.f32 %v2999_v55, %v2239_v39  ;;  %v10368_v55 = vld [vmem:[#allocation81_spill] sm:$0xff] }
 0x33c   :  { %v3703_v44 = vmul.f32 %v9197_v52, %v1359_v42  ;;  %v3016_v32 = vmul.f32 %v3000_v1, %v2240_v47  ;;  %v3704_v50 = vmul.f32 %v9197_v52, %v10362_v26  ;;  %10365 = vst [vmem:[#allocation38_spill] sm:$0xff] %v9212_v27  ;;  %10366 = vst [vmem:[#allocation18_spill] sm:$0xff] %v9214_v21  ;;  %v5111_v37 = vsel %vm823_vm3, 1.0, %v9982_v48  ;;  %v9224_v47 = vpop.f32.mrf.mxu1  ;;  %v9226_v26 = vpop.f32.mrf.mxu0  ;;  %v10373_v1 = vld [vmem:[#allocation23_spill] sm:$0xff]  ;;  %v10374_v27 = vld [vmem:[#allocation20_spill] sm:$0xff] }
 0x33d   :  { %v2163_v38 = vmul.f32 %v10350_v6, %v1191_v2  ;;  %v2199_v4 = vmul.f32 %v10351_v34, %v1351_v51  ;;  %v2955_v45 = vmul.f32 %v10235_v40, %v10367_v17  ;;  %v3031_v0 = vadd.f32 %v3015_v25, %v2979_v24  ;;  %10371 = vst [vmem:[#allocation74_spill] sm:$0xff] %v9224_v47  ;;  %v10375_v24 = vld [vmem:[#allocation46_spill] sm:$0xff] }
 0x33e   :  { %v3683_v42 = vmul.f32 %v3667_v15, %v10368_v55  ;;  %v3032_v39 = vadd.f32 %v3016_v32, %v10369_v22  ;;  %v1031_v36 = vsub.f32 %v10370_v54, %v5111_v37  ;;  %10372 = vst [vmem:[#allocation76_spill] sm:$0xff] %v9226_v26  ;;  %v2991_v63 = vmul.f32 %v9181_v23, %v1351_v51  ;;  %v10376_v25 = vld [vmem:[#allocation78_spill] sm:$0xff]  ;;  %v9233_v55 = vpop.f32.mrf.mxu1  ;;  %v9235_v32 = vpop.f32.mrf.mxu0  ;;  %v10379_v37 = vld [vmem:[#allocation45_spill] sm:$0xff] }
 0x33f   :  { %v2179_v19 = vmul.f32 %v2163_v38, %v10373_v1  ;;  %v2971_v2 = vmul.f32 %v2955_v45, %v10374_v27  ;;  %v3719_v21 = vmul.f32 %v3703_v44, %v3031_v0  ;;  %v2232_v15 = vadd.f32 %v10376_v25, %v10375_v24  ;;  %10377 = vst [vmem:[#allocation131_spill] sm:$0xff] %v9233_v55  ;;  %v10380_v54 = vld [vmem:[#allocation29_spill] sm:$0xff]  ;;  %v10384_v25 = vld [vmem:[#allocation50_spill] sm:$0xff] }
 0x340   :  { %v3720_v11 = vmul.f32 %v3704_v50, %v3032_v39  ;;  %v2215_v17 = vmul.f32 %v2199_v4, %v1031_v36  ;;  %10378 = vst [vmem:[#allocation79_spill] sm:$0xff] %v9235_v32  ;;  %v3659_v22 = vmul.f32 %v10357_v18, %v10379_v37  ;;  %v2992_v38 = vmul.f32 %v9181_v23, %v10380_v54  ;;  %v5668_v45 = vld [vmem:[#allocation3 + $0x50] sm:$0xff]  ;;  %v9246_v36 = vpop.f32.mrf.mxu1  ;;  %v9248_v1 = vpop.f32.mrf.mxu0  ;;  %v10393_v26 = vld [vmem:[#allocation86_spill] sm:$0xff] }
 0x341   :  { %v3696_v27 = vmul.f32 %v9197_v52, %v10380_v54  ;;  %vm833_vm4 = vcmp.ge.f32.partialorder %v5668_v45, %v10342_v60  ;;  %v3735_v44 = vadd.f32 %v3719_v21, %v3683_v42  ;;  %v10381_v50 = vld [vmem:[#allocation17_spill] sm:$0xff]  ;;  %10382 = vst [vmem:[#allocation84_spill] sm:$0xff] %v9246_v36  ;;  %10383 = vst [vmem:[#allocation80_spill] sm:$0xff] %v9248_v1  ;;  %v5669_v42 = vld [vmem:[#allocation3 + $0x58] sm:$0xff] }
 0x342   :  { %v3736_v4 = vadd.f32 %v3720_v11, %v10381_v50  ;;  %v2231_v0 = vadd.f32 %v2215_v17, %v2179_v19  ;;  %v5121_v39 = vsel %vm833_vm4, 1.0, %v9982_v48  ;;  %v3008_v24 = vmul.f32 %v2992_v38, %v2232_v15  ;;  %v10385_v11 = vld [vmem:[#allocation48_spill] sm:$0xff]  ;;  %v10391_v1 = vld [vmem:[#allocation90_spill] sm:$0xff] }
 0x343   :  { %v1041_v37 = vsub.f32 %v10384_v25, %v5121_v39  ;;  %v1201_v55 = vsub.f32 %v5668_v45, %v10091_v9  ;;  %v1361_v54 = vsub.f32 %v10342_v60, %v5668_v45  ;;  %5523 = vmatprep.mubr.f32.mxu1 %v3735_v44  ;;  %v3695_v21 = vmul.f32 %v9197_v52, %v1351_v51  ;;  %v10386_v38 = vld [vmem:[#allocation88_spill] sm:$0xff]  ;;  %v10387_v25 = vld [vmem:[#allocation21_spill] sm:$0xff]  ;;  %v9262_v44 = vpop.f32.mrf.mxu1  ;;  %v9264_v51 = vpop.f32.mrf.mxu0 }
 0x344   :  { %v3007_v47 = vmul.f32 %v2991_v63, %v2231_v0  ;;  %vm834_vm5 = vcmp.ge.f32.partialorder %v5669_v42, %v10342_v60  ;;  %5524 = vmatmul.mubr.f32.vlgmr.msra.gmra.mxu1 %v3736_v4  ;;  %v3024_v19 = vadd.f32 %v3008_v24, %v10385_v11  ;;  %v2965_v50 = vmul.f32 %v10235_v40, %v10386_v38  ;;  %v10390_v4 = vld [vmem:[#allocation85_spill] sm:$0xff] }
 0x345   :  { %v2173_v17 = vmul.f32 %v10350_v6, %v1201_v55  ;;  %v2209_v15 = vmul.f32 %v10351_v34, %v1361_v54  ;;  %v3675_v45 = vmul.f32 %v3659_v22, %v10387_v25  ;;  %v3001_v63 = vmul.f32 %v9181_v23, %v1361_v54  ;;  %10388 = vst [vmem:[#allocation26_spill] sm:$0xff] %v9262_v44 }
 0x346   :  { %v3023_v39 = vadd.f32 %v3007_v47, %v2971_v2  ;;  %10389 = vst [vmem:[#allocation81_spill] sm:$0xff] %v9264_v51  ;;  %v3712_v0 = vmul.f32 %v3696_v27, %v3024_v19  ;;  %v5122_v55 = vsel %vm834_vm5, 1.0, %v9982_v48  ;;  %v1202_v38 = vsub.f32 %v5669_v42, %v10091_v9  ;;  %v10392_v2 = vld [vmem:[#allocation35_spill] sm:$0xff] }
 0x347   :  { %v2189_v36 = vmul.f32 %v2173_v17, %v10390_v4  ;;  %v2225_v24 = vmul.f32 %v2209_v15, %v1041_v37  ;;  %v1042_v32 = vsub.f32 %v10391_v1, %v5122_v55  ;;  %v1362_v47 = vsub.f32 %v10342_v60, %v5669_v42  ;;  %v9279_v15 = vpop.f32.mrf.mxu1 }
 0x348   :  { %v3711_v11 = vmul.f32 %v3695_v21, %v3023_v39  ;;  %v3728_v22 = vadd.f32 %v3712_v0, %v10392_v2  ;;  %v2981_v44 = vmul.f32 %v2965_v50, %v10393_v26  ;;  %v3669_v27 = vmul.f32 %v10357_v18, %v10394_v10  ;;  %v10395_v21 = vld [vmem:[#allocation91_spill] sm:$0xff]  ;;  %10396 = vst [vmem:[#allocation27_spill] sm:$0xff] %v9279_v15  ;;  %v9281_v39 = vpop.f32.mrf.mxu0  ;;  %v10398_v50 = vld [vmem:[#allocation93_spill] sm:$0xff] }
 0x349   :  { %v2241_v25 = vadd.f32 %v2225_v24, %v2189_v36  ;;  %v2174_v37 = vmul.f32 %v10350_v6, %v1202_v38  ;;  %v2210_v17 = vmul.f32 %v10351_v34, %v1362_v47  ;;  %v2966_v1 = vmul.f32 %v10235_v40, %v10395_v21  ;;  %10397 = vst [vmem:[#allocation49_spill] sm:$0xff] %v9281_v39  ;;  %v5670_v24 = vld [vmem:[#allocation3 + $0x10] sm:$0xff]  ;;  %v10401_v21 = vld [vmem:[#allocation94_spill] sm:$0xff] }
 0x34a   :  { %v3727_v19 = vadd.f32 %v3711_v11, %v3675_v45  ;;  %v3705_v36 = vmul.f32 %v9197_v52, %v1361_v54  ;;  %v3002_v26 = vmul.f32 %v9181_v23, %v1362_v47  ;;  %v3670_v10 = vmul.f32 %v10357_v18, %v10398_v50  ;;  %v10399_v45 = vld [vmem:[#allocation130_spill] sm:$0xff]  ;;  %v10400_v38 = vld [vmem:[#allocation89_spill] sm:$0xff] }
 0x34b   :  { %v3017_v42 = vmul.f32 %v3001_v63, %v2241_v25  ;;  %v2190_v0 = vmul.f32 %v2174_v37, %v10399_v45  ;;  %v2226_v4 = vmul.f32 %v2210_v17, %v1042_v32  ;;  %vm825_vm6 = vcmp.ge.f32.partialorder %v5670_v24, %v10342_v60  ;;  %v9296_v37 = vpop.f32.mrf.mxu1  ;;  %v9298_v17 = vpop.f32.mrf.mxu0 }
 0x34c   :  { %5511 = vmatprep.mubr.f32.mxu0 %v3727_v19  ;;  %v1193_v55 = vsub.f32 %v5670_v24, %v10091_v9  ;;  %v3685_v63 = vmul.f32 %v3669_v27, %v10400_v38  ;;  %v5113_v54 = vsel %vm825_vm6, 1.0, %v9982_v48  ;;  %v1353_v2 = vsub.f32 %v10342_v60, %v5670_v24  ;;  %v10402_v19 = vld [vmem:[#allocation36_spill] sm:$0xff]  ;;  %10403 = vst [vmem:[#allocation23_spill] sm:$0xff] %v9296_v37  ;;  %v10412_v37 = vld [vmem:[#allocation54_spill] sm:$0xff] }
 0x34d   :  { %5512 = vmatmul.mubr.f32.vlgmr.msra.gmra.mxu0 %v3728_v22  ;;  %v3033_v11 = vadd.f32 %v3017_v42, %v2981_v44  ;;  %v2242_v25 = vadd.f32 %v2226_v4, %v2190_v0  ;;  %v2982_v50 = vmul.f32 %v2966_v1, %v10401_v21  ;;  %v1033_v15 = vsub.f32 %v10402_v19, %v5113_v54  ;;  %v10405_v22 = vld [vmem:[#allocation92_spill] sm:$0xff]  ;;  %v10407_v1 = vld [vmem:[#allocation51_spill] sm:$0xff]  ;;  %v5671_v19 = vld [vmem:[#allocation3 + $0x18] sm:$0xff] }
 0x34e   :  { %v2165_v32 = vmul.f32 %v10350_v6, %v1193_v55  ;;  %10404 = vst [vmem:[#allocation20_spill] sm:$0xff] %v9298_v17  ;;  %v3686_v44 = vmul.f32 %v3670_v10, %v10405_v22  ;;  %v2201_v27 = vmul.f32 %v10351_v34, %v1353_v2  ;;  %v10406_v42 = vld [vmem:[#allocation40_spill] sm:$0xff]  ;;  %v3706_v0 = vmul.f32 %v9197_v52, %v1362_v47  ;;  %v9313_v47 = vpop.f32.mrf.mxu1  ;;  %v10413_v17 = vld [vmem:[#allocation39_spill] sm:$0xff] }
 0x34f   :  { %v3721_v45 = vmul.f32 %v3705_v36, %v3033_v11  ;;  %v2957_v38 = vmul.f32 %v10235_v40, %v10406_v42  ;;  %v3018_v24 = vmul.f32 %v3002_v26, %v2242_v25  ;;  %v2993_v54 = vmul.f32 %v9181_v23, %v1353_v2  ;;  %v10408_v11 = vld [vmem:[#allocation53_spill] sm:$0xff]  ;;  %v9315_v25 = vpop.f32.mrf.mxu0 }
 0x350   :  { %v2181_v4 = vmul.f32 %v2165_v32, %v10407_v1  ;;  %v2217_v21 = vmul.f32 %v2201_v27, %v1033_v15  ;;  %vm826_vm7 = vcmp.ge.f32.partialorder %v5671_v19, %v10342_v60  ;;  %v1194_v36 = vsub.f32 %v5671_v19, %v10091_v9  ;;  %10409 = vst [vmem:[#allocation46_spill] sm:$0xff] %v9315_v25  ;;  %v10410_v15 = vld [vmem:[#allocation41_spill] sm:$0xff] }
 0x351   :  { %v3737_v55 = vadd.f32 %v3721_v45, %v3685_v63  ;;  %v3034_v10 = vadd.f32 %v3018_v24, %v2982_v50  ;;  %v3661_v22 = vmul.f32 %v10357_v18, %v10408_v11  ;;  %v5114_v42 = vsel %vm826_vm7, 1.0, %v9982_v48  ;;  %v10411_v45 = vld [vmem:[#allocation43_spill] sm:$0xff] }
 0x352   :  { %v1354_v26 = vsub.f32 %v10342_v60, %v5671_v19  ;;  %v2233_v63 = vadd.f32 %v2217_v21, %v2181_v4  ;;  %v2973_v32 = vmul.f32 %v2957_v38, %v10410_v15  ;;  %v1034_v27 = vsub.f32 %v10411_v45, %v5114_v42  ;;  %v10414_v4 = vld [vmem:[#allocation44_spill] sm:$0xff]  ;;  %v5672_v15 = vld [vmem:[#allocation3 + $0x60] sm:$0xff] }
 0x353   :  { %5526 = vmatprep.mubr.f32.mxu1 %v3737_v55  ;;  %v2166_v1 = vmul.f32 %v10350_v6, %v1194_v36  ;;  %v3722_v50 = vmul.f32 %v3706_v0, %v3034_v10  ;;  %v3697_v24 = vmul.f32 %v9197_v52, %v1353_v2  ;;  %v2958_v19 = vmul.f32 %v10235_v40, %v10412_v37  ;;  %v9330_v0 = vpop.f32.mrf.mxu1  ;;  %v9332_v36 = vpop.f32.mrf.mxu0 }
 0x354   :  { %v2202_v11 = vmul.f32 %v10351_v34, %v1354_v26  ;;  %v3009_v51 = vmul.f32 %v2993_v54, %v2233_v63  ;;  %v2994_v55 = vmul.f32 %v9181_v23, %v1354_v26  ;;  %v3662_v38 = vmul.f32 %v10357_v18, %v10414_v4  ;;  %10415 = vst [vmem:[#allocation78_spill] sm:$0xff] %v9332_v36  ;;  %v10416_v54 = vld [vmem:[#allocation52_spill] sm:$0xff] }
 0x355   :  { %v2182_v39 = vmul.f32 %v2166_v1, %v10413_v17  ;;  %v3738_v21 = vadd.f32 %v3722_v50, %v3686_v44  ;;  %vm835_vm8 = vcmp.ge.f32.partialorder %v5672_v15, %v10342_v60  ;;  %v1203_v2 = vsub.f32 %v5672_v15, %v10091_v9  ;;  %v10417_v44 = vld [vmem:[#allocation42_spill] sm:$0xff]  ;;  %v10418_v1 = vld [vmem:[#allocation95_spill] sm:$0xff] }
 0x356   :  { %v2218_v42 = vmul.f32 %v2202_v11, %v1034_v27  ;;  %v3025_v37 = vadd.f32 %v3009_v51, %v2973_v32  ;;  %v3677_v10 = vmul.f32 %v3661_v22, %v10416_v54  ;;  %v5123_v17 = vsel %vm835_vm8, 1.0, %v9982_v48  ;;  %v10420_v51 = vld [vmem:[#allocation19_spill] sm:$0xff] }
 0x357   :  { %v1363_v63 = vsub.f32 %v10342_v60, %v5672_v15  ;;  %5527 = vmatmul.mubr.f32.gmra.mxu1 %v3738_v21  ;;  %v2974_v27 = vmul.f32 %v2958_v19, %v10417_v44  ;;  %v1043_v50 = vsub.f32 %v10418_v1, %v5123_v17  ;;  %v2175_v11 = vmul.f32 %v10350_v6, %v1203_v2  ;;  %v10421_v15 = vld [vmem:[#allocation96_spill] sm:$0xff]  ;;  %v9347_v19 = vpop.f32.mrf.mxu1  ;;  %v10425_v44 = vld [vmem:[#allocation97_spill] sm:$0xff] }
 0x358   :  { %v2234_v45 = vadd.f32 %v2218_v42, %v2182_v39  ;;  %v3713_v4 = vmul.f32 %v3697_v24, %v3025_v37  ;;  %v3678_v25 = vmul.f32 %v3662_v38, %v10419_v5  ;;  %v2967_v22 = vmul.f32 %v10235_v40, %v10420_v51  ;;  %10422 = vst [vmem:[#allocation45_spill] sm:$0xff] %v9347_v19  ;;  %v9349_v42 = vpop.f32.mrf.mxu0  ;;  %v10427_v51 = vld [vmem:[#allocation101_spill] sm:$0xff]  ;;  %v10440_v19 = vld [vmem:[#allocation58_spill] sm:$0xff] }
 0x359   :  { %v2211_v36 = vmul.f32 %v10351_v34, %v1363_v63  ;;  %v3698_v54 = vmul.f32 %v9197_v52, %v1354_v26  ;;  %v2191_v21 = vmul.f32 %v2175_v11, %v10421_v15  ;;  %v3003_v39 = vmul.f32 %v9181_v23, %v1363_v63  ;;  %10423 = vst [vmem:[#allocation29_spill] sm:$0xff] %v9349_v42  ;;  %v9367_v15 = vpop.f32.mrf.mxu1  ;;  %v10441_v42 = vld [vmem:[#allocation60_spill] sm:$0xff] }
 0x35a   :  { %v3010_v32 = vmul.f32 %v2994_v55, %v2234_v45  ;;  %v3729_v2 = vadd.f32 %v3713_v4, %v3677_v10  ;;  %vm836_vm9 = vcmp.ge.f32.partialorder %v8830_v57, %v10342_v60  ;;  %v1204_v5 = vsub.f32 %v8830_v57, %v10091_v9  ;;  %v10424_v55 = vld [vmem:[#allocation22_spill] sm:$0xff]  ;;  %10428 = vst [vmem:[#allocation17_spill] sm:$0xff] %v9367_v15  ;;  %v10433_v15 = vld [vmem:[#allocation56_spill] sm:$0xff] }
 0x35b   :  { %v2227_v24 = vmul.f32 %v2211_v36, %v1043_v50  ;;  %v3671_v26 = vmul.f32 %v10357_v18, %v10424_v55  ;;  %v5124_v37 = vsel %vm836_vm9, 1.0, %v9982_v48  ;;  %v1364_v17 = vsub.f32 %v10342_v60, %v8830_v57  ;;  %v10426_v36 = vld [vmem:[#allocation100_spill] sm:$0xff]  ;;  %v9369_v55 = vpop.f32.mrf.mxu0 }
 0x35c   :  { %v3026_v38 = vadd.f32 %v3010_v32, %v2974_v27  ;;  %5514 = vmatprep.mubr.f32.mxu0 %v3729_v2  ;;  %v2983_v10 = vmul.f32 %v2967_v22, %v10425_v44  ;;  %v1044_v1 = vsub.f32 %v10426_v36, %v5124_v37  ;;  %v2176_v50 = vmul.f32 %v10350_v6, %v1204_v5  ;;  %v10430_v2 = vld [vmem:[#allocation98_spill] sm:$0xff]  ;;  %v10431_v44 = vld [vmem:[#allocation99_spill] sm:$0xff] }
 0x35d   :  { %v2243_v45 = vadd.f32 %v2227_v24, %v2191_v21  ;;  %v3707_v4 = vmul.f32 %v9197_v52, %v1363_v63  ;;  %v2212_v27 = vmul.f32 %v10351_v34, %v1364_v17  ;;  %v2968_v32 = vmul.f32 %v10235_v40, %v10427_v51  ;;  %10429 = vst [vmem:[#allocation50_spill] sm:$0xff] %v9369_v55  ;;  %v5673_v63 = vld [vmem:[#allocation3 + $0x20] sm:$0xff] }
 0x35e   :  { %v3714_v11 = vmul.f32 %v3698_v54, %v3026_v38  ;;  %v2192_v21 = vmul.f32 %v2176_v50, %v8849_v35  ;;  %v3004_v22 = vmul.f32 %v9181_v23, %v1364_v17  ;;  %v3672_v24 = vmul.f32 %v10357_v18, %v10430_v2 }
 0x35f   :  { %v3019_v57 = vmul.f32 %v3003_v39, %v2243_v45  ;;  %v2228_v5 = vmul.f32 %v2212_v27, %v1044_v1  ;;  %vm827_vm10 = vcmp.ge.f32.partialorder %v5673_v63, %v10342_v60  ;;  %v1195_v38 = vsub.f32 %v5673_v63, %v10091_v9  ;;  %v10432_v45 = vld [vmem:[#allocation102_spill] sm:$0xff]  ;;  %v9383_v1 = vpop.f32.mrf.mxu1 }
 0x360   :  { %v3730_v54 = vadd.f32 %v3714_v11, %v3678_v25  ;;  %v3687_v36 = vmul.f32 %v3671_v26, %v10431_v44  ;;  %v5115_v51 = vsel %vm827_vm10, 1.0, %v9982_v48  ;;  %v1355_v39 = vsub.f32 %v10342_v60, %v5673_v63  ;;  %v9385_v11 = vpop.f32.mrf.mxu0  ;;  %v10435_v44 = vld [vmem:[#allocation32_spill] sm:$0xff] }
 0x361   :  { %v3035_v37 = vadd.f32 %v3019_v57, %v2983_v10  ;;  %v2244_v35 = vadd.f32 %v2228_v5, %v2192_v21  ;;  %v2984_v50 = vmul.f32 %v2968_v32, %v10432_v45  ;;  %v1035_v2 = vsub.f32 %v10433_v15, %v5115_v51  ;;  %v10434_v10 = vld [vmem:[#allocation103_spill] sm:$0xff]  ;;  %v10436_v32 = vld [vmem:[#allocation33_spill] sm:$0xff]  ;;  %v5674_v45 = vld [vmem:[#allocation3 + $0x28] sm:$0xff] }
 0x362   :  { %5515 = vmatmul.mubr.f32.gmra.mxu0 %v3730_v54  ;;  %v2167_v25 = vmul.f32 %v10350_v6, %v1195_v38  ;;  %v3688_v57 = vmul.f32 %v3672_v24, %v10434_v10  ;;  %v2203_v26 = vmul.f32 %v10351_v34, %v1355_v39  ;;  %v2959_v63 = vmul.f32 %v10235_v40, %v10435_v44 }
 0x363   :  { %v3723_v27 = vmul.f32 %v3707_v4, %v3035_v37  ;;  %v3020_v54 = vmul.f32 %v3004_v22, %v2244_v35  ;;  %v3708_v21 = vmul.f32 %v9197_v52, %v1364_v17  ;;  %v2995_v15 = vmul.f32 %v9181_v23, %v1355_v39  ;;  %v10437_v37 = vld [vmem:[#allocation55_spill] sm:$0xff]  ;;  %v9400_v17 = vpop.f32.mrf.mxu1  ;;  %v9402_v35 = vpop.f32.mrf.mxu0 }
 0x364   :  { %v2183_v5 = vmul.f32 %v2167_v25, %v10436_v32  ;;  %v2219_v51 = vmul.f32 %v2203_v26, %v1035_v2  ;;  %vm828_vm11 = vcmp.ge.f32.partialorder %v5674_v45, %v10342_v60  ;;  %v1196_v4 = vsub.f32 %v5674_v45, %v10091_v9  ;;  %v10438_v2 = vld [vmem:[#allocation30_spill] sm:$0xff] }
 0x365   :  { %v3739_v38 = vadd.f32 %v3723_v27, %v3687_v36  ;;  %v3036_v24 = vadd.f32 %v3020_v54, %v2984_v50  ;;  %v3663_v10 = vmul.f32 %v10357_v18, %v10437_v37  ;;  %v5116_v44 = vsel %vm828_vm11, 1.0, %v9982_v48  ;;  %v10439_v27 = vld [vmem:[#allocation59_spill] sm:$0xff] }
 0x366   :  { %v1356_v22 = vsub.f32 %v10342_v60, %v5674_v45  ;;  %v2235_v36 = vadd.f32 %v2219_v51, %v2183_v5  ;;  %v2975_v25 = vmul.f32 %v2959_v63, %v10438_v2  ;;  %v1036_v26 = vsub.f32 %v10439_v27, %v5116_v44  ;;  %v10442_v5 = vld [vmem:[#allocation31_spill] sm:$0xff]  ;;  %v10445_v27 = vld [vmem:[#allocation61_spill] sm:$0xff] }
 0x367   :  { %5529 = vmatprep.mubr.f32.mxu1 %v3739_v38  ;;  %v2168_v32 = vmul.f32 %v10350_v6, %v1196_v4  ;;  %v3724_v50 = vmul.f32 %v3708_v21, %v3036_v24  ;;  %v3699_v54 = vmul.f32 %v9197_v52, %v1355_v39  ;;  %v2960_v45 = vmul.f32 %v10235_v40, %v10440_v19  ;;  %v10443_v4 = vld [vmem:[#allocation105_spill] sm:$0xff]  ;;  %v9419_v21 = vpop.f32.mrf.mxu1  ;;  %v9421_v24 = vpop.f32.mrf.mxu0 }
 0x368   :  { %v2204_v37 = vmul.f32 %v10351_v34, %v1356_v22  ;;  %v3011_v55 = vmul.f32 %v2995_v15, %v2235_v36  ;;  %v2996_v38 = vmul.f32 %v9181_v23, %v1356_v22  ;;  %v3664_v63 = vmul.f32 %v10357_v18, %v10442_v5  ;;  %v10444_v15 = vld [vmem:[#allocation57_spill] sm:$0xff] }
 0x369   :  { %v2184_v61 = vmul.f32 %v2168_v32, %v10441_v42  ;;  %v3740_v51 = vadd.f32 %v3724_v50, %v3688_v57  ;;  %vm837_vm12 = vcmp.ge.f32.partialorder %v10443_v4, %v10342_v60  ;;  %v1205_v39 = vsub.f32 %v10443_v4, %v10091_v9  ;;  %v10446_v32 = vld [vmem:[#allocation111_spill] sm:$0xff] }
 0x36a   :  { %v2220_v44 = vmul.f32 %v2204_v37, %v1036_v26  ;;  %v3027_v19 = vadd.f32 %v3011_v55, %v2975_v25  ;;  %v3679_v42 = vmul.f32 %v3663_v10, %v10444_v15  ;;  %v5125_v36 = vsel %vm837_vm12, 1.0, %v9982_v48  ;;  %v10448_v25 = vld [vmem:[#allocation114_spill] sm:$0xff] }
 0x36b   :  { %v1365_v2 = vsub.f32 %v10342_v60, %v10443_v4  ;;  %5530 = vmatmul.mubr.f32.gmra.mxu1 %v3740_v51  ;;  %v2976_v26 = vmul.f32 %v2960_v45, %v10445_v27  ;;  %v1045_v50 = vsub.f32 %v10446_v32, %v5125_v36  ;;  %v2177_v37 = vmul.f32 %v10350_v6, %v1205_v39  ;;  %v10449_v4 = vld [vmem:[#allocation109_spill] sm:$0xff]  ;;  %v9437_v45 = vpop.f32.mrf.mxu1  ;;  %v10451_v27 = vld [vmem:[#allocation134_spill] sm:$0xff] }
 0x36c   :  { %v2236_v57 = vadd.f32 %v2220_v44, %v2184_v61  ;;  %v3715_v5 = vmul.f32 %v3699_v54, %v3027_v19  ;;  %v3680_v46 = vmul.f32 %v3664_v63, %v10447_v28  ;;  %v2969_v10 = vmul.f32 %v10235_v40, %v10448_v25  ;;  %v9439_v44 = vpop.f32.mrf.mxu0 }
 0x36d   :  { %v2213_v55 = vmul.f32 %v10351_v34, %v1365_v2  ;;  %v3700_v56 = vmul.f32 %v9197_v52, %v1356_v22  ;;  %v2193_v51 = vmul.f32 %v2177_v37, %v10449_v4  ;;  %v3005_v61 = vmul.f32 %v9181_v23, %v1365_v2  ;;  %v9457_v25 = vpop.f32.mrf.mxu1 }
 0x36e   :  { %v3012_v15 = vmul.f32 %v2996_v38, %v2236_v57  ;;  %v3731_v39 = vadd.f32 %v3715_v5, %v3679_v42  ;;  %vm838_vm13 = vcmp.ge.f32.partialorder %v9034_v8, %v10342_v60  ;;  %v1206_v28 = vsub.f32 %v9034_v8, %v10091_v9  ;;  %v10450_v38 = vld [vmem:[#allocation113_spill] sm:$0xff] }
 0x36f   :  { %v2229_v54 = vmul.f32 %v2213_v55, %v1045_v50  ;;  %v3673_v22 = vmul.f32 %v10357_v18, %v10450_v38  ;;  %v5126_v19 = vsel %vm838_vm13, 1.0, %v9982_v48  ;;  %v1366_v36 = vsub.f32 %v10342_v60, %v9034_v8  ;;  %v10452_v38 = vld [vmem:[#allocation64_spill] sm:$0xff] }
 0x370   :  { %v3028_v63 = vadd.f32 %v3012_v15, %v2976_v26  ;;  %5517 = vmatprep.mubr.f32.mxu0 %v3731_v39  ;;  %v2985_v42 = vmul.f32 %v2969_v10, %v10451_v27  ;;  %v1046_v32 = vsub.f32 %v9057_v14, %v5126_v19  ;;  %v2178_v50 = vmul.f32 %v10350_v6, %v1206_v28  ;;  %v9459_v15 = vpop.f32.mrf.mxu0  ;;  %v9473_v19 = vpop.f32.mrf.mxu1 }
 0x371   :  { %v2245_v57 = vadd.f32 %v2229_v54, %v2193_v51  ;;  %v3709_v5 = vmul.f32 %v9197_v52, %v1365_v2  ;;  %v2214_v26 = vmul.f32 %v10351_v34, %v1366_v36  ;;  %v2970_v55 = vmul.f32 %v10235_v40, %v9077_v13  ;;  %v5675_v2 = vld [vmem:[#allocation3 + $0x30] sm:$0xff] }
 0x372   :  { %v3716_v37 = vmul.f32 %v3700_v56, %v3028_v63  ;;  %v2194_v4 = vmul.f32 %v2178_v50, %v9067_v53  ;;  %v3006_v10 = vmul.f32 %v9181_v23, %v1366_v36  ;;  %v3674_v14 = vmul.f32 %v10357_v18, %v9073_v20 }
 0x373   :  { %v3021_v8 = vmul.f32 %v3005_v61, %v2245_v57  ;;  %v2230_v51 = vmul.f32 %v2214_v26, %v1046_v32  ;;  %vm829_vm14 = vcmp.ge.f32.partialorder %v5675_v2, %v10342_v60  ;;  %v1197_v39 = vsub.f32 %v5675_v2, %v10091_v9  ;;  %v9475_v57 = vpop.f32.mrf.mxu0 }
 0x374   :  { %v3732_v56 = vadd.f32 %v3716_v37, %v3680_v46  ;;  %v3689_v54 = vmul.f32 %v3673_v22, %v9019_v3  ;;  %v5117_v28 = vsel %vm829_vm14, 1.0, %v9982_v48  ;;  %v1357_v61 = vsub.f32 %v10342_v60, %v5675_v2  ;;  %v10453_v22 = vld [vmem:[#allocation65_spill] sm:$0xff] }
 0x375   :  { %v3037_v13 = vadd.f32 %v3021_v8, %v2985_v42  ;;  %v2246_v53 = vadd.f32 %v2230_v51, %v2194_v4  ;;  %v2986_v63 = vmul.f32 %v2970_v55, %v9122_v41  ;;  %v1037_v20 = vsub.f32 %v10452_v38, %v5117_v28  ;;  %v10454_v41 = vld [vmem:[#allocation63_spill] sm:$0xff]  ;;  %v10456_v28 = vld [vmem:[#allocation66_spill] sm:$0xff] }
 0x376   :  { %5518 = vmatmul.mubr.f32.gmra.mxu0 %v3732_v56  ;;  %v2169_v46 = vmul.f32 %v10350_v6, %v1197_v39  ;;  %v3690_v42 = vmul.f32 %v3674_v14, %v9143_v43  ;;  %v2205_v3 = vmul.f32 %v10351_v34, %v1357_v61  ;;  %v2961_v32 = vmul.f32 %v10235_v40, %v10453_v22  ;;  %v5676_v56 = vld [vmem:[#allocation3 + $0x38] sm:$0xff]  ;;  %v5334_v39 = vpop.f32.mrf.mxu0 }
 0x377   :  { %v3725_v27 = vmul.f32 %v3709_v5, %v3037_v13  ;;  %v3022_v50 = vmul.f32 %v3006_v10, %v2246_v53  ;;  %v3710_v37 = vmul.f32 %v9197_v52, %v1366_v36  ;;  %v2997_v55 = vmul.f32 %v9181_v23, %v1357_v61  ;;  %v10455_v14 = vld [vmem:[#allocation34_spill] sm:$0xff]  ;;  %v5414_v36 = vpop.f32.mrf.mxu1  ;;  %v10457_v53 = vld [vmem:[#allocation69_spill] sm:$0xff] }
 0x378   :  { %v2185_v26 = vmul.f32 %v2169_v46, %v10454_v41  ;;  %v2221_v4 = vmul.f32 %v2205_v3, %v1037_v20  ;;  %vm830_vm15 = vcmp.ge.f32.partialorder %v5676_v56, %v10342_v60  ;;  %v1198_v5 = vsub.f32 %v5676_v56, %v10091_v9 }
 0x379   :  { %v3741_v8 = vadd.f32 %v3725_v27, %v3689_v54  ;;  %v3038_v43 = vadd.f32 %v3022_v50, %v2986_v63  ;;  %v3665_v51 = vmul.f32 %v10357_v18, %v10455_v14  ;;  %v5118_v2 = vsel %vm830_vm15, 1.0, %v9982_v48  ;;  %v10458_v63 = vld [vmem:[#allocation71_spill] sm:$0xff] }
 0x37a   :  { %v1358_v10 = vsub.f32 %v10342_v60, %v5676_v56  ;;  %v2237_v13 = vadd.f32 %v2221_v4, %v2185_v26  ;;  %v2977_v54 = vmul.f32 %v2961_v32, %v10456_v28  ;;  %v1038_v38 = vsub.f32 %v10457_v53, %v5118_v2  ;;  %v10459_v60 = vld [vmem:[#allocation68_spill] sm:$0xff]  ;;  %v5415_v32 = vpop.f32.mrf.mxu1  ;;  %v10460_v56 = vld [vmem:[#allocation67_spill] sm:$0xff]  ;;  %v10463_v28 = vld [vmem:[#allocation73_spill] sm:$0xff] }
 0x37b   :  { %5532 = vmatprep.mubr.f32.mxu1 %v3741_v8  ;;  %v2170_v20 = vmul.f32 %v10350_v6, %v1198_v5  ;;  %v3726_v46 = vmul.f32 %v3710_v37, %v3038_v43  ;;  %v2962_v27 = vmul.f32 %v10235_v40, %v10458_v63  ;;  %v3701_v48 = vmul.f32 %v9197_v52, %v1357_v61  ;;  %v5335_v8 = vpop.f32.mrf.mxu0  ;;  %v10462_v43 = vld [vmem:[#allocation70_spill] sm:$0xff] }
 0x37c   :  { %v2206_v9 = vmul.f32 %v10351_v34, %v1358_v10  ;;  %v3013_v3 = vmul.f32 %v2997_v55, %v2237_v13  ;;  %v2998_v26 = vmul.f32 %v9181_v23, %v1358_v10  ;;  %v3681_v6 = vmul.f32 %v3665_v51, %v10460_v56  ;;  %v10461_v34 = vld [vmem:[#allocation72_spill] sm:$0xff] }
 0x37d   :  { %v2186_v22 = vmul.f32 %v2170_v20, %v10459_v60  ;;  %v3742_v50 = vadd.f32 %v3726_v46, %v3690_v42  ;;  %v2978_v5 = vmul.f32 %v2962_v27, %v10461_v34  ;;  %v3666_v40 = vmul.f32 %v10357_v18, %v10462_v43  ;;  %v5417_v42 = vpop.f32.mrf.mxu1  ;;  %v5337_v2 = vpop.f32.mrf.mxu0  ;;  %v10464_v46 = vld [vmem:[#allocation116_spill] sm:$0xff]  ;;  %v10466_v27 = vld [vmem:[#allocation133_spill] sm:$0xff]  ;;  %v10469_v60 = vld [vmem:[#allocation118_spill] sm:$0xff] }
 0x37e   :  { %v2222_v41 = vmul.f32 %v2206_v9, %v1038_v38  ;;  %v3029_v4 = vadd.f32 %v3013_v3, %v2977_v54  ;;  %v3702_v14 = vmul.f32 %v9197_v52, %v1358_v10  ;;  %v10465_v9 = vld [vmem:[#allocation119_spill] sm:$0xff]  ;;  %v10467_v18 = vld [vmem:[#allocation136_spill] sm:$0xff]  ;;  %v10468_v10 = vld [vmem:[#allocation37_spill] sm:$0xff] }
 0x37f   :  { %5533 = vmatmul.mubr.f32.gmra.mxu1 %v3742_v50  ;;  %v3682_v53 = vmul.f32 %v3666_v40, %v10463_v28  ;;  %v5418_v51 = vpop.f32.mrf.mxu1  ;;  %v5338_v38 = vpop.f32.mrf.mxu0  ;;  %v5167_v63 = vadd.f32 %v10465_v9, %v10464_v46  ;;  %v5170_v3 = vadd.f32 %v10467_v18, %v10466_v27  ;;  %v10470_v50 = vld [vmem:[#allocation132_spill] sm:$0xff]  ;;  %v5407_v40 = vadd.f32 %v9400_v17, %v9383_v1 }
 0x380   :  { %v2238_v37 = vadd.f32 %v2222_v41, %v2186_v22  ;;  %v3717_v55 = vmul.f32 %v3701_v48, %v3029_v4  ;;  %v5247_v22 = vadd.f32 %v10469_v60, %v10468_v10  ;;  %v10471_v41 = vld [vmem:[#allocation135_spill] sm:$0xff]  ;;  %v10472_v4 = vld [vmem:[#allocation138_spill] sm:$0xff]  ;;  %v5333_v1 = vadd.f32 %v9475_v57, %v9459_v15  ;;  %v10478_v15 = vld [vmem:[#allocation121_spill] sm:$0xff] }
 0x381   :  { %v5420_v48 = vpop.f32.mrf.mxu1  ;;  %v5340_v52 = vpop.f32.mrf.mxu0  ;;  %v5173_v56 = vadd.f32 %v9027_v16, %v10472_v4  ;;  %v5410_v16 = vadd.f32 %v9437_v45, %v9419_v21  ;;  %v10476_v21 = vld [vmem:[#allocation122_spill] sm:$0xff]  ;;  %v10479_v57 = vld [vmem:[#allocation124_spill] sm:$0xff] }
 0x382   :  { %v3014_v61 = vmul.f32 %v2998_v26, %v2238_v37  ;;  %v3733_v13 = vadd.f32 %v3717_v55, %v3681_v6  ;;  %v5250_v26 = vadd.f32 %v10471_v41, %v10470_v50  ;;  %v9517_v6 = vadd.f32 %v9330_v0, %v9313_v47  ;;  %v10473_v37 = vld [vmem:[#allocation137_spill] sm:$0xff] }
 0x383   :  { %v5253_v34 = vadd.f32 %v9025_v30, %v10473_v37  ;;  %v5327_v55 = vadd.f32 %v9402_v35, %v9385_v11  ;;  %v5330_v47 = vadd.f32 %v9439_v44, %v9421_v24  ;;  %v5413_v30 = vadd.f32 %v9473_v19, %v9457_v25  ;;  %v5421_v0 = vpop.f32.mrf.mxu1  ;;  %v10477_v25 = vld [vmem:[#allocation125_spill] sm:$0xff] }
 0x384   :  { %v3030_v23 = vadd.f32 %v3014_v61, %v2978_v5  ;;  %5520 = vmatprep.mubr.f32.mxu0 %v3733_v13  ;;  %v4381_v5 = vadd.f32 %v5247_v22, %v5167_v63  ;;  %v4386_v43 = vadd.f32 %v5250_v26, %v5170_v3  ;;  %v10474_v61 = vld [vmem:[#allocation123_spill] sm:$0xff]  ;;  %v5341_v13 = vpop.f32.mrf.mxu0  ;;  %v5416_v11 = vadd.f32 %v5415_v32, %v5414_v36 }
 0x385   :  { %v5336_v35 = vadd.f32 %v5335_v8, %v5334_v39  ;;  %v5422_v24 = vadd.f32 %v5421_v0, %v5420_v48  ;;  %v5342_v44 = vadd.f32 %v5341_v13, %v5340_v52  ;;  %v5179_v19 = vadd.f32 %v10477_v25, %v9064_v33  ;;  %v5423_v48 = vpop.f32.mrf.mxu1 }
 0x386   :  { %v3718_v54 = vmul.f32 %v3702_v14, %v3030_v23  ;;  %v5176_v14 = vadd.f32 %v10474_v61, %v9040_v31  ;;  %v4391_v23 = vadd.f32 %v5253_v34, %v5173_v56  ;;  %v4526_v28 = vadd.f32 %v5327_v55, %v4381_v5  ;;  %v5343_v10 = vpop.f32.mrf.mxu0 }
 0x387   :  { %v4531_v17 = vadd.f32 %v5330_v47, %v4386_v43  ;;  %v5419_v31 = vadd.f32 %v5418_v51, %v5417_v42  ;;  %v5259_v36 = vadd.f32 %v10479_v57, %v10478_v15  ;;  %v5182_v42 = vadd.f32 %v9105_v12, %v9094_v7  ;;  %v5424_v52 = vpop.f32.mrf.mxu1 }
 0x388   :  { %v3734_v20 = vadd.f32 %v3718_v54, %v3682_v53  ;;  %v5339_v53 = vadd.f32 %v5338_v38, %v5337_v2  ;;  %v10475_v54 = vld [vmem:[#allocation120_spill] sm:$0xff]  ;;  %v9541_v63 = vadd.f32 %v5407_v40, %v4526_v28  ;;  %v5262_v2 = vadd.f32 %v9103_v29, %v9092_v62  ;;  %v5344_v22 = vpop.f32.mrf.mxu0 }
 0x389   :  { %v5256_v45 = vadd.f32 %v10476_v21, %v10475_v54  ;;  %v9539_v9 = vadd.f32 %v5410_v16, %v4531_v17  ;;  %v4401_v8 = vadd.f32 %v5259_v36, %v5179_v19  ;;  %v5426_v60 = vpop.f32.mrf.mxu1  ;;  %v5188_v13 = vadd.f32 %v9150_v59, %v9136_v49  ;;  %v10483_v54 = vld [vmem:[#allocation139_spill] sm:$0xff]  ;;  %v10484_v21 = vld [vmem:[#allocation140_spill] sm:$0xff]  ;;  %v10486_v59 = vld [vmem:[#allocation117_spill] sm:$0xff] }
 0x38a   :  { %5521 = vmatmul.mubr.f32.gmra.mxu0 %v3734_v20  ;;  %v4536_v20 = vadd.f32 %v5333_v1, %v4391_v23  ;;  %v4406_v33 = vadd.f32 %v5262_v2, %v5182_v42  ;;  %v5346_v41 = vpop.f32.mrf.mxu0  ;;  %v10480_v23 = vld [vmem:[#allocation141_spill] sm:$0xff]  ;;  %v10481_v1 = vld [vmem:[#allocation142_spill] sm:$0xff]  ;;  %v10487_v36 = vld [vmem:[#allocation104_spill] sm:$0xff] }
 0x38b   :  { %v4396_v46 = vadd.f32 %v5256_v45, %v5176_v14  ;;  %v4546_v51 = vadd.f32 %v5339_v53, %v4401_v8  ;;  %v5427_v50 = vpop.f32.mrf.mxu1  ;;  %v5185_v28 = vadd.f32 %v10480_v23, %v9115_v58  ;;  %v5265_v45 = vadd.f32 %v10484_v21, %v10483_v54  ;;  %v10485_v58 = vld [vmem:[#allocation110_spill] sm:$0xff]  ;;  %v10489_v42 = vld [vmem:[#allocation112_spill] sm:$0xff]  ;;  %v10490_v2 = vld [vmem:[#allocation115_spill] sm:$0xff] }
 0x38c   :  { %v9545_v32 = vadd.f32 %v5413_v30, %v4536_v20  ;;  %v4551_v27 = vadd.f32 %v5342_v44, %v4406_v33  ;;  %v5347_v12 = vpop.f32.mrf.mxu0  ;;  %v5164_v19 = vadd.f32 %v10486_v59, %v10485_v58  ;;  %v5428_v57 = vadd.f32 %v5427_v50, %v5426_v60  ;;  %v10491_v33 = vld [vmem:[#allocation29_spill] sm:$0xff]  ;;  %v10496_v60 = vld [vmem:[#allocation78_spill] sm:$0xff] }
 0x38d   :  { %v4541_v39 = vadd.f32 %v5336_v35, %v4396_v46  ;;  %v9553_v18 = vadd.f32 %v5419_v31, %v4546_v51  ;;  %v5348_v35 = vadd.f32 %v5347_v12, %v5346_v41  ;;  %v4411_v44 = vadd.f32 %v5265_v45, %v5185_v28  ;;  %v10493_v12 = vld [vmem:[#allocation106_spill] sm:$0xff] }
 0x38e   :  { %v9555_v3 = vadd.f32 %v5422_v24, %v4551_v27  ;;  %v5345_v24 = vadd.f32 %v5344_v22, %v5343_v10  ;;  %v5244_v51 = vadd.f32 %v10490_v2, %v10489_v42  ;;  %v10492_v27 = vld [vmem:[#allocation50_spill] sm:$0xff]  ;;  %v5425_v22 = vadd.f32 %v5424_v52, %v5423_v48  ;;  %v10497_v52 = vld [vmem:[#allocation45_spill] sm:$0xff] }
 0x38f   :  { %v9551_v38 = vadd.f32 %v5416_v11, %v4541_v39  ;;  %v10482_v11 = vld [vmem:[#allocation126_spill] sm:$0xff]  ;;  %v10488_v39 = vld [vmem:[#allocation108_spill] sm:$0xff]  ;;  %v5324_v10 = vadd.f32 %v10492_v27, %v10491_v33  ;;  %v10504_v27 = vld [vmem:[#allocation77_spill] sm:$0xff] }
 0x390   :  { %v5268_v17 = vadd.f32 %v10482_v11, %v10481_v1  ;;  %v4556_v15 = vadd.f32 %v5345_v24, %v4411_v44  ;;  %v5161_v8 = vadd.f32 %v10488_v39, %v10487_v36  ;;  %v4376_v11 = vadd.f32 %v5244_v51, %v5164_v19  ;;  %v10500_v36 = vld [vmem:[#allocation82_spill] sm:$0xff]  ;;  %v10502_v51 = vld [vmem:[#allocation47_spill] sm:$0xff]  ;;  %v10503_v33 = vld [vmem:[#allocation24_spill] sm:$0xff] }
 0x392   :  { %v4416_v20 = vadd.f32 %v5268_v17, %v5188_v13  ;;  %v10494_v13 = vld [vmem:[#allocation107_spill] sm:$0xff]  ;;  %v10495_v17 = vld [vmem:[#allocation46_spill] sm:$0xff]  ;;  %v4701_v54 = vadd.f32 %v5425_v22, %v4556_v15  ;;  %v10501_v15 = vld [vmem:[#allocation129_spill] sm:$0xff] }
 0x393   :  { %v5241_v23 = vadd.f32 %v10494_v13, %v10493_v12  ;;  %v5321_v50 = vadd.f32 %v10496_v60, %v10495_v17  ;;  %v10505_v13 = vld [vmem:[#allocation128_spill] sm:$0xff] }
 0x394   :  { %v9557_v7 = vpop.f32.mrf.mxu1  ;;  %v4561_v46 = vadd.f32 %v5348_v35, %v4416_v20  ;;  %v4521_v20 = vadd.f32 %v5324_v10, %v4376_v11  ;;  %v5274_v10 = vadd.f32 %v10504_v27, %v10503_v33 }
 0x395   :  { %v4371_v45 = vadd.f32 %v5241_v23, %v5161_v8  ;;  %v5191_v8 = vadd.f32 %v10502_v51, %v10501_v15  ;;  %v10506_v23 = vld [vmem:[#allocation127_spill] sm:$0xff] }
 0x396   :  { %v9559_v62 = vpop.f32.mrf.mxu1  ;;  %v9561_v29 = vpop.f32.mrf.mxu0  ;;  %v4706_v41 = vadd.f32 %v5428_v57, %v4561_v46  ;;  %v10498_v46 = vld [vmem:[#allocation17_spill] sm:$0xff]  ;;  %v10499_v57 = vld [vmem:[#allocation75_spill] sm:$0xff] }
 0x397   :  { %v4516_v48 = vadd.f32 %v5321_v50, %v4371_v45  ;;  %v5404_v58 = vadd.f32 %v10498_v46, %v10497_v52  ;;  %v5194_v19 = vadd.f32 %v10500_v36, %v10499_v57  ;;  %v10509_v46 = vld [vmem:[#allocation28_spill] sm:$0xff]  ;;  %v10511_v57 = vld [vmem:[#allocation74_spill] sm:$0xff] }
 0x398   :  { %v9565_v4 = vpop.f32.mrf.mxu0 }
 0x399   :  { %v4666_v59 = vadd.f32 %v5404_v58, %v4521_v20  ;;  %v4661_v2 = vadd.f32 %v9517_v6, %v4516_v48  ;;  %v4426_v11 = vadd.f32 %v5274_v10, %v5194_v19  ;;  %v5351_v17 = vadd.f32 %v9565_v4, %v9561_v29  ;;  %v10507_v48 = vld [vmem:[#allocation76_spill] sm:$0xff]  ;;  %v10508_v29 = vld [vmem:[#allocation79_spill] sm:$0xff]  ;;  %v10510_v58 = vld [vmem:[#allocation18_spill] sm:$0xff] }
 0x39a   :  { %v5200_v4 = vadd.f32 %v10508_v29, %v10507_v48  ;;  %v10513_v19 = vld [vmem:[#allocation83_spill] sm:$0xff] }
 0x3a8   :  { %v9563_v26 = vpop.f32.mrf.mxu1 }
 0x3a9   :  { %v5352_v37 = vpop.f32.mrf.mxu0 }
 0x3aa   :  { %v9567_v56 = vpop.f32.mrf.mxu1 }
 0x3ab   :  { %v5353_v5 = vpop.f32.mrf.mxu0 }
 0x3ac   :  { %v5354_v22 = vadd.f32 %v5353_v5, %v5352_v37  ;;  %v5431_v37 = vadd.f32 %v9559_v62, %v9557_v7 }
 0x3ae   :  { %v4571_v6 = vadd.f32 %v5354_v22, %v4426_v11  ;;  %v10518_v11 = vld [vmem:[#allocation81_spill] sm:$0xff] }
 0x3bc   :  { %v9569_v34 = vpop.f32.mrf.mxu1 }
 0x3bd   :  { %v9573_v40 = vpop.f32.mrf.mxu0 }
 0x3be   :  { %v9571_v43 = vpop.f32.mrf.mxu1 }
 0x3bf   :  { %v9577_v61 = vpop.f32.mrf.mxu0 }
 0x3c0   :  { %v5357_v15 = vadd.f32 %v9577_v61, %v9573_v40  ;;  %v10515_v61 = vld [vmem:[#allocation49_spill] sm:$0xff] }
 0x3d1   :  { %v9575_v55 = vpop.f32.mrf.mxu1 }
 0x3d2   :  { %v9581_v16 = vpop.f32.mrf.mxu0 }
 0x3d3   :  { %v9579_v14 = vpop.f32.mrf.mxu1 }
 0x3d4   :  { %v9585_v30 = vpop.f32.mrf.mxu0 }
 0x3d5   :  { %v5360_v7 = vadd.f32 %v9585_v30, %v9581_v16  ;;  %v5440_v16 = vadd.f32 %v9579_v14, %v9575_v55  ;;  %v10520_v55 = vld [vmem:[#allocation23_spill] sm:$0xff] }
 0x3e6   :  { %v9583_v47 = vpop.f32.mrf.mxu1 }
 0x3e7   :  { %v9595_v31 = vpop.f32.mrf.mxu0 }
 0x3e8   :  { %v9587_v0 = vpop.f32.mrf.mxu1 }
 0x3e9   :  { %v9601_v25 = vpop.f32.mrf.mxu0 }
 0x3fa   :  { %v9597_v53 = vpop.f32.mrf.mxu1 }
 0x3fb   :  { %v9615_v28 = vpop.f32.mrf.mxu0 }
 0x3fc   :  { %v9603_v49 = vpop.f32.mrf.mxu1 }
 0x3fd   :  { %v5365_v44 = vpop.f32.mrf.mxu0 }
 0x404   :  { %v5525_v1 = vpop.f32.mrf.mxu1 }
 0x405   :  { %v4851_v35 = vadd.f32 %v5525_v1, %v4706_v41  ;;  %v5271_v1 = vadd.f32 %v10506_v23, %v10505_v13 }
 0x406   :  { %v4845_v21 = vpop.f32.mrf.mxu1 }
 0x407   :  { %4893 = vst [vmem:[#allocation12 + $0x48] sm:$0xff] %v4851_v35  ;;  %v4846_v24 = vadd.f32 %v4845_v21, %v4701_v54  ;;  %v4421_v60 = vadd.f32 %v5271_v1, %v5191_v8  ;;  %v5434_v35 = vadd.f32 %v9567_v56, %v9563_v26  ;;  %v10512_v26 = vld [vmem:[#allocation131_spill] sm:$0xff]  ;;  %v10517_v1 = vld [vmem:[#allocation80_spill] sm:$0xff] }
 0x408   :  { %v5280_v56 = vadd.f32 %v10512_v26, %v10511_v57 }
 0x409   :  { %4892 = vst [vmem:[#allocation12 + $0x40] sm:$0xff] %v4846_v24  ;;  %v4566_v50 = vadd.f32 %v5351_v17, %v4421_v60  ;;  %v4716_v5 = vadd.f32 %v5434_v35, %v4571_v6  ;;  %v5203_v17 = vadd.f32 %v10518_v11, %v10517_v1  ;;  %v10519_v60 = vld [vmem:[#allocation27_spill] sm:$0xff]  ;;  %v10522_v35 = vld [vmem:[#allocation26_spill] sm:$0xff] }
 0x40a   :  { %v5286_v14 = vadd.f32 %v10520_v55, %v10519_v60 }
 0x40b   :  { %v4711_v45 = vadd.f32 %v5431_v37, %v4566_v50  ;;  %v10521_v50 = vld [vmem:[#allocation84_spill] sm:$0xff] }
 0x40c   :  { %v5283_v37 = vadd.f32 %v10522_v35, %v10521_v50 }
 0x40d   :  { %v5513_v39 = vpop.f32.mrf.mxu0 }
 0x40e   :  { %v4811_v42 = vadd.f32 %v5513_v39, %v4666_v59  ;;  %v5197_v59 = vadd.f32 %v10510_v58, %v10509_v46  ;;  %v10514_v39 = vld [vmem:[#allocation38_spill] sm:$0xff] }
 0x40f   :  { %v4805_v41 = vpop.f32.mrf.mxu0 }
 0x410   :  { %4885 = vst [vmem:[#allocation12 + $0x8] sm:$0xff] %v4811_v42  ;;  %v4806_v12 = vadd.f32 %v4805_v41, %v4661_v2  ;;  %v5277_v42 = vadd.f32 %v10514_v39, %v10513_v19  ;;  %v4436_v2 = vadd.f32 %v5280_v56, %v5200_v4 }
 0x412   :  { %4884 = vst [vmem:[#allocation12] sm:$0xff] %v4806_v12  ;;  %v4431_v8 = vadd.f32 %v5277_v42, %v5197_v59  ;;  %v4581_v33 = vadd.f32 %v5360_v7, %v4436_v2 }
 0x414   :  { %v4576_v27 = vadd.f32 %v5357_v15, %v4431_v8  ;;  %v4726_v30 = vadd.f32 %v5440_v16, %v4581_v33 }
 0x417   :  { %v5528_v54 = vpop.f32.mrf.mxu1 }
 0x418   :  { %v4861_v21 = vadd.f32 %v5528_v54, %v4716_v5  ;;  %v5363_v54 = vadd.f32 %v9601_v25, %v9595_v31 }
 0x419   :  { %v4855_v20 = vpop.f32.mrf.mxu1 }
 0x41a   :  { %4895 = vst [vmem:[#allocation12 + $0x58] sm:$0xff] %v4861_v21  ;;  %v4856_v24 = vadd.f32 %v4855_v20, %v4711_v45  ;;  %v4441_v45 = vadd.f32 %v5283_v37, %v5203_v17 }
 0x41c   :  { %4894 = vst [vmem:[#allocation12 + $0x50] sm:$0xff] %v4856_v24  ;;  %v4586_v24 = vadd.f32 %v5363_v54, %v4441_v45 }
 0x422   :  { %v5516_v52 = vpop.f32.mrf.mxu0 }
 0x423   :  { %v4821_v62 = vadd.f32 %v5516_v52, %v9539_v9  ;;  %v5437_v9 = vadd.f32 %v9571_v43, %v9569_v34  ;;  %v5366_v34 = vadd.f32 %v5365_v44, %v9615_v28  ;;  %v5446_v28 = vadd.f32 %v9603_v49, %v9597_v53 }
 0x424   :  { %v4815_v36 = vpop.f32.mrf.mxu0 }
 0x425   :  { %4887 = vst [vmem:[#allocation12 + $0x18] sm:$0xff] %v4821_v62  ;;  %v4816_v51 = vadd.f32 %v4815_v36, %v9541_v63  ;;  %v4721_v41 = vadd.f32 %v5437_v9, %v4576_v27  ;;  %v10516_v63 = vld [vmem:[#allocation20_spill] sm:$0xff] }
 0x426   :  { %v5206_v13 = vadd.f32 %v10516_v63, %v10515_v61 }
 0x427   :  { %4886 = vst [vmem:[#allocation12 + $0x10] sm:$0xff] %v4816_v51 }
 0x428   :  { %v4446_v5 = vadd.f32 %v5286_v14, %v5206_v13 }
 0x42a   :  { %v4591_v20 = vadd.f32 %v5366_v34, %v4446_v5 }
 0x42b   :  { %v5531_v10 = vpop.f32.mrf.mxu1 }
 0x42c   :  { %v4871_v22 = vadd.f32 %v5531_v10, %v4726_v30  ;;  %v4736_v44 = vadd.f32 %v5446_v28, %v4591_v20 }
 0x42d   :  { %v4865_v12 = vpop.f32.mrf.mxu1 }
 0x42e   :  { %4897 = vst [vmem:[#allocation12 + $0x68] sm:$0xff] %v4871_v22  ;;  %v4866_v40 = vadd.f32 %v4865_v12, %v4721_v41 }
 0x430   :  { %4896 = vst [vmem:[#allocation12 + $0x60] sm:$0xff] %v4866_v40 }
 0x436   :  { %v5519_v23 = vpop.f32.mrf.mxu0 }
 0x437   :  { %v4831_v43 = vadd.f32 %v5519_v23, %v9551_v38  ;;  %v5443_v38 = vadd.f32 %v9587_v0, %v9583_v47 }
 0x438   :  { %v4825_v6 = vpop.f32.mrf.mxu0 }
 0x439   :  { %4889 = vst [vmem:[#allocation12 + $0x28] sm:$0xff] %v4831_v43  ;;  %v4826_v21 = vadd.f32 %v4825_v6, %v9545_v32  ;;  %v4731_v4 = vadd.f32 %v5443_v38, %v4586_v24 }
 0x43b   :  { %4888 = vst [vmem:[#allocation12 + $0x20] sm:$0xff] %v4826_v21 }
 0x43f   :  { %v5534_v48 = vpop.f32.mrf.mxu1 }
 0x440   :  { %v4881_v29 = vadd.f32 %v5534_v48, %v4736_v44 }
 0x441   :  { %v4875_v52 = vpop.f32.mrf.mxu1 }
 0x442   :  { %4899 = vst [vmem:[#allocation12 + $0x78] sm:$0xff] %v4881_v29  ;;  %v4876_v31 = vadd.f32 %v4875_v52, %v4731_v4 }
 0x444   :  { %4898 = vst [vmem:[#allocation12 + $0x70] sm:$0xff] %v4876_v31 }
 0x44a   :  { %v5522_v25 = vpop.f32.mrf.mxu0 }
 0x44b   :  { %v4841_v32 = vadd.f32 %v5522_v25, %v9555_v3 }
 0x44c   :  { %v4835_v46 = vpop.f32.mrf.mxu0 }
 0x44d   :  { %4891 = vst [vmem:[#allocation12 + $0x38] sm:$0xff] %v4841_v32  ;;  %v4836_v53 = vadd.f32 %v4835_v46, %v9553_v18 }
 0x44f   :  { %4890 = vst [vmem:[#allocation12 + $0x30] sm:$0xff] %v4836_v53 }
 0x450   :  { %5788 = shalt.err (!%p5785_p1)
}
 0x451   :  { %4911 = dma.vmem_to_hbm [thread:$0]  %s4906_s4, 2048, %s9684_s5, [#allocation5], %s5807_s23, %s5807_s23, %s5808_s24  }
 0x452   :  { %5803 = dma.done.wait [#allocation5], 2048  }
 0x453   :  { %5804 = vsyncadd [#allocation5], 4294965248 }
 0x454   :  { %4915 = vsyncpa [#allocation4], 1 }
 0x455   :  { %4916 = vsyncpa [#allocation7], 1 }
 0x456   :  { %4917 = vsyncpa [#allocation10], 1 }
 0x457   :  { %4918 = vsyncpa [#allocation5], 1 }

</bundles_post_ra>
